<compile_context>
chip_gen: v6e
topology: v6e:2x2x1
jax: 0.10.0
libtpu: 0.0.40
codegen_flags: <defaults>
</compile_context>

<pallas_src>
import functools

import jax
import jax.numpy as jnp
from jax.experimental import pallas as pl
from jax.experimental.pallas import tpu as pltpu

LANE = 128  # lane width; logits are padded to this for lane-dense stores


# ---------------------------------------------------------------------------
# Fused kernel: per grid step -> spb samples x both branches
#   conv1+ReLU -> conv2+ReLU -> GAP -> concat+Linear (lane-dense logits)
# ---------------------------------------------------------------------------
def _siamese_fused_kernel(x_ref, w1_ref, b1_ref, w2_ref, b2_ref,
                          fcw_ref, fcb_ref, o_ref, *, H, W, spb):
    cin = x_ref.shape[-1]
    hidden = w1_ref.shape[-1]
    feat = w2_ref.shape[-1]
    n_img = 2 * spb                       # both branches stacked along M
    M = n_img * H * W

    def conv3x3_relu(xpad, w_ref, b_ref, c_in):
        # xpad: (n_img, H+2, W+2, c_in).  Build the im2col patch slab ONCE
        # (9 shifted copies concatenated on the minor dim) and issue a single
        # MXU matmul with K = 9*c_in; bias + ReLU fused into the epilogue.
        taps = [xpad[:, ky:ky + H, kx:kx + W, :]
                for ky in range(3) for kx in range(3)]
        patches = jnp.concatenate(taps, axis=-1).reshape(M, 9 * c_in)
        b = b_ref[...]                                    # hoisted, one broadcast
        acc = jnp.dot(patches, w_ref[...], preferred_element_type=jnp.float32)
        return jnp.maximum(acc + b, 0.0)                  # (M, c_out)

    # ---- conv1 + ReLU : the input block already carries its zero halo.
    x = x_ref[...].reshape(n_img, H + 2, W + 2, cin)
    y1 = conv3x3_relu(x, w1_ref, b1_ref, cin)             # (M, hidden)

    # ---- conv2 + ReLU : zero-pad conv1's activation in-register (zero-border
    #      concat; no persistent halo scratch, no per-step memset).
    y = y1.reshape(n_img, H, W, hidden)
    zr = jnp.zeros((n_img, 1, W, hidden), jnp.float32)
    y = jnp.concatenate([zr, y, zr], axis=1)              # (n_img, H+2, W,   hid)
    zc = jnp.zeros((n_img, H + 2, 1, hidden), jnp.float32)
    y = jnp.concatenate([zc, y, zc], axis=2)              # (n_img, H+2, W+2, hid)
    y2 = conv3x3_relu(y, w2_ref, b2_ref, hidden)          # (M, feat)

    # ---- Global average pool  (== AdaptiveAvgPool2d((1,1)) + flatten).
    pooled = jnp.mean(y2.reshape(n_img, H * W, feat), axis=1)   # (n_img, feat)

    # ---- Fused concat + Linear head (lane-dense: num_classes padded to 128).
    f_spect = pooled[:spb]                                # (spb, feat)
    f_png = pooled[spb:]                                  # (spb, feat)
    cat = jnp.concatenate([f_spect, f_png], axis=-1)      # (spb, 2*feat)
    logits = (jnp.dot(cat, fcw_ref[...], preferred_element_type=jnp.float32)
              + fcb_ref[...])                             # (spb, 128)
    o_ref[...] = logits.reshape(spb, 1, LANE)


# ---------------------------------------------------------------------------
# Wrapper
# ---------------------------------------------------------------------------
def siamese_net_forward(params, spect_nchw, png_nchw):
    B, Cin, H, W = spect_nchw.shape
    num_classes = params["num_classes"]

    # Samples per grid step: fat steps amortize per-step overhead; keep >= 2
    # steps when possible so both v7x TensorCores get work (v5e/v6e: 1 TC).
    spb = B // 2 if (B >= 2 and B % 2 == 0) else 1
    n_steps = B // spb

    def to_padded_nhwc(x):
        x = jnp.transpose(x, (0, 2, 3, 1))                   # NCHW -> NHWC
        return jnp.pad(x, ((0, 0), (1, 1), (1, 1), (0, 0)))  # 3x3 halo

    # Stack both branches on a leading axis so one block feeds both and the
    # shared-weight conv matmuls run once with M = 2*spb*H*W rows.
    x_all = jnp.stack([to_padded_nhwc(spect_nchw), to_padded_nhwc(png_nchw)],
                      axis=0)                                # (2,B,H+2,W+2,Cin)

    def whole(arr):   # full-array, grid-invariant block (loaded once)
        return pl.BlockSpec(arr.shape, lambda *_: (0,) * arr.ndim)

    hidden = params["w1"].shape[-1]
    feat = params["w2"].shape[-1]
    hw = H * W
    conv_flops = 2 * hw * (9 * Cin) * hidden + 2 * hw * (9 * hidden) * feat
    flops = 2 * B * conv_flops + B * 2 * (2 * feat) * LANE
    bytes_accessed = (2 * B * (H + 2) * (W + 2) * Cin * 4
                      + 4 * sum(int(params[k].size) for k in
                                ("w1", "b1", "w2", "b2", "fc_w", "fc_b"))
                      + B * LANE * 4)

    kernel = functools.partial(_siamese_fused_kernel, H=H, W=W, spb=spb)

    out = pl.pallas_call(
        kernel,
        out_shape=jax.ShapeDtypeStruct((B, 1, LANE), jnp.float32),
        grid=(n_steps,),
        in_specs=[
            pl.BlockSpec((2, spb, H + 2, W + 2, Cin),
                         lambda i: (0, i, 0, 0, 0)),
            whole(params["w1"]), whole(params["b1"]),
            whole(params["w2"]), whole(params["b2"]),
            whole(params["fc_w"]), whole(params["fc_b"]),
        ],
        out_specs=pl.BlockSpec((spb, 1, LANE), lambda i: (i, 0, 0)),
        compiler_params=pltpu.CompilerParams(
            dimension_semantics=("parallel",)),
        cost_estimate=pl.CostEstimate(flops=flops, transcendentals=0,
                                      bytes_accessed=bytes_accessed),
    )(x_all, params["w1"], params["b1"], params["w2"], params["b2"],
      params["fc_w"], params["fc_b"])
    return out[:, 0, :num_classes]                           # (B, num_classes)


# ---------------------------------------------------------------------------
# Deterministic parameter construction
# ---------------------------------------------------------------------------
def make_params(key, cin, hidden, feat, num_classes):
    k1, k2, k3 = jax.random.split(key, 3)
    # Conv weights HWIO; kernel consumes the im2col reshape (9*Cin, Cout)
    # whose row index (ky*3+kx)*Cin + ci matches the tap-concat patch layout.
    w1 = jax.random.normal(k1, (3, 3, cin, hidden), jnp.float32)
    w1 = w1 * jnp.sqrt(2.0 / (9 * cin))
    w2 = jax.random.normal(k2, (3, 3, hidden, feat), jnp.float32)
    w2 = w2 * jnp.sqrt(2.0 / (9 * hidden))
    # fc: kaiming_normal_(mode='fan_out', relu) -> std = sqrt(2/out_features),
    # bias = 0 (matches SiameseNet._initialize_weights).
    fc_w = jax.random.normal(k3, (num_classes, 2 * feat), jnp.float32)
    fc_w = fc_w * jnp.sqrt(2.0 / num_classes)
    fc_wt = fc_w.T                                           # (2*feat, NC)
    fc_w_pad = jnp.pad(fc_wt, ((0, 0), (0, LANE - num_classes)))  # lane-dense
    return {
        "w1": w1.reshape(9 * cin, hidden),
        "b1": jnp.full((1, hidden), 0.01, jnp.float32),
        "w2": w2.reshape(9 * hidden, feat),
        "b2": jnp.full((1, feat), 0.01, jnp.float32),
        "fc_w": fc_w_pad,                                    # (2*feat, 128)
        "fc_b": jnp.zeros((1, LANE), jnp.float32),
        "num_classes": num_classes,
        "_w1_hwio": w1, "_w2_hwio": w2, "_fc_wt": fc_wt,     # for reference
    }


# ---------------------------------------------------------------------------
# Pure-JAX reference (correctness sanity check)
# ---------------------------------------------------------------------------
def reference_forward(params, spect_nchw, png_nchw):
    dn = ("NHWC", "HWIO", "NHWC")

    def enc(x_nchw):
        x = jnp.transpose(x_nchw, (0, 2, 3, 1))
        y = jax.lax.conv_general_dilated(x, params["_w1_hwio"], (1, 1),
                                         "SAME", dimension_numbers=dn)
        y = jnp.maximum(y + params["b1"].reshape(1, 1, 1, -1), 0.0)
        y = jax.lax.conv_general_dilated(y, params["_w2_hwio"], (1, 1),
                                         "SAME", dimension_numbers=dn)
        y = jnp.maximum(y + params["b2"].reshape(1, 1, 1, -1), 0.0)
        return jnp.mean(y, axis=(1, 2))                      # GAP + flatten

    p1, p2 = enc(spect_nchw), enc(png_nchw)
    cat = jnp.concatenate([p1, p2], axis=1)
    return cat @ params["_fc_wt"]                            # fc bias == 0


if __name__ == "__main__":
    B, Cin, H, W = 2, 4, 16, 16
    hidden, feat, num_classes = 8, 32, 5

    key = jax.random.PRNGKey(0)
    kp, ks, kg = jax.random.split(key, 3)
    params = make_params(kp, Cin, hidden, feat, num_classes)
    spect = jax.random.normal(ks, (B, Cin, H, W), jnp.float32)  # NCHW, as torch
    png = jax.random.normal(kg, (B, Cin, H, W), jnp.float32)

    out = jax.block_until_ready(siamese_net_forward(params, spect, png))
    ref = jax.block_until_ready(reference_forward(params, spect, png))

    assert out.shape == (B, num_classes), out.shape
    assert jnp.allclose(out, ref, rtol=5e-4, atol=5e-4), (out, ref)

    print("KERNEL_OK")
</pallas_src>

<mosaic_0001>
module attributes {stable_mosaic.version = 11 : i64} {
  func.func @_siamese_fused_kernel(%arg0: i32, %arg1: memref<2x1x18x18x4xf32, #tpu.memory_space<vmem>>, %arg2: memref<36x8xf32, #tpu.memory_space<vmem>>, %arg3: memref<1x8xf32, #tpu.memory_space<vmem>>, %arg4: memref<72x32xf32, #tpu.memory_space<vmem>>, %arg5: memref<1x32xf32, #tpu.memory_space<vmem>>, %arg6: memref<64x128xf32, #tpu.memory_space<vmem>>, %arg7: memref<1x128xf32, #tpu.memory_space<vmem>>, %arg8: memref<1x1x128xf32, #tpu.memory_space<vmem>>) attributes {dimension_semantics = [#tpu.dimension_semantics<parallel>], iteration_bounds = array<i64: 2>, scalar_prefetch = 0 : i64, scratch_operands = 0 : i64, tpu.core_type = #tpu.core_type<tc>, window_params = [{transform_indices = @transform_0, window_bounds = array<i64: 2, 1, 18, 18, 4>}, {pipeline_mode = #tpu.pipeline_mode<synchronous>, transform_indices = @transform_1, window_bounds = array<i64: 36, 8>}, {pipeline_mode = #tpu.pipeline_mode<synchronous>, transform_indices = @transform_2, window_bounds = array<i64: 1, 8>}, {pipeline_mode = #tpu.pipeline_mode<synchronous>, transform_indices = @transform_3, window_bounds = array<i64: 72, 32>}, {pipeline_mode = #tpu.pipeline_mode<synchronous>, transform_indices = @transform_4, window_bounds = array<i64: 1, 32>}, {pipeline_mode = #tpu.pipeline_mode<synchronous>, transform_indices = @transform_5, window_bounds = array<i64: 64, 128>}, {pipeline_mode = #tpu.pipeline_mode<synchronous>, transform_indices = @transform_6, window_bounds = array<i64: 1, 128>}, {transform_indices = @transform_7, window_bounds = array<i64: 1, 1, 128>}]} {
    %c0 = arith.constant 0 : index
    %c0_0 = arith.constant 0 : index
    %c0_1 = arith.constant 0 : index
    %c0_2 = arith.constant 0 : index
    %c0_3 = arith.constant 0 : index
    %0 = vector.load %arg1[%c0, %c0_0, %c0_1, %c0_2, %c0_3] : memref<2x1x18x18x4xf32, #tpu.memory_space<vmem>>, vector<2x1x18x18x4xf32>
    %1 = vector.shape_cast %0 : vector<2x1x18x18x4xf32> to vector<2x18x18x4xf32>
    %2 = vector.extract_strided_slice %1 {offsets = [0, 0, 0, 0], sizes = [2, 16, 16, 4], strides = [1, 1, 1, 1]} : vector<2x18x18x4xf32> to vector<2x16x16x4xf32>
    %3 = vector.extract_strided_slice %1 {offsets = [0, 0, 1, 0], sizes = [2, 16, 16, 4], strides = [1, 1, 1, 1]} : vector<2x18x18x4xf32> to vector<2x16x16x4xf32>
    %4 = vector.extract_strided_slice %1 {offsets = [0, 0, 2, 0], sizes = [2, 16, 16, 4], strides = [1, 1, 1, 1]} : vector<2x18x18x4xf32> to vector<2x16x16x4xf32>
    %5 = vector.extract_strided_slice %1 {offsets = [0, 1, 0, 0], sizes = [2, 16, 16, 4], strides = [1, 1, 1, 1]} : vector<2x18x18x4xf32> to vector<2x16x16x4xf32>
    %6 = vector.extract_strided_slice %1 {offsets = [0, 1, 1, 0], sizes = [2, 16, 16, 4], strides = [1, 1, 1, 1]} : vector<2x18x18x4xf32> to vector<2x16x16x4xf32>
    %7 = vector.extract_strided_slice %1 {offsets = [0, 1, 2, 0], sizes = [2, 16, 16, 4], strides = [1, 1, 1, 1]} : vector<2x18x18x4xf32> to vector<2x16x16x4xf32>
    %8 = vector.extract_strided_slice %1 {offsets = [0, 2, 0, 0], sizes = [2, 16, 16, 4], strides = [1, 1, 1, 1]} : vector<2x18x18x4xf32> to vector<2x16x16x4xf32>
    %9 = vector.extract_strided_slice %1 {offsets = [0, 2, 1, 0], sizes = [2, 16, 16, 4], strides = [1, 1, 1, 1]} : vector<2x18x18x4xf32> to vector<2x16x16x4xf32>
    %10 = vector.extract_strided_slice %1 {offsets = [0, 2, 2, 0], sizes = [2, 16, 16, 4], strides = [1, 1, 1, 1]} : vector<2x18x18x4xf32> to vector<2x16x16x4xf32>
    %11 = tpu.concatenate %2, %3, %4, %5, %6, %7, %8, %9, %10 in 3 : vector<2x16x16x4xf32>, vector<2x16x16x4xf32>, vector<2x16x16x4xf32>, vector<2x16x16x4xf32>, vector<2x16x16x4xf32>, vector<2x16x16x4xf32>, vector<2x16x16x4xf32>, vector<2x16x16x4xf32>, vector<2x16x16x4xf32> -> vector<2x16x16x36xf32>
    %12 = vector.shape_cast %11 : vector<2x16x16x36xf32> to vector<512x36xf32>
    %c0_4 = arith.constant 0 : index
    %c0_5 = arith.constant 0 : index
    %13 = vector.load %arg3[%c0_4, %c0_5] : memref<1x8xf32, #tpu.memory_space<vmem>>, vector<1x8xf32>
    %c0_6 = arith.constant 0 : index
    %c0_7 = arith.constant 0 : index
    %14 = vector.load %arg2[%c0_6, %c0_7] : memref<36x8xf32, #tpu.memory_space<vmem>>, vector<36x8xf32>
    %cst = arith.constant dense<0.000000e+00> : vector<512x8xf32>
    %15 = tpu.matmul %12, %14, %cst {dimension_numbers = #tpu.dot_dimension_numbers<[1], [0], [0], [1], [0, 0, 1, 1], [], []>} : vector<512x36xf32>, vector<36x8xf32>, vector<512x8xf32> -> vector<512x8xf32>
    %16 = vector.broadcast %13 : vector<1x8xf32> to vector<512x8xf32>
    %17 = arith.addf %15, %16 : vector<512x8xf32>
    %cst_8 = arith.constant 0.000000e+00 : f32
    %18 = vector.broadcast %cst_8 : f32 to vector<512x8xf32>
    %19 = arith.maximumf %17, %18 : vector<512x8xf32>
    %20 = vector.shape_cast %19 : vector<512x8xf32> to vector<2x16x16x8xf32>
    %cst_9 = arith.constant 0.000000e+00 : f32
    %21 = vector.broadcast %cst_9 : f32 to vector<2x1x16x8xf32>
    %22 = tpu.concatenate %21, %20, %21 in 1 : vector<2x1x16x8xf32>, vector<2x16x16x8xf32>, vector<2x1x16x8xf32> -> vector<2x18x16x8xf32>
    %cst_10 = arith.constant 0.000000e+00 : f32
    %23 = vector.broadcast %cst_10 : f32 to vector<2x18x1x8xf32>
    %24 = tpu.concatenate %23, %22, %23 in 2 : vector<2x18x1x8xf32>, vector<2x18x16x8xf32>, vector<2x18x1x8xf32> -> vector<2x18x18x8xf32>
    %25 = vector.extract_strided_slice %24 {offsets = [0, 0, 0, 0], sizes = [2, 16, 16, 8], strides = [1, 1, 1, 1]} : vector<2x18x18x8xf32> to vector<2x16x16x8xf32>
    %26 = vector.extract_strided_slice %24 {offsets = [0, 0, 1, 0], sizes = [2, 16, 16, 8], strides = [1, 1, 1, 1]} : vector<2x18x18x8xf32> to vector<2x16x16x8xf32>
    %27 = vector.extract_strided_slice %24 {offsets = [0, 0, 2, 0], sizes = [2, 16, 16, 8], strides = [1, 1, 1, 1]} : vector<2x18x18x8xf32> to vector<2x16x16x8xf32>
    %28 = vector.extract_strided_slice %24 {offsets = [0, 1, 0, 0], sizes = [2, 16, 16, 8], strides = [1, 1, 1, 1]} : vector<2x18x18x8xf32> to vector<2x16x16x8xf32>
    %29 = vector.extract_strided_slice %24 {offsets = [0, 1, 1, 0], sizes = [2, 16, 16, 8], strides = [1, 1, 1, 1]} : vector<2x18x18x8xf32> to vector<2x16x16x8xf32>
    %30 = vector.extract_strided_slice %24 {offsets = [0, 1, 2, 0], sizes = [2, 16, 16, 8], strides = [1, 1, 1, 1]} : vector<2x18x18x8xf32> to vector<2x16x16x8xf32>
    %31 = vector.extract_strided_slice %24 {offsets = [0, 2, 0, 0], sizes = [2, 16, 16, 8], strides = [1, 1, 1, 1]} : vector<2x18x18x8xf32> to vector<2x16x16x8xf32>
    %32 = vector.extract_strided_slice %24 {offsets = [0, 2, 1, 0], sizes = [2, 16, 16, 8], strides = [1, 1, 1, 1]} : vector<2x18x18x8xf32> to vector<2x16x16x8xf32>
    %33 = vector.extract_strided_slice %24 {offsets = [0, 2, 2, 0], sizes = [2, 16, 16, 8], strides = [1, 1, 1, 1]} : vector<2x18x18x8xf32> to vector<2x16x16x8xf32>
    %34 = tpu.concatenate %25, %26, %27, %28, %29, %30, %31, %32, %33 in 3 : vector<2x16x16x8xf32>, vector<2x16x16x8xf32>, vector<2x16x16x8xf32>, vector<2x16x16x8xf32>, vector<2x16x16x8xf32>, vector<2x16x16x8xf32>, vector<2x16x16x8xf32>, vector<2x16x16x8xf32>, vector<2x16x16x8xf32> -> vector<2x16x16x72xf32>
    %35 = vector.shape_cast %34 : vector<2x16x16x72xf32> to vector<512x72xf32>
    %c0_11 = arith.constant 0 : index
    %c0_12 = arith.constant 0 : index
    %36 = vector.load %arg5[%c0_11, %c0_12] : memref<1x32xf32, #tpu.memory_space<vmem>>, vector<1x32xf32>
    %c0_13 = arith.constant 0 : index
    %c0_14 = arith.constant 0 : index
    %37 = vector.load %arg4[%c0_13, %c0_14] : memref<72x32xf32, #tpu.memory_space<vmem>>, vector<72x32xf32>
    %cst_15 = arith.constant dense<0.000000e+00> : vector<512x32xf32>
    %38 = tpu.matmul %35, %37, %cst_15 {dimension_numbers = #tpu.dot_dimension_numbers<[1], [0], [0], [1], [0, 0, 1, 1], [], []>} : vector<512x72xf32>, vector<72x32xf32>, vector<512x32xf32> -> vector<512x32xf32>
    %39 = vector.broadcast %36 : vector<1x32xf32> to vector<512x32xf32>
    %40 = arith.addf %38, %39 : vector<512x32xf32>
    %cst_16 = arith.constant 0.000000e+00 : f32
    %41 = vector.broadcast %cst_16 : f32 to vector<512x32xf32>
    %42 = arith.maximumf %40, %41 : vector<512x32xf32>
    %43 = vector.shape_cast %42 : vector<512x32xf32> to vector<2x256x32xf32>
    %cst_17 = arith.constant dense<0.000000e+00> : vector<2x32xf32>
    %44 = vector.multi_reduction <add>, %43, %cst_17 [1] : vector<2x256x32xf32> to vector<2x32xf32>
    %cst_18 = arith.constant 2.560000e+02 : f32
    %45 = vector.broadcast %cst_18 : f32 to vector<2x32xf32>
    %46 = arith.divf %44, %45 : vector<2x32xf32>
    %47 = vector.extract_strided_slice %46 {offsets = [0, 0], sizes = [1, 32], strides = [1, 1]} : vector<2x32xf32> to vector<1x32xf32>
    %48 = vector.extract_strided_slice %46 {offsets = [1, 0], sizes = [1, 32], strides = [1, 1]} : vector<2x32xf32> to vector<1x32xf32>
    %49 = tpu.concatenate %47, %48 in 1 : vector<1x32xf32>, vector<1x32xf32> -> vector<1x64xf32>
    %c0_19 = arith.constant 0 : index
    %c0_20 = arith.constant 0 : index
    %50 = vector.load %arg6[%c0_19, %c0_20] : memref<64x128xf32, #tpu.memory_space<vmem>>, vector<64x128xf32>
    %cst_21 = arith.constant dense<0.000000e+00> : vector<1x128xf32>
    %51 = tpu.matmul %49, %50, %cst_21 {dimension_numbers = #tpu.dot_dimension_numbers<[1], [0], [0], [1], [0, 0, 1, 1], [], []>} : vector<1x64xf32>, vector<64x128xf32>, vector<1x128xf32> -> vector<1x128xf32>
    %c0_22 = arith.constant 0 : index
    %c0_23 = arith.constant 0 : index
    %52 = vector.load %arg7[%c0_22, %c0_23] : memref<1x128xf32, #tpu.memory_space<vmem>>, vector<1x128xf32>
    %53 = arith.addf %51, %52 : vector<1x128xf32>
    %54 = vector.shape_cast %53 : vector<1x128xf32> to vector<1x1x128xf32>
    %c0_24 = arith.constant 0 : index
    %c0_25 = arith.constant 0 : index
    %c0_26 = arith.constant 0 : index
    %55 = vector.load %arg8[%c0_24, %c0_25, %c0_26] : memref<1x1x128xf32, #tpu.memory_space<vmem>>, vector<1x1x128xf32>
    tpu.vector_store %arg8[%c0_24, %c0_25, %c0_26], %54 {strides = array<i32>} : memref<1x1x128xf32, #tpu.memory_space<vmem>>, vector<1x1x128xf32>,
    return
  }
  func.func @transform_0(%arg0: i32) -> (i32, i32, i32, i32, i32) {
    %c0_i32 = arith.constant 0 : i32
    %c0_i32_0 = arith.constant 0 : i32
    %c0_i32_1 = arith.constant 0 : i32
    %c0_i32_2 = arith.constant 0 : i32
    %c0_i32_3 = arith.constant 0 : i32
    return %c0_i32, %arg0, %c0_i32_0, %c0_i32_1, %c0_i32_2 : i32, i32, i32, i32, i32
  }
  func.func @transform_1(%arg0: i32) -> (i32, i32) {
    %c0_i32 = arith.constant 0 : i32
    %c0_i32_0 = arith.constant 0 : i32
    %c0_i32_1 = arith.constant 0 : i32
    return %c0_i32, %c0_i32_0 : i32, i32
  }
  func.func @transform_2(%arg0: i32) -> (i32, i32) {
    %c0_i32 = arith.constant 0 : i32
    %c0_i32_0 = arith.constant 0 : i32
    %c0_i32_1 = arith.constant 0 : i32
    return %c0_i32, %c0_i32_0 : i32, i32
  }
  func.func @transform_3(%arg0: i32) -> (i32, i32) {
    %c0_i32 = arith.constant 0 : i32
    %c0_i32_0 = arith.constant 0 : i32
    %c0_i32_1 = arith.constant 0 : i32
    return %c0_i32, %c0_i32_0 : i32, i32
  }
  func.func @transform_4(%arg0: i32) -> (i32, i32) {
    %c0_i32 = arith.constant 0 : i32
    %c0_i32_0 = arith.constant 0 : i32
    %c0_i32_1 = arith.constant 0 : i32
    return %c0_i32, %c0_i32_0 : i32, i32
  }
  func.func @transform_5(%arg0: i32) -> (i32, i32) {
    %c0_i32 = arith.constant 0 : i32
    %c0_i32_0 = arith.constant 0 : i32
    %c0_i32_1 = arith.constant 0 : i32
    return %c0_i32, %c0_i32_0 : i32, i32
  }
  func.func @transform_6(%arg0: i32) -> (i32, i32) {
    %c0_i32 = arith.constant 0 : i32
    %c0_i32_0 = arith.constant 0 : i32
    %c0_i32_1 = arith.constant 0 : i32
    return %c0_i32, %c0_i32_0 : i32, i32
  }
  func.func @transform_7(%arg0: i32) -> (i32, i32, i32) {
    %c0_i32 = arith.constant 0 : i32
    %c0_i32_0 = arith.constant 0 : i32
    %c0_i32_1 = arith.constant 0 : i32
    return %arg0, %c0_i32, %c0_i32_0 : i32, i32, i32
  }
}

</mosaic_0001>

<bundles_post_ra>
// kernel: tpu_custom_call.1
= control target key start
LH: loop header
LB: loop body
LE: loop exit
PB: predicated region body
PF: predicated region fallthrough
CT: control target
= control target key end

     0   :  { %12 = vsyncpa [#allocation4], 0  ;;  %s16402_s0 = inlined_call_operand.vmem [shape: f32[2,2,18,18,4], index: 0, kind: input, shape index: {}]   ;;  %s16403_s1 = inlined_call_operand.vmem [shape: f32[36,8], index: 1, kind: input, shape index: {}]   ;;  %s16404_s2 = inlined_call_operand.vmem [shape: f32[1,8], index: 2, kind: input, shape index: {}]   ;;  %s16405_s3 = inlined_call_operand.vmem [shape: f32[72,32], index: 3, kind: input, shape index: {}]   ;;  %s16406_s4 = inlined_call_operand.vmem [shape: f32[1,32], index: 4, kind: input, shape index: {}]   ;;  %s16407_s5 = inlined_call_operand.vmem [shape: f32[64,128], index: 5, kind: input, shape index: {}]   ;;  %s16408_s6 = inlined_call_operand.vmem [shape: f32[1,128], index: 6, kind: input, shape index: {}]   ;;  %s16409_s7 = inlined_call_operand.hbm [shape: f32[2,1,128], index: 7, kind: output, shape index: {}]  }
   0x1   :  { %14 = vsyncpa [#allocation4 + $0x1], 0  ;;  %s8589_s24 = smov 0   ;;  %s8591_s25 = smov 0  }
   0x2   :  { %s8593_s26 = smov 0   ;;  %s8595_s27 = smov 0  }
   0x3 LB: > { %s7732_s28 = sadd.s32 4294967295, %s8532_s27   ;;  %s7733_s29 = sadd.s32 4294967294, %s8532_s27   ;;  %s8532_s27 = sphi %s8595_s27, %s18991_s27   ;;  %s8528_s26 = sphi %s8593_s26, %s18990_s26   ;;  %s8524_s25 = sphi %s8591_s25, %s18989_s25   ;;  %s8520_s24 = sphi %s8589_s24, %s18988_s24  }
   0x4   : > { %s8612_s30 = sadd.s32 1, %s8532_s27   ;;  %s27_s8 = sadd.s32 1, %s8528_s26 }
   0x5   : > { %s24_s9 = ssub.s32 %s8532_s27, %s8612_s30  ;;  %p34_p0 = scmp.ne.s32.totalorder %s8528_s26, %s8524_s25 }
   0x6   : > { %p25_p1 = scmp.eq.s32.totalorder %s24_s9, 0  ;;  %p35_p2 = scmp.eq.s32.totalorder %s8532_s27, 0 }
   0x7   : > { %p190_p3 = scmp.eq.s32.totalorder %s7732_s28, 1  ;;  %p195_p4 = scmp.ne.s32.totalorder %s8524_s25, %s8520_s24 }
   0x8   : > { %s8625_s10 = scalar_select %p25_p1, %s8528_s26, %s27_s8  }
   0x9   : > { %p36_p5 = por %p35_p2, %p34_p0  ;;  %p8627_p6 = por %p190_p3, %p34_p0 }
   0xa   : > { %p196_p7 = scmp.eq.s32.totalorder %s7733_s29, 1  ;;  %p7735_p9 = scmp.ge.s32.totalorder %s8532_s27, 2 }
   0xc   : > { %p8631_p8 = por %p196_p7, %p195_p4  ;;  %230 = sbr.rel (%p7735_p9) target bundleno = 76 (0x4c), region = 40 }
  0x11   : > { %233 = sbr.rel (!%p36_p5) target bundleno = 76 (0x4c), region = 44  ;;  %s235_s13 = sand.u32 (%p36_p5), 1, %s8528_s26  }
  0x12   : > { %s8264_s14 = smul.u32 (%p36_p5), 432, %s8532_s27 }
  0x13   : > { %s8263_s15 = smul.u32 (%p36_p5), 864, %s235_s13 }
  0x14   : > { %s8643_s18 = scalar_lea.vmem (%p36_p5), %s16402_s0, %s8264_s14 }
  0x15   : > { %v483_v0 = vld [vmem:[%s8643_s18] sm:$0xff] (%p36_p5)  ;;  %v485_v1 = vld [vmem:[%s8643_s18 + $0x8] sm:$0xff] (%p36_p5)  ;;  %v487_v2 = vld [vmem:[%s8643_s18 + $0x10] sm:$0xff] (%p36_p5)  ;;  %s8648_s19 = scalar_lea.vmem (%p36_p5), [#allocation2], %s8263_s15 }
  0x16   : > { %484 = vst [vmem:[%s8648_s19] sm:$0xff] %v483_v0  ;;  %486 = vst [vmem:[%s8648_s19 + $0x8] sm:$0xff] %v485_v1  ;;  %v489_v3 = vld [vmem:[%s8643_s18 + $0x18] sm:$0xff]  ;;  %v491_v4 = vld [vmem:[%s8643_s18 + $0x20] sm:$0xff] }
  0x17   : > { %488 = vst [vmem:[%s8648_s19 + $0x10] sm:$0xff] %v487_v2  ;;  %v493_v5 = vld [vmem:[%s8643_s18 + $0x28] sm:$0xff]  ;;  %490 = vst [vmem:[%s8648_s19 + $0x18] sm:$0xff] %v489_v3  ;;  %v495_v6 = vld [vmem:[%s8643_s18 + $0x30] sm:$0xff] }
  0x18   : > { %492 = vst [vmem:[%s8648_s19 + $0x20] sm:$0xff] %v491_v4  ;;  %494 = vst [vmem:[%s8648_s19 + $0x28] sm:$0xff] %v493_v5  ;;  %v497_v7 = vld [vmem:[%s8643_s18 + $0x38] sm:$0xff]  ;;  %v499_v8 = vld [vmem:[%s8643_s18 + $0x40] sm:$0xff] }
  0x19   : > { %496 = vst [vmem:[%s8648_s19 + $0x30] sm:$0xff] %v495_v6  ;;  %498 = vst [vmem:[%s8648_s19 + $0x38] sm:$0xff] %v497_v7  ;;  %v501_v9 = vld [vmem:[%s8643_s18 + $0x48] sm:$0xff]  ;;  %v503_v10 = vld [vmem:[%s8643_s18 + $0x50] sm:$0xff] }
  0x1a   : > { %500 = vst [vmem:[%s8648_s19 + $0x40] sm:$0xff] %v499_v8  ;;  %v505_v11 = vld [vmem:[%s8643_s18 + $0x58] sm:$0xff]  ;;  %502 = vst [vmem:[%s8648_s19 + $0x48] sm:$0xff] %v501_v9  ;;  %v507_v12 = vld [vmem:[%s8643_s18 + $0x60] sm:$0xff] }
  0x1b   : > { %504 = vst [vmem:[%s8648_s19 + $0x50] sm:$0xff] %v503_v10  ;;  %506 = vst [vmem:[%s8648_s19 + $0x58] sm:$0xff] %v505_v11  ;;  %v509_v13 = vld [vmem:[%s8643_s18 + $0x68] sm:$0xff]  ;;  %v511_v14 = vld [vmem:[%s8643_s18 + $0x70] sm:$0xff] }
  0x1c   : > { %508 = vst [vmem:[%s8648_s19 + $0x60] sm:$0xff] %v507_v12  ;;  %510 = vst [vmem:[%s8648_s19 + $0x68] sm:$0xff] %v509_v13  ;;  %v513_v15 = vld [vmem:[%s8643_s18 + $0x78] sm:$0xff]  ;;  %v515_v16 = vld [vmem:[%s8643_s18 + $0x80] sm:$0xff] }
  0x1d   : > { %512 = vst [vmem:[%s8648_s19 + $0x70] sm:$0xff] %v511_v14  ;;  %v517_v17 = vld [vmem:[%s8643_s18 + $0x88] sm:$0xff]  ;;  %514 = vst [vmem:[%s8648_s19 + $0x78] sm:$0xff] %v513_v15  ;;  %v519_v18 = vld [vmem:[%s8643_s18 + $0x90] sm:$0xff] }
  0x1e   : > { %516 = vst [vmem:[%s8648_s19 + $0x80] sm:$0xff] %v515_v16  ;;  %518 = vst [vmem:[%s8648_s19 + $0x88] sm:$0xff] %v517_v17  ;;  %v521_v19 = vld [vmem:[%s8643_s18 + $0x98] sm:$0xff]  ;;  %v523_v20 = vld [vmem:[%s8643_s18 + $0xa0] sm:$0xff] }
  0x1f   : > { %520 = vst [vmem:[%s8648_s19 + $0x90] sm:$0xff] %v519_v18  ;;  %522 = vst [vmem:[%s8648_s19 + $0x98] sm:$0xff] %v521_v19  ;;  %v525_v21 = vld [vmem:[%s8643_s18 + $0xa8] sm:$0xff]  ;;  %v527_v22 = vld [vmem:[%s8643_s18 + $0xb0] sm:$0xff] }
  0x20   : > { %524 = vst [vmem:[%s8648_s19 + $0xa0] sm:$0xff] %v523_v20  ;;  %v529_v23 = vld [vmem:[%s8643_s18 + $0xb8] sm:$0xff]  ;;  %526 = vst [vmem:[%s8648_s19 + $0xa8] sm:$0xff] %v525_v21  ;;  %v531_v24 = vld [vmem:[%s8643_s18 + $0xc0] sm:$0xff] }
  0x21   : > { %528 = vst [vmem:[%s8648_s19 + $0xb0] sm:$0xff] %v527_v22  ;;  %530 = vst [vmem:[%s8648_s19 + $0xb8] sm:$0xff] %v529_v23  ;;  %v533_v25 = vld [vmem:[%s8643_s18 + $0xc8] sm:$0xff]  ;;  %v535_v26 = vld [vmem:[%s8643_s18 + $0xd0] sm:$0xff] }
  0x22   : > { %532 = vst [vmem:[%s8648_s19 + $0xc0] sm:$0xff] %v531_v24  ;;  %534 = vst [vmem:[%s8648_s19 + $0xc8] sm:$0xff] %v533_v25  ;;  %v537_v27 = vld [vmem:[%s8643_s18 + $0xd8] sm:$0xff]  ;;  %v539_v28 = vld [vmem:[%s8643_s18 + $0xe0] sm:$0xff] }
  0x23   : > { %536 = vst [vmem:[%s8648_s19 + $0xd0] sm:$0xff] %v535_v26  ;;  %v541_v29 = vld [vmem:[%s8643_s18 + $0xe8] sm:$0xff]  ;;  %538 = vst [vmem:[%s8648_s19 + $0xd8] sm:$0xff] %v537_v27  ;;  %v543_v30 = vld [vmem:[%s8643_s18 + $0xf0] sm:$0xff] }
  0x24   : > { %540 = vst [vmem:[%s8648_s19 + $0xe0] sm:$0xff] %v539_v28  ;;  %542 = vst [vmem:[%s8648_s19 + $0xe8] sm:$0xff] %v541_v29  ;;  %v545_v31 = vld [vmem:[%s8643_s18 + $0xf8] sm:$0xff]  ;;  %v547_v32 = vld [vmem:[%s8643_s18 + $0x100] sm:$0xff] }
  0x25   : > { %544 = vst [vmem:[%s8648_s19 + $0xf0] sm:$0xff] %v543_v30  ;;  %546 = vst [vmem:[%s8648_s19 + $0xf8] sm:$0xff] %v545_v31  ;;  %v549_v33 = vld [vmem:[%s8643_s18 + $0x108] sm:$0xff]  ;;  %v551_v34 = vld [vmem:[%s8643_s18 + $0x110] sm:$0xff] }
  0x26   : > { %548 = vst [vmem:[%s8648_s19 + $0x100] sm:$0xff] %v547_v32  ;;  %v553_v35 = vld [vmem:[%s8643_s18 + $0x118] sm:$0xff]  ;;  %550 = vst [vmem:[%s8648_s19 + $0x108] sm:$0xff] %v549_v33  ;;  %v555_v36 = vld [vmem:[%s8643_s18 + $0x120] sm:$0xff] }
  0x27   : > { %552 = vst [vmem:[%s8648_s19 + $0x110] sm:$0xff] %v551_v34  ;;  %554 = vst [vmem:[%s8648_s19 + $0x118] sm:$0xff] %v553_v35  ;;  %v557_v37 = vld [vmem:[%s8643_s18 + $0x128] sm:$0xff]  ;;  %v559_v38 = vld [vmem:[%s8643_s18 + $0x130] sm:$0xff] }
  0x28   : > { %556 = vst [vmem:[%s8648_s19 + $0x120] sm:$0xff] %v555_v36  ;;  %558 = vst [vmem:[%s8648_s19 + $0x128] sm:$0xff] %v557_v37  ;;  %v561_v39 = vld [vmem:[%s8643_s18 + $0x138] sm:$0xff]  ;;  %v563_v40 = vld [vmem:[%s8643_s18 + $0x140] sm:$0xff] }
  0x29   : > { %560 = vst [vmem:[%s8648_s19 + $0x130] sm:$0xff] %v559_v38  ;;  %v565_v41 = vld [vmem:[%s8643_s18 + $0x148] sm:$0xff]  ;;  %562 = vst [vmem:[%s8648_s19 + $0x138] sm:$0xff] %v561_v39  ;;  %v567_v42 = vld [vmem:[%s8643_s18 + $0x150] sm:$0xff] }
  0x2a   : > { %564 = vst [vmem:[%s8648_s19 + $0x140] sm:$0xff] %v563_v40  ;;  %566 = vst [vmem:[%s8648_s19 + $0x148] sm:$0xff] %v565_v41  ;;  %v569_v43 = vld [vmem:[%s8643_s18 + $0x158] sm:$0xff]  ;;  %v571_v44 = vld [vmem:[%s8643_s18 + $0x160] sm:$0xff] }
  0x2b   : > { %568 = vst [vmem:[%s8648_s19 + $0x150] sm:$0xff] %v567_v42  ;;  %570 = vst [vmem:[%s8648_s19 + $0x158] sm:$0xff] %v569_v43  ;;  %v573_v45 = vld [vmem:[%s8643_s18 + $0x168] sm:$0xff]  ;;  %v575_v46 = vld [vmem:[%s8643_s18 + $0x170] sm:$0xff] }
  0x2c   : > { %572 = vst [vmem:[%s8648_s19 + $0x160] sm:$0xff] %v571_v44  ;;  %v577_v47 = vld [vmem:[%s8643_s18 + $0x178] sm:$0xff]  ;;  %574 = vst [vmem:[%s8648_s19 + $0x168] sm:$0xff] %v573_v45  ;;  %v579_v48 = vld [vmem:[%s8643_s18 + $0x180] sm:$0xff] }
  0x2d   : > { %576 = vst [vmem:[%s8648_s19 + $0x170] sm:$0xff] %v575_v46  ;;  %578 = vst [vmem:[%s8648_s19 + $0x178] sm:$0xff] %v577_v47  ;;  %v581_v49 = vld [vmem:[%s8643_s18 + $0x188] sm:$0xff]  ;;  %v583_v50 = vld [vmem:[%s8643_s18 + $0x190] sm:$0xff] }
  0x2e   : > { %580 = vst [vmem:[%s8648_s19 + $0x180] sm:$0xff] %v579_v48  ;;  %582 = vst [vmem:[%s8648_s19 + $0x188] sm:$0xff] %v581_v49  ;;  %v585_v51 = vld [vmem:[%s8643_s18 + $0x198] sm:$0xff]  ;;  %v587_v52 = vld [vmem:[%s8643_s18 + $0x1a0] sm:$0xff] }
  0x2f   : > { %584 = vst [vmem:[%s8648_s19 + $0x190] sm:$0xff] %v583_v50  ;;  %v589_v53 = vld [vmem:[%s8643_s18 + $0x1a8] sm:$0xff]  ;;  %586 = vst [vmem:[%s8648_s19 + $0x198] sm:$0xff] %v585_v51  ;;  %v591_v54 = vld [vmem:[%s8643_s18 + $0x360] sm:$0xff] }
  0x30   : > { %588 = vst [vmem:[%s8648_s19 + $0x1a0] sm:$0xff] %v587_v52  ;;  %590 = vst [vmem:[%s8648_s19 + $0x1a8] sm:$0xff] %v589_v53  ;;  %v593_v55 = vld [vmem:[%s8643_s18 + $0x368] sm:$0xff]  ;;  %v595_v56 = vld [vmem:[%s8643_s18 + $0x370] sm:$0xff] }
  0x31   : > { %592 = vst [vmem:[%s8648_s19 + $0x1b0] sm:$0xff] %v591_v54  ;;  %594 = vst [vmem:[%s8648_s19 + $0x1b8] sm:$0xff] %v593_v55  ;;  %v597_v57 = vld [vmem:[%s8643_s18 + $0x378] sm:$0xff]  ;;  %v599_v58 = vld [vmem:[%s8643_s18 + $0x380] sm:$0xff] }
  0x32   : > { %596 = vst [vmem:[%s8648_s19 + $0x1c0] sm:$0xff] %v595_v56  ;;  %v601_v59 = vld [vmem:[%s8643_s18 + $0x388] sm:$0xff]  ;;  %598 = vst [vmem:[%s8648_s19 + $0x1c8] sm:$0xff] %v597_v57  ;;  %v603_v60 = vld [vmem:[%s8643_s18 + $0x390] sm:$0xff] }
  0x33   : > { %600 = vst [vmem:[%s8648_s19 + $0x1d0] sm:$0xff] %v599_v58  ;;  %602 = vst [vmem:[%s8648_s19 + $0x1d8] sm:$0xff] %v601_v59  ;;  %v605_v61 = vld [vmem:[%s8643_s18 + $0x398] sm:$0xff]  ;;  %v607_v62 = vld [vmem:[%s8643_s18 + $0x3a0] sm:$0xff] }
  0x34   : > { %604 = vst [vmem:[%s8648_s19 + $0x1e0] sm:$0xff] %v603_v60  ;;  %606 = vst [vmem:[%s8648_s19 + $0x1e8] sm:$0xff] %v605_v61  ;;  %v609_v63 = vld [vmem:[%s8643_s18 + $0x3a8] sm:$0xff]  ;;  %v611_v0 = vld [vmem:[%s8643_s18 + $0x3b0] sm:$0xff] }
  0x35   : > { %608 = vst [vmem:[%s8648_s19 + $0x1f0] sm:$0xff] %v607_v62  ;;  %v613_v1 = vld [vmem:[%s8643_s18 + $0x3b8] sm:$0xff]  ;;  %610 = vst [vmem:[%s8648_s19 + $0x1f8] sm:$0xff] %v609_v63  ;;  %v615_v2 = vld [vmem:[%s8643_s18 + $0x3c0] sm:$0xff] }
  0x36   : > { %612 = vst [vmem:[%s8648_s19 + $0x200] sm:$0xff] %v611_v0  ;;  %614 = vst [vmem:[%s8648_s19 + $0x208] sm:$0xff] %v613_v1  ;;  %v617_v3 = vld [vmem:[%s8643_s18 + $0x3c8] sm:$0xff]  ;;  %v619_v4 = vld [vmem:[%s8643_s18 + $0x3d0] sm:$0xff] }
  0x37   : > { %616 = vst [vmem:[%s8648_s19 + $0x210] sm:$0xff] %v615_v2  ;;  %618 = vst [vmem:[%s8648_s19 + $0x218] sm:$0xff] %v617_v3  ;;  %v621_v5 = vld [vmem:[%s8643_s18 + $0x3d8] sm:$0xff]  ;;  %v623_v6 = vld [vmem:[%s8643_s18 + $0x3e0] sm:$0xff] }
  0x38   : > { %620 = vst [vmem:[%s8648_s19 + $0x220] sm:$0xff] %v619_v4  ;;  %v625_v7 = vld [vmem:[%s8643_s18 + $0x3e8] sm:$0xff]  ;;  %622 = vst [vmem:[%s8648_s19 + $0x228] sm:$0xff] %v621_v5  ;;  %v627_v8 = vld [vmem:[%s8643_s18 + $0x3f0] sm:$0xff] }
  0x39   : > { %624 = vst [vmem:[%s8648_s19 + $0x230] sm:$0xff] %v623_v6  ;;  %626 = vst [vmem:[%s8648_s19 + $0x238] sm:$0xff] %v625_v7  ;;  %v629_v9 = vld [vmem:[%s8643_s18 + $0x3f8] sm:$0xff]  ;;  %v631_v10 = vld [vmem:[%s8643_s18 + $0x400] sm:$0xff] }
  0x3a   : > { %628 = vst [vmem:[%s8648_s19 + $0x240] sm:$0xff] %v627_v8  ;;  %630 = vst [vmem:[%s8648_s19 + $0x248] sm:$0xff] %v629_v9  ;;  %v633_v11 = vld [vmem:[%s8643_s18 + $0x408] sm:$0xff]  ;;  %v635_v12 = vld [vmem:[%s8643_s18 + $0x410] sm:$0xff] }
  0x3b   : > { %632 = vst [vmem:[%s8648_s19 + $0x250] sm:$0xff] %v631_v10  ;;  %v637_v13 = vld [vmem:[%s8643_s18 + $0x418] sm:$0xff]  ;;  %634 = vst [vmem:[%s8648_s19 + $0x258] sm:$0xff] %v633_v11  ;;  %v639_v14 = vld [vmem:[%s8643_s18 + $0x420] sm:$0xff] }
  0x3c   : > { %636 = vst [vmem:[%s8648_s19 + $0x260] sm:$0xff] %v635_v12  ;;  %638 = vst [vmem:[%s8648_s19 + $0x268] sm:$0xff] %v637_v13  ;;  %v641_v15 = vld [vmem:[%s8643_s18 + $0x428] sm:$0xff]  ;;  %v643_v16 = vld [vmem:[%s8643_s18 + $0x430] sm:$0xff] }
  0x3d   : > { %640 = vst [vmem:[%s8648_s19 + $0x270] sm:$0xff] %v639_v14  ;;  %642 = vst [vmem:[%s8648_s19 + $0x278] sm:$0xff] %v641_v15  ;;  %v645_v17 = vld [vmem:[%s8643_s18 + $0x438] sm:$0xff]  ;;  %v647_v18 = vld [vmem:[%s8643_s18 + $0x440] sm:$0xff] }
  0x3e   : > { %644 = vst [vmem:[%s8648_s19 + $0x280] sm:$0xff] %v643_v16  ;;  %v649_v19 = vld [vmem:[%s8643_s18 + $0x448] sm:$0xff]  ;;  %646 = vst [vmem:[%s8648_s19 + $0x288] sm:$0xff] %v645_v17  ;;  %v651_v20 = vld [vmem:[%s8643_s18 + $0x450] sm:$0xff] }
  0x3f   : > { %648 = vst [vmem:[%s8648_s19 + $0x290] sm:$0xff] %v647_v18  ;;  %650 = vst [vmem:[%s8648_s19 + $0x298] sm:$0xff] %v649_v19  ;;  %v653_v21 = vld [vmem:[%s8643_s18 + $0x458] sm:$0xff]  ;;  %v655_v22 = vld [vmem:[%s8643_s18 + $0x460] sm:$0xff] }
  0x40   : > { %652 = vst [vmem:[%s8648_s19 + $0x2a0] sm:$0xff] %v651_v20  ;;  %654 = vst [vmem:[%s8648_s19 + $0x2a8] sm:$0xff] %v653_v21  ;;  %v657_v23 = vld [vmem:[%s8643_s18 + $0x468] sm:$0xff]  ;;  %v659_v24 = vld [vmem:[%s8643_s18 + $0x470] sm:$0xff] }
  0x41   : > { %656 = vst [vmem:[%s8648_s19 + $0x2b0] sm:$0xff] %v655_v22  ;;  %v661_v25 = vld [vmem:[%s8643_s18 + $0x478] sm:$0xff]  ;;  %658 = vst [vmem:[%s8648_s19 + $0x2b8] sm:$0xff] %v657_v23  ;;  %v663_v26 = vld [vmem:[%s8643_s18 + $0x480] sm:$0xff] }
  0x42   : > { %660 = vst [vmem:[%s8648_s19 + $0x2c0] sm:$0xff] %v659_v24  ;;  %662 = vst [vmem:[%s8648_s19 + $0x2c8] sm:$0xff] %v661_v25  ;;  %v665_v27 = vld [vmem:[%s8643_s18 + $0x488] sm:$0xff]  ;;  %v667_v28 = vld [vmem:[%s8643_s18 + $0x490] sm:$0xff] }
  0x43   : > { %664 = vst [vmem:[%s8648_s19 + $0x2d0] sm:$0xff] %v663_v26  ;;  %666 = vst [vmem:[%s8648_s19 + $0x2d8] sm:$0xff] %v665_v27  ;;  %v669_v29 = vld [vmem:[%s8643_s18 + $0x498] sm:$0xff]  ;;  %v671_v30 = vld [vmem:[%s8643_s18 + $0x4a0] sm:$0xff] }
  0x44   : > { %668 = vst [vmem:[%s8648_s19 + $0x2e0] sm:$0xff] %v667_v28  ;;  %v673_v31 = vld [vmem:[%s8643_s18 + $0x4a8] sm:$0xff]  ;;  %670 = vst [vmem:[%s8648_s19 + $0x2e8] sm:$0xff] %v669_v29  ;;  %v675_v32 = vld [vmem:[%s8643_s18 + $0x4b0] sm:$0xff] }
  0x45   : > { %672 = vst [vmem:[%s8648_s19 + $0x2f0] sm:$0xff] %v671_v30  ;;  %674 = vst [vmem:[%s8648_s19 + $0x2f8] sm:$0xff] %v673_v31  ;;  %v677_v33 = vld [vmem:[%s8643_s18 + $0x4b8] sm:$0xff]  ;;  %v679_v34 = vld [vmem:[%s8643_s18 + $0x4c0] sm:$0xff] }
  0x46   : > { %676 = vst [vmem:[%s8648_s19 + $0x300] sm:$0xff] %v675_v32  ;;  %678 = vst [vmem:[%s8648_s19 + $0x308] sm:$0xff] %v677_v33  ;;  %v681_v35 = vld [vmem:[%s8643_s18 + $0x4c8] sm:$0xff]  ;;  %v683_v36 = vld [vmem:[%s8643_s18 + $0x4d0] sm:$0xff] }
  0x47   : > { %680 = vst [vmem:[%s8648_s19 + $0x310] sm:$0xff] %v679_v34  ;;  %v685_v37 = vld [vmem:[%s8643_s18 + $0x4d8] sm:$0xff]  ;;  %682 = vst [vmem:[%s8648_s19 + $0x318] sm:$0xff] %v681_v35  ;;  %v687_v38 = vld [vmem:[%s8643_s18 + $0x4e0] sm:$0xff] }
  0x48   : > { %684 = vst [vmem:[%s8648_s19 + $0x320] sm:$0xff] %v683_v36  ;;  %686 = vst [vmem:[%s8648_s19 + $0x328] sm:$0xff] %v685_v37  ;;  %v689_v39 = vld [vmem:[%s8643_s18 + $0x4e8] sm:$0xff]  ;;  %v691_v40 = vld [vmem:[%s8643_s18 + $0x4f0] sm:$0xff] }
  0x49   : > { %688 = vst [vmem:[%s8648_s19 + $0x330] sm:$0xff] %v687_v38  ;;  %690 = vst [vmem:[%s8648_s19 + $0x338] sm:$0xff] %v689_v39  ;;  %v693_v41 = vld [vmem:[%s8643_s18 + $0x4f8] sm:$0xff]  ;;  %v695_v42 = vld [vmem:[%s8643_s18 + $0x500] sm:$0xff] }
  0x4a   : > { %692 = vst [vmem:[%s8648_s19 + $0x340] sm:$0xff] %v691_v40  ;;  %v697_v43 = vld [vmem:[%s8643_s18 + $0x508] sm:$0xff]  ;;  %694 = vst [vmem:[%s8648_s19 + $0x348] sm:$0xff] %v693_v41 }
  0x4b   : > { %696 = vst [vmem:[%s8648_s19 + $0x350] sm:$0xff] %v695_v42  ;;  %698 = vst [vmem:[%s8648_s19 + $0x358] sm:$0xff] %v697_v43 }
  0x4c PF: > { %p7737_p10 = scmp.ge.s32.totalorder %s8532_s27, 1  ;;  %p703_p11 = scmp.lt.s32.totalorder %s8532_s27, 3 }
  0x4e   : > { %p704_p12 = pnand %p7737_p10, %p703_p11 }
  0x50   : > { %707 = sbr.rel (%p704_p12) target bundleno = 2996 (0xbb4), region = 82 }
  0x55   : > { %s8866_s20 = sand.u32 1, %s8524_s25   ;;  %vm944_vm0 = vcmask 1046528   ;;  %s8534_s23 = smov 4   ;;  %vm1297_vm1 = vcmask 1045504   ;;  %vm3579_vm2 = vcmask 1043456   ;;  %vm2854_vm3 = vcmask 31744  }
  0x56   : > { %s8265_s21 = smul.u32 864, %s8866_s20  ;;  %s8535_s29 = smov 8   ;;  %vm2919_vm4 = vcmask 64512   ;;  %vm2984_vm5 = vcmask 97280   ;;  %vm3049_vm6 = vcmask 130048   ;;  %vm3114_vm7 = vcmask 162816  }
  0x57   : > { %s8536_s8 = smov 12   ;;  %s8537_s9 = smov 16   ;;  %vm3179_vm8 = vcmask 195584   ;;  %vm3244_vm9 = vcmask 228352   ;;  %vm3309_vm10 = vcmask 261120   ;;  %vm3386_vm11 = vcmask 293888  }
  0x58   : > { %s8869_s22 = scalar_lea.vmem [#allocation2], %s8265_s21  ;;  %s8538_s13 = smov 20   ;;  %vm4097_vm12 = vcmask 1040384   ;;  %vm6512_vm13 = vcmask 326656   ;;  %vm6577_vm14 = vcmask 392192   ;;  %vm6642_vm15 = vcmask 457728  }
  0x59   : > { %v8872_v44 = vld [vmem:[%s8869_s22 + $0x18] sm:$0xff]  ;;  %v8875_v45 = vld [vmem:[%s8869_s22 + $0x20] sm:$0xff]  ;;  %v8883_v49 = vld [vmem:[%s8869_s22 + $0x8] sm:$0xff]  ;;  %s8539_s14 = smov 24   ;;  %s8540_s15 = smov 28  }
  0x5a   : > { %v8878_v46 = vld [vmem:[%s8869_s22] sm:$0xff]  ;;  %v950_v47 = vrot.slane %v8872_v44, 1  ;;  %v951_v48 = vrot.slane %v8875_v45, 1  ;;  %v8887_v51 = vld [vmem:[%s8869_s22 + $0x28] sm:$0x3]  ;;  %v946_v52 = vrot.slane %v8883_v49, 1 }
  0x5b   : > { %v945_v50 = vrot.slane %v8878_v46, 1  ;;  %v953_v53 = vrot.slane %v8887_v51, 1  ;;  %v8892_v54 = vld [vmem:[%s8869_s22 + $0x10] sm:$0x3]  ;;  %v8895_v55 = vld [vmem:[%s8869_s22 + $0x38] sm:$0xff]  ;;  %v8925_v4 = vld [vmem:[%s8869_s22 + $0x48] sm:$0xff] }
  0x5c   : > { %v8898_v56 = vsel %vm944_vm0, %v950_v47, %v951_v48  ;;  %v948_v57 = vrot.slane %v8892_v54, 1  ;;  %v8902_v58 = vld [vmem:[%s8869_s22 + $0x40] sm:$0x3]  ;;  %v8905_v59 = vld [vmem:[%s8869_s22 + $0x30] sm:$0xff]  ;;  %v956_v62 = vrot.slane %v8895_v55, 1  ;;  %v960_v9 = vrot.slane %v8925_v4, 1 }
  0x5d   : > { %17042 = vst [vmem:[#allocation6_spill] sm:$0xff] %v8898_v56  ;;  %1109 = vrot.lane.b32.xlu1 %v8898_v56, %s8534_s23  ;;  %v947_v60 = vsel %vm944_vm0, %v945_v50, %v946_v52  ;;  %v8912_v61 = vsel %vm944_vm0, %v951_v48, %v953_v53  ;;  %v958_v63 = vrot.slane %v8902_v58, 1  ;;  %v955_v1 = vrot.slane %v8905_v59, 1  ;;  %v8919_v2 = vld [vmem:[%s8869_s22 + $0x50] sm:$0xff]  ;;  %v8922_v3 = vld [vmem:[%s8869_s22 + $0x58] sm:$0x3] }
  0x5e   : > { %1105 = vrot.lane.b32.xlu0 %v947_v60, %s8534_s23  ;;  %17043 = vst [vmem:[#allocation7_spill] sm:$0xff] %v8912_v61  ;;  %v949_v0 = vsel %vm944_vm0, %v946_v52, %v948_v57  ;;  %v961_v6 = vrot.slane %v8919_v2, 1  ;;  %v963_v7 = vrot.slane %v8922_v3, 1  ;;  %v8940_v10 = vld [vmem:[%s8869_s22 + $0x68] sm:$0xff]  ;;  %v8943_v11 = vld [vmem:[%s8869_s22 + $0x70] sm:$0x3] }
  0x5f   : > { %v8931_v5 = vsel %vm944_vm0, %v956_v62, %v958_v63  ;;  %v8936_v8 = vsel %vm944_vm0, %v955_v1, %v956_v62  ;;  %v8946_v12 = vld [vmem:[%s8869_s22 + $0x60] sm:$0xff]  ;;  %v966_v14 = vrot.slane %v8940_v10, 1  ;;  %v968_v15 = vrot.slane %v8943_v11, 1  ;;  %v8965_v19 = vld [vmem:[%s8869_s22 + $0x88] sm:$0x3]  ;;  %v8968_v20 = vld [vmem:[%s8869_s22 + $0x78] sm:$0xff] }
  0x60   : > { %17044 = vst [vmem:[#allocation8_spill] sm:$0xff] %v8931_v5  ;;  %17045 = vst [vmem:[#allocation9_spill] sm:$0xff] %v8936_v8  ;;  %v8953_v13 = vsel %vm944_vm0, %v961_v6, %v963_v7  ;;  %v8958_v16 = vsel %vm944_vm0, %v960_v9, %v961_v6  ;;  %v965_v17 = vrot.slane %v8946_v12, 1  ;;  %v8962_v18 = vld [vmem:[%s8869_s22 + $0x80] sm:$0xff]  ;;  %v973_v23 = vrot.slane %v8965_v19, 1  ;;  %v8984_v26 = vld [vmem:[%s8869_s22 + $0x98] sm:$0xff] }
  0x61   : > { %1111 = vrot.lane.b32.xlu1 %v8912_v61, %s8534_s23  ;;  %17046 = vst [vmem:[#allocation10_spill] sm:$0xff] %v8953_v13  ;;  %17047 = vst [vmem:[#allocation11_spill] sm:$0xff] %v8958_v16  ;;  %v8975_v21 = vsel %vm944_vm0, %v966_v14, %v968_v15  ;;  %v971_v22 = vrot.slane %v8962_v18, 1  ;;  %v970_v25 = vrot.slane %v8968_v20, 1  ;;  %v8987_v27 = vld [vmem:[%s8869_s22 + $0xa0] sm:$0x3] }
  0x62   : > { %1107 = vrot.lane.b32.xlu0 %v949_v0, %s8534_s23  ;;  %17048 = vst [vmem:[#allocation12_spill] sm:$0xff] %v8975_v21  ;;  %v8980_v24 = vsel %vm944_vm0, %v965_v17, %v966_v14  ;;  %v8990_v28 = vld [vmem:[%s8869_s22 + $0x90] sm:$0xff]  ;;  %v976_v30 = vrot.slane %v8984_v26, 1  ;;  %v978_v31 = vrot.slane %v8987_v27, 1  ;;  %v9009_v35 = vld [vmem:[%s8869_s22 + $0xb8] sm:$0x3] }
  0x63   : > { %17049 = vst [vmem:[#allocation13_spill] sm:$0xff] %v8980_v24  ;;  %v8997_v29 = vsel %vm944_vm0, %v971_v22, %v973_v23  ;;  %v9002_v32 = vsel %vm944_vm0, %v970_v25, %v971_v22  ;;  %v975_v33 = vrot.slane %v8990_v28, 1  ;;  %v9006_v34 = vld [vmem:[%s8869_s22 + $0xb0] sm:$0xff]  ;;  %v9012_v36 = vld [vmem:[%s8869_s22 + $0xa8] sm:$0xff]  ;;  %v983_v39 = vrot.slane %v9009_v35, 1  ;;  %v9034_v47 = vld [vmem:[%s8869_s22 + $0xc0] sm:$0xff] }
  0x64   : > { %17050 = vst [vmem:[#allocation14_spill] sm:$0xff] %v8997_v29  ;;  %17051 = vst [vmem:[#allocation15_spill] sm:$0xff] %v9002_v32  ;;  %v9019_v37 = vsel %vm944_vm0, %v976_v30, %v978_v31  ;;  %v981_v38 = vrot.slane %v9006_v34, 1  ;;  %v980_v41 = vrot.slane %v9012_v36, 1  ;;  %v9028_v42 = vld [vmem:[%s8869_s22 + $0xc8] sm:$0xff]  ;;  %v985_v57 = vrot.slane %v9034_v47, 1 }
  0x65   : > { %1115 = vrot.lane.b32.xlu1 %v8931_v5, %s8534_s23  ;;  %17052 = vst [vmem:[#allocation16_spill] sm:$0xff] %v9019_v37  ;;  %v9024_v40 = vsel %vm944_vm0, %v975_v33, %v976_v30  ;;  %v9031_v43 = vld [vmem:[%s8869_s22 + $0xd0] sm:$0x3]  ;;  %v986_v50 = vrot.slane %v9028_v42, 1  ;;  %v9050_v60 = vld [vmem:[%s8869_s22 + $0xe0] sm:$0xff]  ;;  %v9056_v63 = vld [vmem:[%s8869_s22 + $0xd8] sm:$0xff] }
  0x66   : > { %1113 = vrot.lane.b32.xlu0 %v8936_v8, %s8534_s23  ;;  %17053 = vst [vmem:[#allocation17_spill] sm:$0xff] %v9024_v40  ;;  %v9041_v48 = vsel %vm944_vm0, %v981_v38, %v983_v39  ;;  %v988_v52 = vrot.slane %v9031_v43, 1  ;;  %v9046_v53 = vsel %vm944_vm0, %v980_v41, %v981_v38  ;;  %v9053_v62 = vld [vmem:[%s8869_s22 + $0xe8] sm:$0x3]  ;;  %v991_v1 = vrot.slane %v9050_v60, 1  ;;  %v9072_v14 = vld [vmem:[%s8869_s22 + $0xf8] sm:$0xff] }
  0x67   : > { %17054 = vst [vmem:[#allocation18_spill] sm:$0xff] %v9041_v48  ;;  %17055 = vst [vmem:[#allocation19_spill] sm:$0xff] %v9046_v53  ;;  %v993_v6 = vrot.slane %v9053_v62, 1  ;;  %v9068_v7 = vsel %vm944_vm0, %v985_v57, %v986_v50  ;;  %v990_v9 = vrot.slane %v9056_v63, 1  ;;  %v9075_v15 = vld [vmem:[%s8869_s22 + $0x100] sm:$0x3] }
  0x68   : > { %v9063_v0 = vsel %vm944_vm0, %v986_v50, %v988_v52  ;;  %17057 = vst [vmem:[#allocation21_spill] sm:$0xff] %v9068_v7  ;;  %v9078_v17 = vld [vmem:[%s8869_s22 + $0xf0] sm:$0xff]  ;;  %v996_v23 = vrot.slane %v9072_v14, 1  ;;  %v998_v25 = vrot.slane %v9075_v15, 1  ;;  %v9097_v38 = vld [vmem:[%s8869_s22 + $0x118] sm:$0x3] }
  0x69   : > { %1119 = vrot.lane.b32.xlu1 %v8953_v13, %s8534_s23  ;;  %17056 = vst [vmem:[#allocation20_spill] sm:$0xff] %v9063_v0  ;;  %v9085_v22 = vsel %vm944_vm0, %v991_v1, %v993_v6  ;;  %v9090_v30 = vsel %vm944_vm0, %v990_v9, %v991_v1  ;;  %v995_v31 = vrot.slane %v9078_v17, 1  ;;  %v9094_v33 = vld [vmem:[%s8869_s22 + $0x110] sm:$0xff]  ;;  %v9100_v39 = vld [vmem:[%s8869_s22 + $0x108] sm:$0xff]  ;;  %v1003_v52 = vrot.slane %v9097_v38, 1  ;;  %s8541_s18 = smov 32  }
  0x6a   : > { %1117 = vrot.lane.b32.xlu0 %v8958_v16, %s8534_s23  ;;  %17058 = vst [vmem:[#allocation22_spill] sm:$0xff] %v9085_v22  ;;  %17059 = vst [vmem:[#allocation23_spill] sm:$0xff] %v9090_v30  ;;  %v9107_v41 = vsel %vm944_vm0, %v996_v23, %v998_v25  ;;  %v1001_v50 = vrot.slane %v9094_v33, 1  ;;  %v1000_v1 = vrot.slane %v9100_v39, 1  ;;  %v9116_v6 = vld [vmem:[%s8869_s22 + $0x128] sm:$0xff]  ;;  %v9204_v16 = vld [vmem:[%s8869_s22 + $0x1b8] sm:$0xff] }
  0x6b   : > { %17060 = vst [vmem:[#allocation24_spill] sm:$0xff] %v9107_v41  ;;  %v9112_v57 = vsel %vm944_vm0, %v995_v31, %v996_v23  ;;  %v9119_v9 = vld [vmem:[%s8869_s22 + $0x130] sm:$0x3]  ;;  %v1006_v23 = vrot.slane %v9116_v6, 1  ;;  %17070 = vst [vmem:[#allocation34_spill] sm:$0xff] %v9204_v16  ;;  %s8546_s19 = smov 64  }
  0x6c   : > { %17061 = vst [vmem:[#allocation25_spill] sm:$0xff] %v9112_v57  ;;  %v9129_v25 = vsel %vm944_vm0, %v1001_v50, %v1003_v52  ;;  %v1008_v31 = vrot.slane %v9119_v9, 1  ;;  %v9226_v5 = vld [vmem:[%s8869_s22 + $0x1d0] sm:$0xff] }
  0x6d   : > { %1123 = vrot.lane.b32.xlu1 %v8975_v21, %s8534_s23  ;;  %17062 = vst [vmem:[#allocation26_spill] sm:$0xff] %v9129_v25  ;;  %17075 = vst [vmem:[#allocation39_spill] sm:$0xff] %v9226_v5 }
  0x6e   : > { %1121 = vrot.lane.b32.xlu0 %v8980_v24, %s8534_s23  ;;  %v9151_v52 = vsel %vm944_vm0, %v1006_v23, %v1008_v31 }
  0x6f   : > { %17064 = vst [vmem:[#allocation28_spill] sm:$0xff] %v9151_v52 }
  0x71   : > { %1127 = vrot.lane.b32.xlu1 %v8997_v29, %s8534_s23  ;;  %v9182_v29 = vld [vmem:[%s8869_s22 + $0x170] sm:$0xff] }
  0x72   : > { %1125 = vrot.lane.b32.xlu0 %v9002_v32, %s8534_s23 }
  0x75   : > { %1131 = vrot.lane.b32.xlu1 %v9019_v37, %s8534_s23 }
  0x76   : > { %1129 = vrot.lane.b32.xlu0 %v9024_v40, %s8534_s23  ;;  %v9160_v40 = vld [vmem:[%s8869_s22 + $0x158] sm:$0xff] }
  0x79   : > { %1135 = vrot.lane.b32.xlu1 %v9041_v48, %s8534_s23 }
  0x7a   : > { %1133 = vrot.lane.b32.xlu0 %v9046_v53, %s8534_s23 }
  0x7d   : > { %1139 = vrot.lane.b32.xlu1 %v9063_v0, %s8534_s23  ;;  %v9138_v0 = vld [vmem:[%s8869_s22 + $0x140] sm:$0xff] }
  0x7e   : > { %1137 = vrot.lane.b32.xlu0 %v9068_v7, %s8534_s23 }
  0x81   : > { %1143 = vrot.lane.b32.xlu1 %v9085_v22, %s8534_s23  ;;  %v9134_v22 = vsel %vm944_vm0, %v1000_v1, %v1001_v50  ;;  %v1011_v50 = vrot.slane %v9138_v0, 1 }
  0x82   : > { %1141 = vrot.lane.b32.xlu0 %v9090_v30, %s8534_s23  ;;  %v9122_v30 = vld [vmem:[%s8869_s22 + $0x120] sm:$0xff]  ;;  %17063 = vst [vmem:[#allocation27_spill] sm:$0xff] %v9134_v22 }
  0x83   : > { %v1005_v7 = vrot.slane %v9122_v30, 1 }
  0x85   : > { %1147 = vrot.lane.b32.xlu1 %v9107_v41, %s8534_s23  ;;  %v9141_v41 = vld [vmem:[%s8869_s22 + $0x148] sm:$0x3]  ;;  %v9156_v53 = vsel %vm944_vm0, %v1005_v7, %v1006_v23  ;;  %v1016_v7 = vrot.slane %v9160_v40, 1 }
  0x86   : > { %1145 = vrot.lane.b32.xlu0 %v9112_v57, %s8534_s23  ;;  %v9144_v57 = vld [vmem:[%s8869_s22 + $0x138] sm:$0xff]  ;;  %v1013_v1 = vrot.slane %v9141_v41, 1  ;;  %17065 = vst [vmem:[#allocation29_spill] sm:$0xff] %v9156_v53 }
  0x87   : > { %v1010_v48 = vrot.slane %v9144_v57, 1 }
  0x88   : > { %v9173_v31 = vsel %vm944_vm0, %v1011_v50, %v1013_v1 }
  0x89   : > { %1151 = vrot.lane.b32.xlu1 %v9129_v25, %s8534_s23  ;;  %v9163_v25 = vld [vmem:[%s8869_s22 + $0x160] sm:$0x3]  ;;  %17066 = vst [vmem:[#allocation30_spill] sm:$0xff] %v9173_v31  ;;  %v9178_v37 = vsel %vm944_vm0, %v1010_v48, %v1011_v50  ;;  %v1021_v48 = vrot.slane %v9182_v29, 1 }
  0x8a   : > { %1149 = vrot.lane.b32.xlu0 %v9134_v22, %s8534_s23  ;;  %v9166_v22 = vld [vmem:[%s8869_s22 + $0x150] sm:$0xff]  ;;  %v1018_v23 = vrot.slane %v9163_v25, 1  ;;  %17067 = vst [vmem:[#allocation31_spill] sm:$0xff] %v9178_v37 }
  0x8b   : > { %v1015_v32 = vrot.slane %v9166_v22, 1 }
  0x8c   : > { %v9195_v1 = vsel %vm944_vm0, %v1016_v7, %v1018_v23 }
  0x8d   : > { %1155 = vrot.lane.b32.xlu1 %v9151_v52, %s8534_s23  ;;  %v9185_v52 = vld [vmem:[%s8869_s22 + $0x178] sm:$0x3]  ;;  %17068 = vst [vmem:[#allocation32_spill] sm:$0xff] %v9195_v1  ;;  %v9200_v24 = vsel %vm944_vm0, %v1015_v32, %v1016_v7  ;;  %v1026_v32 = vrot.slane %v9204_v16, 1 }
  0x8e   : > { %1153 = vrot.lane.b32.xlu0 %v9156_v53, %s8534_s23  ;;  %v9188_v53 = vld [vmem:[%s8869_s22 + $0x168] sm:$0xff]  ;;  %v1023_v50 = vrot.slane %v9185_v52, 1  ;;  %17069 = vst [vmem:[#allocation33_spill] sm:$0xff] %v9200_v24 }
  0x8f   : > { %v1020_v21 = vrot.slane %v9188_v53, 1 }
  0x90   : > { %v9217_v23 = vsel %vm944_vm0, %v1021_v48, %v1023_v50 }
  0x91   : > { %1159 = vrot.lane.b32.xlu1 %v9173_v31, %s8534_s23  ;;  %v9207_v31 = vld [vmem:[%s8869_s22 + $0x1c0] sm:$0x3]  ;;  %17073 = vst [vmem:[#allocation37_spill] sm:$0xff] %v9217_v23  ;;  %v9222_v13 = vsel %vm944_vm0, %v1020_v21, %v1021_v48  ;;  %v1031_v21 = vrot.slane %v9226_v5, 1 }
  0x92   : > { %1157 = vrot.lane.b32.xlu0 %v9178_v37, %s8534_s23  ;;  %17071 = vst [vmem:[#allocation35_spill] sm:$0xff] %v9207_v31  ;;  %v9210_v37 = vld [vmem:[%s8869_s22 + $0x1b0] sm:$0xff]  ;;  %v1028_v7 = vrot.slane %v9207_v31, 1  ;;  %17074 = vst [vmem:[#allocation38_spill] sm:$0xff] %v9222_v13  ;;  %v9530_v5 = vld [vmem:[%s8869_s22 + $0x320] sm:$0xff] }
  0x93   : > { %17072 = vst [vmem:[#allocation36_spill] sm:$0xff] %v9210_v37  ;;  %v1025_v8 = vrot.slane %v9210_v37, 1  ;;  %v9244_v37 = vld [vmem:[%s8869_s22 + $0x1e8] sm:$0xff]  ;;  %v9247_v31 = vld [vmem:[%s8869_s22 + $0x1f0] sm:$0x3] }
  0x94   : > { %v1029_v50 = vsel %vm944_vm0, %v1026_v32, %v1028_v7  ;;  %17078 = vst [vmem:[#allocation42_spill] sm:$0xff] %v9244_v37  ;;  %17079 = vst [vmem:[#allocation43_spill] sm:$0xff] %v9247_v31 }
  0x95   : > { %1163 = vrot.lane.b32.xlu1 %v9195_v1, %s8534_s23  ;;  %v9229_v1 = vld [vmem:[%s8869_s22 + $0x1d8] sm:$0x3]  ;;  %v1027_v56 = vsel %vm944_vm0, %v1025_v8, %v1026_v32  ;;  %v1038_v8 = vrot.slane %v9247_v31, 1 }
  0x96   : > { %1161 = vrot.lane.b32.xlu0 %v9200_v24, %s8534_s23  ;;  %17076 = vst [vmem:[#allocation40_spill] sm:$0xff] %v9229_v1  ;;  %v9232_v24 = vld [vmem:[%s8869_s22 + $0x1c8] sm:$0xff]  ;;  %v1033_v48 = vrot.slane %v9229_v1, 1  ;;  %v9264_v1 = vld [vmem:[%s8869_s22 + $0x200] sm:$0xff] }
  0x97   : > { %17077 = vst [vmem:[#allocation41_spill] sm:$0xff] %v9232_v24  ;;  %v1030_v61 = vrot.slane %v9232_v24, 1  ;;  %17083 = vst [vmem:[#allocation47_spill] sm:$0xff] %v9264_v1 }
  0x98   : > { %v9255_v7 = vsel %vm944_vm0, %v1031_v21, %v1033_v48 }
  0x99   : > { %1167 = vrot.lane.b32.xlu1 %v9217_v23, %s8534_s23  ;;  %v9250_v23 = vld [vmem:[%s8869_s22 + $0x1e0] sm:$0xff]  ;;  %17081 = vst [vmem:[#allocation45_spill] sm:$0xff] %v9255_v7  ;;  %v9260_v32 = vsel %vm944_vm0, %v1030_v61, %v1031_v21  ;;  %v1041_v61 = vrot.slane %v9264_v1, 1  ;;  %v9308_v1 = vld [vmem:[%s8869_s22 + $0x230] sm:$0xff] }
  0x9a   : > { %1165 = vrot.lane.b32.xlu0 %v9222_v13, %s8534_s23  ;;  %17080 = vst [vmem:[#allocation44_spill] sm:$0xff] %v9250_v23  ;;  %v1036_v13 = vrot.slane %v9244_v37, 1  ;;  %17082 = vst [vmem:[#allocation46_spill] sm:$0xff] %v9260_v32  ;;  %v1035_v24 = vrot.slane %v9250_v23, 1  ;;  %v9286_v37 = vld [vmem:[%s8869_s22 + $0x218] sm:$0xff] }
  0x9b   : > { %17088 = vst [vmem:[#allocation52_spill] sm:$0xff] %v9286_v37  ;;  %17093 = vst [vmem:[#allocation57_spill] sm:$0xff] %v9308_v1 }
  0x9c   : > { %v9277_v48 = vsel %vm944_vm0, %v1036_v13, %v1038_v8  ;;  %v9282_v23 = vsel %vm944_vm0, %v1035_v24, %v1036_v13  ;;  %v1046_v13 = vrot.slane %v9286_v37, 1  ;;  %v9330_v37 = vld [vmem:[%s8869_s22 + $0x248] sm:$0xff] }
  0x9d   : > { %1171 = vrot.lane.b32.xlu1 %v1029_v50, %s8534_s23  ;;  %v9267_v50 = vld [vmem:[%s8869_s22 + $0x208] sm:$0x3]  ;;  %17086 = vst [vmem:[#allocation50_spill] sm:$0xff] %v9277_v48  ;;  %17087 = vst [vmem:[#allocation51_spill] sm:$0xff] %v9282_v23 }
  0x9e   : > { %1169 = vrot.lane.b32.xlu0 %v1027_v56, %s8534_s23  ;;  %17084 = vst [vmem:[#allocation48_spill] sm:$0xff] %v9267_v50  ;;  %v9270_v56 = vld [vmem:[%s8869_s22 + $0x1f8] sm:$0xff]  ;;  %v1043_v21 = vrot.slane %v9267_v50, 1  ;;  %17098 = vst [vmem:[#allocation62_spill] sm:$0xff] %v9330_v37 }
  0x9f   : > { %17085 = vst [vmem:[#allocation49_spill] sm:$0xff] %v9270_v56  ;;  %v1040_v31 = vrot.slane %v9270_v56, 1 }
  0xa0   : > { %v9299_v8 = vsel %vm944_vm0, %v1041_v61, %v1043_v21 }
  0xa1   : > { %1175 = vrot.lane.b32.xlu1 %v9255_v7, %s8534_s23  ;;  %v9289_v7 = vld [vmem:[%s8869_s22 + $0x220] sm:$0x3]  ;;  %17091 = vst [vmem:[#allocation55_spill] sm:$0xff] %v9299_v8  ;;  %v9304_v56 = vsel %vm944_vm0, %v1040_v31, %v1041_v61  ;;  %v1051_v31 = vrot.slane %v9308_v1, 1 }
  0xa2   : > { %1173 = vrot.lane.b32.xlu0 %v9260_v32, %s8534_s23  ;;  %17089 = vst [vmem:[#allocation53_spill] sm:$0xff] %v9289_v7  ;;  %v9292_v32 = vld [vmem:[%s8869_s22 + $0x210] sm:$0xff]  ;;  %v1048_v24 = vrot.slane %v9289_v7, 1  ;;  %17092 = vst [vmem:[#allocation56_spill] sm:$0xff] %v9304_v56  ;;  %v9352_v1 = vld [vmem:[%s8869_s22 + $0x260] sm:$0xff] }
  0xa3   : > { %17090 = vst [vmem:[#allocation54_spill] sm:$0xff] %v9292_v32  ;;  %v1045_v50 = vrot.slane %v9292_v32, 1  ;;  %17103 = vst [vmem:[#allocation67_spill] sm:$0xff] %v9352_v1 }
  0xa4   : > { %v9321_v21 = vsel %vm944_vm0, %v1046_v13, %v1048_v24 }
  0xa5   : > { %1179 = vrot.lane.b32.xlu1 %v9277_v48, %s8534_s23  ;;  %v9311_v48 = vld [vmem:[%s8869_s22 + $0x238] sm:$0x3]  ;;  %17096 = vst [vmem:[#allocation60_spill] sm:$0xff] %v9321_v21  ;;  %v9326_v32 = vsel %vm944_vm0, %v1045_v50, %v1046_v13  ;;  %v1056_v50 = vrot.slane %v9330_v37, 1 }
  0xa6   : > { %1177 = vrot.lane.b32.xlu0 %v9282_v23, %s8534_s23  ;;  %17094 = vst [vmem:[#allocation58_spill] sm:$0xff] %v9311_v48  ;;  %v9314_v23 = vld [vmem:[%s8869_s22 + $0x228] sm:$0xff]  ;;  %v1053_v61 = vrot.slane %v9311_v48, 1  ;;  %17097 = vst [vmem:[#allocation61_spill] sm:$0xff] %v9326_v32  ;;  %v9374_v37 = vld [vmem:[%s8869_s22 + $0x278] sm:$0xff] }
  0xa7   : > { %17095 = vst [vmem:[#allocation59_spill] sm:$0xff] %v9314_v23  ;;  %v1050_v7 = vrot.slane %v9314_v23, 1  ;;  %17108 = vst [vmem:[#allocation72_spill] sm:$0xff] %v9374_v37 }
  0xa8   : > { %v9343_v24 = vsel %vm944_vm0, %v1051_v31, %v1053_v61 }
  0xa9   : > { %1183 = vrot.lane.b32.xlu1 %v9299_v8, %s8534_s23  ;;  %v9333_v8 = vld [vmem:[%s8869_s22 + $0x250] sm:$0x3]  ;;  %17101 = vst [vmem:[#allocation65_spill] sm:$0xff] %v9343_v24  ;;  %v9348_v23 = vsel %vm944_vm0, %v1050_v7, %v1051_v31  ;;  %v1061_v7 = vrot.slane %v9352_v1, 1 }
  0xaa   : > { %1181 = vrot.lane.b32.xlu0 %v9304_v56, %s8534_s23  ;;  %17099 = vst [vmem:[#allocation63_spill] sm:$0xff] %v9333_v8  ;;  %v9336_v56 = vld [vmem:[%s8869_s22 + $0x240] sm:$0xff]  ;;  %v1058_v13 = vrot.slane %v9333_v8, 1  ;;  %17102 = vst [vmem:[#allocation66_spill] sm:$0xff] %v9348_v23  ;;  %v9396_v1 = vld [vmem:[%s8869_s22 + $0x290] sm:$0xff] }
  0xab   : > { %17100 = vst [vmem:[#allocation64_spill] sm:$0xff] %v9336_v56  ;;  %v1055_v48 = vrot.slane %v9336_v56, 1  ;;  %17113 = vst [vmem:[#allocation77_spill] sm:$0xff] %v9396_v1 }
  0xac   : > { %v9365_v61 = vsel %vm944_vm0, %v1056_v50, %v1058_v13 }
  0xad   : > { %1187 = vrot.lane.b32.xlu1 %v9321_v21, %s8534_s23  ;;  %v9355_v21 = vld [vmem:[%s8869_s22 + $0x268] sm:$0x3]  ;;  %17106 = vst [vmem:[#allocation70_spill] sm:$0xff] %v9365_v61  ;;  %v9370_v56 = vsel %vm944_vm0, %v1055_v48, %v1056_v50  ;;  %v1066_v48 = vrot.slane %v9374_v37, 1 }
  0xae   : > { %1185 = vrot.lane.b32.xlu0 %v9326_v32, %s8534_s23  ;;  %17104 = vst [vmem:[#allocation68_spill] sm:$0xff] %v9355_v21  ;;  %v9358_v32 = vld [vmem:[%s8869_s22 + $0x258] sm:$0xff]  ;;  %v1063_v31 = vrot.slane %v9355_v21, 1  ;;  %17107 = vst [vmem:[#allocation71_spill] sm:$0xff] %v9370_v56  ;;  %v9418_v37 = vld [vmem:[%s8869_s22 + $0x2a8] sm:$0xff] }
  0xaf   : > { %17105 = vst [vmem:[#allocation69_spill] sm:$0xff] %v9358_v32  ;;  %v1060_v8 = vrot.slane %v9358_v32, 1  ;;  %17118 = vst [vmem:[#allocation82_spill] sm:$0xff] %v9418_v37 }
  0xb0   : > { %v9387_v13 = vsel %vm944_vm0, %v1061_v7, %v1063_v31 }
  0xb1   : > { %1191 = vrot.lane.b32.xlu1 %v9343_v24, %s8534_s23  ;;  %v9377_v24 = vld [vmem:[%s8869_s22 + $0x280] sm:$0x3]  ;;  %17111 = vst [vmem:[#allocation75_spill] sm:$0xff] %v9387_v13  ;;  %v9392_v32 = vsel %vm944_vm0, %v1060_v8, %v1061_v7  ;;  %v1071_v8 = vrot.slane %v9396_v1, 1 }
  0xb2   : > { %1189 = vrot.lane.b32.xlu0 %v9348_v23, %s8534_s23  ;;  %17109 = vst [vmem:[#allocation73_spill] sm:$0xff] %v9377_v24  ;;  %v9380_v23 = vld [vmem:[%s8869_s22 + $0x270] sm:$0xff]  ;;  %v1068_v50 = vrot.slane %v9377_v24, 1  ;;  %17112 = vst [vmem:[#allocation76_spill] sm:$0xff] %v9392_v32  ;;  %v9440_v1 = vld [vmem:[%s8869_s22 + $0x2c0] sm:$0xff] }
  0xb3   : > { %17110 = vst [vmem:[#allocation74_spill] sm:$0xff] %v9380_v23  ;;  %v1065_v21 = vrot.slane %v9380_v23, 1  ;;  %17123 = vst [vmem:[#allocation87_spill] sm:$0xff] %v9440_v1 }
  0xb4   : > { %v9409_v31 = vsel %vm944_vm0, %v1066_v48, %v1068_v50 }
  0xb5   : > { %1195 = vrot.lane.b32.xlu1 %v9365_v61, %s8534_s23  ;;  %v9399_v61 = vld [vmem:[%s8869_s22 + $0x298] sm:$0x3]  ;;  %17116 = vst [vmem:[#allocation80_spill] sm:$0xff] %v9409_v31  ;;  %v9414_v23 = vsel %vm944_vm0, %v1065_v21, %v1066_v48  ;;  %v1076_v21 = vrot.slane %v9418_v37, 1 }
  0xb6   : > { %1193 = vrot.lane.b32.xlu0 %v9370_v56, %s8534_s23  ;;  %17114 = vst [vmem:[#allocation78_spill] sm:$0xff] %v9399_v61  ;;  %v9402_v56 = vld [vmem:[%s8869_s22 + $0x288] sm:$0xff]  ;;  %v1073_v7 = vrot.slane %v9399_v61, 1  ;;  %17117 = vst [vmem:[#allocation81_spill] sm:$0xff] %v9414_v23  ;;  %v9462_v37 = vld [vmem:[%s8869_s22 + $0x2d8] sm:$0xff] }
  0xb7   : > { %17115 = vst [vmem:[#allocation79_spill] sm:$0xff] %v9402_v56  ;;  %v1070_v24 = vrot.slane %v9402_v56, 1  ;;  %17128 = vst [vmem:[#allocation92_spill] sm:$0xff] %v9462_v37 }
  0xb8   : > { %v9431_v50 = vsel %vm944_vm0, %v1071_v8, %v1073_v7 }
  0xb9   : > { %1199 = vrot.lane.b32.xlu1 %v9387_v13, %s8534_s23  ;;  %v9421_v13 = vld [vmem:[%s8869_s22 + $0x2b0] sm:$0x3]  ;;  %17121 = vst [vmem:[#allocation85_spill] sm:$0xff] %v9431_v50  ;;  %v9436_v56 = vsel %vm944_vm0, %v1070_v24, %v1071_v8  ;;  %v1081_v24 = vrot.slane %v9440_v1, 1 }
  0xba   : > { %1197 = vrot.lane.b32.xlu0 %v9392_v32, %s8534_s23  ;;  %17119 = vst [vmem:[#allocation83_spill] sm:$0xff] %v9421_v13  ;;  %v9424_v32 = vld [vmem:[%s8869_s22 + $0x2a0] sm:$0xff]  ;;  %v1078_v48 = vrot.slane %v9421_v13, 1  ;;  %17122 = vst [vmem:[#allocation86_spill] sm:$0xff] %v9436_v56  ;;  %v9484_v1 = vld [vmem:[%s8869_s22 + $0x2f0] sm:$0xff] }
  0xbb   : > { %17120 = vst [vmem:[#allocation84_spill] sm:$0xff] %v9424_v32  ;;  %v1075_v61 = vrot.slane %v9424_v32, 1  ;;  %17133 = vst [vmem:[#allocation97_spill] sm:$0xff] %v9484_v1 }
  0xbc   : > { %v9453_v7 = vsel %vm944_vm0, %v1076_v21, %v1078_v48 }
  0xbd   : > { %1203 = vrot.lane.b32.xlu1 %v9409_v31, %s8534_s23  ;;  %v9443_v31 = vld [vmem:[%s8869_s22 + $0x2c8] sm:$0x3]  ;;  %17126 = vst [vmem:[#allocation90_spill] sm:$0xff] %v9453_v7  ;;  %v9458_v32 = vsel %vm944_vm0, %v1075_v61, %v1076_v21  ;;  %v1086_v61 = vrot.slane %v9462_v37, 1 }
  0xbe   : > { %1201 = vrot.lane.b32.xlu0 %v9414_v23, %s8534_s23  ;;  %17124 = vst [vmem:[#allocation88_spill] sm:$0xff] %v9443_v31  ;;  %v9446_v23 = vld [vmem:[%s8869_s22 + $0x2b8] sm:$0xff]  ;;  %v1083_v8 = vrot.slane %v9443_v31, 1  ;;  %17127 = vst [vmem:[#allocation91_spill] sm:$0xff] %v9458_v32  ;;  %v9506_v37 = vld [vmem:[%s8869_s22 + $0x308] sm:$0xff] }
  0xbf   : > { %17125 = vst [vmem:[#allocation89_spill] sm:$0xff] %v9446_v23  ;;  %v1080_v13 = vrot.slane %v9446_v23, 1 }
  0xc0   : > { %v9475_v48 = vsel %vm944_vm0, %v1081_v24, %v1083_v8 }
  0xc1   : > { %1207 = vrot.lane.b32.xlu1 %v9431_v50, %s8534_s23  ;;  %v9465_v50 = vld [vmem:[%s8869_s22 + $0x2e0] sm:$0x3]  ;;  %17131 = vst [vmem:[#allocation95_spill] sm:$0xff] %v9475_v48  ;;  %v9480_v23 = vsel %vm944_vm0, %v1080_v13, %v1081_v24  ;;  %v1091_v13 = vrot.slane %v9484_v1, 1 }
  0xc2   : > { %1205 = vrot.lane.b32.xlu0 %v9436_v56, %s8534_s23  ;;  %17129 = vst [vmem:[#allocation93_spill] sm:$0xff] %v9465_v50  ;;  %v9468_v56 = vld [vmem:[%s8869_s22 + $0x2d0] sm:$0xff]  ;;  %v1088_v21 = vrot.slane %v9465_v50, 1  ;;  %17132 = vst [vmem:[#allocation96_spill] sm:$0xff] %v9480_v23 }
  0xc3   : > { %17130 = vst [vmem:[#allocation94_spill] sm:$0xff] %v9468_v56  ;;  %v1085_v31 = vrot.slane %v9468_v56, 1 }
  0xc4   : > { %v9497_v8 = vsel %vm944_vm0, %v1086_v61, %v1088_v21 }
  0xc5   : > { %1211 = vrot.lane.b32.xlu1 %v9453_v7, %s8534_s23  ;;  %v9487_v7 = vld [vmem:[%s8869_s22 + $0x2f8] sm:$0x3]  ;;  %17136 = vst [vmem:[#allocation100_spill] sm:$0xff] %v9497_v8  ;;  %v9502_v56 = vsel %vm944_vm0, %v1085_v31, %v1086_v61  ;;  %v1096_v31 = vrot.slane %v9506_v37, 1 }
  0xc6   : > { %1209 = vrot.lane.b32.xlu0 %v9458_v32, %s8534_s23  ;;  %17134 = vst [vmem:[#allocation98_spill] sm:$0xff] %v9487_v7  ;;  %v9490_v32 = vld [vmem:[%s8869_s22 + $0x2e8] sm:$0xff]  ;;  %v1093_v24 = vrot.slane %v9487_v7, 1  ;;  %17137 = vst [vmem:[#allocation101_spill] sm:$0xff] %v9502_v56 }
  0xc7   : > { %17135 = vst [vmem:[#allocation99_spill] sm:$0xff] %v9490_v32  ;;  %v1090_v50 = vrot.slane %v9490_v32, 1 }
  0xc8   : > { %v9519_v21 = vsel %vm944_vm0, %v1091_v13, %v1093_v24 }
  0xc9   : > { %1215 = vrot.lane.b32.xlu1 %v9475_v48, %s8534_s23  ;;  %v9509_v48 = vld [vmem:[%s8869_s22 + $0x310] sm:$0x3]  ;;  %17140 = vst [vmem:[#allocation104_spill] sm:$0xff] %v9519_v21  ;;  %v9526_v7 = vsel %vm944_vm0, %v1090_v50, %v1091_v13  ;;  %v1101_v50 = vrot.slane %v9530_v5, 1 }
  0xca   : > { %1213 = vrot.lane.b32.xlu0 %v9480_v23, %s8534_s23  ;;  %17138 = vst [vmem:[#allocation102_spill] sm:$0xff] %v9509_v48  ;;  %v9512_v23 = vld [vmem:[%s8869_s22 + $0x300] sm:$0xff]  ;;  %v1098_v61 = vrot.slane %v9509_v48, 1  ;;  %17142 = vst [vmem:[#allocation106_spill] sm:$0xff] %v9526_v7 }
  0xcb   : > { %17139 = vst [vmem:[#allocation103_spill] sm:$0xff] %v9512_v23  ;;  %v1095_v1 = vrot.slane %v9512_v23, 1 }
  0xcc   : > { %v9545_v24 = vsel %vm944_vm0, %v1096_v31, %v1098_v61 }
  0xcd   : > { %1219 = vrot.lane.b32.xlu1 %v9497_v8, %s8534_s23  ;;  %v9533_v8 = vld [vmem:[%s8869_s22 + $0x328] sm:$0x3]  ;;  %17144 = vst [vmem:[#allocation108_spill] sm:$0xff] %v9545_v24  ;;  %v9552_v23 = vsel %vm944_vm0, %v1095_v1, %v1096_v31  ;;  %v1298_v31 = vrot.slane %v8878_v46, 2  ;;  %v1303_v46 = vrot.slane %v8872_v44, 2  ;;  %v1308_v44 = vrot.slane %v8905_v59, 2 }
  0xce   : > { %1217 = vrot.lane.b32.xlu0 %v9502_v56, %s8534_s23  ;;  %v9538_v56 = vld [vmem:[%s8869_s22 + $0x318] sm:$0xff]  ;;  %v1103_v13 = vrot.slane %v9533_v8, 1  ;;  %17146 = vst [vmem:[#allocation110_spill] sm:$0xff] %v9552_v23  ;;  %v1313_v59 = vrot.slane %v8925_v4, 2  ;;  %v1318_v4 = vrot.slane %v8946_v12, 2  ;;  %v1323_v12 = vrot.slane %v8968_v20, 2 }
  0xcf   : > { %v9523_v32 = vpop.permute.xlu1 %1109  ;;  %v1328_v20 = vrot.slane %v8990_v28, 2  ;;  %v1333_v28 = vrot.slane %v9012_v36, 2  ;;  %v1338_v36 = vrot.slane %v9034_v47, 2  ;;  %v1343_v47 = vrot.slane %v9056_v63, 2 }
  0xd0   : > { %17141 = vst [vmem:[#allocation105_spill] sm:$0xff] %v9523_v32  ;;  %v9535_v16 = vpop.permute.xlu0 %1105  ;;  %v9562_v61 = vsel %vm944_vm0, %v1101_v50, %v1103_v13  ;;  %v1306_v13 = vrot.slane %v8887_v51, 2  ;;  %v1311_v51 = vrot.slane %v8902_v58, 2  ;;  %v1316_v58 = vrot.slane %v8922_v3, 2 }
  0xd1   : > { %17143 = vst [vmem:[#allocation107_spill] sm:$0xff] %v9535_v16  ;;  %1223 = vrot.lane.b32.xlu1 %v9519_v21, %s8534_s23  ;;  %v1100_v16 = vrot.slane %v9538_v56, 1  ;;  %v1321_v3 = vrot.slane %v8943_v11, 2  ;;  %v1326_v11 = vrot.slane %v8965_v19, 2  ;;  %v1331_v19 = vrot.slane %v8987_v27, 2 }
  0xd2   : > { %1221 = vrot.lane.b32.xlu0 %v9526_v7, %s8534_s23  ;;  %v1299_v7 = vrot.slane %v8883_v49, 2  ;;  %v1336_v27 = vrot.slane %v9009_v35, 2  ;;  %v1341_v35 = vrot.slane %v9031_v43, 2  ;;  %v1346_v43 = vrot.slane %v9053_v62, 2 }
  0xd3   : > { %v9549_v32 = vpop.permute.xlu1 %1111  ;;  %v9569_v1 = vsel %vm944_vm0, %v1100_v16, %v1101_v50  ;;  %v1351_v62 = vrot.slane %v9075_v15, 2  ;;  %v1348_v63 = vrot.slane %v9078_v17, 2  ;;  %v1356_v15 = vrot.slane %v9097_v38, 2 }
  0xd4   : > { %17145 = vst [vmem:[#allocation109_spill] sm:$0xff] %v9549_v32  ;;  %v9555_v48 = vpop.permute.xlu0 %1107  ;;  %v1301_v32 = vrot.slane %v8892_v54, 2  ;;  %v1304_v54 = vrot.slane %v8875_v45, 2  ;;  %v1300_v16 = vsel %vm1297_vm1, %v1298_v31, %v1299_v7  ;;  %v1309_v45 = vrot.slane %v8895_v55, 2 }
  0xd5   : > { %17147 = vst [vmem:[#allocation111_spill] sm:$0xff] %v9555_v48  ;;  %1227 = vrot.lane.b32.xlu1 %v9545_v24, %s8534_s23  ;;  %v1314_v55 = vrot.slane %v8919_v2, 2  ;;  %v1319_v2 = vrot.slane %v8940_v10, 2  ;;  %v1324_v10 = vrot.slane %v8962_v18, 2  ;;  %v1329_v18 = vrot.slane %v8984_v26, 2 }
  0xd6   : > { %1225 = vrot.lane.b32.xlu0 %v9552_v23, %s8534_s23  ;;  %v1302_v49 = vsel %vm1297_vm1, %v1299_v7, %v1301_v32  ;;  %v9597_v7 = vsel %vm1297_vm1, %v1303_v46, %v1304_v54  ;;  %v1334_v26 = vrot.slane %v9006_v34, 2  ;;  %v1339_v34 = vrot.slane %v9028_v42, 2 }
  0xd7   : > { %v9566_v21 = vpop.permute.xlu1 %1115  ;;  %v9624_v46 = vsel %vm1297_vm1, %v1314_v55, %v1316_v58  ;;  %v9641_v58 = vsel %vm1297_vm1, %v1319_v2, %v1321_v3  ;;  %v9658_v3 = vsel %vm1297_vm1, %v1324_v10, %v1326_v11  ;;  %v9675_v11 = vsel %vm1297_vm1, %v1329_v18, %v1331_v19 }
  0xd8   : > { %17148 = vst [vmem:[#allocation112_spill] sm:$0xff] %v9566_v21  ;;  %v9572_v48 = vpop.permute.xlu0 %1113  ;;  %v9692_v19 = vsel %vm1297_vm1, %v1334_v26, %v1336_v27  ;;  %v9709_v27 = vsel %vm1297_vm1, %v1339_v34, %v1341_v35  ;;  %v1344_v42 = vrot.slane %v9050_v60, 2  ;;  %v1349_v60 = vrot.slane %v9072_v14, 2 }
  0xd9   : > { %17149 = vst [vmem:[#allocation113_spill] sm:$0xff] %v9572_v48  ;;  %1231 = vrot.lane.b32.xlu1 %v9562_v61, %s8534_s23  ;;  %v9590_v48 = vsel %vm1297_vm1, %v1304_v54, %v1306_v13  ;;  %v9614_v54 = vsel %vm1297_vm1, %v1308_v44, %v1309_v45  ;;  %v1354_v14 = vrot.slane %v9094_v33, 2  ;;  %v1353_v17 = vrot.slane %v9100_v39, 2 }
  0xda   : > { %1229 = vrot.lane.b32.xlu0 %v9569_v1, %s8534_s23  ;;  %v9726_v35 = vsel %vm1297_vm1, %v1344_v42, %v1346_v43  ;;  %v9743_v43 = vsel %vm1297_vm1, %v1349_v60, %v1351_v62  ;;  %v1359_v33 = vrot.slane %v9116_v6, 2  ;;  %v1361_v38 = vrot.slane %v9119_v9, 2 }
  0xdb   : > { %v9581_v21 = vpop.permute.xlu1 %1119  ;;  %v9760_v62 = vsel %vm1297_vm1, %v1354_v14, %v1356_v15  ;;  %v1358_v39 = vrot.slane %v9122_v30, 2  ;;  %v1364_v6 = vrot.slane %v9138_v0, 2  ;;  %v1366_v9 = vrot.slane %v9141_v41, 2 }
  0xdc   : > { %17150 = vst [vmem:[#allocation114_spill] sm:$0xff] %v9581_v21  ;;  %v9585_v50 = vpop.permute.xlu0 %1117  ;;  %17173 = vst [vmem:[#allocation137_spill] sm:$0xff] %v9760_v62  ;;  %v9777_v15 = vsel %vm1297_vm1, %v1359_v33, %v1361_v38  ;;  %v1363_v30 = vrot.slane %v9144_v57, 2  ;;  %v1369_v0 = vrot.slane %v9160_v40, 2  ;;  %v1371_v41 = vrot.slane %v9163_v25, 2 }
  0xdd   : > { %17151 = vst [vmem:[#allocation115_spill] sm:$0xff] %v9585_v50  ;;  %1460 = vrot.lane.b32.xlu1 %v1302_v49, %s8535_s29  ;;  %v9607_v49 = vsel %vm1297_vm1, %v1309_v45, %v1311_v51  ;;  %v9631_v45 = vsel %vm1297_vm1, %v1313_v59, %v1314_v55  ;;  %v9648_v55 = vsel %vm1297_vm1, %v1318_v4, %v1319_v2  ;;  %17177 = vst [vmem:[#allocation141_spill] sm:$0xff] %v9777_v15  ;;  %v17231_v50 = vld [vmem:[#allocation63_spill] sm:$0xff] }
  0xde   : > { %1458 = vrot.lane.b32.xlu0 %v1300_v16, %s8535_s29  ;;  %v9665_v2 = vsel %vm1297_vm1, %v1323_v12, %v1324_v10  ;;  %v9682_v10 = vsel %vm1297_vm1, %v1328_v20, %v1329_v18  ;;  %v9699_v18 = vsel %vm1297_vm1, %v1333_v28, %v1334_v26  ;;  %v9716_v26 = vsel %vm1297_vm1, %v1338_v36, %v1339_v34 }
  0xdf   : > { %v9594_v32 = vpop.permute.xlu1 %1123  ;;  %v9733_v34 = vsel %vm1297_vm1, %v1343_v47, %v1344_v42  ;;  %v9750_v42 = vsel %vm1297_vm1, %v1348_v63, %v1349_v60  ;;  %v9767_v60 = vsel %vm1297_vm1, %v1353_v17, %v1354_v14  ;;  %v9784_v14 = vsel %vm1297_vm1, %v1358_v39, %v1359_v33 }
  0xe0   : > { %17152 = vst [vmem:[#allocation116_spill] sm:$0xff] %v9594_v32  ;;  %v9600_v31 = vpop.permute.xlu0 %1121  ;;  %17171 = vst [vmem:[#allocation135_spill] sm:$0xff] %v9750_v42  ;;  %v9794_v38 = vsel %vm1297_vm1, %v1364_v6, %v1366_v9  ;;  %v9801_v33 = vsel %vm1297_vm1, %v1363_v30, %v1364_v6  ;;  %v1368_v57 = vrot.slane %v9166_v22, 2  ;;  %v9811_v9 = vsel %vm1297_vm1, %v1369_v0, %v1371_v41  ;;  %v17230_v32 = vld [vmem:[#allocation62_spill] sm:$0xff] }
  0xe1   : > { %17153 = vst [vmem:[#allocation117_spill] sm:$0xff] %v9600_v31  ;;  %1464 = vrot.lane.b32.xlu1 %v9590_v48, %s8535_s29  ;;  %17175 = vst [vmem:[#allocation139_spill] sm:$0xff] %v9767_v60  ;;  %v1374_v40 = vrot.slane %v9182_v29, 2  ;;  %v1376_v25 = vrot.slane %v9185_v52, 2  ;;  %v1373_v22 = vrot.slane %v9188_v53, 2  ;;  %v17190_v29 = vld [vmem:[#allocation34_spill] sm:$0xff] }
  0xe2   : > { %1462 = vrot.lane.b32.xlu0 %v9597_v7, %s8535_s29  ;;  %17179 = vst [vmem:[#allocation143_spill] sm:$0xff] %v9784_v14  ;;  %17181 = vst [vmem:[#allocation145_spill] sm:$0xff] %v9794_v38  ;;  %v9818_v6 = vsel %vm1297_vm1, %v1368_v57, %v1369_v0  ;;  %v1379_v52 = vrot.slane %v17190_v29, 2  ;;  %v17194_v53 = vld [vmem:[#allocation36_spill] sm:$0xff]  ;;  %v17196_v29 = vld [vmem:[#allocation39_spill] sm:$0xff] }
  0xe3   : > { %v9611_v13 = vpop.permute.xlu1 %1127  ;;  %17183 = vst [vmem:[#allocation147_spill] sm:$0xff] %v9801_v33  ;;  %17185 = vst [vmem:[#allocation149_spill] sm:$0xff] %v9811_v9  ;;  %v9828_v41 = vsel %vm1297_vm1, %v1374_v40, %v1376_v25  ;;  %v9835_v0 = vsel %vm1297_vm1, %v1373_v22, %v1374_v40  ;;  %v1378_v57 = vrot.slane %v17194_v53, 2  ;;  %v17199_v22 = vld [vmem:[#allocation41_spill] sm:$0xff] }
  0xe4   : > { %17154 = vst [vmem:[#allocation118_spill] sm:$0xff] %v9611_v13  ;;  %v9617_v16 = vpop.permute.xlu0 %1125  ;;  %17187 = vst [vmem:[#allocation151_spill] sm:$0xff] %v9818_v6  ;;  %v1383_v53 = vrot.slane %v17199_v22, 2 }
  0xe5   : > { %17155 = vst [vmem:[#allocation119_spill] sm:$0xff] %v9617_v16  ;;  %1468 = vrot.lane.b32.xlu1 %v9607_v49, %s8535_s29  ;;  %17189 = vst [vmem:[#allocation153_spill] sm:$0xff] %v9828_v41  ;;  %v1380_v40 = vsel %vm1297_vm1, %v1378_v57, %v1379_v52  ;;  %v17224_v16 = vld [vmem:[#allocation58_spill] sm:$0xff] }
  0xe6   : > { %1466 = vrot.lane.b32.xlu0 %v9614_v54, %s8535_s29 }
  0xe7   : > { %v9628_v51 = vpop.permute.xlu1 %1131 }
  0xe8   : > { %17156 = vst [vmem:[#allocation120_spill] sm:$0xff] %v9628_v51  ;;  %v9634_v44 = vpop.permute.xlu0 %1129 }
  0xe9   : > { %17157 = vst [vmem:[#allocation121_spill] sm:$0xff] %v9634_v44  ;;  %1472 = vrot.lane.b32.xlu1 %v9624_v46, %s8535_s29  ;;  %v17223_v44 = vld [vmem:[#allocation57_spill] sm:$0xff] }
  0xea   : > { %1470 = vrot.lane.b32.xlu0 %v9631_v45, %s8535_s29 }
  0xeb   : > { %v9645_v51 = vpop.permute.xlu1 %1135 }
  0xec   : > { %17158 = vst [vmem:[#allocation122_spill] sm:$0xff] %v9645_v51  ;;  %v9651_v59 = vpop.permute.xlu0 %1133 }
  0xed   : > { %17159 = vst [vmem:[#allocation123_spill] sm:$0xff] %v9651_v59  ;;  %1476 = vrot.lane.b32.xlu1 %v9641_v58, %s8535_s29 }
  0xee   : > { %1474 = vrot.lane.b32.xlu0 %v9648_v55, %s8535_s29 }
  0xef   : > { %v9662_v51 = vpop.permute.xlu1 %1139 }
  0xf0   : > { %17160 = vst [vmem:[#allocation124_spill] sm:$0xff] %v9662_v51  ;;  %v9668_v4 = vpop.permute.xlu0 %1137 }
  0xf1   : > { %17161 = vst [vmem:[#allocation125_spill] sm:$0xff] %v9668_v4  ;;  %1480 = vrot.lane.b32.xlu1 %v9658_v3, %s8535_s29 }
  0xf2   : > { %1478 = vrot.lane.b32.xlu0 %v9665_v2, %s8535_s29 }
  0xf3   : > { %v9679_v51 = vpop.permute.xlu1 %1143 }
  0xf4   : > { %17162 = vst [vmem:[#allocation126_spill] sm:$0xff] %v9679_v51  ;;  %v9685_v12 = vpop.permute.xlu0 %1141 }
  0xf5   : > { %17163 = vst [vmem:[#allocation127_spill] sm:$0xff] %v9685_v12  ;;  %1484 = vrot.lane.b32.xlu1 %v9675_v11, %s8535_s29  ;;  %v17217_v12 = vld [vmem:[#allocation53_spill] sm:$0xff] }
  0xf6   : > { %1482 = vrot.lane.b32.xlu0 %v9682_v10, %s8535_s29 }
  0xf7   : > { %v9696_v51 = vpop.permute.xlu1 %1147 }
  0xf8   : > { %17164 = vst [vmem:[#allocation128_spill] sm:$0xff] %v9696_v51  ;;  %v9702_v20 = vpop.permute.xlu0 %1145 }
  0xf9   : > { %17165 = vst [vmem:[#allocation129_spill] sm:$0xff] %v9702_v20  ;;  %1488 = vrot.lane.b32.xlu1 %v9692_v19, %s8535_s29 }
  0xfa   : > { %1486 = vrot.lane.b32.xlu0 %v9699_v18, %s8535_s29 }
  0xfb   : > { %v9713_v51 = vpop.permute.xlu1 %1151 }
  0xfc   : > { %17166 = vst [vmem:[#allocation130_spill] sm:$0xff] %v9713_v51  ;;  %v9719_v28 = vpop.permute.xlu0 %1149 }
  0xfd   : > { %17167 = vst [vmem:[#allocation131_spill] sm:$0xff] %v9719_v28  ;;  %1492 = vrot.lane.b32.xlu1 %v9709_v27, %s8535_s29 }
  0xfe   : > { %1490 = vrot.lane.b32.xlu0 %v9716_v26, %s8535_s29 }
  0xff   : > { %v9730_v51 = vpop.permute.xlu1 %1155 }
 0x100   : > { %17168 = vst [vmem:[#allocation132_spill] sm:$0xff] %v9730_v51  ;;  %v9736_v36 = vpop.permute.xlu0 %1153 }
 0x101   : > { %17169 = vst [vmem:[#allocation133_spill] sm:$0xff] %v9736_v36  ;;  %1496 = vrot.lane.b32.xlu1 %v9726_v35, %s8535_s29 }
 0x102   : > { %1494 = vrot.lane.b32.xlu0 %v9733_v34, %s8535_s29 }
 0x103   : > { %v9747_v51 = vpop.permute.xlu1 %1159 }
 0x104   : > { %17170 = vst [vmem:[#allocation134_spill] sm:$0xff] %v9747_v51  ;;  %v9753_v47 = vpop.permute.xlu0 %1157 }
 0x105   : > { %17172 = vst [vmem:[#allocation136_spill] sm:$0xff] %v9753_v47  ;;  %1500 = vrot.lane.b32.xlu1 %v9743_v43, %s8535_s29 }
 0x106   : > { %1498 = vrot.lane.b32.xlu0 %v9750_v42, %s8535_s29 }
 0x107   : > { %v9764_v51 = vpop.permute.xlu1 %1163 }
 0x108   : > { %17174 = vst [vmem:[#allocation138_spill] sm:$0xff] %v9764_v51  ;;  %v9770_v63 = vpop.permute.xlu0 %1161 }
 0x109   : > { %17176 = vst [vmem:[#allocation140_spill] sm:$0xff] %v9770_v63  ;;  %1504 = vrot.lane.b32.xlu1 %v9760_v62, %s8535_s29  ;;  %v1384_v63 = vrot.slane %v17196_v29, 2  ;;  %v17203_v29 = vld [vmem:[#allocation43_spill] sm:$0xff] }
 0x10a   : > { %1502 = vrot.lane.b32.xlu0 %v9767_v60, %s8535_s29  ;;  %v1391_v20 = vrot.slane %v17203_v29, 2 }
 0x10b   : > { %v9781_v51 = vpop.permute.xlu1 %1167 }
 0x10c   : > { %17178 = vst [vmem:[#allocation142_spill] sm:$0xff] %v9781_v51  ;;  %v9787_v17 = vpop.permute.xlu0 %1165 }
 0x10d   : > { %17180 = vst [vmem:[#allocation144_spill] sm:$0xff] %v9787_v17  ;;  %1508 = vrot.lane.b32.xlu1 %v9777_v15, %s8535_s29 }
 0x10e   : > { %1506 = vrot.lane.b32.xlu0 %v9784_v14, %s8535_s29 }
 0x10f   : > { %v9798_v51 = vpop.permute.xlu1 %1171 }
 0x110   : > { %17182 = vst [vmem:[#allocation146_spill] sm:$0xff] %v9798_v51  ;;  %v9804_v39 = vpop.permute.xlu0 %1169 }
 0x111   : > { %17184 = vst [vmem:[#allocation148_spill] sm:$0xff] %v9804_v39  ;;  %1512 = vrot.lane.b32.xlu1 %v9794_v38, %s8535_s29  ;;  %v17191_v39 = vld [vmem:[#allocation35_spill] sm:$0xff] }
 0x112   : > { %1510 = vrot.lane.b32.xlu0 %v9801_v33, %s8535_s29  ;;  %17193 = vst [vmem:[#allocation35_spill] sm:$0xff] %v9835_v0 }
 0x113   : > { %v9815_v51 = vpop.permute.xlu1 %1175 }
 0x114   : > { %17186 = vst [vmem:[#allocation150_spill] sm:$0xff] %v9815_v51  ;;  %v9821_v30 = vpop.permute.xlu0 %1173  ;;  %v1381_v51 = vrot.slane %v17191_v39, 2  ;;  %v17197_v39 = vld [vmem:[#allocation40_spill] sm:$0xff] }
 0x115   : > { %17188 = vst [vmem:[#allocation152_spill] sm:$0xff] %v9821_v30  ;;  %1516 = vrot.lane.b32.xlu1 %v9811_v9, %s8535_s29  ;;  %v1386_v47 = vrot.slane %v17197_v39, 2 }
 0x116   : > { %1514 = vrot.lane.b32.xlu0 %v9818_v6, %s8535_s29  ;;  %v1382_v25 = vsel %vm1297_vm1, %v1379_v52, %v1381_v51  ;;  %v17202_v51 = vld [vmem:[#allocation42_spill] sm:$0xff]  ;;  %v17206_v52 = vld [vmem:[#allocation44_spill] sm:$0xff] }
 0x117   : > { %v9832_v17 = vpop.permute.xlu1 %1179  ;;  %v1389_v28 = vrot.slane %v17202_v51, 2  ;;  %v1388_v57 = vrot.slane %v17206_v52, 2  ;;  %v17210_v51 = vld [vmem:[#allocation48_spill] sm:$0xff] }
 0x118   : > { %17192 = vst [vmem:[#allocation34_spill] sm:$0xff] %v9832_v17  ;;  %v9838_v30 = vpop.permute.xlu0 %1177  ;;  %v1396_v29 = vrot.slane %v17210_v51, 2 }
 0x119   : > { %17195 = vst [vmem:[#allocation36_spill] sm:$0xff] %v9838_v30  ;;  %1520 = vrot.lane.b32.xlu1 %v9828_v41, %s8535_s29  ;;  %v9856_v30 = vsel %vm1297_vm1, %v1384_v63, %v1386_v47  ;;  %v9873_v47 = vsel %vm1297_vm1, %v1389_v28, %v1391_v20 }
 0x11a   : > { %1518 = vrot.lane.b32.xlu0 %v9835_v0, %s8535_s29  ;;  %17201 = vst [vmem:[#allocation41_spill] sm:$0xff] %v9856_v30  ;;  %17208 = vst [vmem:[#allocation154_spill] sm:$0xff] %v9873_v47 }
 0x11b   : > { %v9847_v17 = vpop.permute.xlu1 %1183 }
 0x11c   : > { %17198 = vst [vmem:[#allocation39_spill] sm:$0xff] %v9847_v17  ;;  %v9851_v36 = vpop.permute.xlu0 %1181  ;;  %v9863_v17 = vsel %vm1297_vm1, %v1383_v53, %v1384_v63  ;;  %v9880_v63 = vsel %vm1297_vm1, %v1388_v57, %v1389_v28  ;;  %v17213_v53 = vld [vmem:[#allocation49_spill] sm:$0xff]  ;;  %v17220_v57 = vld [vmem:[#allocation54_spill] sm:$0xff] }
 0x11d   : > { %17200 = vst [vmem:[#allocation40_spill] sm:$0xff] %v9851_v36  ;;  %1524 = vrot.lane.b32.xlu1 %v1382_v25, %s8535_s29  ;;  %17205 = vst [vmem:[#allocation43_spill] sm:$0xff] %v9863_v17  ;;  %v17209_v25 = vld [vmem:[#allocation47_spill] sm:$0xff]  ;;  %v1393_v52 = vrot.slane %v17213_v53, 2  ;;  %v17216_v36 = vld [vmem:[#allocation52_spill] sm:$0xff] }
 0x11e   : > { %1522 = vrot.lane.b32.xlu0 %v1380_v40, %s8535_s29  ;;  %v1394_v40 = vrot.slane %v17209_v25, 2  ;;  %17212 = vst [vmem:[#allocation48_spill] sm:$0xff] %v9880_v63  ;;  %v1399_v51 = vrot.slane %v17216_v36, 2 }
 0x11f   : > { %v9860_v39 = vpop.permute.xlu1 %1187 }
 0x120   : > { %17204 = vst [vmem:[#allocation42_spill] sm:$0xff] %v9860_v39  ;;  %v9866_v22 = vpop.permute.xlu0 %1185  ;;  %v9890_v20 = vsel %vm1297_vm1, %v1394_v40, %v1396_v29  ;;  %v9897_v28 = vsel %vm1297_vm1, %v1393_v52, %v1394_v40  ;;  %v17227_v52 = vld [vmem:[#allocation59_spill] sm:$0xff] }
 0x121   : > { %17207 = vst [vmem:[#allocation44_spill] sm:$0xff] %v9866_v22  ;;  %1528 = vrot.lane.b32.xlu1 %v9856_v30, %s8535_s29  ;;  %17215 = vst [vmem:[#allocation155_spill] sm:$0xff] %v9890_v20 }
 0x122   : > { %1526 = vrot.lane.b32.xlu0 %v9863_v17, %s8535_s29  ;;  %17219 = vst [vmem:[#allocation53_spill] sm:$0xff] %v9897_v28 }
 0x123   : > { %v9877_v39 = vpop.permute.xlu1 %1191 }
 0x124   : > { %17211 = vst [vmem:[#allocation47_spill] sm:$0xff] %v9877_v39  ;;  %v9883_v22 = vpop.permute.xlu0 %1189  ;;  %v1401_v39 = vrot.slane %v17217_v12, 2  ;;  %v1404_v12 = vrot.slane %v17223_v44, 2 }
 0x125   : > { %17214 = vst [vmem:[#allocation49_spill] sm:$0xff] %v9883_v22  ;;  %1532 = vrot.lane.b32.xlu1 %v9873_v47, %s8535_s29  ;;  %v1398_v22 = vrot.slane %v17220_v57, 2 }
 0x126   : > { %1530 = vrot.lane.b32.xlu0 %v9880_v63, %s8535_s29  ;;  %v9907_v29 = vsel %vm1297_vm1, %v1399_v51, %v1401_v39 }
 0x127   : > { %v9894_v4 = vpop.permute.xlu1 %1195  ;;  %17222 = vst [vmem:[#allocation156_spill] sm:$0xff] %v9907_v29  ;;  %v9914_v40 = vsel %vm1297_vm1, %v1398_v22, %v1399_v51  ;;  %v17234_v51 = vld [vmem:[#allocation64_spill] sm:$0xff] }
 0x128   : > { %17218 = vst [vmem:[#allocation52_spill] sm:$0xff] %v9894_v4  ;;  %v9900_v59 = vpop.permute.xlu0 %1193  ;;  %v1406_v4 = vrot.slane %v17224_v16, 2  ;;  %17226 = vst [vmem:[#allocation58_spill] sm:$0xff] %v9914_v40  ;;  %v1409_v16 = vrot.slane %v17230_v32, 2 }
 0x129   : > { %17221 = vst [vmem:[#allocation54_spill] sm:$0xff] %v9900_v59  ;;  %1536 = vrot.lane.b32.xlu1 %v9890_v20, %s8535_s29  ;;  %v1403_v59 = vrot.slane %v17227_v52, 2 }
 0x12a   : > { %1534 = vrot.lane.b32.xlu0 %v9897_v28, %s8535_s29  ;;  %v9924_v39 = vsel %vm1297_vm1, %v1404_v12, %v1406_v4 }
 0x12b   : > { %v9911_v13 = vpop.permute.xlu1 %1199  ;;  %17229 = vst [vmem:[#allocation157_spill] sm:$0xff] %v9924_v39  ;;  %v9931_v22 = vsel %vm1297_vm1, %v1403_v59, %v1404_v12  ;;  %v17241_v12 = vld [vmem:[#allocation69_spill] sm:$0xff] }
 0x12c   : > { %17225 = vst [vmem:[#allocation57_spill] sm:$0xff] %v9911_v13  ;;  %v9917_v31 = vpop.permute.xlu0 %1197  ;;  %v1411_v13 = vrot.slane %v17231_v50, 2  ;;  %17233 = vst [vmem:[#allocation63_spill] sm:$0xff] %v9931_v22 }
 0x12d   : > { %17228 = vst [vmem:[#allocation59_spill] sm:$0xff] %v9917_v31  ;;  %1540 = vrot.lane.b32.xlu1 %v9907_v29, %s8535_s29  ;;  %v1408_v31 = vrot.slane %v17234_v51, 2  ;;  %v17238_v29 = vld [vmem:[#allocation68_spill] sm:$0xff] }
 0x12e   : > { %1538 = vrot.lane.b32.xlu0 %v9914_v40, %s8535_s29  ;;  %v9941_v4 = vsel %vm1297_vm1, %v1409_v16, %v1411_v13  ;;  %v17237_v40 = vld [vmem:[#allocation67_spill] sm:$0xff] }
 0x12f   : > { %v9928_v21 = vpop.permute.xlu1 %1203  ;;  %17236 = vst [vmem:[#allocation158_spill] sm:$0xff] %v9941_v4  ;;  %v1414_v50 = vrot.slane %v17237_v40, 2  ;;  %v9948_v59 = vsel %vm1297_vm1, %v1408_v31, %v1409_v16  ;;  %v17248_v16 = vld [vmem:[#allocation74_spill] sm:$0xff] }
 0x130   : > { %17232 = vst [vmem:[#allocation62_spill] sm:$0xff] %v9928_v21  ;;  %v9934_v28 = vpop.permute.xlu0 %1201  ;;  %v1416_v21 = vrot.slane %v17238_v29, 2  ;;  %17240 = vst [vmem:[#allocation68_spill] sm:$0xff] %v9948_v59 }
 0x131   : > { %17235 = vst [vmem:[#allocation64_spill] sm:$0xff] %v9934_v28  ;;  %1544 = vrot.lane.b32.xlu1 %v9924_v39, %s8535_s29  ;;  %v1413_v28 = vrot.slane %v17241_v12, 2  ;;  %v17245_v39 = vld [vmem:[#allocation73_spill] sm:$0xff] }
 0x132   : > { %1542 = vrot.lane.b32.xlu0 %v9931_v22, %s8535_s29  ;;  %v9958_v13 = vsel %vm1297_vm1, %v1414_v50, %v1416_v21  ;;  %v17244_v22 = vld [vmem:[#allocation72_spill] sm:$0xff] }
 0x133   : > { %v9945_v20 = vpop.permute.xlu1 %1207  ;;  %17243 = vst [vmem:[#allocation159_spill] sm:$0xff] %v9958_v13  ;;  %v1419_v29 = vrot.slane %v17244_v22, 2  ;;  %v9965_v31 = vsel %vm1297_vm1, %v1413_v28, %v1414_v50  ;;  %v17255_v50 = vld [vmem:[#allocation79_spill] sm:$0xff] }
 0x134   : > { %17239 = vst [vmem:[#allocation67_spill] sm:$0xff] %v9945_v20  ;;  %v9951_v63 = vpop.permute.xlu0 %1205  ;;  %v1421_v20 = vrot.slane %v17245_v39, 2  ;;  %17247 = vst [vmem:[#allocation73_spill] sm:$0xff] %v9965_v31 }
 0x135   : > { %17242 = vst [vmem:[#allocation69_spill] sm:$0xff] %v9951_v63  ;;  %1548 = vrot.lane.b32.xlu1 %v9941_v4, %s8535_s29  ;;  %v1418_v63 = vrot.slane %v17248_v16, 2  ;;  %v17252_v4 = vld [vmem:[#allocation78_spill] sm:$0xff] }
 0x136   : > { %1546 = vrot.lane.b32.xlu0 %v9948_v59, %s8535_s29  ;;  %v9975_v21 = vsel %vm1297_vm1, %v1419_v29, %v1421_v20  ;;  %v17251_v59 = vld [vmem:[#allocation77_spill] sm:$0xff] }
 0x137   : > { %v9962_v47 = vpop.permute.xlu1 %1211  ;;  %17250 = vst [vmem:[#allocation160_spill] sm:$0xff] %v9975_v21  ;;  %v1424_v39 = vrot.slane %v17251_v59, 2  ;;  %v9982_v28 = vsel %vm1297_vm1, %v1418_v63, %v1419_v29  ;;  %v17262_v29 = vld [vmem:[#allocation84_spill] sm:$0xff] }
 0x138   : > { %17246 = vst [vmem:[#allocation72_spill] sm:$0xff] %v9962_v47  ;;  %v9968_v17 = vpop.permute.xlu0 %1209  ;;  %v1426_v47 = vrot.slane %v17252_v4, 2  ;;  %17254 = vst [vmem:[#allocation78_spill] sm:$0xff] %v9982_v28 }
 0x139   : > { %17249 = vst [vmem:[#allocation74_spill] sm:$0xff] %v9968_v17  ;;  %1552 = vrot.lane.b32.xlu1 %v9958_v13, %s8535_s29  ;;  %v1423_v17 = vrot.slane %v17255_v50, 2  ;;  %v17259_v13 = vld [vmem:[#allocation83_spill] sm:$0xff] }
 0x13a   : > { %1550 = vrot.lane.b32.xlu0 %v9965_v31, %s8535_s29  ;;  %v9992_v20 = vsel %vm1297_vm1, %v1424_v39, %v1426_v47  ;;  %v17258_v31 = vld [vmem:[#allocation82_spill] sm:$0xff] }
 0x13b   : > { %v9979_v30 = vpop.permute.xlu1 %1215  ;;  %17257 = vst [vmem:[#allocation161_spill] sm:$0xff] %v9992_v20  ;;  %v1429_v4 = vrot.slane %v17258_v31, 2  ;;  %v9999_v63 = vsel %vm1297_vm1, %v1423_v17, %v1424_v39  ;;  %v17269_v39 = vld [vmem:[#allocation89_spill] sm:$0xff] }
 0x13c   : > { %17253 = vst [vmem:[#allocation77_spill] sm:$0xff] %v9979_v30  ;;  %v9985_v0 = vpop.permute.xlu0 %1213  ;;  %v1431_v30 = vrot.slane %v17259_v13, 2  ;;  %17261 = vst [vmem:[#allocation83_spill] sm:$0xff] %v9999_v63 }
 0x13d   : > { %17256 = vst [vmem:[#allocation79_spill] sm:$0xff] %v9985_v0  ;;  %1556 = vrot.lane.b32.xlu1 %v9975_v21, %s8535_s29  ;;  %v1428_v0 = vrot.slane %v17262_v29, 2  ;;  %v17266_v21 = vld [vmem:[#allocation88_spill] sm:$0xff] }
 0x13e   : > { %1554 = vrot.lane.b32.xlu0 %v9982_v28, %s8535_s29  ;;  %v10009_v47 = vsel %vm1297_vm1, %v1429_v4, %v1431_v30  ;;  %v17265_v28 = vld [vmem:[#allocation87_spill] sm:$0xff] }
 0x13f   : > { %v9996_v41 = vpop.permute.xlu1 %1219  ;;  %17264 = vst [vmem:[#allocation162_spill] sm:$0xff] %v10009_v47  ;;  %v1434_v13 = vrot.slane %v17265_v28, 2  ;;  %v10016_v17 = vsel %vm1297_vm1, %v1428_v0, %v1429_v4  ;;  %v17276_v4 = vld [vmem:[#allocation94_spill] sm:$0xff] }
 0x140   : > { %17260 = vst [vmem:[#allocation82_spill] sm:$0xff] %v9996_v41  ;;  %v10002_v6 = vpop.permute.xlu0 %1217  ;;  %v1436_v41 = vrot.slane %v17266_v21, 2  ;;  %17268 = vst [vmem:[#allocation88_spill] sm:$0xff] %v10016_v17 }
 0x141   : > { %17263 = vst [vmem:[#allocation84_spill] sm:$0xff] %v10002_v6  ;;  %1560 = vrot.lane.b32.xlu1 %v9992_v20, %s8535_s29  ;;  %v1433_v6 = vrot.slane %v17269_v39, 2  ;;  %v17273_v20 = vld [vmem:[#allocation93_spill] sm:$0xff] }
 0x142   : > { %1558 = vrot.lane.b32.xlu0 %v9999_v63, %s8535_s29  ;;  %v10026_v30 = vsel %vm1297_vm1, %v1434_v13, %v1436_v41  ;;  %v17272_v63 = vld [vmem:[#allocation92_spill] sm:$0xff] }
 0x143   : > { %v10013_v9 = vpop.permute.xlu1 %1223  ;;  %17271 = vst [vmem:[#allocation163_spill] sm:$0xff] %v10026_v30  ;;  %v1439_v21 = vrot.slane %v17272_v63, 2  ;;  %v10033_v0 = vsel %vm1297_vm1, %v1433_v6, %v1434_v13  ;;  %v17283_v13 = vld [vmem:[#allocation99_spill] sm:$0xff] }
 0x144   : > { %17267 = vst [vmem:[#allocation87_spill] sm:$0xff] %v10013_v9  ;;  %v10019_v33 = vpop.permute.xlu0 %1221  ;;  %v1441_v9 = vrot.slane %v17273_v20, 2  ;;  %17275 = vst [vmem:[#allocation93_spill] sm:$0xff] %v10033_v0 }
 0x145   : > { %17270 = vst [vmem:[#allocation89_spill] sm:$0xff] %v10019_v33  ;;  %1564 = vrot.lane.b32.xlu1 %v10009_v47, %s8535_s29  ;;  %v1438_v33 = vrot.slane %v17276_v4, 2  ;;  %v17280_v47 = vld [vmem:[#allocation98_spill] sm:$0xff] }
 0x146   : > { %1562 = vrot.lane.b32.xlu0 %v10016_v17, %s8535_s29  ;;  %v10043_v41 = vsel %vm1297_vm1, %v1439_v21, %v1441_v9  ;;  %v17279_v17 = vld [vmem:[#allocation97_spill] sm:$0xff] }
 0x147   : > { %v10030_v38 = vpop.permute.xlu1 %1227  ;;  %17278 = vst [vmem:[#allocation164_spill] sm:$0xff] %v10043_v41  ;;  %v1444_v20 = vrot.slane %v17279_v17, 2  ;;  %v10050_v6 = vsel %vm1297_vm1, %v1438_v33, %v1439_v21  ;;  %v17289_v21 = vld [vmem:[#allocation103_spill] sm:$0xff] }
 0x148   : > { %17274 = vst [vmem:[#allocation92_spill] sm:$0xff] %v10030_v38  ;;  %v10036_v14 = vpop.permute.xlu0 %1225  ;;  %v1446_v38 = vrot.slane %v17280_v47, 2  ;;  %17282 = vst [vmem:[#allocation98_spill] sm:$0xff] %v10050_v6  ;;  %v1449_v47 = vrot.slane %v9506_v37, 2 }
 0x149   : > { %17277 = vst [vmem:[#allocation94_spill] sm:$0xff] %v10036_v14  ;;  %1568 = vrot.lane.b32.xlu1 %v10026_v30, %s8535_s29  ;;  %v1443_v14 = vrot.slane %v17283_v13, 2 }
 0x14a   : > { %1566 = vrot.lane.b32.xlu0 %v10033_v0, %s8535_s29  ;;  %v10060_v9 = vsel %vm1297_vm1, %v1444_v20, %v1446_v38  ;;  %v17286_v0 = vld [vmem:[#allocation102_spill] sm:$0xff] }
 0x14b   : > { %v10047_v15 = vpop.permute.xlu1 %1231  ;;  %17285 = vst [vmem:[#allocation165_spill] sm:$0xff] %v10060_v9  ;;  %v10067_v33 = vsel %vm1297_vm1, %v1443_v14, %v1444_v20 }
 0x14c   : > { %17281 = vst [vmem:[#allocation97_spill] sm:$0xff] %v10047_v15  ;;  %v10053_v60 = vpop.permute.xlu0 %1229  ;;  %v1451_v15 = vrot.slane %v17286_v0, 2  ;;  %17288 = vst [vmem:[#allocation166_spill] sm:$0xff] %v10067_v33  ;;  %v1454_v0 = vrot.slane %v9530_v5, 2 }
 0x14d   : > { %17284 = vst [vmem:[#allocation99_spill] sm:$0xff] %v10053_v60  ;;  %1572 = vrot.lane.b32.xlu1 %v10043_v41, %s8535_s29  ;;  %v1448_v60 = vrot.slane %v17289_v21, 2 }
 0x14e   : > { %1570 = vrot.lane.b32.xlu0 %v10050_v6, %s8535_s29  ;;  %v10077_v38 = vsel %vm1297_vm1, %v1449_v47, %v1451_v15 }
 0x14f   : > { %v10064_v30 = vpop.permute.xlu1 %1460  ;;  %17291 = vst [vmem:[#allocation167_spill] sm:$0xff] %v10077_v38  ;;  %v10084_v20 = vsel %vm1297_vm1, %v1448_v60, %v1449_v47 }
 0x150   : > { %17287 = vst [vmem:[#allocation102_spill] sm:$0xff] %v10064_v30  ;;  %v10070_v62 = vpop.permute.xlu0 %1458  ;;  %v1456_v30 = vrot.slane %v9533_v8, 2  ;;  %17293 = vst [vmem:[#allocation169_spill] sm:$0xff] %v10084_v20 }
 0x151   : > { %17290 = vst [vmem:[#allocation103_spill] sm:$0xff] %v10070_v62  ;;  %1576 = vrot.lane.b32.xlu1 %v10060_v9, %s8535_s29  ;;  %v1453_v62 = vrot.slane %v9538_v56, 2 }
 0x152   : > { %1574 = vrot.lane.b32.xlu0 %v10067_v33, %s8535_s29  ;;  %v10094_v15 = vsel %vm1297_vm1, %v1454_v0, %v1456_v30  ;;  %v8344_v30 = vld [vmem:[%s8869_s22 + $0x20] sm:$0xff] }
 0x153   : > { %v10081_v14 = vpop.permute.xlu1 %1464  ;;  %17295 = vst [vmem:[#allocation171_spill] sm:$0xff] %v10094_v15  ;;  %v10099_v60 = vsel %vm1297_vm1, %v1453_v62, %v1454_v0  ;;  %v8345_v62 = vld [vmem:[%s8869_s22 + $0x18] sm:$0xff] }
 0x154   : > { %17292 = vst [vmem:[#allocation168_spill] sm:$0xff] %v10081_v14  ;;  %v10087_v9 = vpop.permute.xlu0 %1462  ;;  %17297 = vst [vmem:[#allocation173_spill] sm:$0xff] %v10099_v60 }
 0x155   : > { %17294 = vst [vmem:[#allocation170_spill] sm:$0xff] %v10087_v9  ;;  %1580 = vrot.lane.b32.xlu1 %v10077_v38, %s8535_s29 }
 0x156   : > { %1578 = vrot.lane.b32.xlu0 %v10084_v20, %s8535_s29  ;;  %v10343_v20 = vld [vmem:[%s8869_s22 + $0x1e0] sm:$0xff] }
 0x157   : > { %v10096_v8 = vpop.permute.xlu1 %1468 }
 0x158   : > { %17296 = vst [vmem:[#allocation172_spill] sm:$0xff] %v10096_v8  ;;  %v10101_v47 = vpop.permute.xlu0 %1466  ;;  %v10120_v8 = vld [vmem:[%s8869_s22 + $0x38] sm:$0xff] }
 0x159   : > { %17298 = vst [vmem:[#allocation174_spill] sm:$0xff] %v10101_v47  ;;  %1584 = vrot.lane.b32.xlu1 %v10094_v15, %s8535_s29  ;;  %17303 = vst [vmem:[#allocation179_spill] sm:$0xff] %v10120_v8 }
 0x15a   : > { %1582 = vrot.lane.b32.xlu0 %v10099_v60, %s8535_s29  ;;  %v8375_v60 = vld [vmem:[%s8869_s22 + $0x1c8] sm:$0xff] }
 0x15b   : > { %v10107_v9 = vpop.permute.xlu1 %1472 }
 0x15c   : > { %17299 = vst [vmem:[#allocation175_spill] sm:$0xff] %v10107_v9  ;;  %v10109_v14 = vpop.permute.xlu0 %1470 }
 0x15d   : > { %17300 = vst [vmem:[#allocation176_spill] sm:$0xff] %v10109_v14  ;;  %1656 = vrot.lane.b32.xlu1 %v8344_v30, %s8536_s8  ;;  %v10125_v14 = vld [vmem:[%s8869_s22 + $0x30] sm:$0xff] }
 0x15e   : > { %1654 = vrot.lane.b32.xlu0 %v8345_v62, %s8536_s8  ;;  %17304 = vst [vmem:[#allocation180_spill] sm:$0xff] %v10125_v14 }
 0x15f   : > { %v10115_v0 = vpop.permute.xlu1 %1476 }
 0x160   : > { %17301 = vst [vmem:[#allocation177_spill] sm:$0xff] %v10115_v0  ;;  %v10117_v47 = vpop.permute.xlu0 %1474  ;;  %v10134_v0 = vld [vmem:[%s8869_s22 + $0x50] sm:$0xff] }
 0x161   : > { %17302 = vst [vmem:[#allocation178_spill] sm:$0xff] %v10117_v47  ;;  %1660 = vrot.lane.b32.xlu1 %v10120_v8, %s8536_s8  ;;  %17307 = vst [vmem:[#allocation183_spill] sm:$0xff] %v10134_v0  ;;  %v10139_v47 = vld [vmem:[%s8869_s22 + $0x48] sm:$0xff] }
 0x162   : > { %1658 = vrot.lane.b32.xlu0 %v10125_v14, %s8536_s8  ;;  %17308 = vst [vmem:[#allocation184_spill] sm:$0xff] %v10139_v47 }
 0x163   : > { %v10129_v30 = vpop.permute.xlu1 %1480 }
 0x164   : > { %17305 = vst [vmem:[#allocation181_spill] sm:$0xff] %v10129_v30  ;;  %v10131_v62 = vpop.permute.xlu0 %1478  ;;  %v10148_v30 = vld [vmem:[%s8869_s22 + $0x68] sm:$0xff] }
 0x165   : > { %17306 = vst [vmem:[#allocation182_spill] sm:$0xff] %v10131_v62  ;;  %1664 = vrot.lane.b32.xlu1 %v10134_v0, %s8536_s8  ;;  %17311 = vst [vmem:[#allocation187_spill] sm:$0xff] %v10148_v30  ;;  %v10153_v62 = vld [vmem:[%s8869_s22 + $0x60] sm:$0xff] }
 0x166   : > { %1662 = vrot.lane.b32.xlu0 %v10139_v47, %s8536_s8  ;;  %17312 = vst [vmem:[#allocation188_spill] sm:$0xff] %v10153_v62 }
 0x167   : > { %v10143_v9 = vpop.permute.xlu1 %1484 }
 0x168   : > { %17309 = vst [vmem:[#allocation185_spill] sm:$0xff] %v10143_v9  ;;  %v10145_v14 = vpop.permute.xlu0 %1482  ;;  %v10162_v9 = vld [vmem:[%s8869_s22 + $0x80] sm:$0xff] }
 0x169   : > { %17310 = vst [vmem:[#allocation186_spill] sm:$0xff] %v10145_v14  ;;  %1668 = vrot.lane.b32.xlu1 %v10148_v30, %s8536_s8  ;;  %17315 = vst [vmem:[#allocation191_spill] sm:$0xff] %v10162_v9  ;;  %v10167_v14 = vld [vmem:[%s8869_s22 + $0x78] sm:$0xff] }
 0x16a   : > { %1666 = vrot.lane.b32.xlu0 %v10153_v62, %s8536_s8  ;;  %17316 = vst [vmem:[#allocation192_spill] sm:$0xff] %v10167_v14 }
 0x16b   : > { %v10157_v0 = vpop.permute.xlu1 %1488 }
 0x16c   : > { %17313 = vst [vmem:[#allocation189_spill] sm:$0xff] %v10157_v0  ;;  %v10159_v47 = vpop.permute.xlu0 %1486  ;;  %v10176_v0 = vld [vmem:[%s8869_s22 + $0x98] sm:$0xff] }
 0x16d   : > { %17314 = vst [vmem:[#allocation190_spill] sm:$0xff] %v10159_v47  ;;  %1672 = vrot.lane.b32.xlu1 %v10162_v9, %s8536_s8  ;;  %17319 = vst [vmem:[#allocation195_spill] sm:$0xff] %v10176_v0  ;;  %v10181_v47 = vld [vmem:[%s8869_s22 + $0x90] sm:$0xff] }
 0x16e   : > { %1670 = vrot.lane.b32.xlu0 %v10167_v14, %s8536_s8  ;;  %17320 = vst [vmem:[#allocation196_spill] sm:$0xff] %v10181_v47 }
 0x16f   : > { %v10171_v30 = vpop.permute.xlu1 %1492 }
 0x170   : > { %17317 = vst [vmem:[#allocation193_spill] sm:$0xff] %v10171_v30  ;;  %v10173_v62 = vpop.permute.xlu0 %1490  ;;  %v10190_v30 = vld [vmem:[%s8869_s22 + $0xb0] sm:$0xff] }
 0x171   : > { %17318 = vst [vmem:[#allocation194_spill] sm:$0xff] %v10173_v62  ;;  %1676 = vrot.lane.b32.xlu1 %v10176_v0, %s8536_s8  ;;  %17323 = vst [vmem:[#allocation199_spill] sm:$0xff] %v10190_v30  ;;  %v10195_v62 = vld [vmem:[%s8869_s22 + $0xa8] sm:$0xff] }
 0x172   : > { %1674 = vrot.lane.b32.xlu0 %v10181_v47, %s8536_s8  ;;  %17324 = vst [vmem:[#allocation200_spill] sm:$0xff] %v10195_v62 }
 0x173   : > { %v10185_v9 = vpop.permute.xlu1 %1496 }
 0x174   : > { %17321 = vst [vmem:[#allocation197_spill] sm:$0xff] %v10185_v9  ;;  %v10187_v14 = vpop.permute.xlu0 %1494  ;;  %v10204_v9 = vld [vmem:[%s8869_s22 + $0xc8] sm:$0xff] }
 0x175   : > { %17322 = vst [vmem:[#allocation198_spill] sm:$0xff] %v10187_v14  ;;  %1680 = vrot.lane.b32.xlu1 %v10190_v30, %s8536_s8  ;;  %17327 = vst [vmem:[#allocation203_spill] sm:$0xff] %v10204_v9  ;;  %v10209_v14 = vld [vmem:[%s8869_s22 + $0xc0] sm:$0xff] }
 0x176   : > { %1678 = vrot.lane.b32.xlu0 %v10195_v62, %s8536_s8  ;;  %17328 = vst [vmem:[#allocation204_spill] sm:$0xff] %v10209_v14 }
 0x177   : > { %v10199_v0 = vpop.permute.xlu1 %1500 }
 0x178   : > { %17325 = vst [vmem:[#allocation201_spill] sm:$0xff] %v10199_v0  ;;  %v10201_v47 = vpop.permute.xlu0 %1498  ;;  %v10218_v0 = vld [vmem:[%s8869_s22 + $0xe0] sm:$0xff] }
 0x179   : > { %17326 = vst [vmem:[#allocation202_spill] sm:$0xff] %v10201_v47  ;;  %1684 = vrot.lane.b32.xlu1 %v10204_v9, %s8536_s8  ;;  %17331 = vst [vmem:[#allocation207_spill] sm:$0xff] %v10218_v0  ;;  %v10223_v47 = vld [vmem:[%s8869_s22 + $0xd8] sm:$0xff] }
 0x17a   : > { %1682 = vrot.lane.b32.xlu0 %v10209_v14, %s8536_s8  ;;  %17332 = vst [vmem:[#allocation208_spill] sm:$0xff] %v10223_v47 }
 0x17b   : > { %v10213_v30 = vpop.permute.xlu1 %1504 }
 0x17c   : > { %17329 = vst [vmem:[#allocation205_spill] sm:$0xff] %v10213_v30  ;;  %v10215_v62 = vpop.permute.xlu0 %1502  ;;  %v10232_v30 = vld [vmem:[%s8869_s22 + $0xf8] sm:$0xff] }
 0x17d   : > { %17330 = vst [vmem:[#allocation206_spill] sm:$0xff] %v10215_v62  ;;  %1688 = vrot.lane.b32.xlu1 %v10218_v0, %s8536_s8  ;;  %17335 = vst [vmem:[#allocation211_spill] sm:$0xff] %v10232_v30  ;;  %v10237_v62 = vld [vmem:[%s8869_s22 + $0xf0] sm:$0xff] }
 0x17e   : > { %1686 = vrot.lane.b32.xlu0 %v10223_v47, %s8536_s8  ;;  %17336 = vst [vmem:[#allocation212_spill] sm:$0xff] %v10237_v62 }
 0x17f   : > { %v10227_v9 = vpop.permute.xlu1 %1508 }
 0x180   : > { %17333 = vst [vmem:[#allocation209_spill] sm:$0xff] %v10227_v9  ;;  %v10229_v14 = vpop.permute.xlu0 %1506  ;;  %v10246_v9 = vld [vmem:[%s8869_s22 + $0x110] sm:$0xff] }
 0x181   : > { %17334 = vst [vmem:[#allocation210_spill] sm:$0xff] %v10229_v14  ;;  %1692 = vrot.lane.b32.xlu1 %v10232_v30, %s8536_s8  ;;  %17339 = vst [vmem:[#allocation215_spill] sm:$0xff] %v10246_v9  ;;  %v10251_v14 = vld [vmem:[%s8869_s22 + $0x108] sm:$0xff] }
 0x182   : > { %1690 = vrot.lane.b32.xlu0 %v10237_v62, %s8536_s8  ;;  %17340 = vst [vmem:[#allocation216_spill] sm:$0xff] %v10251_v14 }
 0x183   : > { %v10241_v0 = vpop.permute.xlu1 %1512 }
 0x184   : > { %17337 = vst [vmem:[#allocation213_spill] sm:$0xff] %v10241_v0  ;;  %v10243_v47 = vpop.permute.xlu0 %1510  ;;  %v10260_v0 = vld [vmem:[%s8869_s22 + $0x128] sm:$0xff] }
 0x185   : > { %17338 = vst [vmem:[#allocation214_spill] sm:$0xff] %v10243_v47  ;;  %1696 = vrot.lane.b32.xlu1 %v10246_v9, %s8536_s8  ;;  %17343 = vst [vmem:[#allocation219_spill] sm:$0xff] %v10260_v0  ;;  %v10265_v47 = vld [vmem:[%s8869_s22 + $0x120] sm:$0xff] }
 0x186   : > { %1694 = vrot.lane.b32.xlu0 %v10251_v14, %s8536_s8  ;;  %17344 = vst [vmem:[#allocation220_spill] sm:$0xff] %v10265_v47 }
 0x187   : > { %v10255_v30 = vpop.permute.xlu1 %1516 }
 0x188   : > { %17341 = vst [vmem:[#allocation217_spill] sm:$0xff] %v10255_v30  ;;  %v10257_v62 = vpop.permute.xlu0 %1514  ;;  %v10274_v30 = vld [vmem:[%s8869_s22 + $0x140] sm:$0xff] }
 0x189   : > { %17342 = vst [vmem:[#allocation218_spill] sm:$0xff] %v10257_v62  ;;  %1700 = vrot.lane.b32.xlu1 %v10260_v0, %s8536_s8  ;;  %17347 = vst [vmem:[#allocation223_spill] sm:$0xff] %v10274_v30  ;;  %v10279_v62 = vld [vmem:[%s8869_s22 + $0x138] sm:$0xff] }
 0x18a   : > { %1698 = vrot.lane.b32.xlu0 %v10265_v47, %s8536_s8  ;;  %17348 = vst [vmem:[#allocation224_spill] sm:$0xff] %v10279_v62 }
 0x18b   : > { %v10269_v9 = vpop.permute.xlu1 %1520 }
 0x18c   : > { %17345 = vst [vmem:[#allocation221_spill] sm:$0xff] %v10269_v9  ;;  %v10271_v14 = vpop.permute.xlu0 %1518  ;;  %v10288_v9 = vld [vmem:[%s8869_s22 + $0x158] sm:$0xff] }
 0x18d   : > { %17346 = vst [vmem:[#allocation222_spill] sm:$0xff] %v10271_v14  ;;  %1704 = vrot.lane.b32.xlu1 %v10274_v30, %s8536_s8  ;;  %17351 = vst [vmem:[#allocation227_spill] sm:$0xff] %v10288_v9  ;;  %v10293_v14 = vld [vmem:[%s8869_s22 + $0x150] sm:$0xff] }
 0x18e   : > { %1702 = vrot.lane.b32.xlu0 %v10279_v62, %s8536_s8  ;;  %17352 = vst [vmem:[#allocation228_spill] sm:$0xff] %v10293_v14  ;;  %v10302_v62 = vld [vmem:[%s8869_s22 + $0x170] sm:$0xff] }
 0x18f   : > { %v10283_v0 = vpop.permute.xlu1 %1524  ;;  %17355 = vst [vmem:[#allocation231_spill] sm:$0xff] %v10302_v62 }
 0x190   : > { %17349 = vst [vmem:[#allocation225_spill] sm:$0xff] %v10283_v0  ;;  %v10285_v47 = vpop.permute.xlu0 %1522  ;;  %v10312_v0 = vld [vmem:[%s8869_s22 + $0x188] sm:$0xff] }
 0x191   : > { %17350 = vst [vmem:[#allocation226_spill] sm:$0xff] %v10285_v47  ;;  %1708 = vrot.lane.b32.xlu1 %v10288_v9, %s8536_s8  ;;  %v10307_v47 = vld [vmem:[%s8869_s22 + $0x168] sm:$0xff] }
 0x192   : > { %1706 = vrot.lane.b32.xlu0 %v10293_v14, %s8536_s8  ;;  %17356 = vst [vmem:[#allocation232_spill] sm:$0xff] %v10307_v47 }
 0x193   : > { %v10297_v30 = vpop.permute.xlu1 %1528 }
 0x194   : > { %17353 = vst [vmem:[#allocation229_spill] sm:$0xff] %v10297_v30  ;;  %v10299_v8 = vpop.permute.xlu0 %1526  ;;  %v10317_v30 = vld [vmem:[%s8869_s22 + $0x180] sm:$0xff] }
 0x195   : > { %17354 = vst [vmem:[#allocation230_spill] sm:$0xff] %v10299_v8  ;;  %1712 = vrot.lane.b32.xlu1 %v10302_v62, %s8536_s8 }
 0x196   : > { %1710 = vrot.lane.b32.xlu0 %v10307_v47, %s8536_s8  ;;  %v8374_v47 = vld [vmem:[%s8869_s22 + $0x1d0] sm:$0xff] }
 0x197   : > { %v10314_v14 = vpop.permute.xlu1 %1532 }
 0x198   : > { %17357 = vst [vmem:[#allocation233_spill] sm:$0xff] %v10314_v14  ;;  %v10319_v9 = vpop.permute.xlu0 %1530 }
 0x199   : > { %17358 = vst [vmem:[#allocation234_spill] sm:$0xff] %v10319_v9  ;;  %1716 = vrot.lane.b32.xlu1 %v10312_v0, %s8536_s8  ;;  %v10338_v9 = vld [vmem:[%s8869_s22 + $0x1e8] sm:$0xff] }
 0x19a   : > { %1714 = vrot.lane.b32.xlu0 %v10317_v30, %s8536_s8 }
 0x19b   : > { %v10325_v8 = vpop.permute.xlu1 %1536 }
 0x19c   : > { %17359 = vst [vmem:[#allocation235_spill] sm:$0xff] %v10325_v8  ;;  %v10327_v62 = vpop.permute.xlu0 %1534 }
 0x19d   : > { %17360 = vst [vmem:[#allocation236_spill] sm:$0xff] %v10327_v62  ;;  %1720 = vrot.lane.b32.xlu1 %v8374_v47, %s8536_s8 }
 0x19e   : > { %1718 = vrot.lane.b32.xlu0 %v8375_v60, %s8536_s8 }
 0x19f   : > { %v10333_v14 = vpop.permute.xlu1 %1540 }
 0x1a0   : > { %17361 = vst [vmem:[#allocation237_spill] sm:$0xff] %v10333_v14  ;;  %v10335_v15 = vpop.permute.xlu0 %1538 }
 0x1a1   : > { %17362 = vst [vmem:[#allocation238_spill] sm:$0xff] %v10335_v15  ;;  %1724 = vrot.lane.b32.xlu1 %v10338_v9, %s8536_s8 }
 0x1a2   : > { %1722 = vrot.lane.b32.xlu0 %v10343_v20, %s8536_s8 }
 0x1a3   : > { %v10347_v62 = vpop.permute.xlu1 %1544 }
 0x1a4   : > { %17363 = vst [vmem:[#allocation239_spill] sm:$0xff] %v10347_v62  ;;  %v10349_v47 = vpop.permute.xlu0 %1542 }
 0x1a5   : > { %17364 = vst [vmem:[#allocation240_spill] sm:$0xff] %v10349_v47  ;;  %1728 = vrot.lane.b32.xlu1 %v17209_v25, %s8536_s8 }
 0x1a6   : > { %1726 = vrot.lane.b32.xlu0 %v17213_v53, %s8536_s8 }
 0x1a7   : > { %v10355_v60 = vpop.permute.xlu1 %1548 }
 0x1a8   : > { %17365 = vst [vmem:[#allocation241_spill] sm:$0xff] %v10355_v60  ;;  %v10357_v15 = vpop.permute.xlu0 %1546  ;;  %v17414_v60 = vld [vmem:[#allocation17_spill] sm:$0xff] }
 0x1a9   : > { %17366 = vst [vmem:[#allocation242_spill] sm:$0xff] %v10357_v15  ;;  %1732 = vrot.lane.b32.xlu1 %v17216_v36, %s8536_s8  ;;  %v17413_v15 = vld [vmem:[#allocation16_spill] sm:$0xff] }
 0x1aa   : > { %1730 = vrot.lane.b32.xlu0 %v17220_v57, %s8536_s8 }
 0x1ab   : > { %v10363_v14 = vpop.permute.xlu1 %1552 }
 0x1ac   : > { %17367 = vst [vmem:[#allocation243_spill] sm:$0xff] %v10363_v14  ;;  %v10365_v62 = vpop.permute.xlu0 %1550 }
 0x1ad   : > { %17368 = vst [vmem:[#allocation244_spill] sm:$0xff] %v10365_v62  ;;  %1736 = vrot.lane.b32.xlu1 %v17223_v44, %s8536_s8 }
 0x1ae   : > { %1734 = vrot.lane.b32.xlu0 %v17227_v52, %s8536_s8 }
 0x1af   : > { %v10371_v25 = vpop.permute.xlu1 %1556 }
 0x1b0   : > { %17369 = vst [vmem:[#allocation245_spill] sm:$0xff] %v10371_v25  ;;  %v10373_v53 = vpop.permute.xlu0 %1554  ;;  %v17410_v25 = vld [vmem:[#allocation15_spill] sm:$0xff] }
 0x1b1   : > { %17370 = vst [vmem:[#allocation246_spill] sm:$0xff] %v10373_v53  ;;  %1740 = vrot.lane.b32.xlu1 %v17230_v32, %s8536_s8  ;;  %v17409_v53 = vld [vmem:[#allocation14_spill] sm:$0xff] }
 0x1b2   : > { %1738 = vrot.lane.b32.xlu0 %v17234_v51, %s8536_s8 }
 0x1b3   : > { %v10379_v36 = vpop.permute.xlu1 %1560 }
 0x1b4   : > { %17371 = vst [vmem:[#allocation247_spill] sm:$0xff] %v10379_v36  ;;  %v10381_v57 = vpop.permute.xlu0 %1558 }
 0x1b5   : > { %17372 = vst [vmem:[#allocation248_spill] sm:$0xff] %v10381_v57  ;;  %1744 = vrot.lane.b32.xlu1 %v17237_v40, %s8536_s8 }
 0x1b6   : > { %1742 = vrot.lane.b32.xlu0 %v17241_v12, %s8536_s8 }
 0x1b7   : > { %v10387_v44 = vpop.permute.xlu1 %1564 }
 0x1b8   : > { %17373 = vst [vmem:[#allocation249_spill] sm:$0xff] %v10387_v44  ;;  %v10389_v52 = vpop.permute.xlu0 %1562  ;;  %v17406_v44 = vld [vmem:[#allocation13_spill] sm:$0xff] }
 0x1b9   : > { %17374 = vst [vmem:[#allocation250_spill] sm:$0xff] %v10389_v52  ;;  %1748 = vrot.lane.b32.xlu1 %v17244_v22, %s8536_s8  ;;  %v17405_v52 = vld [vmem:[#allocation12_spill] sm:$0xff] }
 0x1ba   : > { %1746 = vrot.lane.b32.xlu0 %v17248_v16, %s8536_s8 }
 0x1bb   : > { %v10395_v32 = vpop.permute.xlu1 %1568 }
 0x1bc   : > { %17375 = vst [vmem:[#allocation251_spill] sm:$0xff] %v10395_v32  ;;  %v10397_v51 = vpop.permute.xlu0 %1566 }
 0x1bd   : > { %17376 = vst [vmem:[#allocation252_spill] sm:$0xff] %v10397_v51  ;;  %1752 = vrot.lane.b32.xlu1 %v17251_v59, %s8536_s8  ;;  %v17401_v51 = vld [vmem:[#allocation10_spill] sm:$0xff] }
 0x1be   : > { %1750 = vrot.lane.b32.xlu0 %v17255_v50, %s8536_s8 }
 0x1bf   : > { %v10403_v40 = vpop.permute.xlu1 %1572 }
 0x1c0   : > { %17377 = vst [vmem:[#allocation253_spill] sm:$0xff] %v10403_v40  ;;  %v10405_v12 = vpop.permute.xlu0 %1570 }
 0x1c1   : > { %17378 = vst [vmem:[#allocation254_spill] sm:$0xff] %v10405_v12  ;;  %1756 = vrot.lane.b32.xlu1 %v17258_v31, %s8536_s8 }
 0x1c2   : > { %1754 = vrot.lane.b32.xlu0 %v17262_v29, %s8536_s8 }
 0x1c3   : > { %v10411_v22 = vpop.permute.xlu1 %1576 }
 0x1c4   : > { %17379 = vst [vmem:[#allocation255_spill] sm:$0xff] %v10411_v22  ;;  %v10413_v16 = vpop.permute.xlu0 %1574  ;;  %v17398_v22 = vld [vmem:[#allocation9_spill] sm:$0xff] }
 0x1c5   : > { %17380 = vst [vmem:[#allocation256_spill] sm:$0xff] %v10413_v16  ;;  %1760 = vrot.lane.b32.xlu1 %v17265_v28, %s8536_s8  ;;  %v17397_v16 = vld [vmem:[#allocation8_spill] sm:$0xff] }
 0x1c6   : > { %1758 = vrot.lane.b32.xlu0 %v17269_v39, %s8536_s8 }
 0x1c7   : > { %v10419_v59 = vpop.permute.xlu1 %1580 }
 0x1c8   : > { %17381 = vst [vmem:[#allocation257_spill] sm:$0xff] %v10419_v59  ;;  %v10421_v50 = vpop.permute.xlu0 %1578 }
 0x1c9   : > { %17382 = vst [vmem:[#allocation258_spill] sm:$0xff] %v10421_v50  ;;  %1764 = vrot.lane.b32.xlu1 %v17272_v63, %s8536_s8 }
 0x1ca   : > { %1762 = vrot.lane.b32.xlu0 %v17276_v4, %s8536_s8 }
 0x1cb   : > { %v10427_v31 = vpop.permute.xlu1 %1584 }
 0x1cc   : > { %17383 = vst [vmem:[#allocation259_spill] sm:$0xff] %v10427_v31  ;;  %v10429_v29 = vpop.permute.xlu0 %1582  ;;  %v17394_v31 = vld [vmem:[#allocation6_spill] sm:$0xff] }
 0x1cd   : > { %17384 = vst [vmem:[#allocation260_spill] sm:$0xff] %v10429_v29  ;;  %1768 = vrot.lane.b32.xlu1 %v17279_v17, %s8536_s8  ;;  %v10452_v17 = vld [vmem:[%s8869_s22 + $0x338] sm:$0xff]  ;;  %v10457_v29 = vld [vmem:[%s8869_s22 + $0x330] sm:$0xff] }
 0x1ce   : > { %1766 = vrot.lane.b32.xlu0 %v17283_v13, %s8536_s8 }
 0x1cf   : > { %v10435_v28 = vpop.permute.xlu1 %1656 }
 0x1d0   : > { %17385 = vst [vmem:[#allocation261_spill] sm:$0xff] %v10435_v28  ;;  %v10437_v39 = vpop.permute.xlu0 %1654  ;;  %v17445_v28 = vld [vmem:[#allocation32_spill] sm:$0xff] }
 0x1d1   : > { %17386 = vst [vmem:[#allocation262_spill] sm:$0xff] %v10437_v39  ;;  %1772 = vrot.lane.b32.xlu1 %v9506_v37, %s8536_s8 }
 0x1d2   : > { %1770 = vrot.lane.b32.xlu0 %v17289_v21, %s8536_s8 }
 0x1d3   : > { %v10443_v63 = vpop.permute.xlu1 %1660 }
 0x1d4   : > { %17387 = vst [vmem:[#allocation263_spill] sm:$0xff] %v10443_v63  ;;  %v10445_v4 = vpop.permute.xlu0 %1658  ;;  %v17442_v63 = vld [vmem:[#allocation31_spill] sm:$0xff] }
 0x1d5   : > { %17388 = vst [vmem:[#allocation264_spill] sm:$0xff] %v10445_v4  ;;  %1776 = vrot.lane.b32.xlu1 %v9530_v5, %s8536_s8 }
 0x1d6   : > { %1774 = vrot.lane.b32.xlu0 %v9538_v56, %s8536_s8  ;;  %v17393_v56 = vld [vmem:[#allocation7_spill] sm:$0xff] }
 0x1d7   : > { %v10454_v13 = vpop.permute.xlu1 %1664 }
 0x1d8   : > { %17389 = vst [vmem:[#allocation265_spill] sm:$0xff] %v10454_v13  ;;  %v10459_v37 = vpop.permute.xlu0 %1662  ;;  %v17438_v13 = vld [vmem:[#allocation29_spill] sm:$0xff] }
 0x1d9   : > { %17390 = vst [vmem:[#allocation266_spill] sm:$0xff] %v10459_v37  ;;  %1780 = vrot.lane.b32.xlu1 %v10452_v17, %s8536_s8  ;;  %v17437_v37 = vld [vmem:[#allocation28_spill] sm:$0xff] }
 0x1da   : > { %1778 = vrot.lane.b32.xlu0 %v10457_v29, %s8536_s8  ;;  %s739_s8 = scalar_lea.vmem [#allocation3], %s8866_s20 }
 0x1db   : > { %v10465_v21 = vpop.permute.xlu1 %1668  ;;  %s7672_s16 = sshll.u32 %s739_s8, 4  ;;  %s7673_s16 = int_to_ptr.vmem [resolvable:$true] %s7672_s16 }
 0x1dc   : > { %17391 = vst [vmem:[#allocation267_spill] sm:$0xff] %v10465_v21  ;;  %v10467_v5 = vpop.permute.xlu0 %1666  ;;  %v17434_v21 = vld [vmem:[#allocation27_spill] sm:$0xff] }
 0x1dd   : > { %17392 = vst [vmem:[#allocation268_spill] sm:$0xff] %v10467_v5  ;;  %1860 = vrot.lane.b32.xlu1 %v17393_v56, %s8537_s9  ;;  %v17402_v56 = vld [vmem:[#allocation11_spill] sm:$0xff]  ;;  %v17433_v5 = vld [vmem:[#allocation26_spill] sm:$0xff] }
 0x1de   : > { %1858 = vrot.lane.b32.xlu0 %v17394_v31, %s8537_s9 }
 0x1df   : > { %v10473_v50 = vpop.permute.xlu1 %1672 }
 0x1e0   : > { %17395 = vst [vmem:[#allocation7_spill] sm:$0xff] %v10473_v50  ;;  %v10475_v59 = vpop.permute.xlu0 %1670  ;;  %v17430_v50 = vld [vmem:[#allocation25_spill] sm:$0xff] }
 0x1e1   : > { %17396 = vst [vmem:[#allocation6_spill] sm:$0xff] %v10475_v59  ;;  %1864 = vrot.lane.b32.xlu1 %v17397_v16, %s8537_s9 }
 0x1e2   : > { %1862 = vrot.lane.b32.xlu0 %v17398_v22, %s8537_s9 }
 0x1e3   : > { %v10481_v12 = vpop.permute.xlu1 %1676 }
 0x1e4   : > { %17399 = vst [vmem:[#allocation8_spill] sm:$0xff] %v10481_v12  ;;  %v10483_v40 = vpop.permute.xlu0 %1674  ;;  %v17426_v12 = vld [vmem:[#allocation23_spill] sm:$0xff] }
 0x1e5   : > { %17400 = vst [vmem:[#allocation9_spill] sm:$0xff] %v10483_v40  ;;  %1868 = vrot.lane.b32.xlu1 %v17401_v51, %s8537_s9 }
 0x1e6   : > { %1866 = vrot.lane.b32.xlu0 %v17402_v56, %s8537_s9 }
 0x1e7   : > { %v10489_v31 = vpop.permute.xlu1 %1680 }
 0x1e8   : > { %17403 = vst [vmem:[#allocation10_spill] sm:$0xff] %v10489_v31  ;;  %v10491_v32 = vpop.permute.xlu0 %1678  ;;  %v17422_v31 = vld [vmem:[#allocation21_spill] sm:$0xff] }
 0x1e9   : > { %17404 = vst [vmem:[#allocation11_spill] sm:$0xff] %v10491_v32  ;;  %1872 = vrot.lane.b32.xlu1 %v17405_v52, %s8537_s9 }
 0x1ea   : > { %1870 = vrot.lane.b32.xlu0 %v17406_v44, %s8537_s9 }
 0x1eb   : > { %v10497_v57 = vpop.permute.xlu1 %1684 }
 0x1ec   : > { %17407 = vst [vmem:[#allocation12_spill] sm:$0xff] %v10497_v57  ;;  %v10499_v36 = vpop.permute.xlu0 %1682  ;;  %v17418_v57 = vld [vmem:[#allocation19_spill] sm:$0xff] }
 0x1ed   : > { %17408 = vst [vmem:[#allocation13_spill] sm:$0xff] %v10499_v36  ;;  %1876 = vrot.lane.b32.xlu1 %v17409_v53, %s8537_s9  ;;  %v17417_v36 = vld [vmem:[#allocation18_spill] sm:$0xff] }
 0x1ee   : > { %1874 = vrot.lane.b32.xlu0 %v17410_v25, %s8537_s9 }
 0x1ef   : > { %v10505_v62 = vpop.permute.xlu1 %1688 }
 0x1f0   : > { %17411 = vst [vmem:[#allocation14_spill] sm:$0xff] %v10505_v62  ;;  %v10507_v14 = vpop.permute.xlu0 %1686 }
 0x1f1   : > { %17412 = vst [vmem:[#allocation15_spill] sm:$0xff] %v10507_v14  ;;  %1880 = vrot.lane.b32.xlu1 %v17413_v15, %s8537_s9  ;;  %v17421_v14 = vld [vmem:[#allocation20_spill] sm:$0xff] }
 0x1f2   : > { %1878 = vrot.lane.b32.xlu0 %v17414_v60, %s8537_s9 }
 0x1f3   : > { %v10513_v47 = vpop.permute.xlu1 %1692 }
 0x1f4   : > { %17415 = vst [vmem:[#allocation16_spill] sm:$0xff] %v10513_v47  ;;  %v10515_v8 = vpop.permute.xlu0 %1690 }
 0x1f5   : > { %17416 = vst [vmem:[#allocation17_spill] sm:$0xff] %v10515_v8  ;;  %1884 = vrot.lane.b32.xlu1 %v17417_v36, %s8537_s9  ;;  %v17425_v8 = vld [vmem:[#allocation22_spill] sm:$0xff] }
 0x1f6   : > { %1882 = vrot.lane.b32.xlu0 %v17418_v57, %s8537_s9 }
 0x1f7   : > { %v10521_v32 = vpop.permute.xlu1 %1696 }
 0x1f8   : > { %17419 = vst [vmem:[#allocation18_spill] sm:$0xff] %v10521_v32  ;;  %v10523_v62 = vpop.permute.xlu0 %1694 }
 0x1f9   : > { %17420 = vst [vmem:[#allocation19_spill] sm:$0xff] %v10523_v62  ;;  %1888 = vrot.lane.b32.xlu1 %v17421_v14, %s8537_s9  ;;  %v17429_v62 = vld [vmem:[#allocation24_spill] sm:$0xff] }
 0x1fa   : > { %1886 = vrot.lane.b32.xlu0 %v17422_v31, %s8537_s9 }
 0x1fb   : > { %v10529_v40 = vpop.permute.xlu1 %1700 }
 0x1fc   : > { %17423 = vst [vmem:[#allocation20_spill] sm:$0xff] %v10529_v40  ;;  %v10531_v47 = vpop.permute.xlu0 %1698 }
 0x1fd   : > { %17424 = vst [vmem:[#allocation21_spill] sm:$0xff] %v10531_v47  ;;  %1892 = vrot.lane.b32.xlu1 %v17425_v8, %s8537_s9 }
 0x1fe   : > { %1890 = vrot.lane.b32.xlu0 %v17426_v12, %s8537_s9 }
 0x1ff   : > { %v10537_v59 = vpop.permute.xlu1 %1704 }
 0x200   : > { %17427 = vst [vmem:[#allocation22_spill] sm:$0xff] %v10537_v59  ;;  %v10539_v32 = vpop.permute.xlu0 %1702 }
 0x201   : > { %17428 = vst [vmem:[#allocation23_spill] sm:$0xff] %v10539_v32  ;;  %1896 = vrot.lane.b32.xlu1 %v17429_v62, %s8537_s9 }
 0x202   : > { %1894 = vrot.lane.b32.xlu0 %v17430_v50, %s8537_s9 }
 0x203   : > { %v10545_v40 = vpop.permute.xlu1 %1708 }
 0x204   : > { %17431 = vst [vmem:[#allocation24_spill] sm:$0xff] %v10545_v40  ;;  %v10547_v47 = vpop.permute.xlu0 %1706 }
 0x205   : > { %17432 = vst [vmem:[#allocation25_spill] sm:$0xff] %v10547_v47  ;;  %1900 = vrot.lane.b32.xlu1 %v17433_v5, %s8537_s9  ;;  %v17441_v47 = vld [vmem:[#allocation30_spill] sm:$0xff] }
 0x206   : > { %1898 = vrot.lane.b32.xlu0 %v17434_v21, %s8537_s9 }
 0x207   : > { %v10553_v59 = vpop.permute.xlu1 %1712 }
 0x208   : > { %17435 = vst [vmem:[#allocation269_spill] sm:$0xff] %v10553_v59  ;;  %v10555_v32 = vpop.permute.xlu0 %1710  ;;  %v10572_v59 = vld [vmem:[%s8869_s22 + $0x190] sm:$0x3] }
 0x209   : > { %17436 = vst [vmem:[#allocation270_spill] sm:$0xff] %v10555_v32  ;;  %1904 = vrot.lane.b32.xlu1 %v17437_v37, %s8537_s9 }
 0x20a   : > { %1902 = vrot.lane.b32.xlu0 %v17438_v13, %s8537_s9  ;;  %v1849_v13 = vrot.slane %v10312_v0, 1 }
 0x20b   : > { %v10561_v4 = vpop.permute.xlu1 %1716 }
 0x20c   : > { %17439 = vst [vmem:[#allocation271_spill] sm:$0xff] %v10561_v4  ;;  %v10563_v40 = vpop.permute.xlu0 %1714  ;;  %v17446_v4 = vld [vmem:[#allocation33_spill] sm:$0xff] }
 0x20d   : > { %17440 = vst [vmem:[#allocation272_spill] sm:$0xff] %v10563_v40  ;;  %1908 = vrot.lane.b32.xlu1 %v17441_v47, %s8537_s9  ;;  %v1851_v40 = vrot.slane %v10572_v59, 1  ;;  %v1848_v47 = vrot.slane %v10317_v30, 1 }
 0x20e   : > { %1906 = vrot.lane.b32.xlu0 %v17442_v63, %s8537_s9 }
 0x20f   : > { %v10569_v39 = vpop.permute.xlu1 %1720 }
 0x210   : > { %17443 = vst [vmem:[#allocation273_spill] sm:$0xff] %v10569_v39  ;;  %v10574_v32 = vpop.permute.xlu0 %1718  ;;  %v17449_v39 = vld [vmem:[#allocation37_spill] sm:$0xff] }
 0x211   : > { %17444 = vst [vmem:[#allocation274_spill] sm:$0xff] %v10574_v32  ;;  %1912 = vrot.lane.b32.xlu1 %v17445_v28, %s8537_s9  ;;  %v17450_v32 = vld [vmem:[#allocation38_spill] sm:$0xff]  ;;  %v10592_v28 = vsel %vm944_vm0, %v1849_v13, %v1851_v40  ;;  %v17457_v40 = vld [vmem:[#allocation45_spill] sm:$0xff] }
 0x212   : > { %1910 = vrot.lane.b32.xlu0 %v17446_v4, %s8537_s9  ;;  %17451 = vst [vmem:[#allocation37_spill] sm:$0xff] %v10592_v28  ;;  %v10597_v4 = vsel %vm944_vm0, %v1848_v47, %v1849_v13 }
 0x213   : > { %v10583_v37 = vpop.permute.xlu1 %1724  ;;  %17453 = vst [vmem:[#allocation277_spill] sm:$0xff] %v10597_v4 }
 0x214   : > { %17447 = vst [vmem:[#allocation275_spill] sm:$0xff] %v10583_v37  ;;  %v10585_v63 = vpop.permute.xlu0 %1722 }
 0x215   : > { %17448 = vst [vmem:[#allocation276_spill] sm:$0xff] %v10585_v63  ;;  %1916 = vrot.lane.b32.xlu1 %v17449_v39, %s8537_s9 }
 0x216   : > { %1914 = vrot.lane.b32.xlu0 %v17450_v32, %s8537_s9 }
 0x217   : > { %v10594_v21 = vpop.permute.xlu1 %1728 }
 0x218   : > { %17452 = vst [vmem:[#allocation38_spill] sm:$0xff] %v10594_v21  ;;  %v10599_v5 = vpop.permute.xlu0 %1726  ;;  %v17458_v21 = vld [vmem:[#allocation46_spill] sm:$0xff] }
 0x219   : > { %17454 = vst [vmem:[#allocation278_spill] sm:$0xff] %v10599_v5  ;;  %1920 = vrot.lane.b32.xlu1 %v10592_v28, %s8537_s9  ;;  %v17461_v5 = vld [vmem:[#allocation50_spill] sm:$0xff]  ;;  %v17462_v28 = vld [vmem:[#allocation51_spill] sm:$0xff] }
 0x21a   : > { %1918 = vrot.lane.b32.xlu0 %v10597_v4, %s8537_s9 }
 0x21b   : > { %v10605_v63 = vpop.permute.xlu1 %1732 }
 0x21c   : > { %17455 = vst [vmem:[#allocation279_spill] sm:$0xff] %v10605_v63  ;;  %v10607_v37 = vpop.permute.xlu0 %1730 }
 0x21d   : > { %17456 = vst [vmem:[#allocation280_spill] sm:$0xff] %v10607_v37  ;;  %1924 = vrot.lane.b32.xlu1 %v17457_v40, %s8537_s9  ;;  %v17465_v37 = vld [vmem:[#allocation55_spill] sm:$0xff]  ;;  %v17466_v40 = vld [vmem:[#allocation56_spill] sm:$0xff] }
 0x21e   : > { %1922 = vrot.lane.b32.xlu0 %v17458_v21, %s8537_s9 }
 0x21f   : > { %v10613_v47 = vpop.permute.xlu1 %1736 }
 0x220   : > { %17459 = vst [vmem:[#allocation45_spill] sm:$0xff] %v10613_v47  ;;  %v10615_v13 = vpop.permute.xlu0 %1734 }
 0x221   : > { %17460 = vst [vmem:[#allocation46_spill] sm:$0xff] %v10615_v13  ;;  %1928 = vrot.lane.b32.xlu1 %v17461_v5, %s8537_s9  ;;  %v17469_v13 = vld [vmem:[#allocation60_spill] sm:$0xff]  ;;  %v17470_v5 = vld [vmem:[#allocation61_spill] sm:$0xff] }
 0x222   : > { %1926 = vrot.lane.b32.xlu0 %v17462_v28, %s8537_s9 }
 0x223   : > { %v10621_v4 = vpop.permute.xlu1 %1740 }
 0x224   : > { %17463 = vst [vmem:[#allocation281_spill] sm:$0xff] %v10621_v4  ;;  %v10623_v63 = vpop.permute.xlu0 %1738 }
 0x225   : > { %17464 = vst [vmem:[#allocation282_spill] sm:$0xff] %v10623_v63  ;;  %1932 = vrot.lane.b32.xlu1 %v17465_v37, %s8537_s9  ;;  %v17473_v63 = vld [vmem:[#allocation65_spill] sm:$0xff]  ;;  %v17474_v37 = vld [vmem:[#allocation66_spill] sm:$0xff] }
 0x226   : > { %1930 = vrot.lane.b32.xlu0 %v17466_v40, %s8537_s9 }
 0x227   : > { %v10629_v21 = vpop.permute.xlu1 %1744 }
 0x228   : > { %17467 = vst [vmem:[#allocation283_spill] sm:$0xff] %v10629_v21  ;;  %v10631_v47 = vpop.permute.xlu0 %1742 }
 0x229   : > { %17468 = vst [vmem:[#allocation284_spill] sm:$0xff] %v10631_v47  ;;  %1936 = vrot.lane.b32.xlu1 %v17469_v13, %s8537_s9  ;;  %v17477_v47 = vld [vmem:[#allocation70_spill] sm:$0xff]  ;;  %v17478_v13 = vld [vmem:[#allocation71_spill] sm:$0xff] }
 0x22a   : > { %1934 = vrot.lane.b32.xlu0 %v17470_v5, %s8537_s9 }
 0x22b   : > { %v10637_v28 = vpop.permute.xlu1 %1748 }
 0x22c   : > { %17471 = vst [vmem:[#allocation285_spill] sm:$0xff] %v10637_v28  ;;  %v10639_v4 = vpop.permute.xlu0 %1746 }
 0x22d   : > { %17472 = vst [vmem:[#allocation286_spill] sm:$0xff] %v10639_v4  ;;  %1940 = vrot.lane.b32.xlu1 %v17473_v63, %s8537_s9  ;;  %v17481_v4 = vld [vmem:[#allocation75_spill] sm:$0xff]  ;;  %v17482_v63 = vld [vmem:[#allocation76_spill] sm:$0xff] }
 0x22e   : > { %1938 = vrot.lane.b32.xlu0 %v17474_v37, %s8537_s9 }
 0x22f   : > { %v10645_v40 = vpop.permute.xlu1 %1752 }
 0x230   : > { %17475 = vst [vmem:[#allocation287_spill] sm:$0xff] %v10645_v40  ;;  %v10647_v21 = vpop.permute.xlu0 %1750 }
 0x231   : > { %17476 = vst [vmem:[#allocation288_spill] sm:$0xff] %v10647_v21  ;;  %1944 = vrot.lane.b32.xlu1 %v17477_v47, %s8537_s9  ;;  %v17485_v21 = vld [vmem:[#allocation80_spill] sm:$0xff]  ;;  %v17486_v47 = vld [vmem:[#allocation81_spill] sm:$0xff] }
 0x232   : > { %1942 = vrot.lane.b32.xlu0 %v17478_v13, %s8537_s9 }
 0x233   : > { %v10653_v5 = vpop.permute.xlu1 %1756 }
 0x234   : > { %17479 = vst [vmem:[#allocation289_spill] sm:$0xff] %v10653_v5  ;;  %v10655_v28 = vpop.permute.xlu0 %1754 }
 0x235   : > { %17480 = vst [vmem:[#allocation290_spill] sm:$0xff] %v10655_v28  ;;  %1948 = vrot.lane.b32.xlu1 %v17481_v4, %s8537_s9  ;;  %v17489_v28 = vld [vmem:[#allocation85_spill] sm:$0xff]  ;;  %v17490_v4 = vld [vmem:[#allocation86_spill] sm:$0xff] }
 0x236   : > { %1946 = vrot.lane.b32.xlu0 %v17482_v63, %s8537_s9 }
 0x237   : > { %v10661_v37 = vpop.permute.xlu1 %1760 }
 0x238   : > { %17483 = vst [vmem:[#allocation291_spill] sm:$0xff] %v10661_v37  ;;  %v10663_v40 = vpop.permute.xlu0 %1758 }
 0x239   : > { %17484 = vst [vmem:[#allocation292_spill] sm:$0xff] %v10663_v40  ;;  %1952 = vrot.lane.b32.xlu1 %v17485_v21, %s8537_s9  ;;  %v17493_v40 = vld [vmem:[#allocation90_spill] sm:$0xff]  ;;  %v17501_v21 = vld [vmem:[#allocation100_spill] sm:$0xff] }
 0x23a   : > { %1950 = vrot.lane.b32.xlu0 %v17486_v47, %s8537_s9  ;;  %v17494_v47 = vld [vmem:[#allocation91_spill] sm:$0xff] }
 0x23b   : > { %v10669_v13 = vpop.permute.xlu1 %1764 }
 0x23c   : > { %17487 = vst [vmem:[#allocation293_spill] sm:$0xff] %v10669_v13  ;;  %v10671_v5 = vpop.permute.xlu0 %1762 }
 0x23d   : > { %17488 = vst [vmem:[#allocation294_spill] sm:$0xff] %v10671_v5  ;;  %1956 = vrot.lane.b32.xlu1 %v17489_v28, %s8537_s9  ;;  %v17497_v28 = vld [vmem:[#allocation95_spill] sm:$0xff] }
 0x23e   : > { %1954 = vrot.lane.b32.xlu0 %v17490_v4, %s8537_s9  ;;  %v17498_v4 = vld [vmem:[#allocation96_spill] sm:$0xff] }
 0x23f   : > { %v10677_v63 = vpop.permute.xlu1 %1768 }
 0x240   : > { %17491 = vst [vmem:[#allocation295_spill] sm:$0xff] %v10677_v63  ;;  %v10679_v37 = vpop.permute.xlu0 %1766 }
 0x241   : > { %17492 = vst [vmem:[#allocation296_spill] sm:$0xff] %v10679_v37  ;;  %1960 = vrot.lane.b32.xlu1 %v17493_v40, %s8537_s9  ;;  %v17502_v40 = vld [vmem:[#allocation101_spill] sm:$0xff] }
 0x242   : > { %1958 = vrot.lane.b32.xlu0 %v17494_v47, %s8537_s9 }
 0x243   : > { %v10685_v13 = vpop.permute.xlu1 %1772 }
 0x244   : > { %17495 = vst [vmem:[#allocation297_spill] sm:$0xff] %v10685_v13  ;;  %v10687_v5 = vpop.permute.xlu0 %1770 }
 0x245   : > { %17496 = vst [vmem:[#allocation298_spill] sm:$0xff] %v10687_v5  ;;  %1964 = vrot.lane.b32.xlu1 %v17497_v28, %s8537_s9  ;;  %v17505_v5 = vld [vmem:[#allocation104_spill] sm:$0xff]  ;;  %v17506_v28 = vld [vmem:[#allocation106_spill] sm:$0xff] }
 0x246   : > { %1962 = vrot.lane.b32.xlu0 %v17498_v4, %s8537_s9 }
 0x247   : > { %v10693_v63 = vpop.permute.xlu1 %1776 }
 0x248   : > { %17499 = vst [vmem:[#allocation299_spill] sm:$0xff] %v10693_v63  ;;  %v10695_v37 = vpop.permute.xlu0 %1774  ;;  %v10712_v63 = vld [vmem:[%s8869_s22 + $0x340] sm:$0x3] }
 0x249   : > { %17500 = vst [vmem:[#allocation300_spill] sm:$0xff] %v10695_v37  ;;  %1968 = vrot.lane.b32.xlu1 %v17501_v21, %s8537_s9 }
 0x24a   : > { %1966 = vrot.lane.b32.xlu0 %v17502_v40, %s8537_s9  ;;  %v1854_v40 = vrot.slane %v10452_v17, 1 }
 0x24b   : > { %v10701_v47 = vpop.permute.xlu1 %1780 }
 0x24c   : > { %17503 = vst [vmem:[#allocation100_spill] sm:$0xff] %v10701_v47  ;;  %v10703_v13 = vpop.permute.xlu0 %1778  ;;  %v1853_v47 = vrot.slane %v10457_v29, 1 }
 0x24d   : > { %17504 = vst [vmem:[#allocation301_spill] sm:$0xff] %v10703_v13  ;;  %1972 = vrot.lane.b32.xlu1 %v17505_v5, %s8537_s9  ;;  %v1856_v13 = vrot.slane %v10712_v63, 1 }
 0x24e   : > { %1970 = vrot.lane.b32.xlu0 %v17506_v28, %s8537_s9 }
 0x24f   : > { %v10709_v4 = vpop.permute.xlu1 %1860 }
 0x250   : > { %17507 = vst [vmem:[#allocation302_spill] sm:$0xff] %v10709_v4  ;;  %v10714_v37 = vpop.permute.xlu0 %1858 }
 0x251   : > { %17508 = vst [vmem:[#allocation303_spill] sm:$0xff] %v10714_v37  ;;  %1976 = vrot.lane.b32.xlu1 %v9545_v24, %s8537_s9  ;;  %v10732_v37 = vsel %vm944_vm0, %v1854_v40, %v1856_v13 }
 0x252   : > { %1974 = vrot.lane.b32.xlu0 %v9552_v23, %s8537_s9  ;;  %v10737_v23 = vsel %vm944_vm0, %v1853_v47, %v1854_v40 }
 0x253   : > { %v10723_v5 = vpop.permute.xlu1 %1864 }
 0x254   : > { %17509 = vst [vmem:[#allocation304_spill] sm:$0xff] %v10723_v5  ;;  %v10725_v28 = vpop.permute.xlu0 %1862 }
 0x255   : > { %17510 = vst [vmem:[#allocation305_spill] sm:$0xff] %v10725_v28  ;;  %1980 = vrot.lane.b32.xlu1 %v9562_v61, %s8537_s9 }
 0x256   : > { %1978 = vrot.lane.b32.xlu0 %v9569_v1, %s8537_s9 }
 0x257   : > { %v10734_v4 = vpop.permute.xlu1 %1868 }
 0x258   : > { %17511 = vst [vmem:[#allocation306_spill] sm:$0xff] %v10734_v4  ;;  %v10739_v24 = vpop.permute.xlu0 %1866 }
 0x259   : > { %17512 = vst [vmem:[#allocation307_spill] sm:$0xff] %v10739_v24  ;;  %1984 = vrot.lane.b32.xlu1 %v10732_v37, %s8537_s9  ;;  %v17540_v24 = vld [vmem:[#allocation143_spill] sm:$0xff] }
 0x25a   : > { %1982 = vrot.lane.b32.xlu0 %v10737_v23, %s8537_s9 }
 0x25b   : > { %v10745_v28 = vpop.permute.xlu1 %1872 }
 0x25c   : > { %17513 = vst [vmem:[#allocation308_spill] sm:$0xff] %v10745_v28  ;;  %v10747_v5 = vpop.permute.xlu0 %1870 }
 0x25d   : > { %17514 = vst [vmem:[#allocation309_spill] sm:$0xff] %v10747_v5  ;;  %2062 = vrot.lane.b32.xlu1 %v9590_v48, %s8538_s13 }
 0x25e   : > { %2060 = vrot.lane.b32.xlu0 %v9597_v7, %s8538_s13 }
 0x25f   : > { %v10753_v47 = vpop.permute.xlu1 %1876 }
 0x260   : > { %17515 = vst [vmem:[#allocation310_spill] sm:$0xff] %v10753_v47  ;;  %v10755_v13 = vpop.permute.xlu0 %1874  ;;  %v17536_v47 = vld [vmem:[#allocation139_spill] sm:$0xff] }
 0x261   : > { %17516 = vst [vmem:[#allocation311_spill] sm:$0xff] %v10755_v13  ;;  %2066 = vrot.lane.b32.xlu1 %v9607_v49, %s8538_s13 }
 0x262   : > { %2064 = vrot.lane.b32.xlu0 %v9614_v54, %s8538_s13 }
 0x263   : > { %v10761_v40 = vpop.permute.xlu1 %1880 }
 0x264   : > { %17517 = vst [vmem:[#allocation312_spill] sm:$0xff] %v10761_v40  ;;  %v10763_v5 = vpop.permute.xlu0 %1878 }
 0x265   : > { %17518 = vst [vmem:[#allocation313_spill] sm:$0xff] %v10763_v5  ;;  %2070 = vrot.lane.b32.xlu1 %v9624_v46, %s8538_s13 }
 0x266   : > { %2068 = vrot.lane.b32.xlu0 %v9631_v45, %s8538_s13 }
 0x267   : > { %v10769_v48 = vpop.permute.xlu1 %1884 }
 0x268   : > { %17519 = vst [vmem:[#allocation314_spill] sm:$0xff] %v10769_v48  ;;  %v10771_v7 = vpop.permute.xlu0 %1882 }
 0x269   : > { %17520 = vst [vmem:[#allocation315_spill] sm:$0xff] %v10771_v7  ;;  %2074 = vrot.lane.b32.xlu1 %v9641_v58, %s8538_s13 }
 0x26a   : > { %2072 = vrot.lane.b32.xlu0 %v9648_v55, %s8538_s13 }
 0x26b   : > { %v10777_v13 = vpop.permute.xlu1 %1888 }
 0x26c   : > { %17521 = vst [vmem:[#allocation316_spill] sm:$0xff] %v10777_v13  ;;  %v10779_v40 = vpop.permute.xlu0 %1886 }
 0x26d   : > { %17522 = vst [vmem:[#allocation317_spill] sm:$0xff] %v10779_v40  ;;  %2078 = vrot.lane.b32.xlu1 %v9658_v3, %s8538_s13 }
 0x26e   : > { %2076 = vrot.lane.b32.xlu0 %v9665_v2, %s8538_s13 }
 0x26f   : > { %v10785_v5 = vpop.permute.xlu1 %1892 }
 0x270   : > { %17523 = vst [vmem:[#allocation318_spill] sm:$0xff] %v10785_v5  ;;  %v10787_v48 = vpop.permute.xlu0 %1890 }
 0x271   : > { %17524 = vst [vmem:[#allocation319_spill] sm:$0xff] %v10787_v48  ;;  %2082 = vrot.lane.b32.xlu1 %v9675_v11, %s8538_s13 }
 0x272   : > { %2080 = vrot.lane.b32.xlu0 %v9682_v10, %s8538_s13 }
 0x273   : > { %v10793_v7 = vpop.permute.xlu1 %1896 }
 0x274   : > { %17525 = vst [vmem:[#allocation320_spill] sm:$0xff] %v10793_v7  ;;  %v10795_v13 = vpop.permute.xlu0 %1894 }
 0x275   : > { %17526 = vst [vmem:[#allocation321_spill] sm:$0xff] %v10795_v13  ;;  %2086 = vrot.lane.b32.xlu1 %v9692_v19, %s8538_s13 }
 0x276   : > { %2084 = vrot.lane.b32.xlu0 %v9699_v18, %s8538_s13 }
 0x277   : > { %v10801_v40 = vpop.permute.xlu1 %1900 }
 0x278   : > { %17527 = vst [vmem:[#allocation322_spill] sm:$0xff] %v10801_v40  ;;  %v10803_v5 = vpop.permute.xlu0 %1898 }
 0x279   : > { %17528 = vst [vmem:[#allocation323_spill] sm:$0xff] %v10803_v5  ;;  %2090 = vrot.lane.b32.xlu1 %v9709_v27, %s8538_s13 }
 0x27a   : > { %2088 = vrot.lane.b32.xlu0 %v9716_v26, %s8538_s13 }
 0x27b   : > { %v10809_v48 = vpop.permute.xlu1 %1904 }
 0x27c   : > { %17529 = vst [vmem:[#allocation324_spill] sm:$0xff] %v10809_v48  ;;  %v10811_v7 = vpop.permute.xlu0 %1902 }
 0x27d   : > { %17530 = vst [vmem:[#allocation325_spill] sm:$0xff] %v10811_v7  ;;  %2094 = vrot.lane.b32.xlu1 %v9726_v35, %s8538_s13  ;;  %v17535_v7 = vld [vmem:[#allocation137_spill] sm:$0xff] }
 0x27e   : > { %2092 = vrot.lane.b32.xlu0 %v9733_v34, %s8538_s13 }
 0x27f   : > { %v10817_v13 = vpop.permute.xlu1 %1908 }
 0x280   : > { %17531 = vst [vmem:[#allocation326_spill] sm:$0xff] %v10817_v13  ;;  %v10819_v40 = vpop.permute.xlu0 %1906 }
 0x281   : > { %17532 = vst [vmem:[#allocation327_spill] sm:$0xff] %v10819_v40  ;;  %2098 = vrot.lane.b32.xlu1 %v9743_v43, %s8538_s13  ;;  %v17539_v40 = vld [vmem:[#allocation141_spill] sm:$0xff] }
 0x282   : > { %2096 = vrot.lane.b32.xlu0 %v9750_v42, %s8538_s13 }
 0x283   : > { %v10825_v5 = vpop.permute.xlu1 %1912 }
 0x284   : > { %17533 = vst [vmem:[#allocation328_spill] sm:$0xff] %v10825_v5  ;;  %v10827_v48 = vpop.permute.xlu0 %1910 }
 0x285   : > { %17534 = vst [vmem:[#allocation329_spill] sm:$0xff] %v10827_v48  ;;  %2102 = vrot.lane.b32.xlu1 %v17535_v7, %s8538_s13  ;;  %v17543_v48 = vld [vmem:[#allocation145_spill] sm:$0xff]  ;;  %v17544_v7 = vld [vmem:[#allocation147_spill] sm:$0xff] }
 0x286   : > { %2100 = vrot.lane.b32.xlu0 %v17536_v47, %s8538_s13 }
 0x287   : > { %v10833_v28 = vpop.permute.xlu1 %1916 }
 0x288   : > { %17537 = vst [vmem:[#allocation330_spill] sm:$0xff] %v10833_v28  ;;  %v10835_v13 = vpop.permute.xlu0 %1914 }
 0x289   : > { %17538 = vst [vmem:[#allocation331_spill] sm:$0xff] %v10835_v13  ;;  %2106 = vrot.lane.b32.xlu1 %v17539_v40, %s8538_s13  ;;  %v17547_v13 = vld [vmem:[#allocation149_spill] sm:$0xff]  ;;  %v2051_v40 = vrot.slane %v10312_v0, 2 }
 0x28a   : > { %2104 = vrot.lane.b32.xlu0 %v17540_v24, %s8538_s13  ;;  %v17548_v24 = vld [vmem:[#allocation151_spill] sm:$0xff] }
 0x28b   : > { %v10841_v4 = vpop.permute.xlu1 %1920 }
 0x28c   : > { %17541 = vst [vmem:[#allocation332_spill] sm:$0xff] %v10841_v4  ;;  %v10843_v5 = vpop.permute.xlu0 %1918  ;;  %v2050_v4 = vrot.slane %v10317_v30, 2 }
 0x28d   : > { %17542 = vst [vmem:[#allocation333_spill] sm:$0xff] %v10843_v5  ;;  %2110 = vrot.lane.b32.xlu1 %v17543_v48, %s8538_s13  ;;  %v2053_v5 = vrot.slane %v10572_v59, 2 }
 0x28e   : > { %2108 = vrot.lane.b32.xlu0 %v17544_v7, %s8538_s13 }
 0x28f   : > { %v10849_v47 = vpop.permute.xlu1 %1924 }
 0x290   : > { %17545 = vst [vmem:[#allocation334_spill] sm:$0xff] %v10849_v47  ;;  %v10851_v28 = vpop.permute.xlu0 %1922  ;;  %v17551_v47 = vld [vmem:[#allocation153_spill] sm:$0xff] }
 0x291   : > { %17546 = vst [vmem:[#allocation335_spill] sm:$0xff] %v10851_v28  ;;  %2114 = vrot.lane.b32.xlu1 %v17547_v13, %s8538_s13  ;;  %v17552_v28 = vld [vmem:[#allocation35_spill] sm:$0xff]  ;;  %v10869_v13 = vsel %vm1297_vm1, %v2051_v40, %v2053_v5  ;;  %v17559_v5 = vld [vmem:[#allocation41_spill] sm:$0xff] }
 0x292   : > { %2112 = vrot.lane.b32.xlu0 %v17548_v24, %s8538_s13  ;;  %17553 = vst [vmem:[#allocation153_spill] sm:$0xff] %v10869_v13  ;;  %v10874_v24 = vsel %vm1297_vm1, %v2050_v4, %v2051_v40 }
 0x293   : > { %v10860_v48 = vpop.permute.xlu1 %1928  ;;  %17555 = vst [vmem:[#allocation338_spill] sm:$0xff] %v10874_v24 }
 0x294   : > { %17549 = vst [vmem:[#allocation336_spill] sm:$0xff] %v10860_v48  ;;  %v10862_v42 = vpop.permute.xlu0 %1926 }
 0x295   : > { %17550 = vst [vmem:[#allocation337_spill] sm:$0xff] %v10862_v42  ;;  %2118 = vrot.lane.b32.xlu1 %v17551_v47, %s8538_s13 }
 0x296   : > { %2116 = vrot.lane.b32.xlu0 %v17552_v28, %s8538_s13 }
 0x297   : > { %v10871_v7 = vpop.permute.xlu1 %1932 }
 0x298   : > { %17554 = vst [vmem:[#allocation35_spill] sm:$0xff] %v10871_v7  ;;  %v10876_v59 = vpop.permute.xlu0 %1930  ;;  %v17560_v7 = vld [vmem:[#allocation43_spill] sm:$0xff] }
 0x299   : > { %17556 = vst [vmem:[#allocation339_spill] sm:$0xff] %v10876_v59  ;;  %2122 = vrot.lane.b32.xlu1 %v10869_v13, %s8538_s13  ;;  %v17563_v59 = vld [vmem:[#allocation154_spill] sm:$0xff]  ;;  %v17564_v13 = vld [vmem:[#allocation48_spill] sm:$0xff] }
 0x29a   : > { %2120 = vrot.lane.b32.xlu0 %v10874_v24, %s8538_s13 }
 0x29b   : > { %v10882_v42 = vpop.permute.xlu1 %1936 }
 0x29c   : > { %17557 = vst [vmem:[#allocation340_spill] sm:$0xff] %v10882_v42  ;;  %v10884_v48 = vpop.permute.xlu0 %1934 }
 0x29d   : > { %17558 = vst [vmem:[#allocation341_spill] sm:$0xff] %v10884_v48  ;;  %2126 = vrot.lane.b32.xlu1 %v17559_v5, %s8538_s13  ;;  %v17567_v48 = vld [vmem:[#allocation155_spill] sm:$0xff]  ;;  %v17568_v5 = vld [vmem:[#allocation53_spill] sm:$0xff] }
 0x29e   : > { %2124 = vrot.lane.b32.xlu0 %v17560_v7, %s8538_s13 }
 0x29f   : > { %v10890_v4 = vpop.permute.xlu1 %1940 }
 0x2a0   : > { %17561 = vst [vmem:[#allocation41_spill] sm:$0xff] %v10890_v4  ;;  %v10892_v40 = vpop.permute.xlu0 %1938 }
 0x2a1   : > { %17562 = vst [vmem:[#allocation43_spill] sm:$0xff] %v10892_v40  ;;  %2130 = vrot.lane.b32.xlu1 %v17563_v59, %s8538_s13  ;;  %v17571_v40 = vld [vmem:[#allocation156_spill] sm:$0xff]  ;;  %v17572_v59 = vld [vmem:[#allocation58_spill] sm:$0xff] }
 0x2a2   : > { %2128 = vrot.lane.b32.xlu0 %v17564_v13, %s8538_s13 }
 0x2a3   : > { %v10898_v24 = vpop.permute.xlu1 %1944 }
 0x2a4   : > { %17565 = vst [vmem:[#allocation342_spill] sm:$0xff] %v10898_v24  ;;  %v10900_v42 = vpop.permute.xlu0 %1942 }
 0x2a5   : > { %17566 = vst [vmem:[#allocation343_spill] sm:$0xff] %v10900_v42  ;;  %2134 = vrot.lane.b32.xlu1 %v17567_v48, %s8538_s13  ;;  %v17575_v42 = vld [vmem:[#allocation157_spill] sm:$0xff]  ;;  %v17576_v48 = vld [vmem:[#allocation63_spill] sm:$0xff] }
 0x2a6   : > { %2132 = vrot.lane.b32.xlu0 %v17568_v5, %s8538_s13 }
 0x2a7   : > { %v10906_v7 = vpop.permute.xlu1 %1948 }
 0x2a8   : > { %17569 = vst [vmem:[#allocation344_spill] sm:$0xff] %v10906_v7  ;;  %v10908_v4 = vpop.permute.xlu0 %1946 }
 0x2a9   : > { %17570 = vst [vmem:[#allocation345_spill] sm:$0xff] %v10908_v4  ;;  %2138 = vrot.lane.b32.xlu1 %v17571_v40, %s8538_s13  ;;  %v17579_v4 = vld [vmem:[#allocation158_spill] sm:$0xff]  ;;  %v17580_v40 = vld [vmem:[#allocation68_spill] sm:$0xff] }
 0x2aa   : > { %2136 = vrot.lane.b32.xlu0 %v17572_v59, %s8538_s13 }
 0x2ab   : > { %v10914_v13 = vpop.permute.xlu1 %1952 }
 0x2ac   : > { %17573 = vst [vmem:[#allocation346_spill] sm:$0xff] %v10914_v13  ;;  %v10916_v24 = vpop.permute.xlu0 %1950 }
 0x2ad   : > { %17574 = vst [vmem:[#allocation347_spill] sm:$0xff] %v10916_v24  ;;  %2142 = vrot.lane.b32.xlu1 %v17575_v42, %s8538_s13  ;;  %v17583_v24 = vld [vmem:[#allocation159_spill] sm:$0xff]  ;;  %v17584_v42 = vld [vmem:[#allocation73_spill] sm:$0xff] }
 0x2ae   : > { %2140 = vrot.lane.b32.xlu0 %v17576_v48, %s8538_s13 }
 0x2af   : > { %v10922_v5 = vpop.permute.xlu1 %1956 }
 0x2b0   : > { %17577 = vst [vmem:[#allocation348_spill] sm:$0xff] %v10922_v5  ;;  %v10924_v7 = vpop.permute.xlu0 %1954 }
 0x2b1   : > { %17578 = vst [vmem:[#allocation349_spill] sm:$0xff] %v10924_v7  ;;  %2146 = vrot.lane.b32.xlu1 %v17579_v4, %s8538_s13  ;;  %v17587_v7 = vld [vmem:[#allocation160_spill] sm:$0xff]  ;;  %v17588_v4 = vld [vmem:[#allocation78_spill] sm:$0xff] }
 0x2b2   : > { %2144 = vrot.lane.b32.xlu0 %v17580_v40, %s8538_s13 }
 0x2b3   : > { %v10930_v59 = vpop.permute.xlu1 %1960 }
 0x2b4   : > { %17581 = vst [vmem:[#allocation350_spill] sm:$0xff] %v10930_v59  ;;  %v10932_v13 = vpop.permute.xlu0 %1958 }
 0x2b5   : > { %17582 = vst [vmem:[#allocation351_spill] sm:$0xff] %v10932_v13  ;;  %2150 = vrot.lane.b32.xlu1 %v17583_v24, %s8538_s13  ;;  %v17591_v13 = vld [vmem:[#allocation161_spill] sm:$0xff]  ;;  %v17592_v24 = vld [vmem:[#allocation83_spill] sm:$0xff] }
 0x2b6   : > { %2148 = vrot.lane.b32.xlu0 %v17584_v42, %s8538_s13 }
 0x2b7   : > { %v10938_v48 = vpop.permute.xlu1 %1964 }
 0x2b8   : > { %17585 = vst [vmem:[#allocation352_spill] sm:$0xff] %v10938_v48  ;;  %v10940_v5 = vpop.permute.xlu0 %1962 }
 0x2b9   : > { %17586 = vst [vmem:[#allocation353_spill] sm:$0xff] %v10940_v5  ;;  %2154 = vrot.lane.b32.xlu1 %v17587_v7, %s8538_s13  ;;  %v17595_v5 = vld [vmem:[#allocation162_spill] sm:$0xff]  ;;  %v17596_v7 = vld [vmem:[#allocation88_spill] sm:$0xff] }
 0x2ba   : > { %2152 = vrot.lane.b32.xlu0 %v17588_v4, %s8538_s13 }
 0x2bb   : > { %v10946_v40 = vpop.permute.xlu1 %1968 }
 0x2bc   : > { %17589 = vst [vmem:[#allocation354_spill] sm:$0xff] %v10946_v40  ;;  %v10948_v59 = vpop.permute.xlu0 %1966 }
 0x2bd   : > { %17590 = vst [vmem:[#allocation355_spill] sm:$0xff] %v10948_v59  ;;  %2158 = vrot.lane.b32.xlu1 %v17591_v13, %s8538_s13  ;;  %v17599_v59 = vld [vmem:[#allocation163_spill] sm:$0xff]  ;;  %v17600_v13 = vld [vmem:[#allocation93_spill] sm:$0xff] }
 0x2be   : > { %2156 = vrot.lane.b32.xlu0 %v17592_v24, %s8538_s13 }
 0x2bf   : > { %v10954_v42 = vpop.permute.xlu1 %1972 }
 0x2c0   : > { %17593 = vst [vmem:[#allocation356_spill] sm:$0xff] %v10954_v42  ;;  %v10956_v48 = vpop.permute.xlu0 %1970 }
 0x2c1   : > { %17594 = vst [vmem:[#allocation357_spill] sm:$0xff] %v10956_v48  ;;  %2162 = vrot.lane.b32.xlu1 %v17595_v5, %s8538_s13 }
 0x2c2   : > { %2160 = vrot.lane.b32.xlu0 %v17596_v7, %s8538_s13 }
 0x2c3   : > { %v10962_v4 = vpop.permute.xlu1 %1976 }
 0x2c4   : > { %17597 = vst [vmem:[#allocation162_spill] sm:$0xff] %v10962_v4  ;;  %v10964_v40 = vpop.permute.xlu0 %1974 }
 0x2c5   : > { %17598 = vst [vmem:[#allocation88_spill] sm:$0xff] %v10964_v40  ;;  %2166 = vrot.lane.b32.xlu1 %v17599_v59, %s8538_s13  ;;  %v17605_v40 = vld [vmem:[#allocation165_spill] sm:$0xff] }
 0x2c6   : > { %2164 = vrot.lane.b32.xlu0 %v17600_v13, %s8538_s13 }
 0x2c7   : > { %v10970_v24 = vpop.permute.xlu1 %1980 }
 0x2c8   : > { %17601 = vst [vmem:[#allocation163_spill] sm:$0xff] %v10970_v24  ;;  %v10972_v42 = vpop.permute.xlu0 %1978 }
 0x2c9   : > { %17602 = vst [vmem:[#allocation358_spill] sm:$0xff] %v10972_v42  ;;  %2170 = vrot.lane.b32.xlu1 %v10043_v41, %s8538_s13  ;;  %v2056_v42 = vrot.slane %v10452_v17, 2 }
 0x2ca   : > { %2168 = vrot.lane.b32.xlu0 %v10050_v6, %s8538_s13  ;;  %v17608_v6 = vld [vmem:[#allocation169_spill] sm:$0xff] }
 0x2cb   : > { %v10978_v48 = vpop.permute.xlu1 %1984 }
 0x2cc   : > { %17603 = vst [vmem:[#allocation359_spill] sm:$0xff] %v10978_v48  ;;  %v10980_v4 = vpop.permute.xlu0 %1982  ;;  %v2055_v48 = vrot.slane %v10457_v29, 2 }
 0x2cd   : > { %17604 = vst [vmem:[#allocation360_spill] sm:$0xff] %v10980_v4  ;;  %2174 = vrot.lane.b32.xlu1 %v17605_v40, %s8538_s13  ;;  %v2058_v4 = vrot.slane %v10712_v63, 2 }
 0x2ce   : > { %2172 = vrot.lane.b32.xlu0 %v10067_v33, %s8538_s13 }
 0x2cf   : > { %v10986_v13 = vpop.permute.xlu1 %2062 }
 0x2d0   : > { %17606 = vst [vmem:[#allocation361_spill] sm:$0xff] %v10986_v13  ;;  %v10988_v24 = vpop.permute.xlu0 %2060  ;;  %v17610_v13 = vld [vmem:[#allocation171_spill] sm:$0xff] }
 0x2d1   : > { %17607 = vst [vmem:[#allocation362_spill] sm:$0xff] %v10988_v24  ;;  %2178 = vrot.lane.b32.xlu1 %v10077_v38, %s8538_s13  ;;  %v17611_v24 = vld [vmem:[#allocation173_spill] sm:$0xff]  ;;  %v11006_v38 = vsel %vm1297_vm1, %v2056_v42, %v2058_v4  ;;  %v17618_v4 = vld [vmem:[#allocation179_spill] sm:$0xff] }
 0x2d2   : > { %2176 = vrot.lane.b32.xlu0 %v17608_v6, %s8538_s13  ;;  %17612 = vst [vmem:[#allocation173_spill] sm:$0xff] %v11006_v38  ;;  %v11011_v6 = vsel %vm1297_vm1, %v2055_v48, %v2056_v42 }
 0x2d3   : > { %v10997_v40 = vpop.permute.xlu1 %2066  ;;  %17614 = vst [vmem:[#allocation365_spill] sm:$0xff] %v11011_v6 }
 0x2d4   : > { %v10999_v41 = vpop.permute.xlu0 %2064 }
 0x2d5   : > { %17609 = vst [vmem:[#allocation363_spill] sm:$0xff] %v10999_v41  ;;  %2182 = vrot.lane.b32.xlu1 %v17610_v13, %s8538_s13 }
 0x2d6   : > { %2180 = vrot.lane.b32.xlu0 %v17611_v24, %s8538_s13 }
 0x2d7   : > { %v11008_v33 = vpop.permute.xlu1 %2070 }
 0x2d8   : > { %17613 = vst [vmem:[#allocation364_spill] sm:$0xff] %v11008_v33  ;;  %v11013_v63 = vpop.permute.xlu0 %2068  ;;  %v17619_v33 = vld [vmem:[#allocation180_spill] sm:$0xff] }
 0x2d9   : > { %17615 = vst [vmem:[#allocation366_spill] sm:$0xff] %v11013_v63  ;;  %2186 = vrot.lane.b32.xlu1 %v11006_v38, %s8538_s13  ;;  %v17622_v63 = vld [vmem:[#allocation183_spill] sm:$0xff] }
 0x2da   : > { %2184 = vrot.lane.b32.xlu0 %v11011_v6, %s8538_s13  ;;  %v17623_v6 = vld [vmem:[#allocation184_spill] sm:$0xff]  ;;  %v17626_v38 = vld [vmem:[#allocation187_spill] sm:$0xff]  ;;  %s8544_s13 = smov 48  }
 0x2db   : > { %v11019_v41 = vpop.permute.xlu1 %2074 }
 0x2dc   : > { %17616 = vst [vmem:[#allocation367_spill] sm:$0xff] %v11019_v41  ;;  %v11021_v13 = vpop.permute.xlu0 %2072 }
 0x2dd   : > { %17617 = vst [vmem:[#allocation368_spill] sm:$0xff] %v11021_v13  ;;  %2258 = vrot.lane.b32.xlu1 %v17618_v4, %s8539_s14  ;;  %v17627_v4 = vld [vmem:[#allocation188_spill] sm:$0xff] }
 0x2de   : > { %2256 = vrot.lane.b32.xlu0 %v17619_v33, %s8539_s14 }
 0x2df   : > { %v11027_v42 = vpop.permute.xlu1 %2078 }
 0x2e0   : > { %17620 = vst [vmem:[#allocation179_spill] sm:$0xff] %v11027_v42  ;;  %v11029_v48 = vpop.permute.xlu0 %2076 }
 0x2e1   : > { %17621 = vst [vmem:[#allocation180_spill] sm:$0xff] %v11029_v48  ;;  %2262 = vrot.lane.b32.xlu1 %v17622_v63, %s8539_s14  ;;  %v17630_v48 = vld [vmem:[#allocation191_spill] sm:$0xff]  ;;  %v17631_v63 = vld [vmem:[#allocation192_spill] sm:$0xff] }
 0x2e2   : > { %2260 = vrot.lane.b32.xlu0 %v17623_v6, %s8539_s14 }
 0x2e3   : > { %v11035_v41 = vpop.permute.xlu1 %2082 }
 0x2e4   : > { %17624 = vst [vmem:[#allocation183_spill] sm:$0xff] %v11035_v41  ;;  %v11037_v13 = vpop.permute.xlu0 %2080 }
 0x2e5   : > { %17625 = vst [vmem:[#allocation184_spill] sm:$0xff] %v11037_v13  ;;  %2266 = vrot.lane.b32.xlu1 %v17626_v38, %s8539_s14  ;;  %v17634_v13 = vld [vmem:[#allocation195_spill] sm:$0xff]  ;;  %v17635_v38 = vld [vmem:[#allocation196_spill] sm:$0xff] }
 0x2e6   : > { %2264 = vrot.lane.b32.xlu0 %v17627_v4, %s8539_s14 }
 0x2e7   : > { %v11043_v33 = vpop.permute.xlu1 %2086 }
 0x2e8   : > { %17628 = vst [vmem:[#allocation187_spill] sm:$0xff] %v11043_v33  ;;  %v11045_v42 = vpop.permute.xlu0 %2084 }
 0x2e9   : > { %17629 = vst [vmem:[#allocation188_spill] sm:$0xff] %v11045_v42  ;;  %2270 = vrot.lane.b32.xlu1 %v17630_v48, %s8539_s14  ;;  %v17638_v42 = vld [vmem:[#allocation199_spill] sm:$0xff]  ;;  %v17639_v48 = vld [vmem:[#allocation200_spill] sm:$0xff] }
 0x2ea   : > { %2268 = vrot.lane.b32.xlu0 %v17631_v63, %s8539_s14 }
 0x2eb   : > { %v11051_v6 = vpop.permute.xlu1 %2090 }
 0x2ec   : > { %17632 = vst [vmem:[#allocation191_spill] sm:$0xff] %v11051_v6  ;;  %v11053_v41 = vpop.permute.xlu0 %2088 }
 0x2ed   : > { %17633 = vst [vmem:[#allocation192_spill] sm:$0xff] %v11053_v41  ;;  %2274 = vrot.lane.b32.xlu1 %v17634_v13, %s8539_s14  ;;  %v17642_v41 = vld [vmem:[#allocation203_spill] sm:$0xff]  ;;  %v17643_v13 = vld [vmem:[#allocation204_spill] sm:$0xff] }
 0x2ee   : > { %2272 = vrot.lane.b32.xlu0 %v17635_v38, %s8539_s14 }
 0x2ef   : > { %v11059_v4 = vpop.permute.xlu1 %2094 }
 0x2f0   : > { %17636 = vst [vmem:[#allocation195_spill] sm:$0xff] %v11059_v4  ;;  %v11061_v33 = vpop.permute.xlu0 %2092 }
 0x2f1   : > { %17637 = vst [vmem:[#allocation196_spill] sm:$0xff] %v11061_v33  ;;  %2278 = vrot.lane.b32.xlu1 %v17638_v42, %s8539_s14  ;;  %v17646_v33 = vld [vmem:[#allocation207_spill] sm:$0xff]  ;;  %v17647_v42 = vld [vmem:[#allocation208_spill] sm:$0xff] }
 0x2f2   : > { %2276 = vrot.lane.b32.xlu0 %v17639_v48, %s8539_s14 }
 0x2f3   : > { %v11067_v63 = vpop.permute.xlu1 %2098 }
 0x2f4   : > { %17640 = vst [vmem:[#allocation199_spill] sm:$0xff] %v11067_v63  ;;  %v11069_v6 = vpop.permute.xlu0 %2096 }
 0x2f5   : > { %17641 = vst [vmem:[#allocation200_spill] sm:$0xff] %v11069_v6  ;;  %2282 = vrot.lane.b32.xlu1 %v17642_v41, %s8539_s14  ;;  %v17650_v6 = vld [vmem:[#allocation211_spill] sm:$0xff]  ;;  %v17651_v41 = vld [vmem:[#allocation212_spill] sm:$0xff] }
 0x2f6   : > { %2280 = vrot.lane.b32.xlu0 %v17643_v13, %s8539_s14 }
 0x2f7   : > { %v11075_v38 = vpop.permute.xlu1 %2102 }
 0x2f8   : > { %17644 = vst [vmem:[#allocation203_spill] sm:$0xff] %v11075_v38  ;;  %v11077_v4 = vpop.permute.xlu0 %2100 }
 0x2f9   : > { %17645 = vst [vmem:[#allocation204_spill] sm:$0xff] %v11077_v4  ;;  %2286 = vrot.lane.b32.xlu1 %v17646_v33, %s8539_s14  ;;  %v17654_v4 = vld [vmem:[#allocation215_spill] sm:$0xff]  ;;  %v17655_v33 = vld [vmem:[#allocation216_spill] sm:$0xff] }
 0x2fa   : > { %2284 = vrot.lane.b32.xlu0 %v17647_v42, %s8539_s14 }
 0x2fb   : > { %v11083_v48 = vpop.permute.xlu1 %2106 }
 0x2fc   : > { %17648 = vst [vmem:[#allocation207_spill] sm:$0xff] %v11083_v48  ;;  %v11085_v63 = vpop.permute.xlu0 %2104 }
 0x2fd   : > { %17649 = vst [vmem:[#allocation208_spill] sm:$0xff] %v11085_v63  ;;  %2290 = vrot.lane.b32.xlu1 %v17650_v6, %s8539_s14  ;;  %v17658_v63 = vld [vmem:[#allocation219_spill] sm:$0xff]  ;;  %v17659_v6 = vld [vmem:[#allocation220_spill] sm:$0xff] }
 0x2fe   : > { %2288 = vrot.lane.b32.xlu0 %v17651_v41, %s8539_s14 }
 0x2ff   : > { %v11091_v13 = vpop.permute.xlu1 %2110 }
 0x300   : > { %17652 = vst [vmem:[#allocation211_spill] sm:$0xff] %v11091_v13  ;;  %v11093_v38 = vpop.permute.xlu0 %2108  ;;  %v17671_v13 = vld [vmem:[#allocation232_spill] sm:$0xff] }
 0x301   : > { %17653 = vst [vmem:[#allocation212_spill] sm:$0xff] %v11093_v38  ;;  %2294 = vrot.lane.b32.xlu1 %v17654_v4, %s8539_s14  ;;  %v17662_v4 = vld [vmem:[#allocation223_spill] sm:$0xff] }
 0x302   : > { %2292 = vrot.lane.b32.xlu0 %v17655_v33, %s8539_s14  ;;  %v17663_v33 = vld [vmem:[#allocation224_spill] sm:$0xff] }
 0x303   : > { %v11099_v42 = vpop.permute.xlu1 %2114 }
 0x304   : > { %17656 = vst [vmem:[#allocation215_spill] sm:$0xff] %v11099_v42  ;;  %v11101_v48 = vpop.permute.xlu0 %2112 }
 0x305   : > { %17657 = vst [vmem:[#allocation216_spill] sm:$0xff] %v11101_v48  ;;  %2298 = vrot.lane.b32.xlu1 %v17658_v63, %s8539_s14  ;;  %v17666_v63 = vld [vmem:[#allocation227_spill] sm:$0xff] }
 0x306   : > { %2296 = vrot.lane.b32.xlu0 %v17659_v6, %s8539_s14  ;;  %v17667_v6 = vld [vmem:[#allocation228_spill] sm:$0xff] }
 0x307   : > { %v11107_v41 = vpop.permute.xlu1 %2118 }
 0x308   : > { %17660 = vst [vmem:[#allocation219_spill] sm:$0xff] %v11107_v41  ;;  %v11109_v38 = vpop.permute.xlu0 %2116 }
 0x309   : > { %17661 = vst [vmem:[#allocation220_spill] sm:$0xff] %v11109_v38  ;;  %2302 = vrot.lane.b32.xlu1 %v17662_v4, %s8539_s14  ;;  %v17670_v4 = vld [vmem:[#allocation231_spill] sm:$0xff] }
 0x30a   : > { %2300 = vrot.lane.b32.xlu0 %v17663_v33, %s8539_s14 }
 0x30b   : > { %v11115_v42 = vpop.permute.xlu1 %2122 }
 0x30c   : > { %17664 = vst [vmem:[#allocation223_spill] sm:$0xff] %v11115_v42  ;;  %v11117_v48 = vpop.permute.xlu0 %2120 }
 0x30d   : > { %17665 = vst [vmem:[#allocation224_spill] sm:$0xff] %v11117_v48  ;;  %2306 = vrot.lane.b32.xlu1 %v17666_v63, %s8539_s14  ;;  %v11140_v63 = vld [vmem:[%s8869_s22 + $0x1a0] sm:$0xff] }
 0x30e   : > { %2304 = vrot.lane.b32.xlu0 %v17667_v6, %s8539_s14 }
 0x30f   : > { %v11123_v41 = vpop.permute.xlu1 %2126 }
 0x310   : > { %17668 = vst [vmem:[#allocation227_spill] sm:$0xff] %v11123_v41  ;;  %v11125_v38 = vpop.permute.xlu0 %2124 }
 0x311   : > { %17669 = vst [vmem:[#allocation228_spill] sm:$0xff] %v11125_v38  ;;  %2310 = vrot.lane.b32.xlu1 %v17670_v4, %s8539_s14  ;;  %v11145_v4 = vld [vmem:[%s8869_s22 + $0x198] sm:$0xff]  ;;  %v11279_v38 = vld [vmem:[%s8869_s22 + $0x348] sm:$0xff] }
 0x312   : > { %2308 = vrot.lane.b32.xlu0 %v17671_v13, %s8539_s14 }
 0x313   : > { %v11131_v33 = vpop.permute.xlu1 %2130 }
 0x314   : > { %17672 = vst [vmem:[#allocation231_spill] sm:$0xff] %v11131_v33  ;;  %v11133_v48 = vpop.permute.xlu0 %2128  ;;  %v8379_v33 = vld [vmem:[%s8869_s22 + $0x1f8] sm:$0xff] }
 0x315   : > { %17673 = vst [vmem:[#allocation232_spill] sm:$0xff] %v11133_v48  ;;  %2314 = vrot.lane.b32.xlu1 %v10312_v0, %s8539_s14 }
 0x316   : > { %2312 = vrot.lane.b32.xlu0 %v10317_v30, %s8539_s14 }
 0x317   : > { %v11142_v6 = vpop.permute.xlu1 %2134 }
 0x318   : > { %17674 = vst [vmem:[#allocation369_spill] sm:$0xff] %v11142_v6  ;;  %v11147_v13 = vpop.permute.xlu0 %2132  ;;  %v8378_v6 = vld [vmem:[%s8869_s22 + $0x200] sm:$0xff] }
 0x319   : > { %17675 = vst [vmem:[#allocation370_spill] sm:$0xff] %v11147_v13  ;;  %2318 = vrot.lane.b32.xlu1 %v11140_v63, %s8539_s14 }
 0x31a   : > { %2316 = vrot.lane.b32.xlu0 %v11145_v4, %s8539_s14 }
 0x31b   : > { %v11153_v0 = vpop.permute.xlu1 %2138 }
 0x31c   : > { %17676 = vst [vmem:[#allocation371_spill] sm:$0xff] %v11153_v0  ;;  %v11155_v48 = vpop.permute.xlu0 %2136  ;;  %v8380_v0 = vld [vmem:[%s8869_s22 + $0x218] sm:$0xff] }
 0x31d   : > { %17677 = vst [vmem:[#allocation372_spill] sm:$0xff] %v11155_v48  ;;  %2322 = vrot.lane.b32.xlu1 %v10338_v9, %s8539_s14 }
 0x31e   : > { %2320 = vrot.lane.b32.xlu0 %v10343_v20, %s8539_s14  ;;  %v8381_v20 = vld [vmem:[%s8869_s22 + $0x210] sm:$0xff] }
 0x31f   : > { %v11161_v30 = vpop.permute.xlu1 %2142 }
 0x320   : > { %17678 = vst [vmem:[#allocation373_spill] sm:$0xff] %v11161_v30  ;;  %v11163_v13 = vpop.permute.xlu0 %2140  ;;  %v8382_v30 = vld [vmem:[%s8869_s22 + $0x230] sm:$0xff] }
 0x321   : > { %17679 = vst [vmem:[#allocation374_spill] sm:$0xff] %v11163_v13  ;;  %2326 = vrot.lane.b32.xlu1 %v8378_v6, %s8539_s14 }
 0x322   : > { %2324 = vrot.lane.b32.xlu0 %v8379_v33, %s8539_s14  ;;  %v8383_v33 = vld [vmem:[%s8869_s22 + $0x228] sm:$0xff] }
 0x323   : > { %v11169_v48 = vpop.permute.xlu1 %2146 }
 0x324   : > { %17680 = vst [vmem:[#allocation375_spill] sm:$0xff] %v11169_v48  ;;  %v11171_v9 = vpop.permute.xlu0 %2144  ;;  %v8384_v48 = vld [vmem:[%s8869_s22 + $0x248] sm:$0xff] }
 0x325   : > { %17681 = vst [vmem:[#allocation376_spill] sm:$0xff] %v11171_v9  ;;  %2330 = vrot.lane.b32.xlu1 %v8380_v0, %s8539_s14 }
 0x326   : > { %2328 = vrot.lane.b32.xlu0 %v8381_v20, %s8539_s14  ;;  %v8385_v20 = vld [vmem:[%s8869_s22 + $0x240] sm:$0xff] }
 0x327   : > { %v11177_v13 = vpop.permute.xlu1 %2150 }
 0x328   : > { %17682 = vst [vmem:[#allocation377_spill] sm:$0xff] %v11177_v13  ;;  %v11179_v6 = vpop.permute.xlu0 %2148  ;;  %v8386_v13 = vld [vmem:[%s8869_s22 + $0x260] sm:$0xff] }
 0x329   : > { %17683 = vst [vmem:[#allocation378_spill] sm:$0xff] %v11179_v6  ;;  %2334 = vrot.lane.b32.xlu1 %v8382_v30, %s8539_s14 }
 0x32a   : > { %2332 = vrot.lane.b32.xlu0 %v8383_v33, %s8539_s14  ;;  %v8387_v33 = vld [vmem:[%s8869_s22 + $0x258] sm:$0xff] }
 0x32b   : > { %v11185_v9 = vpop.permute.xlu1 %2154 }
 0x32c   : > { %17684 = vst [vmem:[#allocation379_spill] sm:$0xff] %v11185_v9  ;;  %v11187_v0 = vpop.permute.xlu0 %2152  ;;  %v8388_v9 = vld [vmem:[%s8869_s22 + $0x278] sm:$0xff] }
 0x32d   : > { %17685 = vst [vmem:[#allocation380_spill] sm:$0xff] %v11187_v0  ;;  %2338 = vrot.lane.b32.xlu1 %v8384_v48, %s8539_s14 }
 0x32e   : > { %2336 = vrot.lane.b32.xlu0 %v8385_v20, %s8539_s14  ;;  %v8389_v20 = vld [vmem:[%s8869_s22 + $0x270] sm:$0xff] }
 0x32f   : > { %v11193_v6 = vpop.permute.xlu1 %2158 }
 0x330   : > { %17686 = vst [vmem:[#allocation381_spill] sm:$0xff] %v11193_v6  ;;  %v11195_v30 = vpop.permute.xlu0 %2156  ;;  %v8390_v6 = vld [vmem:[%s8869_s22 + $0x290] sm:$0xff] }
 0x331   : > { %17687 = vst [vmem:[#allocation382_spill] sm:$0xff] %v11195_v30  ;;  %2342 = vrot.lane.b32.xlu1 %v8386_v13, %s8539_s14 }
 0x332   : > { %2340 = vrot.lane.b32.xlu0 %v8387_v33, %s8539_s14  ;;  %v8391_v33 = vld [vmem:[%s8869_s22 + $0x288] sm:$0xff] }
 0x333   : > { %v11201_v0 = vpop.permute.xlu1 %2162 }
 0x334   : > { %17688 = vst [vmem:[#allocation383_spill] sm:$0xff] %v11201_v0  ;;  %v11203_v48 = vpop.permute.xlu0 %2160  ;;  %v8392_v0 = vld [vmem:[%s8869_s22 + $0x2a8] sm:$0xff] }
 0x335   : > { %17689 = vst [vmem:[#allocation384_spill] sm:$0xff] %v11203_v48  ;;  %2346 = vrot.lane.b32.xlu1 %v8388_v9, %s8539_s14 }
 0x336   : > { %2344 = vrot.lane.b32.xlu0 %v8389_v20, %s8539_s14  ;;  %v8393_v20 = vld [vmem:[%s8869_s22 + $0x2a0] sm:$0xff] }
 0x337   : > { %v11209_v30 = vpop.permute.xlu1 %2166 }
 0x338   : > { %17690 = vst [vmem:[#allocation385_spill] sm:$0xff] %v11209_v30  ;;  %v11211_v13 = vpop.permute.xlu0 %2164  ;;  %v8394_v30 = vld [vmem:[%s8869_s22 + $0x2c0] sm:$0xff] }
 0x339   : > { %17691 = vst [vmem:[#allocation386_spill] sm:$0xff] %v11211_v13  ;;  %2350 = vrot.lane.b32.xlu1 %v8390_v6, %s8539_s14 }
 0x33a   : > { %2348 = vrot.lane.b32.xlu0 %v8391_v33, %s8539_s14  ;;  %v8395_v33 = vld [vmem:[%s8869_s22 + $0x2b8] sm:$0xff] }
 0x33b   : > { %v11217_v48 = vpop.permute.xlu1 %2170 }
 0x33c   : > { %17692 = vst [vmem:[#allocation387_spill] sm:$0xff] %v11217_v48  ;;  %v11219_v9 = vpop.permute.xlu0 %2168  ;;  %v8396_v48 = vld [vmem:[%s8869_s22 + $0x2d8] sm:$0xff] }
 0x33d   : > { %17693 = vst [vmem:[#allocation388_spill] sm:$0xff] %v11219_v9  ;;  %2354 = vrot.lane.b32.xlu1 %v8392_v0, %s8539_s14 }
 0x33e   : > { %2352 = vrot.lane.b32.xlu0 %v8393_v20, %s8539_s14  ;;  %v8397_v20 = vld [vmem:[%s8869_s22 + $0x2d0] sm:$0xff] }
 0x33f   : > { %v11225_v13 = vpop.permute.xlu1 %2174 }
 0x340   : > { %17694 = vst [vmem:[#allocation389_spill] sm:$0xff] %v11225_v13  ;;  %v11227_v6 = vpop.permute.xlu0 %2172  ;;  %v8398_v13 = vld [vmem:[%s8869_s22 + $0x2f0] sm:$0xff] }
 0x341   : > { %17695 = vst [vmem:[#allocation390_spill] sm:$0xff] %v11227_v6  ;;  %2358 = vrot.lane.b32.xlu1 %v8394_v30, %s8539_s14 }
 0x342   : > { %2356 = vrot.lane.b32.xlu0 %v8395_v33, %s8539_s14  ;;  %v8399_v33 = vld [vmem:[%s8869_s22 + $0x2e8] sm:$0xff] }
 0x343   : > { %v11233_v9 = vpop.permute.xlu1 %2178 }
 0x344   : > { %17696 = vst [vmem:[#allocation391_spill] sm:$0xff] %v11233_v9  ;;  %v11235_v0 = vpop.permute.xlu0 %2176 }
 0x345   : > { %17697 = vst [vmem:[#allocation392_spill] sm:$0xff] %v11235_v0  ;;  %2362 = vrot.lane.b32.xlu1 %v8396_v48, %s8539_s14  ;;  %v8400_v48 = vld [vmem:[%s8869_s22 + $0x308] sm:$0xff] }
 0x346   : > { %2360 = vrot.lane.b32.xlu0 %v8397_v20, %s8539_s14  ;;  %v8401_v20 = vld [vmem:[%s8869_s22 + $0x300] sm:$0xff] }
 0x347   : > { %v11241_v6 = vpop.permute.xlu1 %2182 }
 0x348   : > { %17698 = vst [vmem:[#allocation393_spill] sm:$0xff] %v11241_v6  ;;  %v11243_v30 = vpop.permute.xlu0 %2180 }
 0x349   : > { %17699 = vst [vmem:[#allocation394_spill] sm:$0xff] %v11243_v30  ;;  %2366 = vrot.lane.b32.xlu1 %v8398_v13, %s8539_s14  ;;  %v8402_v13 = vld [vmem:[%s8869_s22 + $0x320] sm:$0xff] }
 0x34a   : > { %2364 = vrot.lane.b32.xlu0 %v8399_v33, %s8539_s14  ;;  %v8403_v33 = vld [vmem:[%s8869_s22 + $0x318] sm:$0xff] }
 0x34b   : > { %v11249_v9 = vpop.permute.xlu1 %2186 }
 0x34c   : > { %17700 = vst [vmem:[#allocation395_spill] sm:$0xff] %v11249_v9  ;;  %v11251_v0 = vpop.permute.xlu0 %2184 }
 0x34d   : > { %17701 = vst [vmem:[#allocation396_spill] sm:$0xff] %v11251_v0  ;;  %2370 = vrot.lane.b32.xlu1 %v8400_v48, %s8539_s14  ;;  %v11274_v48 = vld [vmem:[%s8869_s22 + $0x350] sm:$0xff] }
 0x34e   : > { %2368 = vrot.lane.b32.xlu0 %v8401_v20, %s8539_s14 }
 0x34f   : > { %v11257_v6 = vpop.permute.xlu1 %2258 }
 0x350   : > { %v11259_v30 = vpop.permute.xlu0 %2256 }
 0x351   : > { %2374 = vrot.lane.b32.xlu1 %v8402_v13, %s8539_s14 }
 0x352   : > { %2372 = vrot.lane.b32.xlu0 %v8403_v33, %s8539_s14 }
 0x353   : > { %v11265_v9 = vpop.permute.xlu1 %2262 }
 0x354   : > { %v11267_v0 = vpop.permute.xlu0 %2260 }
 0x355   : > { %2378 = vrot.lane.b32.xlu1 %v10452_v17, %s8539_s14 }
 0x356   : > { %2376 = vrot.lane.b32.xlu0 %v10457_v29, %s8539_s14 }
 0x357   : > { %v11276_v20 = vpop.permute.xlu1 %2266 }
 0x358   : > { %v11281_v13 = vpop.permute.xlu0 %2264 }
 0x359   : > { %2382 = vrot.lane.b32.xlu1 %v11274_v48, %s8539_s14 }
 0x35a   : > { %2380 = vrot.lane.b32.xlu0 %v11279_v38, %s8539_s14 }
 0x35b   : > { %v11287_v33 = vpop.permute.xlu1 %2270 }
 0x35c   : > { %v11289_v17 = vpop.permute.xlu0 %2268 }
 0x35d   : > { %17702 = vst [vmem:[#allocation397_spill] sm:$0xff] %v11289_v17  ;;  %2462 = vrot.lane.b32.xlu1 %v17397_v16, %s8540_s15 }
 0x35e   : > { %2460 = vrot.lane.b32.xlu0 %v17398_v22, %s8540_s15 }
 0x35f   : > { %v11295_v29 = vpop.permute.xlu1 %2274 }
 0x360   : > { %v11297_v41 = vpop.permute.xlu0 %2272 }
 0x361   : > { %2466 = vrot.lane.b32.xlu1 %v17401_v51, %s8540_s15 }
 0x362   : > { %2464 = vrot.lane.b32.xlu0 %v17402_v56, %s8540_s15 }
 0x363   : > { %v11303_v42 = vpop.permute.xlu1 %2278 }
 0x364   : > { %v11305_v17 = vpop.permute.xlu0 %2276 }
 0x365   : > { %2470 = vrot.lane.b32.xlu1 %v17405_v52, %s8540_s15 }
 0x366   : > { %2468 = vrot.lane.b32.xlu0 %v17406_v44, %s8540_s15 }
 0x367   : > { %v11311_v22 = vpop.permute.xlu1 %2282 }
 0x368   : > { %v11313_v16 = vpop.permute.xlu0 %2280 }
 0x369   : > { %2474 = vrot.lane.b32.xlu1 %v17409_v53, %s8540_s15 }
 0x36a   : > { %2472 = vrot.lane.b32.xlu0 %v17410_v25, %s8540_s15 }
 0x36b   : > { %v11319_v51 = vpop.permute.xlu1 %2286 }
 0x36c   : > { %v11321_v56 = vpop.permute.xlu0 %2284 }
 0x36d   : > { %17703 = vst [vmem:[#allocation398_spill] sm:$0xff] %v11321_v56  ;;  %2478 = vrot.lane.b32.xlu1 %v17413_v15, %s8540_s15 }
 0x36e   : > { %2476 = vrot.lane.b32.xlu0 %v17414_v60, %s8540_s15 }
 0x36f   : > { %v11327_v44 = vpop.permute.xlu1 %2290 }
 0x370   : > { %17704 = vst [vmem:[#allocation399_spill] sm:$0xff] %v11327_v44  ;;  %v11329_v52 = vpop.permute.xlu0 %2288 }
 0x371   : > { %17705 = vst [vmem:[#allocation400_spill] sm:$0xff] %v11329_v52  ;;  %2482 = vrot.lane.b32.xlu1 %v17417_v36, %s8540_s15 }
 0x372   : > { %2480 = vrot.lane.b32.xlu0 %v17418_v57, %s8540_s15 }
 0x373   : > { %v11335_v25 = vpop.permute.xlu1 %2294 }
 0x374   : > { %17706 = vst [vmem:[#allocation401_spill] sm:$0xff] %v11335_v25  ;;  %v11337_v53 = vpop.permute.xlu0 %2292  ;;  %v17880_v25 = vld [vmem:[#allocation123_spill] sm:$0xff] }
 0x375   : > { %17707 = vst [vmem:[#allocation402_spill] sm:$0xff] %v11337_v53  ;;  %2486 = vrot.lane.b32.xlu1 %v17421_v14, %s8540_s15 }
 0x376   : > { %2484 = vrot.lane.b32.xlu0 %v17422_v31, %s8540_s15 }
 0x377   : > { %v11343_v15 = vpop.permute.xlu1 %2298 }
 0x378   : > { %17708 = vst [vmem:[#allocation403_spill] sm:$0xff] %v11343_v15  ;;  %v11345_v60 = vpop.permute.xlu0 %2296 }
 0x379   : > { %17709 = vst [vmem:[#allocation404_spill] sm:$0xff] %v11345_v60  ;;  %2490 = vrot.lane.b32.xlu1 %v17425_v8, %s8540_s15  ;;  %v17714_v60 = vld [vmem:[#allocation26_spill] sm:$0xff]  ;;  %v17715_v8 = vld [vmem:[#allocation27_spill] sm:$0xff] }
 0x37a   : > { %2488 = vrot.lane.b32.xlu0 %v17426_v12, %s8540_s15 }
 0x37b   : > { %v11351_v36 = vpop.permute.xlu1 %2302 }
 0x37c   : > { %17710 = vst [vmem:[#allocation405_spill] sm:$0xff] %v11351_v36  ;;  %v11353_v57 = vpop.permute.xlu0 %2300  ;;  %v17722_v36 = vld [vmem:[#allocation30_spill] sm:$0xff] }
 0x37d   : > { %17711 = vst [vmem:[#allocation406_spill] sm:$0xff] %v11353_v57  ;;  %2494 = vrot.lane.b32.xlu1 %v17429_v62, %s8540_s15  ;;  %v17718_v62 = vld [vmem:[#allocation28_spill] sm:$0xff] }
 0x37e   : > { %2492 = vrot.lane.b32.xlu0 %v17430_v50, %s8540_s15  ;;  %v17719_v50 = vld [vmem:[#allocation29_spill] sm:$0xff] }
 0x37f   : > { %v11359_v14 = vpop.permute.xlu1 %2306 }
 0x380   : > { %17712 = vst [vmem:[#allocation407_spill] sm:$0xff] %v11359_v14  ;;  %v11361_v31 = vpop.permute.xlu0 %2304 }
 0x381   : > { %17713 = vst [vmem:[#allocation408_spill] sm:$0xff] %v11361_v31  ;;  %2498 = vrot.lane.b32.xlu1 %v17714_v60, %s8540_s15  ;;  %v17723_v60 = vld [vmem:[#allocation31_spill] sm:$0xff] }
 0x382   : > { %2496 = vrot.lane.b32.xlu0 %v17715_v8, %s8540_s15 }
 0x383   : > { %v11367_v12 = vpop.permute.xlu1 %2310 }
 0x384   : > { %17716 = vst [vmem:[#allocation26_spill] sm:$0xff] %v11367_v12  ;;  %v11369_v57 = vpop.permute.xlu0 %2308 }
 0x385   : > { %17717 = vst [vmem:[#allocation27_spill] sm:$0xff] %v11369_v57  ;;  %2502 = vrot.lane.b32.xlu1 %v17718_v62, %s8540_s15  ;;  %v17726_v57 = vld [vmem:[#allocation32_spill] sm:$0xff]  ;;  %v17727_v62 = vld [vmem:[#allocation33_spill] sm:$0xff] }
 0x386   : > { %2500 = vrot.lane.b32.xlu0 %v17719_v50, %s8540_s15 }
 0x387   : > { %v11375_v14 = vpop.permute.xlu1 %2314 }
 0x388   : > { %17720 = vst [vmem:[#allocation28_spill] sm:$0xff] %v11375_v14  ;;  %v11377_v31 = vpop.permute.xlu0 %2312  ;;  %v11394_v14 = vld [vmem:[%s8869_s22 + $0x1a8] sm:$0x3] }
 0x389   : > { %17721 = vst [vmem:[#allocation29_spill] sm:$0xff] %v11377_v31  ;;  %2506 = vrot.lane.b32.xlu1 %v17722_v36, %s8540_s15  ;;  %v2451_v36 = vrot.slane %v11140_v63, 1 }
 0x38a   : > { %2504 = vrot.lane.b32.xlu0 %v17723_v60, %s8540_s15  ;;  %v2453_v60 = vrot.slane %v11394_v14, 1 }
 0x38b   : > { %v11383_v8 = vpop.permute.xlu1 %2318 }
 0x38c   : > { %17724 = vst [vmem:[#allocation30_spill] sm:$0xff] %v11383_v8  ;;  %v11385_v12 = vpop.permute.xlu0 %2316 }
 0x38d   : > { %17725 = vst [vmem:[#allocation31_spill] sm:$0xff] %v11385_v12  ;;  %2510 = vrot.lane.b32.xlu1 %v17726_v57, %s8540_s15  ;;  %v2450_v57 = vrot.slane %v11145_v4, 1 }
 0x38e   : > { %2508 = vrot.lane.b32.xlu0 %v17727_v62, %s8540_s15 }
 0x38f   : > { %v11391_v50 = vpop.permute.xlu1 %2322 }
 0x390   : > { %17728 = vst [vmem:[#allocation32_spill] sm:$0xff] %v11391_v50  ;;  %v11396_v31 = vpop.permute.xlu0 %2320  ;;  %v17732_v50 = vld [vmem:[#allocation37_spill] sm:$0xff] }
 0x391   : > { %17729 = vst [vmem:[#allocation33_spill] sm:$0xff] %v11396_v31  ;;  %2514 = vrot.lane.b32.xlu1 %v17449_v39, %s8540_s15  ;;  %v17733_v31 = vld [vmem:[#allocation277_spill] sm:$0xff]  ;;  %v2454_v39 = vsel %vm944_vm0, %v2451_v36, %v2453_v60 }
 0x392   : > { %2512 = vrot.lane.b32.xlu0 %v17450_v32, %s8540_s15  ;;  %v2452_v32 = vsel %vm944_vm0, %v2450_v57, %v2451_v36  ;;  %v17742_v36 = vld [vmem:[#allocation55_spill] sm:$0xff]  ;;  %v17743_v57 = vld [vmem:[#allocation56_spill] sm:$0xff] }
 0x393   : > { %v11405_v12 = vpop.permute.xlu1 %2326 }
 0x394   : > { %17730 = vst [vmem:[#allocation409_spill] sm:$0xff] %v11405_v12  ;;  %v11407_v62 = vpop.permute.xlu0 %2324 }
 0x395   : > { %17731 = vst [vmem:[#allocation410_spill] sm:$0xff] %v11407_v62  ;;  %2518 = vrot.lane.b32.xlu1 %v17732_v50, %s8540_s15  ;;  %v17738_v50 = vld [vmem:[#allocation50_spill] sm:$0xff] }
 0x396   : > { %2516 = vrot.lane.b32.xlu0 %v17733_v31, %s8540_s15  ;;  %v17739_v31 = vld [vmem:[#allocation51_spill] sm:$0xff] }
 0x397   : > { %v11414_v8 = vpop.permute.xlu1 %2330 }
 0x398   : > { %17734 = vst [vmem:[#allocation37_spill] sm:$0xff] %v11414_v8  ;;  %v11417_v15 = vpop.permute.xlu0 %2328 }
 0x399   : > { %17735 = vst [vmem:[#allocation277_spill] sm:$0xff] %v11417_v15  ;;  %2522 = vrot.lane.b32.xlu1 %v2454_v39, %s8540_s15 }
 0x39a   : > { %2520 = vrot.lane.b32.xlu0 %v2452_v32, %s8540_s15 }
 0x39b   : > { %v11421_v12 = vpop.permute.xlu1 %2334 }
 0x39c   : > { %17736 = vst [vmem:[#allocation411_spill] sm:$0xff] %v11421_v12  ;;  %v11423_v62 = vpop.permute.xlu0 %2332 }
 0x39d   : > { %17737 = vst [vmem:[#allocation412_spill] sm:$0xff] %v11423_v62  ;;  %2526 = vrot.lane.b32.xlu1 %v17738_v50, %s8540_s15  ;;  %v17746_v62 = vld [vmem:[#allocation60_spill] sm:$0xff]  ;;  %v17747_v50 = vld [vmem:[#allocation61_spill] sm:$0xff] }
 0x39e   : > { %2524 = vrot.lane.b32.xlu0 %v17739_v31, %s8540_s15 }
 0x39f   : > { %v11429_v60 = vpop.permute.xlu1 %2338 }
 0x3a0   : > { %17740 = vst [vmem:[#allocation50_spill] sm:$0xff] %v11429_v60  ;;  %v11431_v8 = vpop.permute.xlu0 %2336 }
 0x3a1   : > { %17741 = vst [vmem:[#allocation51_spill] sm:$0xff] %v11431_v8  ;;  %2530 = vrot.lane.b32.xlu1 %v17742_v36, %s8540_s15  ;;  %v17750_v8 = vld [vmem:[#allocation65_spill] sm:$0xff]  ;;  %v17751_v36 = vld [vmem:[#allocation66_spill] sm:$0xff] }
 0x3a2   : > { %2528 = vrot.lane.b32.xlu0 %v17743_v57, %s8540_s15 }
 0x3a3   : > { %v11437_v39 = vpop.permute.xlu1 %2342 }
 0x3a4   : > { %17744 = vst [vmem:[#allocation55_spill] sm:$0xff] %v11437_v39  ;;  %v11439_v32 = vpop.permute.xlu0 %2340 }
 0x3a5   : > { %17745 = vst [vmem:[#allocation56_spill] sm:$0xff] %v11439_v32  ;;  %2534 = vrot.lane.b32.xlu1 %v17746_v62, %s8540_s15  ;;  %v17754_v32 = vld [vmem:[#allocation70_spill] sm:$0xff]  ;;  %v17755_v62 = vld [vmem:[#allocation71_spill] sm:$0xff] }
 0x3a6   : > { %2532 = vrot.lane.b32.xlu0 %v17747_v50, %s8540_s15 }
 0x3a7   : > { %v11445_v31 = vpop.permute.xlu1 %2346 }
 0x3a8   : > { %17748 = vst [vmem:[#allocation60_spill] sm:$0xff] %v11445_v31  ;;  %v11447_v60 = vpop.permute.xlu0 %2344 }
 0x3a9   : > { %17749 = vst [vmem:[#allocation61_spill] sm:$0xff] %v11447_v60  ;;  %2538 = vrot.lane.b32.xlu1 %v17750_v8, %s8540_s15  ;;  %v17758_v60 = vld [vmem:[#allocation75_spill] sm:$0xff]  ;;  %v17759_v8 = vld [vmem:[#allocation76_spill] sm:$0xff] }
 0x3aa   : > { %2536 = vrot.lane.b32.xlu0 %v17751_v36, %s8540_s15 }
 0x3ab   : > { %v11453_v57 = vpop.permute.xlu1 %2350 }
 0x3ac   : > { %17752 = vst [vmem:[#allocation65_spill] sm:$0xff] %v11453_v57  ;;  %v11455_v39 = vpop.permute.xlu0 %2348 }
 0x3ad   : > { %17753 = vst [vmem:[#allocation66_spill] sm:$0xff] %v11455_v39  ;;  %2542 = vrot.lane.b32.xlu1 %v17754_v32, %s8540_s15  ;;  %v17762_v39 = vld [vmem:[#allocation80_spill] sm:$0xff]  ;;  %v17763_v32 = vld [vmem:[#allocation81_spill] sm:$0xff] }
 0x3ae   : > { %2540 = vrot.lane.b32.xlu0 %v17755_v62, %s8540_s15 }
 0x3af   : > { %v11461_v50 = vpop.permute.xlu1 %2354 }
 0x3b0   : > { %17756 = vst [vmem:[#allocation70_spill] sm:$0xff] %v11461_v50  ;;  %v11463_v31 = vpop.permute.xlu0 %2352 }
 0x3b1   : > { %17757 = vst [vmem:[#allocation71_spill] sm:$0xff] %v11463_v31  ;;  %2546 = vrot.lane.b32.xlu1 %v17758_v60, %s8540_s15  ;;  %v17766_v31 = vld [vmem:[#allocation85_spill] sm:$0xff]  ;;  %v17767_v60 = vld [vmem:[#allocation86_spill] sm:$0xff] }
 0x3b2   : > { %2544 = vrot.lane.b32.xlu0 %v17759_v8, %s8540_s15 }
 0x3b3   : > { %v11469_v36 = vpop.permute.xlu1 %2358 }
 0x3b4   : > { %17760 = vst [vmem:[#allocation75_spill] sm:$0xff] %v11469_v36  ;;  %v11471_v57 = vpop.permute.xlu0 %2356 }
 0x3b5   : > { %17761 = vst [vmem:[#allocation76_spill] sm:$0xff] %v11471_v57  ;;  %2550 = vrot.lane.b32.xlu1 %v17762_v39, %s8540_s15  ;;  %v17770_v57 = vld [vmem:[#allocation90_spill] sm:$0xff]  ;;  %v17771_v39 = vld [vmem:[#allocation91_spill] sm:$0xff] }
 0x3b6   : > { %2548 = vrot.lane.b32.xlu0 %v17763_v32, %s8540_s15 }
 0x3b7   : > { %v11477_v62 = vpop.permute.xlu1 %2362 }
 0x3b8   : > { %17764 = vst [vmem:[#allocation80_spill] sm:$0xff] %v11477_v62  ;;  %v11479_v50 = vpop.permute.xlu0 %2360 }
 0x3b9   : > { %17765 = vst [vmem:[#allocation81_spill] sm:$0xff] %v11479_v50  ;;  %2554 = vrot.lane.b32.xlu1 %v17766_v31, %s8540_s15  ;;  %v17774_v50 = vld [vmem:[#allocation95_spill] sm:$0xff]  ;;  %v17775_v31 = vld [vmem:[#allocation96_spill] sm:$0xff] }
 0x3ba   : > { %2552 = vrot.lane.b32.xlu0 %v17767_v60, %s8540_s15 }
 0x3bb   : > { %v11485_v8 = vpop.permute.xlu1 %2366 }
 0x3bc   : > { %17768 = vst [vmem:[#allocation85_spill] sm:$0xff] %v11485_v8  ;;  %v11487_v36 = vpop.permute.xlu0 %2364 }
 0x3bd   : > { %17769 = vst [vmem:[#allocation86_spill] sm:$0xff] %v11487_v36  ;;  %2558 = vrot.lane.b32.xlu1 %v17770_v57, %s8540_s15  ;;  %v17778_v57 = vld [vmem:[#allocation101_spill] sm:$0xff] }
 0x3be   : > { %2556 = vrot.lane.b32.xlu0 %v17771_v39, %s8540_s15 }
 0x3bf   : > { %v11493_v32 = vpop.permute.xlu1 %2370 }
 0x3c0   : > { %17772 = vst [vmem:[#allocation90_spill] sm:$0xff] %v11493_v32  ;;  %v11495_v62 = vpop.permute.xlu0 %2368 }
 0x3c1   : > { %17773 = vst [vmem:[#allocation91_spill] sm:$0xff] %v11495_v62  ;;  %2562 = vrot.lane.b32.xlu1 %v17774_v50, %s8540_s15  ;;  %v3379_v50 = vld [vmem:[%s16403_s1 + $0x20] sm:$0xf] }
 0x3c2   : > { %2560 = vrot.lane.b32.xlu0 %v17775_v31, %s8540_s15  ;;  %v17781_v31 = vld [vmem:[#allocation104_spill] sm:$0xff]  ;;  %8024 = vmatprep.subr.msk.mxu0 %vm3579_vm2, %v3379_v50 }
 0x3c3   : > { %v11501_v60 = vpop.permute.xlu1 %2374  ;;  %8025 = vmatpush3.msk.msra.mxu0 %vm3579_vm2, %v3379_v50  ;;  %v3376_v50 = vld [vmem:[%s16403_s1 + $0x8] sm:$0xff]  ;;  %vm6707_vm2 = vcmask 523264  }
 0x3c4   : > { %17776 = vst [vmem:[#allocation95_spill] sm:$0xff] %v11501_v60  ;;  %v11503_v8 = vpop.permute.xlu0 %2372  ;;  %v2455_v60 = vrot.slane %v11279_v38, 1 }
 0x3c5   : > { %17777 = vst [vmem:[#allocation96_spill] sm:$0xff] %v11503_v8  ;;  %2566 = vrot.lane.b32.xlu1 %v17501_v21, %s8540_s15  ;;  %v17782_v8 = vld [vmem:[#allocation106_spill] sm:$0xff]  ;;  %v3378_v21 = vld [vmem:[%s16403_s1 + $0x18] sm:$0xff] }
 0x3c6   : > { %2564 = vrot.lane.b32.xlu0 %v17778_v57, %s8540_s15  ;;  %8026 = vmatprep.subr.mxu0 %v3378_v21 }
 0x3c7   : > { %v11509_v39 = vpop.permute.xlu1 %2378  ;;  %8027 = vmatpush3.msra.mxu0 %v3378_v21 }
 0x3c8   : > { %17779 = vst [vmem:[#allocation101_spill] sm:$0xff] %v11509_v39  ;;  %v11511_v32 = vpop.permute.xlu0 %2376  ;;  %v17785_v39 = vld [vmem:[#allocation108_spill] sm:$0xff] }
 0x3c9   : > { %17780 = vst [vmem:[#allocation413_spill] sm:$0xff] %v11511_v32  ;;  %2570 = vrot.lane.b32.xlu1 %v17781_v31, %s8540_s15  ;;  %v3377_v31 = vld [vmem:[%s16403_s1 + $0x10] sm:$0xff] }
 0x3ca   : > { %2568 = vrot.lane.b32.xlu0 %v17782_v8, %s8540_s15  ;;  %8028 = vmatprep.subr.mxu0 %v3377_v31  ;;  %v17786_v8 = vld [vmem:[#allocation110_spill] sm:$0xff] }
 0x3cb   : > { %v11523_v57 = vpop.permute.xlu1 %2382  ;;  %8029 = vmatpush3.msra.mxu0 %v3377_v31  ;;  %v2456_v31 = vrot.slane %v11274_v48, 1 }
 0x3cc   : > { %17783 = vst [vmem:[#allocation104_spill] sm:$0xff] %v11523_v57  ;;  %v11525_v32 = vpop.permute.xlu0 %2380  ;;  %8030 = vmatprep.subr.mxu0 %v3376_v50 }
 0x3cd   : > { %17784 = vst [vmem:[#allocation106_spill] sm:$0xff] %v11525_v32  ;;  %2574 = vrot.lane.b32.xlu1 %v17785_v39, %s8540_s15  ;;  %v11540_v32 = vld [vmem:[%s8869_s22 + $0x358] sm:$0x3]  ;;  %8031 = vmatpush3.msra.mxu0 %v3376_v50  ;;  %v3375_v39 = vld [vmem:[%s16403_s1] sm:$0xff] }
 0x3ce   : > { %2572 = vrot.lane.b32.xlu0 %v17786_v8, %s8540_s15  ;;  %8032 = vmatprep.subr.mxu0 %v3375_v39  ;;  %v2458_v8 = vrot.slane %v11540_v32, 1 }
 0x3cf   : > { %v11537_v57 = vpop.permute.xlu1 %2462  ;;  %8033 = vmatpush3.msra.mxu0 %v3375_v39 }
 0x3d0   : > { %v11542_v21 = vpop.permute.xlu0 %2460 }
 0x3d1   : > { %2578 = vrot.lane.b32.xlu1 %v9562_v61, %s8540_s15  ;;  %v2459_v61 = vsel %vm944_vm0, %v2456_v31, %v2458_v8 }
 0x3d2   : > { %2576 = vrot.lane.b32.xlu0 %v9569_v1, %s8540_s15  ;;  %v2457_v1 = vsel %vm944_vm0, %v2455_v60, %v2456_v31 }
 0x3d3   : > { %v11554_v62 = vpop.permute.xlu1 %2466 }
 0x3d4   : > { %v11556_v50 = vpop.permute.xlu0 %2464 }
 0x3d5   : > { %2582 = vrot.lane.b32.xlu1 %v10732_v37, %s8540_s15 }
 0x3d6   : > { %2580 = vrot.lane.b32.xlu0 %v10737_v23, %s8540_s15 }
 0x3d7   : > { %v11563_v36 = vpop.permute.xlu1 %2470 }
 0x3d8   : > { %v11566_v12 = vpop.permute.xlu0 %2468 }
 0x3d9   : > { %2586 = vrot.lane.b32.xlu1 %v2459_v61, %s8540_s15  ;;  %v17800_v61 = vld [vmem:[#allocation137_spill] sm:$0xff] }
 0x3da   : > { %2584 = vrot.lane.b32.xlu0 %v2457_v1, %s8540_s15 }
 0x3db   : > { %v11570_v39 = vpop.permute.xlu1 %2474 }
 0x3dc   : > { %v11572_v15 = vpop.permute.xlu0 %2472 }
 0x3dd   : > { %2664 = vrot.lane.b32.xlu1 %v9607_v49, %s8541_s18 }
 0x3de   : > { %2662 = vrot.lane.b32.xlu0 %v9614_v54, %s8541_s18 }
 0x3df   : > { %v11578_v23 = vpop.permute.xlu1 %2478 }
 0x3e0   : > { %v11580_v37 = vpop.permute.xlu0 %2476 }
 0x3e1   : > { %2668 = vrot.lane.b32.xlu1 %v9624_v46, %s8541_s18 }
 0x3e2   : > { %2666 = vrot.lane.b32.xlu0 %v9631_v45, %s8541_s18 }
 0x3e3   : > { %v11586_v60 = vpop.permute.xlu1 %2482 }
 0x3e4   : > { %v11588_v31 = vpop.permute.xlu0 %2480 }
 0x3e5   : > { %2672 = vrot.lane.b32.xlu1 %v9641_v58, %s8541_s18 }
 0x3e6   : > { %2670 = vrot.lane.b32.xlu0 %v9648_v55, %s8541_s18 }
 0x3e7   : > { %v11594_v49 = vpop.permute.xlu1 %2486 }
 0x3e8   : > { %v11596_v54 = vpop.permute.xlu0 %2484 }
 0x3e9   : > { %2676 = vrot.lane.b32.xlu1 %v9658_v3, %s8541_s18 }
 0x3ea   : > { %2674 = vrot.lane.b32.xlu0 %v9665_v2, %s8541_s18 }
 0x3eb   : > { %v11602_v46 = vpop.permute.xlu1 %2490 }
 0x3ec   : > { %17787 = vst [vmem:[#allocation108_spill] sm:$0xff] %v11602_v46  ;;  %v11604_v45 = vpop.permute.xlu0 %2488  ;;  %v17890_v46 = vld [vmem:[#allocation103_spill] sm:$0xff] }
 0x3ed   : > { %17788 = vst [vmem:[#allocation110_spill] sm:$0xff] %v11604_v45  ;;  %2680 = vrot.lane.b32.xlu1 %v9675_v11, %s8541_s18  ;;  %v17889_v45 = vld [vmem:[#allocation127_spill] sm:$0xff] }
 0x3ee   : > { %2678 = vrot.lane.b32.xlu0 %v9682_v10, %s8541_s18 }
 0x3ef   : > { %v11610_v58 = vpop.permute.xlu1 %2494 }
 0x3f0   : > { %17789 = vst [vmem:[#allocation414_spill] sm:$0xff] %v11610_v58  ;;  %v11612_v55 = vpop.permute.xlu0 %2492 }
 0x3f1   : > { %17790 = vst [vmem:[#allocation415_spill] sm:$0xff] %v11612_v55  ;;  %2684 = vrot.lane.b32.xlu1 %v9692_v19, %s8541_s18 }
 0x3f2   : > { %2682 = vrot.lane.b32.xlu0 %v9699_v18, %s8541_s18 }
 0x3f3   : > { %v11618_v3 = vpop.permute.xlu1 %2498 }
 0x3f4   : > { %17791 = vst [vmem:[#allocation416_spill] sm:$0xff] %v11618_v3  ;;  %v11620_v2 = vpop.permute.xlu0 %2496  ;;  %v17877_v3 = vld [vmem:[#allocation121_spill] sm:$0xff] }
 0x3f5   : > { %17792 = vst [vmem:[#allocation417_spill] sm:$0xff] %v11620_v2  ;;  %2688 = vrot.lane.b32.xlu1 %v9709_v27, %s8541_s18  ;;  %v17797_v27 = vld [vmem:[#allocation135_spill] sm:$0xff]  ;;  %v17876_v2 = vld [vmem:[#allocation120_spill] sm:$0xff] }
 0x3f6   : > { %2686 = vrot.lane.b32.xlu0 %v9716_v26, %s8541_s18 }
 0x3f7   : > { %v11626_v11 = vpop.permute.xlu1 %2502 }
 0x3f8   : > { %17793 = vst [vmem:[#allocation418_spill] sm:$0xff] %v11626_v11  ;;  %v11628_v10 = vpop.permute.xlu0 %2500  ;;  %v17875_v11 = vld [vmem:[#allocation119_spill] sm:$0xff] }
 0x3f9   : > { %17794 = vst [vmem:[#allocation419_spill] sm:$0xff] %v11628_v10  ;;  %2692 = vrot.lane.b32.xlu1 %v9726_v35, %s8541_s18  ;;  %v17801_v35 = vld [vmem:[#allocation139_spill] sm:$0xff] }
 0x3fa   : > { %2690 = vrot.lane.b32.xlu0 %v9733_v34, %s8541_s18 }
 0x3fb   : > { %v11634_v19 = vpop.permute.xlu1 %2506 }
 0x3fc   : > { %17795 = vst [vmem:[#allocation420_spill] sm:$0xff] %v11634_v19  ;;  %v11636_v18 = vpop.permute.xlu0 %2504 }
 0x3fd   : > { %17796 = vst [vmem:[#allocation421_spill] sm:$0xff] %v11636_v18  ;;  %2696 = vrot.lane.b32.xlu1 %v9743_v43, %s8541_s18  ;;  %v17804_v18 = vld [vmem:[#allocation141_spill] sm:$0xff]  ;;  %v17805_v43 = vld [vmem:[#allocation143_spill] sm:$0xff] }
 0x3fe   : > { %2694 = vrot.lane.b32.xlu0 %v17797_v27, %s8541_s18 }
 0x3ff   : > { %v11642_v26 = vpop.permute.xlu1 %2510 }
 0x400   : > { %17798 = vst [vmem:[#allocation135_spill] sm:$0xff] %v11642_v26  ;;  %v11644_v8 = vpop.permute.xlu0 %2508 }
 0x401   : > { %17799 = vst [vmem:[#allocation422_spill] sm:$0xff] %v11644_v8  ;;  %2700 = vrot.lane.b32.xlu1 %v17800_v61, %s8541_s18  ;;  %v17808_v8 = vld [vmem:[#allocation145_spill] sm:$0xff]  ;;  %v17809_v61 = vld [vmem:[#allocation147_spill] sm:$0xff] }
 0x402   : > { %2698 = vrot.lane.b32.xlu0 %v17801_v35, %s8541_s18 }
 0x403   : > { %v11650_v34 = vpop.permute.xlu1 %2514 }
 0x404   : > { %17802 = vst [vmem:[#allocation137_spill] sm:$0xff] %v11650_v34  ;;  %v11652_v1 = vpop.permute.xlu0 %2512 }
 0x405   : > { %17803 = vst [vmem:[#allocation139_spill] sm:$0xff] %v11652_v1  ;;  %2704 = vrot.lane.b32.xlu1 %v17804_v18, %s8541_s18  ;;  %v17812_v1 = vld [vmem:[#allocation149_spill] sm:$0xff]  ;;  %v17813_v18 = vld [vmem:[#allocation151_spill] sm:$0xff] }
 0x406   : > { %2702 = vrot.lane.b32.xlu0 %v17805_v43, %s8541_s18 }
 0x407   : > { %v11658_v27 = vpop.permute.xlu1 %2518 }
 0x408   : > { %17806 = vst [vmem:[#allocation141_spill] sm:$0xff] %v11658_v27  ;;  %v11660_v26 = vpop.permute.xlu0 %2516 }
 0x409   : > { %17807 = vst [vmem:[#allocation143_spill] sm:$0xff] %v11660_v26  ;;  %2708 = vrot.lane.b32.xlu1 %v17808_v8, %s8541_s18  ;;  %v2653_v8 = vrot.slane %v11140_v63, 2 }
 0x40a   : > { %2706 = vrot.lane.b32.xlu0 %v17809_v61, %s8541_s18  ;;  %v2655_v61 = vrot.slane %v11394_v14, 2 }
 0x40b   : > { %v11666_v35 = vpop.permute.xlu1 %2522 }
 0x40c   : > { %17810 = vst [vmem:[#allocation145_spill] sm:$0xff] %v11666_v35  ;;  %v11668_v34 = vpop.permute.xlu0 %2520 }
 0x40d   : > { %17811 = vst [vmem:[#allocation147_spill] sm:$0xff] %v11668_v34  ;;  %2712 = vrot.lane.b32.xlu1 %v17812_v1, %s8541_s18  ;;  %v2652_v34 = vrot.slane %v11145_v4, 2 }
 0x40e   : > { %2710 = vrot.lane.b32.xlu0 %v17813_v18, %s8541_s18  ;;  %v17818_v18 = vld [vmem:[#allocation153_spill] sm:$0xff] }
 0x40f   : > { %v11674_v43 = vpop.permute.xlu1 %2526 }
 0x410   : > { %17814 = vst [vmem:[#allocation149_spill] sm:$0xff] %v11674_v43  ;;  %v11676_v27 = vpop.permute.xlu0 %2524 }
 0x411   : > { %17815 = vst [vmem:[#allocation151_spill] sm:$0xff] %v11676_v27  ;;  %2716 = vrot.lane.b32.xlu1 %v17551_v47, %s8541_s18  ;;  %v17819_v27 = vld [vmem:[#allocation338_spill] sm:$0xff]  ;;  %v2656_v47 = vsel %vm1297_vm1, %v2653_v8, %v2655_v61 }
 0x412   : > { %2714 = vrot.lane.b32.xlu0 %v17552_v28, %s8541_s18  ;;  %v2654_v28 = vsel %vm1297_vm1, %v2652_v34, %v2653_v8  ;;  %v17828_v34 = vld [vmem:[#allocation155_spill] sm:$0xff]  ;;  %v17829_v8 = vld [vmem:[#allocation53_spill] sm:$0xff] }
 0x413   : > { %v11685_v1 = vpop.permute.xlu1 %2530 }
 0x414   : > { %17816 = vst [vmem:[#allocation423_spill] sm:$0xff] %v11685_v1  ;;  %v11687_v35 = vpop.permute.xlu0 %2528  ;;  %v17869_v1 = vld [vmem:[#allocation98_spill] sm:$0xff] }
 0x415   : > { %17817 = vst [vmem:[#allocation424_spill] sm:$0xff] %v11687_v35  ;;  %2720 = vrot.lane.b32.xlu1 %v17818_v18, %s8541_s18  ;;  %v17824_v18 = vld [vmem:[#allocation154_spill] sm:$0xff] }
 0x416   : > { %2718 = vrot.lane.b32.xlu0 %v17819_v27, %s8541_s18  ;;  %v17825_v27 = vld [vmem:[#allocation48_spill] sm:$0xff]  ;;  %v17868_v35 = vld [vmem:[#allocation114_spill] sm:$0xff] }
 0x417   : > { %v11694_v63 = vpop.permute.xlu1 %2534 }
 0x418   : > { %17820 = vst [vmem:[#allocation153_spill] sm:$0xff] %v11694_v63  ;;  %v11697_v43 = vpop.permute.xlu0 %2532 }
 0x419   : > { %17821 = vst [vmem:[#allocation338_spill] sm:$0xff] %v11697_v43  ;;  %2724 = vrot.lane.b32.xlu1 %v2656_v47, %s8541_s18  ;;  %v17867_v43 = vld [vmem:[#allocation113_spill] sm:$0xff] }
 0x41a   : > { %2722 = vrot.lane.b32.xlu0 %v2654_v28, %s8541_s18 }
 0x41b   : > { %v11701_v4 = vpop.permute.xlu1 %2538 }
 0x41c   : > { %17822 = vst [vmem:[#allocation425_spill] sm:$0xff] %v11701_v4  ;;  %v11703_v14 = vpop.permute.xlu0 %2536  ;;  %v17866_v4 = vld [vmem:[#allocation112_spill] sm:$0xff] }
 0x41d   : > { %17823 = vst [vmem:[#allocation426_spill] sm:$0xff] %v11703_v14  ;;  %2728 = vrot.lane.b32.xlu1 %v17824_v18, %s8541_s18  ;;  %v17832_v14 = vld [vmem:[#allocation156_spill] sm:$0xff]  ;;  %v17833_v18 = vld [vmem:[#allocation58_spill] sm:$0xff] }
 0x41e   : > { %2726 = vrot.lane.b32.xlu0 %v17825_v27, %s8541_s18 }
 0x41f   : > { %v11709_v61 = vpop.permute.xlu1 %2542 }
 0x420   : > { %17826 = vst [vmem:[#allocation154_spill] sm:$0xff] %v11709_v61  ;;  %v11711_v63 = vpop.permute.xlu0 %2540 }
 0x421   : > { %17827 = vst [vmem:[#allocation48_spill] sm:$0xff] %v11711_v63  ;;  %2732 = vrot.lane.b32.xlu1 %v17828_v34, %s8541_s18  ;;  %v17836_v63 = vld [vmem:[#allocation157_spill] sm:$0xff]  ;;  %v17837_v34 = vld [vmem:[#allocation63_spill] sm:$0xff] }
 0x422   : > { %2730 = vrot.lane.b32.xlu0 %v17829_v8, %s8541_s18 }
 0x423   : > { %v11717_v47 = vpop.permute.xlu1 %2546 }
 0x424   : > { %17830 = vst [vmem:[#allocation155_spill] sm:$0xff] %v11717_v47  ;;  %v11719_v28 = vpop.permute.xlu0 %2544 }
 0x425   : > { %17831 = vst [vmem:[#allocation53_spill] sm:$0xff] %v11719_v28  ;;  %2736 = vrot.lane.b32.xlu1 %v17832_v14, %s8541_s18  ;;  %v17840_v28 = vld [vmem:[#allocation158_spill] sm:$0xff]  ;;  %v17841_v14 = vld [vmem:[#allocation68_spill] sm:$0xff] }
 0x426   : > { %2734 = vrot.lane.b32.xlu0 %v17833_v18, %s8541_s18 }
 0x427   : > { %v11725_v27 = vpop.permute.xlu1 %2550 }
 0x428   : > { %17834 = vst [vmem:[#allocation156_spill] sm:$0xff] %v11725_v27  ;;  %v11727_v61 = vpop.permute.xlu0 %2548 }
 0x429   : > { %17835 = vst [vmem:[#allocation58_spill] sm:$0xff] %v11727_v61  ;;  %2740 = vrot.lane.b32.xlu1 %v17836_v63, %s8541_s18  ;;  %v17844_v61 = vld [vmem:[#allocation159_spill] sm:$0xff]  ;;  %v17845_v63 = vld [vmem:[#allocation73_spill] sm:$0xff] }
 0x42a   : > { %2738 = vrot.lane.b32.xlu0 %v17837_v34, %s8541_s18 }
 0x42b   : > { %v11733_v8 = vpop.permute.xlu1 %2554 }
 0x42c   : > { %17838 = vst [vmem:[#allocation157_spill] sm:$0xff] %v11733_v8  ;;  %v11735_v47 = vpop.permute.xlu0 %2552 }
 0x42d   : > { %17839 = vst [vmem:[#allocation63_spill] sm:$0xff] %v11735_v47  ;;  %2744 = vrot.lane.b32.xlu1 %v17840_v28, %s8541_s18  ;;  %v17848_v47 = vld [vmem:[#allocation160_spill] sm:$0xff]  ;;  %v17849_v28 = vld [vmem:[#allocation78_spill] sm:$0xff] }
 0x42e   : > { %2742 = vrot.lane.b32.xlu0 %v17841_v14, %s8541_s18 }
 0x42f   : > { %v11741_v18 = vpop.permute.xlu1 %2558 }
 0x430   : > { %17842 = vst [vmem:[#allocation158_spill] sm:$0xff] %v11741_v18  ;;  %v11743_v27 = vpop.permute.xlu0 %2556 }
 0x431   : > { %17843 = vst [vmem:[#allocation68_spill] sm:$0xff] %v11743_v27  ;;  %2748 = vrot.lane.b32.xlu1 %v17844_v61, %s8541_s18  ;;  %v17852_v61 = vld [vmem:[#allocation161_spill] sm:$0xff] }
 0x432   : > { %2746 = vrot.lane.b32.xlu0 %v17845_v63, %s8541_s18  ;;  %v17853_v63 = vld [vmem:[#allocation83_spill] sm:$0xff] }
 0x433   : > { %v11749_v34 = vpop.permute.xlu1 %2562 }
 0x434   : > { %17846 = vst [vmem:[#allocation159_spill] sm:$0xff] %v11749_v34  ;;  %v11751_v8 = vpop.permute.xlu0 %2560 }
 0x435   : > { %17847 = vst [vmem:[#allocation73_spill] sm:$0xff] %v11751_v8  ;;  %2752 = vrot.lane.b32.xlu1 %v17848_v47, %s8541_s18 }
 0x436   : > { %2750 = vrot.lane.b32.xlu0 %v17849_v28, %s8541_s18 }
 0x437   : > { %v11757_v14 = vpop.permute.xlu1 %2566 }
 0x438   : > { %17850 = vst [vmem:[#allocation160_spill] sm:$0xff] %v11757_v14  ;;  %v11759_v27 = vpop.permute.xlu0 %2564  ;;  %v17863_v14 = vld [vmem:[#allocation109_spill] sm:$0xff] }
 0x439   : > { %17851 = vst [vmem:[#allocation78_spill] sm:$0xff] %v11759_v27  ;;  %2756 = vrot.lane.b32.xlu1 %v17852_v61, %s8541_s18  ;;  %v17858_v61 = vld [vmem:[#allocation93_spill] sm:$0xff] }
 0x43a   : > { %2754 = vrot.lane.b32.xlu0 %v17853_v63, %s8541_s18 }
 0x43b   : > { %v11765_v8 = vpop.permute.xlu1 %2570 }
 0x43c   : > { %17854 = vst [vmem:[#allocation161_spill] sm:$0xff] %v11765_v8  ;;  %v11767_v34 = vpop.permute.xlu0 %2568  ;;  %v17862_v8 = vld [vmem:[#allocation107_spill] sm:$0xff] }
 0x43d   : > { %17855 = vst [vmem:[#allocation83_spill] sm:$0xff] %v11767_v34  ;;  %2760 = vrot.lane.b32.xlu1 %v17595_v5, %s8541_s18  ;;  %v17861_v34 = vld [vmem:[#allocation105_spill] sm:$0xff] }
 0x43e   : > { %2758 = vrot.lane.b32.xlu0 %v17596_v7, %s8541_s18  ;;  %v8404_v7 = vld [vmem:[%s8869_s22 + $0x18] sm:$0xff] }
 0x43f   : > { %v11773_v47 = vpop.permute.xlu1 %2574 }
 0x440   : > { %17856 = vst [vmem:[#allocation427_spill] sm:$0xff] %v11773_v47  ;;  %v11775_v28 = vpop.permute.xlu0 %2572  ;;  %v2857_v47 = vsel %vm2854_vm3, %v8404_v7, %v17861_v34  ;;  %v8408_v7 = vld [vmem:[%s8869_s22 + $0x38] sm:$0xff] }
 0x441   : > { %17857 = vst [vmem:[#allocation428_spill] sm:$0xff] %v11775_v28  ;;  %2764 = vrot.lane.b32.xlu1 %v17599_v59, %s8541_s18  ;;  %v8405_v28 = vld [vmem:[%s8869_s22] sm:$0xff] }
 0x442   : > { %2762 = vrot.lane.b32.xlu0 %v17858_v61, %s8541_s18  ;;  %v2855_v27 = vsel %vm2854_vm3, %v8405_v28, %v17862_v8  ;;  %v8406_v59 = vld [vmem:[%s8869_s22 + $0x20] sm:$0xff]  ;;  %v17864_v61 = vld [vmem:[#allocation164_spill] sm:$0xff]  ;;  %v2860_v8 = vsel %vm2854_vm3, %v8408_v7, %v17866_v4  ;;  %v8412_v4 = vld [vmem:[%s8869_s22 + $0x68] sm:$0xff] }
 0x443   : > { %v11781_v63 = vpop.permute.xlu1 %2578  ;;  %v2858_v18 = vsel %vm2854_vm3, %v8406_v59, %v17863_v14  ;;  %v8409_v28 = vld [vmem:[%s8869_s22 + $0x30] sm:$0xff] }
 0x444   : > { %17859 = vst [vmem:[#allocation93_spill] sm:$0xff] %v11781_v63  ;;  %v11783_v5 = vpop.permute.xlu0 %2576  ;;  %v17865_v63 = vld [vmem:[#allocation111_spill] sm:$0xff]  ;;  %v2859_v14 = vsel %vm2854_vm3, %v8409_v28, %v17867_v43  ;;  %v17871_v7 = vld [vmem:[#allocation116_spill] sm:$0xff]  ;;  %v8413_v43 = vld [vmem:[%s8869_s22 + $0x60] sm:$0xff] }
 0x445   : > { %17860 = vst [vmem:[#allocation429_spill] sm:$0xff] %v11783_v5  ;;  %2768 = vrot.lane.b32.xlu1 %v17864_v61, %s8541_s18  ;;  %v8407_v5 = vld [vmem:[%s8869_s22 + $0x8] sm:$0xff]  ;;  %v8410_v59 = vld [vmem:[%s8869_s22 + $0x50] sm:$0xff]  ;;  %v11820_v19 = vsel %vm2854_vm3, %v8412_v4, %v17871_v7  ;;  %v17872_v28 = vld [vmem:[#allocation117_spill] sm:$0xff] }
 0x446   : > { %v2856_v34 = vsel %vm2854_vm3, %v8407_v5, %v17865_v63  ;;  %v11808_v61 = vsel %vm2854_vm3, %v8410_v59, %v17868_v35  ;;  %2766 = vrot.lane.b32.xlu0 %v17869_v1, %s8541_s18  ;;  %v8411_v63 = vld [vmem:[%s8869_s22 + $0x48] sm:$0xff]  ;;  %v11825_v35 = vsel %vm2854_vm3, %v8413_v43, %v17872_v28  ;;  %v8414_v59 = vld [vmem:[%s8869_s22 + $0x80] sm:$0xff]  ;;  %v8416_v7 = vld [vmem:[%s8869_s22 + $0x98] sm:$0xff] }
 0x447   : > { %v17870_v5 = vld [vmem:[#allocation115_spill] sm:$0xff]  ;;  %v17873_v1 = vld [vmem:[#allocation118_spill] sm:$0xff]  ;;  %v11842_v43 = vsel %vm2854_vm3, %v8416_v7, %v17876_v2  ;;  %v17881_v7 = vld [vmem:[#allocation124_spill] sm:$0xff] }
 0x448   : > { %v11815_v26 = vsel %vm2854_vm3, %v8411_v63, %v17870_v5  ;;  %v11830_v10 = vsel %vm2854_vm3, %v8414_v59, %v17873_v1  ;;  %v11832_v63 = vpop.permute.xlu1 %2582  ;;  %v8415_v5 = vld [vmem:[%s8869_s22 + $0x78] sm:$0xff]  ;;  %v8417_v28 = vld [vmem:[%s8869_s22 + $0x90] sm:$0xff]  ;;  %v11849_v59 = vpop.permute.xlu0 %2580  ;;  %v8420_v2 = vld [vmem:[%s8869_s22 + $0xc8] sm:$0xff] }
 0x449   : > { %17874 = vst [vmem:[#allocation105_spill] sm:$0xff] %v11832_v63  ;;  %v11837_v4 = vsel %vm2854_vm3, %v8415_v5, %v17875_v11  ;;  %v11847_v53 = vsel %vm2854_vm3, %v8417_v28, %v17877_v3  ;;  %17878 = vst [vmem:[#allocation107_spill] sm:$0xff] %v11849_v59  ;;  %v8418_v1 = vld [vmem:[%s8869_s22 + $0xb0] sm:$0xff]  ;;  %v17879_v63 = vld [vmem:[#allocation122_spill] sm:$0xff]  ;;  %v11864_v58 = vsel %vm2854_vm3, %v8420_v2, %v17881_v7 }
 0x44a   : > { %v11854_v11 = vsel %vm2854_vm3, %v8418_v1, %v17879_v63  ;;  %v8419_v5 = vld [vmem:[%s8869_s22 + $0xa8] sm:$0xff]  ;;  %v17882_v3 = vld [vmem:[#allocation165_spill] sm:$0xff] }
 0x44b   : > { %v11859_v55 = vsel %vm2854_vm3, %v8419_v5, %v17880_v25  ;;  %2772 = vrot.lane.b32.xlu1 %v17882_v3, %s8541_s18  ;;  %v8421_v28 = vld [vmem:[%s8869_s22 + $0xc0] sm:$0xff]  ;;  %v8423_v7 = vld [vmem:[%s8869_s22 + $0xd8] sm:$0xff] }
 0x44c   : > { %v17883_v59 = vld [vmem:[#allocation125_spill] sm:$0xff]  ;;  %v17885_v1 = vld [vmem:[#allocation126_spill] sm:$0xff]  ;;  %v11885_v3 = vsel %vm2854_vm3, %v8423_v7, %v17889_v45  ;;  %v11899_v45 = vpop.permute.xlu0 %2584 }
 0x44d   : > { %v11871_v52 = vsel %vm2854_vm3, %v8421_v28, %v17883_v59  ;;  %v8422_v63 = vld [vmem:[%s8869_s22 + $0xe0] sm:$0xff]  ;;  %v2920_v59 = vsel %vm2919_vm4, %v2855_v27, %v17890_v46  ;;  %17896 = vst [vmem:[#allocation112_spill] sm:$0xff] %v11899_v45  ;;  %v17898_v27 = vld [vmem:[#allocation303_spill] sm:$0xff] }
 0x44e   : > { %17884 = vst [vmem:[#allocation109_spill] sm:$0xff] %v11871_v52  ;;  %v11876_v44 = vsel %vm2854_vm3, %v8422_v63, %v17885_v1  ;;  %v17887_v25 = vld [vmem:[#allocation102_spill] sm:$0xff]  ;;  %v17891_v28 = vld [vmem:[#allocation261_spill] sm:$0xff]  ;;  %v11891_v63 = vpop.permute.xlu1 %2586  ;;  %v17893_v1 = vld [vmem:[#allocation168_spill] sm:$0xff] }
 0x44f   : > { %17886 = vst [vmem:[#allocation164_spill] sm:$0xff] %v11876_v44  ;;  %v2921_v5 = vsel %vm2919_vm4, %v2856_v34, %v17887_v25  ;;  %v17888_v2 = vld [vmem:[#allocation166_spill] sm:$0xff]  ;;  %17892 = vst [vmem:[#allocation111_spill] sm:$0xff] %v11891_v63  ;;  %v2923_v34 = vsel %vm2919_vm4, %v2858_v18, %v17893_v1  ;;  %v17900_v18 = vld [vmem:[#allocation167_spill] sm:$0xff] }
 0x450   : > { %2770 = vrot.lane.b32.xlu0 %v17888_v2, %s8541_s18  ;;  %v2986_v56 = vsel %vm2984_vm5, %v2921_v5, %v17891_v28  ;;  %v17894_v25 = vld [vmem:[#allocation262_spill] sm:$0xff]  ;;  %v17899_v28 = vld [vmem:[#allocation361_spill] sm:$0xff]  ;;  %2776 = vrot.lane.b32.xlu1 %v17900_v18, %s8541_s18  ;;  %v17907_v18 = vld [vmem:[#allocation304_spill] sm:$0xff] }
 0x451   : > { %v2985_v2 = vsel %vm2984_vm5, %v2920_v59, %v17894_v25  ;;  %v17895_v44 = vld [vmem:[#allocation302_spill] sm:$0xff]  ;;  %v17901_v59 = vld [vmem:[#allocation172_spill] sm:$0xff] }
 0x452   : > { %v3051_v52 = vsel %vm3049_vm6, %v2986_v56, %v17895_v44  ;;  %v17897_v7 = vld [vmem:[#allocation170_spill] sm:$0xff]  ;;  %v3050_v5 = vsel %vm3049_vm6, %v2985_v2, %v17898_v27  ;;  %v2925_v1 = vsel %vm2919_vm4, %v2860_v8, %v17901_v59  ;;  %v17904_v2 = vld [vmem:[#allocation169_spill] sm:$0xff] }
 0x453   : > { %v2922_v46 = vsel %vm2919_vm4, %v2857_v47, %v17897_v7  ;;  %v3116_v63 = vsel %vm3114_vm7, %v3051_v52, %v17899_v28  ;;  %v17902_v56 = vld [vmem:[#allocation174_spill] sm:$0xff]  ;;  %v17905_v52 = vld [vmem:[#allocation263_spill] sm:$0xff]  ;;  %v2665_v28 = vpop.permute.xlu1 %2664 }
 0x454   : > { %v2924_v44 = vsel %vm2919_vm4, %v2859_v14, %v17902_v56  ;;  %v17903_v25 = vld [vmem:[#allocation362_spill] sm:$0xff]  ;;  %v3181_v47 = vsel %vm3179_vm8, %v3116_v63, %v11257_v6  ;;  %2774 = vrot.lane.b32.xlu0 %v17904_v2, %s8541_s18  ;;  %v2988_v7 = vsel %vm2984_vm5, %v2923_v34, %v17905_v52  ;;  %v17906_v14 = vld [vmem:[#allocation264_spill] sm:$0xff]  ;;  %v2663_v34 = vpop.permute.xlu0 %2662  ;;  %v17908_v56 = vld [vmem:[#allocation175_spill] sm:$0xff] }
 0x455   : > { %v3115_v45 = vsel %vm3114_vm7, %v3050_v5, %v17903_v25  ;;  %v3246_v8 = vsel %vm3244_vm9, %v3181_v47, %v11537_v57  ;;  %v2987_v5 = vsel %vm2984_vm5, %v2922_v46, %v17906_v14  ;;  %v3053_v6 = vsel %vm3049_vm6, %v2988_v7, %v17907_v18  ;;  %v17910_v46 = vld [vmem:[#allocation171_spill] sm:$0xff]  ;;  %v17913_v14 = vld [vmem:[#allocation266_spill] sm:$0xff] }
 0x456   : > { %v3180_v27 = vsel %vm3179_vm8, %v3115_v45, %v11259_v30  ;;  %v3311_v59 = vsel %vm3309_vm10, %v3246_v8, %v2665_v28  ;;  %v2927_v30 = vsel %vm2919_vm4, %v11808_v61, %v17908_v56  ;;  %v17909_v45 = vld [vmem:[#allocation305_spill] sm:$0xff]  ;;  %v3118_v25 = vsel %vm3114_vm7, %v3053_v6, %v10997_v40  ;;  %2780 = vrot.lane.b32.xlu1 %v17910_v46, %s8541_s18  ;;  %v17911_v2 = vld [vmem:[#allocation363_spill] sm:$0xff]  ;;  %v17915_v6 = vld [vmem:[#allocation176_spill] sm:$0xff] }
 0x457   : > { %v3245_v63 = vsel %vm3244_vm9, %v3180_v27, %v11542_v21  ;;  %v3052_v57 = vsel %vm3049_vm6, %v2987_v5, %v17909_v45  ;;  %v3183_v52 = vsel %vm3179_vm8, %v3118_v25, %v11265_v9  ;;  %v2658_v7 = vrot.slane %v11274_v48, 2  ;;  %v17912_v61 = vld [vmem:[#allocation265_spill] sm:$0xff]  ;;  %v2669_v48 = vpop.permute.xlu1 %2668  ;;  %v17914_v5 = vld [vmem:[#allocation306_spill] sm:$0xff]  ;;  %v17921_v46 = vld [vmem:[#allocation267_spill] sm:$0xff] }
 0x458   : > { %v3310_v47 = vsel %vm3309_vm10, %v3245_v63, %v2663_v34  ;;  %v3117_v21 = vsel %vm3114_vm7, %v3052_v57, %v17911_v2  ;;  %2778 = vrot.lane.b32.xlu0 %v17611_v24, %s8541_s18  ;;  %v2660_v40 = vrot.slane %v11540_v32, 2  ;;  %v2990_v27 = vsel %vm2984_vm5, %v2925_v1, %v17912_v61  ;;  %v17918_v56 = vld [vmem:[#allocation173_spill] sm:$0xff]  ;;  %v17919_v45 = vld [vmem:[#allocation366_spill] sm:$0xff]  ;;  %v17922_v61 = vld [vmem:[#allocation268_spill] sm:$0xff] }
 0x459   : > { %8034 = vmatprep.mubr.msk.f32.mxu0 %vm3386_vm11, %v3310_v47  ;;  %v3182_v8 = vsel %vm3179_vm8, %v3117_v21, %v11267_v0  ;;  %v2657_v28 = vrot.slane %v11279_v38, 2  ;;  %v3248_v9 = vsel %vm3244_vm9, %v3183_v52, %v11554_v62  ;;  %v2989_v24 = vsel %vm2984_vm5, %v2924_v44, %v17913_v14  ;;  %v2667_v0 = vpop.permute.xlu0 %2666  ;;  %v17916_v62 = vld [vmem:[#allocation307_spill] sm:$0xff]  ;;  %v17924_v14 = vld [vmem:[#allocation128_spill] sm:$0xff] }
 0x45a   : > { %8035 = vmatmul.mubr.msk.f32.vlgmr.msra.gmra.mxu0 %vm3386_vm11, %v3311_v59  ;;  %v3055_v32 = vsel %vm3049_vm6, %v2990_v27, %v17914_v5  ;;  %v3247_v1 = vsel %vm3244_vm9, %v3182_v8, %v11556_v50  ;;  %v3313_v18 = vsel %vm3309_vm10, %v3248_v9, %v2669_v48  ;;  %v2926_v38 = vsel %vm2919_vm4, %v11815_v26, %v17915_v6  ;;  %v17917_v59 = vld [vmem:[#allocation364_spill] sm:$0xff]  ;;  %v17920_v26 = vld [vmem:[#allocation365_spill] sm:$0xff] }
 0x45b   : > { %v3054_v63 = vsel %vm3049_vm6, %v2989_v24, %v17916_v62  ;;  %v3120_v34 = vsel %vm3114_vm7, %v3055_v32, %v17917_v59  ;;  %v3312_v44 = vsel %vm3309_vm10, %v3247_v1, %v2667_v0  ;;  %2784 = vrot.lane.b32.xlu1 %v17918_v56, %s8541_s18  ;;  %v2661_v25 = vsel %vm1297_vm1, %v2658_v7, %v2660_v40  ;;  %v2673_v52 = vpop.permute.xlu1 %2672  ;;  %v17923_v8 = vld [vmem:[#allocation308_spill] sm:$0xff]  ;;  %v17925_v24 = vld [vmem:[#allocation309_spill] sm:$0xff]  ;;  %v17932_v56 = vld [vmem:[#allocation6_spill] sm:$0xff] }
 0x45c   : > { %v3119_v50 = vsel %vm3114_vm7, %v3054_v63, %v17919_v45  ;;  %v3185_v57 = vsel %vm3179_vm8, %v3120_v34, %v11276_v20  ;;  %2782 = vrot.lane.b32.xlu0 %v17920_v26, %s8541_s18  ;;  %8037 = vmatprep.mubr.msk.f32.mxu0 %vm3386_vm11, %v3312_v44  ;;  %v2992_v47 = vsel %vm2984_vm5, %v2927_v30, %v17921_v46  ;;  %v8424_v48 = vld [vmem:[%s8869_s22 + $0xf8] sm:$0xff]  ;;  %v17930_v63 = vld [vmem:[#allocation7_spill] sm:$0xff] }
 0x45d   : > { %v3184_v2 = vsel %vm3179_vm8, %v3119_v50, %v11281_v13  ;;  %v3250_v21 = vsel %vm3244_vm9, %v3185_v57, %v11563_v36  ;;  %v2659_v20 = vsel %vm1297_vm1, %v2657_v28, %v2658_v7  ;;  %v2991_v27 = vsel %vm2984_vm5, %v2926_v38, %v17922_v61  ;;  %v2671_v13 = vpop.permute.xlu0 %2670  ;;  %v17926_v28 = vld [vmem:[#allocation367_spill] sm:$0xff]  ;;  %v17927_v1 = vld [vmem:[#allocation177_spill] sm:$0xff]  ;;  %v17929_v38 = vld [vmem:[#allocation178_spill] sm:$0xff] }
 0x45e   : > { %8038 = vmatmul.mubr.msk.f32.gmra.mxu0 %vm3386_vm11, %v3313_v18  ;;  %v3057_v40 = vsel %vm3049_vm6, %v2992_v47, %v17923_v8  ;;  %v3249_v30 = vsel %vm3244_vm9, %v3184_v2, %v11566_v12  ;;  %v3315_v9 = vsel %vm3309_vm10, %v3250_v21, %v2673_v52  ;;  %v12002_v36 = vsel %vm2854_vm3, %v8424_v48, %v17924_v14  ;;  %v17928_v18 = vld [vmem:[#allocation368_spill] sm:$0xff]  ;;  %v17933_v50 = vld [vmem:[#allocation310_spill] sm:$0xff]  ;;  %v17934_v47 = vld [vmem:[#allocation129_spill] sm:$0xff] }
 0x45f   : > { %v3056_v7 = vsel %vm3049_vm6, %v2991_v27, %v17925_v24  ;;  %v3122_v5 = vsel %vm3114_vm7, %v3057_v40, %v17926_v28  ;;  %v3314_v32 = vsel %vm3309_vm10, %v3249_v30, %v2671_v13  ;;  %2788 = vrot.lane.b32.xlu1 %v2661_v25, %s8541_s18  ;;  %v2929_v12 = vsel %vm2919_vm4, %v11820_v19, %v17927_v1  ;;  %v17931_v19 = vld [vmem:[#allocation397_spill] sm:$0xff]  ;;  %v8425_v46 = vld [vmem:[%s8869_s22 + $0xf0] sm:$0xff]  ;;  %v17937_v8 = vld [vmem:[#allocation130_spill] sm:$0xff] }
 0x460   : > { %v3121_v0 = vsel %vm3114_vm7, %v3056_v7, %v17928_v18  ;;  %v3187_v6 = vsel %vm3179_vm8, %v3122_v5, %v11287_v33  ;;  %2786 = vrot.lane.b32.xlu0 %v2659_v20, %s8541_s18  ;;  %8040 = vmatprep.mubr.msk.f32.mxu0 %vm3386_vm11, %v3314_v32  ;;  %v2928_v62 = vsel %vm2919_vm4, %v11825_v35, %v17929_v38  ;;  %v2677_v33 = vpop.permute.xlu1 %2676  ;;  %v17936_v52 = vld [vmem:[#allocation179_spill] sm:$0xff]  ;;  %v17938_v40 = vld [vmem:[#allocation181_spill] sm:$0xff]  ;;  %v17940_v14 = vld [vmem:[#allocation182_spill] sm:$0xff] }
 0x461   : > { %v2994_v59 = vsel %vm2984_vm5, %v2929_v12, %v17930_v63  ;;  %v3186_v34 = vsel %vm3179_vm8, %v3121_v0, %v17931_v19  ;;  %v3252_v44 = vsel %vm3244_vm9, %v3187_v6, %v11570_v39  ;;  %v2993_v45 = vsel %vm2984_vm5, %v2928_v62, %v17932_v56  ;;  %v2675_v25 = vpop.permute.xlu0 %2674  ;;  %v17935_v39 = vld [vmem:[#allocation311_spill] sm:$0xff]  ;;  %v17941_v7 = vld [vmem:[#allocation8_spill] sm:$0xff]  ;;  %v17948_v56 = vld [vmem:[#allocation185_spill] sm:$0xff] }
 0x462   : > { %8041 = vmatmul.mubr.msk.f32.gmra.mxu0 %vm3386_vm11, %v3315_v9  ;;  %v3059_v57 = vsel %vm3049_vm6, %v2994_v59, %v17933_v50  ;;  %v3251_v35 = vsel %vm3244_vm9, %v3186_v34, %v11572_v15  ;;  %v3317_v26 = vsel %vm3309_vm10, %v3252_v44, %v2677_v33  ;;  %v12039_v2 = vsel %vm2854_vm3, %v8425_v46, %v17934_v47  ;;  %v8426_v27 = vld [vmem:[%s8869_s22 + $0x110] sm:$0xff]  ;;  %v8427_v38 = vld [vmem:[%s8869_s22 + $0x108] sm:$0xff] }
 0x463   : > { %v3058_v21 = vsel %vm3049_vm6, %v2993_v45, %v17935_v39  ;;  %v3124_v20 = vsel %vm3114_vm7, %v3059_v57, %v17936_v52  ;;  %v3316_v61 = vsel %vm3309_vm10, %v3251_v35, %v2675_v25  ;;  %v12049_v15 = vsel %vm2854_vm3, %v8426_v27, %v17937_v8  ;;  %v17939_v9 = vld [vmem:[#allocation180_spill] sm:$0xff]  ;;  %v17946_v59 = vld [vmem:[#allocation183_spill] sm:$0xff]  ;;  %v17951_v46 = vld [vmem:[#allocation10_spill] sm:$0xff] }
 0x464   : > { %v2931_v30 = vsel %vm2919_vm4, %v11830_v10, %v17938_v40  ;;  %v3123_v13 = vsel %vm3114_vm7, %v3058_v21, %v17939_v9  ;;  %v3189_v48 = vsel %vm3179_vm8, %v3124_v20, %v11295_v29  ;;  %8043 = vmatprep.mubr.msk.f32.mxu0 %vm3386_vm11, %v3316_v61  ;;  %v2930_v24 = vsel %vm2919_vm4, %v11837_v4, %v17940_v14  ;;  %v2681_v32 = vpop.permute.xlu1 %2680  ;;  %v17942_v29 = vld [vmem:[#allocation9_spill] sm:$0xff]  ;;  %v17943_v12 = vld [vmem:[#allocation312_spill] sm:$0xff]  ;;  %v8428_v44 = vld [vmem:[%s8869_s22 + $0x128] sm:$0xff] }
 0x465   : > { %v2996_v28 = vsel %vm2984_vm5, %v2931_v30, %v17941_v7  ;;  %v3188_v5 = vsel %vm3179_vm8, %v3123_v13, %v11297_v41  ;;  %v3254_v10 = vsel %vm3244_vm9, %v3189_v48, %v11578_v23  ;;  %v2995_v1 = vsel %vm2984_vm5, %v2930_v24, %v17942_v29  ;;  %v2679_v6 = vpop.permute.xlu0 %2678  ;;  %v17944_v41 = vld [vmem:[#allocation131_spill] sm:$0xff]  ;;  %v17945_v23 = vld [vmem:[#allocation313_spill] sm:$0xff]  ;;  %v17947_v33 = vld [vmem:[#allocation132_spill] sm:$0xff] }
 0x466   : > { %8044 = vmatmul.mubr.msk.f32.gmra.mxu0 %vm3386_vm11, %v3317_v26  ;;  %v3061_v18 = vsel %vm3049_vm6, %v2996_v28, %v17943_v12  ;;  %v3253_v4 = vsel %vm3244_vm9, %v3188_v5, %v11580_v37  ;;  %v3319_v0 = vsel %vm3309_vm10, %v3254_v10, %v2681_v32  ;;  %v12079_v62 = vsel %vm2854_vm3, %v8427_v38, %v17944_v41  ;;  %v17949_v50 = vld [vmem:[#allocation184_spill] sm:$0xff]  ;;  %v17950_v26 = vld [vmem:[#allocation186_spill] sm:$0xff]  ;;  %v17956_v13 = vld [vmem:[#allocation187_spill] sm:$0xff] }
 0x467   : > { %v3060_v63 = vsel %vm3049_vm6, %v2995_v1, %v17945_v23  ;;  %v3126_v19 = vsel %vm3114_vm7, %v3061_v18, %v17946_v59  ;;  %v3318_v34 = vsel %vm3309_vm10, %v3253_v4, %v2679_v6  ;;  %v12089_v37 = vsel %vm2854_vm3, %v8428_v44, %v17947_v33  ;;  %v17953_v20 = vld [vmem:[#allocation314_spill] sm:$0xff]  ;;  %v17958_v28 = vld [vmem:[#allocation189_spill] sm:$0xff]  ;;  %v17959_v10 = vld [vmem:[#allocation188_spill] sm:$0xff] }
 0x468   : > { %v2933_v45 = vsel %vm2919_vm4, %v11842_v43, %v17948_v56  ;;  %v3125_v57 = vsel %vm3114_vm7, %v3060_v63, %v17949_v50  ;;  %v3191_v35 = vsel %vm3179_vm8, %v3126_v19, %v11303_v42  ;;  %8046 = vmatprep.mubr.msk.f32.mxu0 %vm3386_vm11, %v3318_v34  ;;  %v2932_v25 = vsel %vm2919_vm4, %v11847_v53, %v17950_v26  ;;  %v2685_v21 = vpop.permute.xlu1 %2684  ;;  %v17952_v42 = vld [vmem:[#allocation11_spill] sm:$0xff]  ;;  %v8429_v40 = vld [vmem:[%s8869_s22 + $0x120] sm:$0xff]  ;;  %v17961_v18 = vld [vmem:[#allocation12_spill] sm:$0xff] }
 0x469   : > { %v2998_v47 = vsel %vm2984_vm5, %v2933_v45, %v17951_v46  ;;  %v3190_v39 = vsel %vm3179_vm8, %v3125_v57, %v11305_v17  ;;  %v3256_v43 = vsel %vm3244_vm9, %v3191_v35, %v11586_v60  ;;  %v2997_v52 = vsel %vm2984_vm5, %v2932_v25, %v17952_v42  ;;  %v2683_v8 = vpop.permute.xlu0 %2682  ;;  %v17954_v17 = vld [vmem:[#allocation133_spill] sm:$0xff]  ;;  %v17955_v60 = vld [vmem:[#allocation315_spill] sm:$0xff]  ;;  %v17957_v7 = vld [vmem:[#allocation134_spill] sm:$0xff] }
 0x46a   : > { %8047 = vmatmul.mubr.msk.f32.gmra.mxu0 %vm3386_vm11, %v3319_v0  ;;  %v3063_v61 = vsel %vm3049_vm6, %v2998_v47, %v17953_v20  ;;  %v3255_v53 = vsel %vm3244_vm9, %v3190_v39, %v11588_v31  ;;  %v3321_v27 = vsel %vm3309_vm10, %v3256_v43, %v2685_v21  ;;  %v12119_v30 = vsel %vm2854_vm3, %v8429_v40, %v17954_v17  ;;  %v8430_v24 = vld [vmem:[%s8869_s22 + $0x140] sm:$0xff]  ;;  %v17963_v41 = vld [vmem:[#allocation316_spill] sm:$0xff]  ;;  %v17966_v33 = vld [vmem:[#allocation191_spill] sm:$0xff] }
 0x46b   : > { %v3062_v9 = vsel %vm3049_vm6, %v2997_v52, %v17955_v60  ;;  %v3128_v48 = vsel %vm3114_vm7, %v3063_v61, %v17956_v13  ;;  %v3320_v14 = vsel %vm3309_vm10, %v3255_v53, %v2683_v8  ;;  %v12129_v31 = vsel %vm2854_vm3, %v8430_v24, %v17957_v7  ;;  %v17960_v1 = vld [vmem:[#allocation190_spill] sm:$0xff]  ;;  %v8431_v19 = vld [vmem:[%s8869_s22 + $0x138] sm:$0xff] }
 0x46c   : > { %v2935_v5 = vsel %vm2919_vm4, %v11854_v11, %v17958_v28  ;;  %v3127_v32 = vsel %vm3114_vm7, %v3062_v9, %v17959_v10  ;;  %v3193_v29 = vsel %vm3179_vm8, %v3128_v48, %v11311_v22  ;;  %8049 = vmatprep.mubr.msk.f32.mxu0 %vm3386_vm11, %v3320_v14  ;;  %v2934_v12 = vsel %vm2919_vm4, %v11859_v55, %v17960_v1  ;;  %v2689_v6 = vpop.permute.xlu1 %2688  ;;  %v17962_v22 = vld [vmem:[#allocation13_spill] sm:$0xff]  ;;  %v17967_v57 = vld [vmem:[#allocation138_spill] sm:$0xff]  ;;  %v17969_v25 = vld [vmem:[#allocation192_spill] sm:$0xff] }
 0x46d   : > { %v3000_v4 = vsel %vm2984_vm5, %v2935_v5, %v17961_v18  ;;  %v3192_v0 = vsel %vm3179_vm8, %v3127_v32, %v11313_v16  ;;  %v3258_v11 = vsel %vm3244_vm9, %v3193_v29, %v11594_v49  ;;  %v2999_v38 = vsel %vm2984_vm5, %v2934_v12, %v17962_v22  ;;  %v2687_v59 = vpop.permute.xlu0 %2686  ;;  %v17964_v16 = vld [vmem:[#allocation136_spill] sm:$0xff]  ;;  %v17965_v49 = vld [vmem:[#allocation317_spill] sm:$0xff]  ;;  %v17970_v39 = vld [vmem:[#allocation194_spill] sm:$0xff] }
 0x46e   : > { %8050 = vmatmul.mubr.msk.f32.gmra.mxu0 %vm3386_vm11, %v3321_v27  ;;  %v3065_v23 = vsel %vm3049_vm6, %v3000_v4, %v17963_v41  ;;  %v3257_v55 = vsel %vm3244_vm9, %v3192_v0, %v11596_v54  ;;  %v3323_v63 = vsel %vm3309_vm10, %v3258_v11, %v2689_v6  ;;  %v12159_v34 = vsel %vm2854_vm3, %v8431_v19, %v17964_v16  ;;  %v8432_v50 = vld [vmem:[%s8869_s22 + $0x158] sm:$0xff]  ;;  %v17972_v42 = vld [vmem:[#allocation14_spill] sm:$0xff]  ;;  %v8433_v14 = vld [vmem:[%s8869_s22 + $0x150] sm:$0xff] }
 0x46f   : > { %v3064_v44 = vsel %vm3049_vm6, %v2999_v38, %v17965_v49  ;;  %v3130_v56 = vsel %vm3114_vm7, %v3065_v23, %v17966_v33  ;;  %v3322_v45 = vsel %vm3309_vm10, %v3257_v55, %v2687_v59  ;;  %v12169_v54 = vsel %vm2854_vm3, %v8432_v50, %v17967_v57  ;;  %v17968_v35 = vld [vmem:[#allocation193_spill] sm:$0xff]  ;;  %v17973_v20 = vld [vmem:[#allocation398_spill] sm:$0xff]  ;;  %v17978_v24 = vld [vmem:[#allocation140_spill] sm:$0xff] }
 0x470   : > { %v2937_v26 = vsel %vm2919_vm4, %v11864_v58, %v17968_v35  ;;  %v3129_v46 = vsel %vm3114_vm7, %v3064_v44, %v17969_v25  ;;  %v3195_v47 = vsel %vm3179_vm8, %v3130_v56, %v11319_v51  ;;  %8052 = vmatprep.mubr.msk.f32.mxu0 %vm3386_vm11, %v3322_v45  ;;  %v17971_v43 = vld [vmem:[#allocation109_spill] sm:$0xff]  ;;  %v17974_v58 = vld [vmem:[#allocation108_spill] sm:$0xff]  ;;  %v2693_v27 = vpop.permute.xlu1 %2692  ;;  %v17975_v51 = vld [vmem:[#allocation15_spill] sm:$0xff]  ;;  %v12199_v7 = vsel %vm2854_vm3, %v8433_v14, %v17978_v24 }
 0x471   : > { %v2936_v21 = vsel %vm2919_vm4, %v17971_v43, %v17970_v39  ;;  %v3002_v52 = vsel %vm2984_vm5, %v2937_v26, %v17972_v42  ;;  %v3194_v61 = vsel %vm3179_vm8, %v3129_v46, %v17973_v20  ;;  %v3260_v53 = vsel %vm3244_vm9, %v3195_v47, %v17974_v58  ;;  %v17976_v40 = vld [vmem:[#allocation318_spill] sm:$0xff]  ;;  %v2691_v48 = vpop.permute.xlu0 %2690  ;;  %v17979_v28 = vld [vmem:[#allocation319_spill] sm:$0xff]  ;;  %v17982_v4 = vld [vmem:[#allocation197_spill] sm:$0xff] }
 0x472   : > { %8053 = vmatmul.mubr.msk.f32.gmra.mxu0 %vm3386_vm11, %v3323_v63  ;;  %v3001_v8 = vsel %vm2984_vm5, %v2936_v21, %v17975_v51  ;;  %v3067_v17 = vsel %vm3049_vm6, %v3002_v52, %v17976_v40  ;;  %v17977_v60 = vld [vmem:[#allocation110_spill] sm:$0xff]  ;;  %v3325_v13 = vsel %vm3309_vm10, %v3260_v53, %v2693_v27  ;;  %v17980_v10 = vld [vmem:[#allocation195_spill] sm:$0xff]  ;;  %v17983_v0 = vld [vmem:[#allocation164_spill] sm:$0xff] }
 0x473   : > { %v3259_v9 = vsel %vm3244_vm9, %v3194_v61, %v17977_v60  ;;  %v3066_v5 = vsel %vm3049_vm6, %v3001_v8, %v17979_v28  ;;  %v3132_v32 = vsel %vm3114_vm7, %v3067_v17, %v17980_v10  ;;  %v8434_v1 = vld [vmem:[%s8869_s22 + $0x170] sm:$0xff]  ;;  %v17981_v12 = vld [vmem:[#allocation142_spill] sm:$0xff]  ;;  %v2939_v11 = vsel %vm2919_vm4, %v17983_v0, %v17982_v4  ;;  %v17990_v56 = vld [vmem:[#allocation17_spill] sm:$0xff] }
 0x474   : > { %v3324_v29 = vsel %vm3309_vm10, %v3259_v9, %v2691_v48  ;;  %v12209_v18 = vsel %vm2854_vm3, %v8434_v1, %v17981_v12  ;;  %v17984_v6 = vld [vmem:[#allocation196_spill] sm:$0xff]  ;;  %v17985_v38 = vld [vmem:[#allocation399_spill] sm:$0xff]  ;;  %v17986_v23 = vld [vmem:[#allocation198_spill] sm:$0xff]  ;;  %v2697_v33 = vpop.permute.xlu1 %2696 }
 0x475   : > { %v3131_v22 = vsel %vm3114_vm7, %v3066_v5, %v17984_v6  ;;  %v3197_v41 = vsel %vm3179_vm8, %v3132_v32, %v17985_v38  ;;  %8055 = vmatprep.mubr.msk.f32.mxu0 %vm3386_vm11, %v3324_v29  ;;  %v2938_v55 = vsel %vm2919_vm4, %v11885_v3, %v17986_v23  ;;  %v17987_v63 = vld [vmem:[#allocation16_spill] sm:$0xff]  ;;  %v17989_v49 = vld [vmem:[#allocation414_spill] sm:$0xff]  ;;  %v17992_v3 = vld [vmem:[#allocation415_spill] sm:$0xff]  ;;  %v2695_v25 = vpop.permute.xlu0 %2694 }
 0x476   : > { %v3004_v59 = vsel %vm2984_vm5, %v2939_v11, %v17987_v63  ;;  %v17988_v19 = vld [vmem:[#allocation400_spill] sm:$0xff]  ;;  %v3262_v44 = vsel %vm3244_vm9, %v3197_v41, %v17989_v49  ;;  %8056 = vmatmul.mubr.msk.f32.gmra.mxu0 %vm3386_vm11, %v3325_v13  ;;  %v3003_v45 = vsel %vm2984_vm5, %v2938_v55, %v17990_v56  ;;  %v8435_v46 = vld [vmem:[%s8869_s22 + $0x168] sm:$0xff]  ;;  %v17994_v43 = vld [vmem:[#allocation321_spill] sm:$0xff] }
 0x477   : > { %v3196_v16 = vsel %vm3179_vm8, %v3131_v22, %v17988_v19  ;;  %v17991_v50 = vld [vmem:[#allocation320_spill] sm:$0xff]  ;;  %v3327_v26 = vsel %vm3309_vm10, %v3262_v44, %v2697_v33  ;;  %v3068_v21 = vsel %vm3049_vm6, %v3003_v45, %v17994_v43  ;;  %v17995_v42 = vld [vmem:[#allocation199_spill] sm:$0xff]  ;;  %v17996_v58 = vld [vmem:[#allocation146_spill] sm:$0xff] }
 0x478   : > { %v3069_v57 = vsel %vm3049_vm6, %v3004_v59, %v17991_v50  ;;  %v3261_v35 = vsel %vm3244_vm9, %v3196_v16, %v17992_v3  ;;  %v17993_v47 = vld [vmem:[#allocation144_spill] sm:$0xff]  ;;  %v17997_v27 = vld [vmem:[#allocation201_spill] sm:$0xff]  ;;  %v18000_v9 = vld [vmem:[#allocation202_spill] sm:$0xff]  ;;  %v2701_v10 = vpop.permute.xlu1 %2700 }
 0x479   : > { %v12239_v39 = vsel %vm2854_vm3, %v8435_v46, %v17993_v47  ;;  %v3134_v52 = vsel %vm3114_vm7, %v3069_v57, %v17995_v42  ;;  %v3326_v20 = vsel %vm3309_vm10, %v3261_v35, %v2695_v25  ;;  %v8436_v61 = vld [vmem:[%s8869_s22 + $0x1b8] sm:$0xff]  ;;  %v2941_v51 = vsel %vm2919_vm4, %v12002_v36, %v17997_v27  ;;  %v18001_v48 = vld [vmem:[#allocation18_spill] sm:$0xff]  ;;  %v18004_v32 = vld [vmem:[#allocation19_spill] sm:$0xff]  ;;  %v2699_v11 = vpop.permute.xlu0 %2698 }
 0x47a   : > { %v12249_v53 = vsel %vm2854_vm3, %v8436_v61, %v17996_v58  ;;  %v17998_v8 = vld [vmem:[#allocation200_spill] sm:$0xff]  ;;  %v17999_v17 = vld [vmem:[#allocation401_spill] sm:$0xff]  ;;  %8058 = vmatprep.mubr.msk.f32.mxu0 %vm3386_vm11, %v3326_v20  ;;  %v2940_v13 = vsel %vm2919_vm4, %v12039_v2, %v18000_v9  ;;  %v3006_v14 = vsel %vm2984_vm5, %v2941_v51, %v18001_v48  ;;  %v18002_v24 = vld [vmem:[#allocation402_spill] sm:$0xff] }
 0x47b   : > { %v3133_v40 = vsel %vm3114_vm7, %v3068_v21, %v17998_v8  ;;  %v3199_v60 = vsel %vm3179_vm8, %v3134_v52, %v17999_v17  ;;  %v18003_v36 = vld [vmem:[#allocation416_spill] sm:$0xff]  ;;  %8059 = vmatmul.mubr.msk.f32.gmra.mxu0 %vm3386_vm11, %v3327_v26  ;;  %v3005_v29 = vsel %vm2984_vm5, %v2940_v13, %v18004_v32  ;;  %v18005_v1 = vld [vmem:[#allocation322_spill] sm:$0xff]  ;;  %v18006_v2 = vld [vmem:[#allocation417_spill] sm:$0xff] }
 0x47c   : > { %v3198_v28 = vsel %vm3179_vm8, %v3133_v40, %v18002_v24  ;;  %v3264_v5 = vsel %vm3244_vm9, %v3199_v60, %v18003_v36  ;;  %v3071_v12 = vsel %vm3049_vm6, %v3006_v14, %v18005_v1  ;;  %v8437_v6 = vld [vmem:[%s8869_s22 + $0x1b0] sm:$0xff]  ;;  %v18010_v16 = vld [vmem:[#allocation150_spill] sm:$0xff]  ;;  %v18011_v44 = vld [vmem:[#allocation205_spill] sm:$0xff]  ;;  %v2705_v21 = vpop.permute.xlu1 %2704 }
 0x47d   : > { %v3263_v4 = vsel %vm3244_vm9, %v3198_v28, %v18006_v2  ;;  %v3329_v0 = vsel %vm3309_vm10, %v3264_v5, %v2701_v10  ;;  %v18007_v22 = vld [vmem:[#allocation148_spill] sm:$0xff]  ;;  %v18008_v41 = vld [vmem:[#allocation323_spill] sm:$0xff]  ;;  %v2943_v33 = vsel %vm2919_vm4, %v12049_v15, %v18011_v44  ;;  %v18014_v3 = vld [vmem:[#allocation206_spill] sm:$0xff]  ;;  %v2703_v51 = vpop.permute.xlu0 %2702 }
 0x47e   : > { %v12279_v38 = vsel %vm2854_vm3, %v8437_v6, %v18007_v22  ;;  %v3070_v23 = vsel %vm3049_vm6, %v3005_v29, %v18008_v41  ;;  %v18009_v55 = vld [vmem:[#allocation203_spill] sm:$0xff]  ;;  %v3328_v59 = vsel %vm3309_vm10, %v3263_v4, %v2699_v11  ;;  %v18012_v56 = vld [vmem:[#allocation204_spill] sm:$0xff]  ;;  %v2942_v35 = vsel %vm2919_vm4, %v12079_v62, %v18014_v3  ;;  %v18017_v15 = vld [vmem:[#allocation418_spill] sm:$0xff] }
 0x47f   : > { %v3136_v63 = vsel %vm3114_vm7, %v3071_v12, %v18009_v55  ;;  %v8438_v19 = vld [vmem:[%s8869_s22 + $0x1d0] sm:$0xff]  ;;  %v3135_v45 = vsel %vm3114_vm7, %v3070_v23, %v18012_v56  ;;  %8061 = vmatprep.mubr.msk.f32.mxu0 %vm3386_vm11, %v3328_v59  ;;  %v18018_v42 = vld [vmem:[#allocation21_spill] sm:$0xff]  ;;  %v8439_v8 = vld [vmem:[%s8869_s22 + $0x1c8] sm:$0xff] }
 0x480   : > { %v12289_v49 = vsel %vm2854_vm3, %v8438_v19, %v18010_v16  ;;  %v18013_v50 = vld [vmem:[#allocation403_spill] sm:$0xff]  ;;  %v18015_v26 = vld [vmem:[#allocation20_spill] sm:$0xff]  ;;  %8062 = vmatmul.mubr.msk.f32.gmra.mxu0 %vm3386_vm11, %v3329_v0  ;;  %v3007_v52 = vsel %vm2984_vm5, %v2942_v35, %v18018_v42  ;;  %v18022_v60 = vld [vmem:[#allocation325_spill] sm:$0xff]  ;;  %v2709_v23 = vpop.permute.xlu1 %2708 }
 0x481   : > { %v3201_v57 = vsel %vm3179_vm8, %v3136_v63, %v18013_v50  ;;  %v3008_v25 = vsel %vm2984_vm5, %v2943_v33, %v18015_v26  ;;  %v18016_v46 = vld [vmem:[#allocation404_spill] sm:$0xff]  ;;  %v18020_v62 = vld [vmem:[#allocation419_spill] sm:$0xff]  ;;  %v3072_v9 = vsel %vm3049_vm6, %v3007_v52, %v18022_v60  ;;  %v18024_v28 = vld [vmem:[#allocation34_spill] sm:$0xff]  ;;  %v2707_v33 = vpop.permute.xlu0 %2706 }
 0x482   : > { %v3200_v47 = vsel %vm3179_vm8, %v3135_v45, %v18016_v46  ;;  %v3266_v43 = vsel %vm3244_vm9, %v3201_v57, %v18017_v15  ;;  %v18019_v20 = vld [vmem:[#allocation324_spill] sm:$0xff]  ;;  %v18023_v13 = vld [vmem:[#allocation207_spill] sm:$0xff]  ;;  %v18025_v5 = vld [vmem:[#allocation209_spill] sm:$0xff] }
 0x483   : > { %v3073_v61 = vsel %vm3049_vm6, %v3008_v25, %v18019_v20  ;;  %v3265_v58 = vsel %vm3244_vm9, %v3200_v47, %v18020_v62  ;;  %v3331_v27 = vsel %vm3309_vm10, %v3266_v43, %v2705_v21  ;;  %v18021_v40 = vld [vmem:[#allocation152_spill] sm:$0xff]  ;;  %v8440_v24 = vld [vmem:[%s8869_s22 + $0x1e8] sm:$0xff]  ;;  %v2945_v10 = vsel %vm2919_vm4, %v12089_v37, %v18025_v5  ;;  %v18027_v1 = vld [vmem:[#allocation405_spill] sm:$0xff] }
 0x484   : > { %v12319_v17 = vsel %vm2854_vm3, %v8439_v8, %v18021_v40  ;;  %v3138_v48 = vsel %vm3114_vm7, %v3073_v61, %v18023_v13  ;;  %v3330_v14 = vsel %vm3309_vm10, %v3265_v58, %v2703_v51  ;;  %v12329_v36 = vsel %vm2854_vm3, %v8440_v24, %v18024_v28  ;;  %v18026_v32 = vld [vmem:[#allocation208_spill] sm:$0xff]  ;;  %v18028_v2 = vld [vmem:[#allocation210_spill] sm:$0xff]  ;;  %v18032_v55 = vld [vmem:[#allocation23_spill] sm:$0xff] }
 0x485   : > { %v3137_v29 = vsel %vm3114_vm7, %v3072_v9, %v18026_v32  ;;  %v3203_v12 = vsel %vm3179_vm8, %v3138_v48, %v18027_v1  ;;  %8064 = vmatprep.mubr.msk.f32.mxu0 %vm3386_vm11, %v3330_v14  ;;  %v2944_v4 = vsel %vm2919_vm4, %v12119_v30, %v18028_v2  ;;  %v18029_v0 = vld [vmem:[#allocation22_spill] sm:$0xff]  ;;  %v18031_v37 = vld [vmem:[#allocation420_spill] sm:$0xff]  ;;  %v18034_v30 = vld [vmem:[#allocation421_spill] sm:$0xff]  ;;  %v2713_v9 = vpop.permute.xlu1 %2712 }
 0x486   : > { %v3010_v11 = vsel %vm2984_vm5, %v2945_v10, %v18029_v0  ;;  %v18030_v6 = vld [vmem:[#allocation406_spill] sm:$0xff]  ;;  %v3268_v41 = vsel %vm3244_vm9, %v3203_v12, %v18031_v37  ;;  %8065 = vmatmul.mubr.msk.f32.gmra.mxu0 %vm3386_vm11, %v3331_v27  ;;  %v3009_v63 = vsel %vm2984_vm5, %v2944_v4, %v18032_v55  ;;  %v18035_v45 = vld [vmem:[#allocation36_spill] sm:$0xff]  ;;  %v18036_v57 = vld [vmem:[#allocation327_spill] sm:$0xff]  ;;  %v2711_v10 = vpop.permute.xlu0 %2710 }
 0x487   : > { %v3202_v22 = vsel %vm3179_vm8, %v3137_v29, %v18030_v6  ;;  %v18033_v59 = vld [vmem:[#allocation326_spill] sm:$0xff]  ;;  %v3333_v44 = vsel %vm3309_vm10, %v3268_v41, %v2709_v23  ;;  %v3074_v3 = vsel %vm3049_vm6, %v3009_v63, %v18036_v57  ;;  %v18037_v35 = vld [vmem:[#allocation211_spill] sm:$0xff]  ;;  %v18039_v43 = vld [vmem:[#allocation213_spill] sm:$0xff] }
 0x488   : > { %v3075_v19 = vsel %vm3049_vm6, %v3010_v11, %v18033_v59  ;;  %v3267_v16 = vsel %vm3244_vm9, %v3202_v22, %v18034_v30  ;;  %v8441_v56 = vld [vmem:[%s8869_s22 + $0x1e0] sm:$0xff]  ;;  %v18038_v47 = vld [vmem:[#allocation39_spill] sm:$0xff]  ;;  %v2947_v21 = vsel %vm2919_vm4, %v12129_v31, %v18039_v43  ;;  %v18040_v42 = vld [vmem:[#allocation212_spill] sm:$0xff] }
 0x489   : > { %v12359_v50 = vsel %vm2854_vm3, %v8441_v56, %v18035_v45  ;;  %v3140_v26 = vsel %vm3114_vm7, %v3075_v19, %v18037_v35  ;;  %v3332_v25 = vsel %vm3309_vm10, %v3267_v16, %v2707_v33  ;;  %v8442_v46 = vld [vmem:[%s8869_s22 + $0x200] sm:$0xff]  ;;  %v3139_v52 = vsel %vm3114_vm7, %v3074_v3, %v18040_v42  ;;  %v18041_v20 = vld [vmem:[#allocation407_spill] sm:$0xff]  ;;  %v18043_v27 = vld [vmem:[#allocation24_spill] sm:$0xff]  ;;  %v2717_v3 = vpop.permute.xlu1 %2716 }
 0x48a   : > { %v12369_v15 = vsel %vm2854_vm3, %v8442_v46, %v18038_v47  ;;  %v3205_v61 = vsel %vm3179_vm8, %v3140_v26, %v18041_v20  ;;  %8067 = vmatprep.mubr.msk.f32.mxu0 %vm3386_vm11, %v3332_v25  ;;  %v18042_v62 = vld [vmem:[#allocation214_spill] sm:$0xff]  ;;  %v3012_v51 = vsel %vm2984_vm5, %v2947_v21, %v18043_v27  ;;  %v18044_v8 = vld [vmem:[#allocation408_spill] sm:$0xff]  ;;  %v18045_v31 = vld [vmem:[#allocation135_spill] sm:$0xff]  ;;  %v2715_v21 = vpop.permute.xlu0 %2714 }
 0x48b   : > { %v2946_v58 = vsel %vm2919_vm4, %v12159_v34, %v18042_v62  ;;  %v3204_v40 = vsel %vm3179_vm8, %v3139_v52, %v18044_v8  ;;  %v3270_v60 = vsel %vm3244_vm9, %v3205_v61, %v18045_v31  ;;  %8068 = vmatmul.mubr.msk.f32.gmra.mxu0 %vm3386_vm11, %v3333_v44  ;;  %v18046_v13 = vld [vmem:[#allocation25_spill] sm:$0xff]  ;;  %v18047_v14 = vld [vmem:[#allocation328_spill] sm:$0xff]  ;;  %v18048_v34 = vld [vmem:[#allocation422_spill] sm:$0xff] }
 0x48c   : > { %v3011_v48 = vsel %vm2984_vm5, %v2946_v58, %v18046_v13  ;;  %v3077_v24 = vsel %vm3049_vm6, %v3012_v51, %v18047_v14  ;;  %v3269_v28 = vsel %vm3244_vm9, %v3204_v40, %v18048_v34  ;;  %v3335_v5 = vsel %vm3309_vm10, %v3270_v60, %v2713_v9  ;;  %v8443_v32 = vld [vmem:[%s8869_s22 + $0x1f8] sm:$0xff]  ;;  %v18051_v4 = vld [vmem:[#allocation215_spill] sm:$0xff]  ;;  %v18052_v22 = vld [vmem:[#allocation42_spill] sm:$0xff] }
 0x48d   : > { %v18049_v29 = vld [vmem:[#allocation40_spill] sm:$0xff]  ;;  %v18050_v12 = vld [vmem:[#allocation329_spill] sm:$0xff]  ;;  %v3142_v0 = vsel %vm3114_vm7, %v3077_v24, %v18051_v4  ;;  %v3334_v11 = vsel %vm3309_vm10, %v3269_v28, %v2711_v10  ;;  %v18055_v59 = vld [vmem:[#allocation26_spill] sm:$0xff] }
 0x48e   : > { %v12399_v1 = vsel %vm2854_vm3, %v8443_v32, %v18049_v29  ;;  %v3076_v2 = vsel %vm3049_vm6, %v3011_v48, %v18050_v12  ;;  %v8444_v6 = vld [vmem:[%s8869_s22 + $0x218] sm:$0xff]  ;;  %v3207_v19 = vsel %vm3179_vm8, %v3142_v0, %v18055_v59  ;;  %8070 = vmatprep.mubr.msk.f32.mxu0 %vm3386_vm11, %v3334_v11  ;;  %v18056_v30 = vld [vmem:[#allocation218_spill] sm:$0xff]  ;;  %v18058_v56 = vld [vmem:[#allocation27_spill] sm:$0xff]  ;;  %v2721_v29 = vpop.permute.xlu1 %2720 }
 0x48f   : > { %v12409_v37 = vsel %vm2854_vm3, %v8444_v6, %v18052_v22  ;;  %v18053_v41 = vld [vmem:[#allocation217_spill] sm:$0xff]  ;;  %v18054_v55 = vld [vmem:[#allocation216_spill] sm:$0xff]  ;;  %v2948_v16 = vsel %vm2919_vm4, %v12199_v7, %v18056_v30  ;;  %8071 = vmatmul.mubr.msk.f32.gmra.mxu0 %vm3386_vm11, %v3335_v5  ;;  %v18060_v35 = vld [vmem:[#allocation270_spill] sm:$0xff]  ;;  %v2719_v22 = vpop.permute.xlu0 %2718 }
 0x490   : > { %v2949_v23 = vsel %vm2919_vm4, %v12169_v54, %v18053_v41  ;;  %v3141_v63 = vsel %vm3114_vm7, %v3076_v2, %v18054_v55  ;;  %v18057_v44 = vld [vmem:[#allocation269_spill] sm:$0xff]  ;;  %v3013_v26 = vsel %vm2984_vm5, %v2948_v16, %v18060_v35  ;;  %v18061_v25 = vld [vmem:[#allocation330_spill] sm:$0xff]  ;;  %v18062_v47 = vld [vmem:[#allocation139_spill] sm:$0xff] }
 0x491   : > { %v3014_v33 = vsel %vm2984_vm5, %v2949_v23, %v18057_v44  ;;  %v3206_v45 = vsel %vm3179_vm8, %v3141_v63, %v18058_v56  ;;  %v18059_v57 = vld [vmem:[#allocation137_spill] sm:$0xff]  ;;  %v8445_v42 = vld [vmem:[%s8869_s22 + $0x210] sm:$0xff]  ;;  %v18067_v31 = vld [vmem:[#allocation222_spill] sm:$0xff] }
 0x492   : > { %v3272_v54 = vsel %vm3244_vm9, %v3207_v19, %v18059_v57  ;;  %v3079_v46 = vsel %vm3049_vm6, %v3014_v33, %v18061_v25  ;;  %v3271_v7 = vsel %vm3244_vm9, %v3206_v45, %v18062_v47  ;;  %v18063_v52 = vld [vmem:[#allocation44_spill] sm:$0xff]  ;;  %v18064_v61 = vld [vmem:[#allocation331_spill] sm:$0xff]  ;;  %v18066_v8 = vld [vmem:[#allocation221_spill] sm:$0xff]  ;;  %v2950_v60 = vsel %vm2919_vm4, %v12239_v39, %v18067_v31 }
 0x493   : > { %v3337_v43 = vsel %vm3309_vm10, %v3272_v54, %v2717_v3  ;;  %v12439_v20 = vsel %vm2854_vm3, %v8445_v42, %v18063_v52  ;;  %v3078_v62 = vsel %vm3049_vm6, %v3013_v26, %v18064_v61  ;;  %v18065_v58 = vld [vmem:[#allocation219_spill] sm:$0xff]  ;;  %v3336_v51 = vsel %vm3309_vm10, %v3271_v7, %v2715_v21  ;;  %v18068_v9 = vld [vmem:[#allocation220_spill] sm:$0xff]  ;;  %v18070_v24 = vld [vmem:[#allocation225_spill] sm:$0xff]  ;;  %v2725_v7 = vpop.permute.xlu1 %2724 }
 0x494   : > { %v3144_v27 = vsel %vm3114_vm7, %v3079_v46, %v18065_v58  ;;  %v2951_v40 = vsel %vm2919_vm4, %v12209_v18, %v18066_v8  ;;  %v3143_v13 = vsel %vm3114_vm7, %v3078_v62, %v18068_v9  ;;  %v18069_v48 = vld [vmem:[#allocation28_spill] sm:$0xff]  ;;  %8073 = vmatprep.mubr.msk.f32.mxu0 %vm3386_vm11, %v3336_v51  ;;  %v2953_v34 = vsel %vm2919_vm4, %v12249_v53, %v18070_v24  ;;  %v18071_v28 = vld [vmem:[#allocation271_spill] sm:$0xff]  ;;  %v18072_v18 = vld [vmem:[#allocation29_spill] sm:$0xff]  ;;  %v2723_v58 = vpop.permute.xlu0 %2722 }
 0x495   : > { %v3209_v14 = vsel %vm3179_vm8, %v3144_v27, %v18069_v48  ;;  %v3016_v5 = vsel %vm2984_vm5, %v2951_v40, %v18071_v28  ;;  %v3208_v10 = vsel %vm3179_vm8, %v3143_v13, %v18072_v18  ;;  %v18073_v32 = vld [vmem:[#allocation141_spill] sm:$0xff]  ;;  %8074 = vmatmul.mubr.msk.f32.gmra.mxu0 %vm3386_vm11, %v3337_v43  ;;  %v18074_v12 = vld [vmem:[#allocation272_spill] sm:$0xff]  ;;  %v18076_v11 = vld [vmem:[#allocation143_spill] sm:$0xff] }
 0x496   : > { %v3274_v39 = vsel %vm3244_vm9, %v3209_v14, %v18073_v32  ;;  %v3015_v2 = vsel %vm2984_vm5, %v2950_v60, %v18074_v12  ;;  %v18075_v4 = vld [vmem:[#allocation332_spill] sm:$0xff]  ;;  %v3273_v53 = vsel %vm3244_vm9, %v3208_v10, %v18076_v11  ;;  %v18077_v41 = vld [vmem:[#allocation226_spill] sm:$0xff]  ;;  %v18078_v55 = vld [vmem:[#allocation333_spill] sm:$0xff] }
 0x497   : > { %v3081_v0 = vsel %vm3049_vm6, %v3016_v5, %v18075_v4  ;;  %v3339_v6 = vsel %vm3309_vm10, %v3274_v39, %v2721_v29  ;;  %v2952_v23 = vsel %vm2919_vm4, %v12279_v38, %v18077_v41  ;;  %v3080_v63 = vsel %vm3049_vm6, %v3015_v2, %v18078_v55  ;;  %v18079_v59 = vld [vmem:[#allocation223_spill] sm:$0xff]  ;;  %v18080_v16 = vld [vmem:[#allocation229_spill] sm:$0xff]  ;;  %v18081_v33 = vld [vmem:[#allocation230_spill] sm:$0xff]  ;;  %v2729_v2 = vpop.permute.xlu1 %2728 }
 0x498   : > { %v3146_v19 = vsel %vm3114_vm7, %v3081_v0, %v18079_v59  ;;  %v3338_v30 = vsel %vm3309_vm10, %v3273_v53, %v2719_v22  ;;  %v2955_v44 = vsel %vm2919_vm4, %v12289_v49, %v18080_v16  ;;  %v2954_v56 = vsel %vm2919_vm4, %v12319_v17, %v18081_v33  ;;  %v18082_v45 = vld [vmem:[#allocation224_spill] sm:$0xff]  ;;  %v18083_v38 = vld [vmem:[#allocation30_spill] sm:$0xff]  ;;  %v18084_v3 = vld [vmem:[#allocation233_spill] sm:$0xff]  ;;  %v2727_v41 = vpop.permute.xlu0 %2726 }
 0x499   : > { %v3145_v57 = vsel %vm3114_vm7, %v3080_v63, %v18082_v45  ;;  %v3211_v54 = vsel %vm3179_vm8, %v3146_v19, %v18083_v38  ;;  %8076 = vmatprep.mubr.msk.f32.mxu0 %vm3386_vm11, %v3338_v30  ;;  %v2957_v35 = vsel %vm2919_vm4, %v12329_v36, %v18084_v3  ;;  %v18085_v26 = vld [vmem:[#allocation273_spill] sm:$0xff]  ;;  %v18086_v49 = vld [vmem:[#allocation31_spill] sm:$0xff]  ;;  %v18088_v43 = vld [vmem:[#allocation274_spill] sm:$0xff] }
 0x49a   : > { %v3018_v25 = vsel %vm2984_vm5, %v2953_v34, %v18085_v26  ;;  %v3210_v46 = vsel %vm3179_vm8, %v3145_v57, %v18086_v49  ;;  %v18087_v47 = vld [vmem:[#allocation145_spill] sm:$0xff]  ;;  %8077 = vmatmul.mubr.msk.f32.gmra.mxu0 %vm3386_vm11, %v3339_v6  ;;  %v3017_v21 = vsel %vm2984_vm5, %v2952_v23, %v18088_v43  ;;  %v18089_v42 = vld [vmem:[#allocation334_spill] sm:$0xff]  ;;  %v18090_v61 = vld [vmem:[#allocation147_spill] sm:$0xff] }
 0x49b   : > { %v3276_v17 = vsel %vm3244_vm9, %v3211_v54, %v18087_v47  ;;  %v3083_v52 = vsel %vm3049_vm6, %v3018_v25, %v18089_v42  ;;  %v3275_v36 = vsel %vm3244_vm9, %v3210_v46, %v18090_v61  ;;  %v18091_v27 = vld [vmem:[#allocation234_spill] sm:$0xff]  ;;  %v18092_v8 = vld [vmem:[#allocation335_spill] sm:$0xff]  ;;  %v18095_v14 = vld [vmem:[#allocation236_spill] sm:$0xff]  ;;  %v2733_v43 = vpop.permute.xlu1 %2732 }
 0x49c   : > { %v3341_v62 = vsel %vm3309_vm10, %v3276_v17, %v2725_v7  ;;  %v2956_v51 = vsel %vm2919_vm4, %v12359_v50, %v18091_v27  ;;  %v3082_v40 = vsel %vm3049_vm6, %v3017_v21, %v18092_v8  ;;  %v18093_v31 = vld [vmem:[#allocation227_spill] sm:$0xff]  ;;  %v3340_v9 = vsel %vm3309_vm10, %v3275_v36, %v2723_v58  ;;  %v18096_v34 = vld [vmem:[#allocation228_spill] sm:$0xff]  ;;  %v18098_v18 = vld [vmem:[#allocation237_spill] sm:$0xff] }
 0x49d   : > { %v3148_v60 = vsel %vm3114_vm7, %v3083_v52, %v18093_v31  ;;  %v18094_v13 = vld [vmem:[#allocation235_spill] sm:$0xff]  ;;  %v2958_v24 = vsel %vm2919_vm4, %v12399_v1, %v18095_v14  ;;  %v3147_v28 = vsel %vm3114_vm7, %v3082_v40, %v18096_v34  ;;  %v18097_v50 = vld [vmem:[#allocation32_spill] sm:$0xff]  ;;  %8079 = vmatprep.mubr.msk.f32.mxu0 %vm3386_vm11, %v3340_v9  ;;  %v2961_v10 = vsel %vm2919_vm4, %v12409_v37, %v18098_v18  ;;  %v18101_v12 = vld [vmem:[#allocation149_spill] sm:$0xff] }
 0x49e   : > { %v2959_v48 = vsel %vm2919_vm4, %v12369_v15, %v18094_v13  ;;  %v3213_v5 = vsel %vm3179_vm8, %v3148_v60, %v18097_v50  ;;  %v18099_v32 = vld [vmem:[#allocation275_spill] sm:$0xff]  ;;  %v18100_v15 = vld [vmem:[#allocation33_spill] sm:$0xff]  ;;  %8080 = vmatmul.mubr.msk.f32.gmra.mxu0 %vm3386_vm11, %v3341_v62  ;;  %v18102_v4 = vld [vmem:[#allocation276_spill] sm:$0xff]  ;;  %v2731_v62 = vpop.permute.xlu0 %2730  ;;  %v16696_v8 = vmov 0.0  }
 0x49f   : > { %v3020_v39 = vsel %vm2984_vm5, %v2955_v44, %v18099_v32  ;;  %v3212_v29 = vsel %vm3179_vm8, %v3147_v28, %v18100_v15  ;;  %v3278_v1 = vsel %vm3244_vm9, %v3213_v5, %v18101_v12  ;;  %v3019_v0 = vsel %vm2984_vm5, %v2954_v56, %v18102_v4  ;;  %v18103_v11 = vld [vmem:[#allocation336_spill] sm:$0xff]  ;;  %v18104_v6 = vld [vmem:[#allocation151_spill] sm:$0xff]  ;;  %v18105_v23 = vld [vmem:[#allocation38_spill] sm:$0xff]  ;;  %8244 = vmatprep.subr.mxu0 %v16696_v8 }
 0x4a0   : > { %v3085_v53 = vsel %vm3049_vm6, %v3020_v39, %v18103_v11  ;;  %v3277_v37 = vsel %vm3244_vm9, %v3212_v29, %v18104_v6  ;;  %v3343_v22 = vsel %vm3309_vm10, %v3278_v1, %v2729_v2  ;;  %v3022_v55 = vsel %vm2984_vm5, %v2957_v35, %v18105_v23  ;;  %v18106_v63 = vld [vmem:[#allocation337_spill] sm:$0xff]  ;;  %v18107_v19 = vld [vmem:[#allocation231_spill] sm:$0xff]  ;;  %v18108_v44 = vld [vmem:[#allocation278_spill] sm:$0xff] }
 0x4a1   : > { %v3084_v59 = vsel %vm3049_vm6, %v3019_v0, %v18106_v63  ;;  %v3150_v30 = vsel %vm3114_vm7, %v3085_v53, %v18107_v19  ;;  %v3342_v16 = vsel %vm3309_vm10, %v3277_v37, %v2727_v41  ;;  %v3021_v33 = vsel %vm2984_vm5, %v2956_v51, %v18108_v44  ;;  %v18109_v56 = vld [vmem:[#allocation279_spill] sm:$0xff]  ;;  %v18110_v57 = vld [vmem:[#allocation232_spill] sm:$0xff]  ;;  %v18111_v54 = vld [vmem:[#allocation409_spill] sm:$0xff] }
 0x4a2   : > { %v3024_v45 = vsel %vm2984_vm5, %v2959_v48, %v18109_v56  ;;  %v3149_v38 = vsel %vm3114_vm7, %v3084_v59, %v18110_v57  ;;  %v3215_v3 = vsel %vm3179_vm8, %v3150_v30, %v18111_v54  ;;  %8082 = vmatprep.mubr.msk.f32.mxu0 %vm3386_vm11, %v3342_v16  ;;  %v18112_v35 = vld [vmem:[#allocation35_spill] sm:$0xff]  ;;  %v18114_v46 = vld [vmem:[#allocation410_spill] sm:$0xff]  ;;  %v18116_v21 = vld [vmem:[#allocation369_spill] sm:$0xff]  ;;  %v12580_v40 = vrot.slane %v16696_v8, 7  ;;  %v2735_v12 = vpop.permute.xlu0 %2734 }
 0x4a3   : > { %v3087_v26 = vsel %vm3049_vm6, %v3022_v55, %v18112_v35  ;;  %v18113_v25 = vld [vmem:[#allocation339_spill] sm:$0xff]  ;;  %v3214_v47 = vsel %vm3179_vm8, %v3149_v38, %v18114_v46  ;;  %8083 = vmatmul.mubr.msk.f32.gmra.mxu0 %vm3386_vm11, %v3343_v22  ;;  %v18117_v52 = vld [vmem:[#allocation424_spill] sm:$0xff]  ;;  %v18118_v58 = vld [vmem:[#allocation370_spill] sm:$0xff] }
 0x4a4   : > { %v3086_v49 = vsel %vm3049_vm6, %v3021_v33, %v18113_v25  ;;  %v18115_v17 = vld [vmem:[#allocation423_spill] sm:$0xff]  ;;  %v3152_v42 = vsel %vm3114_vm7, %v3087_v26, %v18116_v21  ;;  %v3279_v61 = vsel %vm3244_vm9, %v3214_v47, %v18117_v52  ;;  %18119 = vst [vmem:[#allocation113_spill] sm:$0xff] %v12580_v40  ;;  %v18120_v31 = vld [vmem:[#allocation280_spill] sm:$0xff]  ;;  %v18122_v48 = vld [vmem:[#allocation37_spill] sm:$0xff]  ;;  %v12599_v39 = vsel %vm4097_vm12, 0.0, %v12580_v40 }
 0x4a5   : > { %v3280_v7 = vsel %vm3244_vm9, %v3215_v3, %v18115_v17  ;;  %v3151_v27 = vsel %vm3114_vm7, %v3086_v49, %v18118_v58  ;;  %v3344_v51 = vsel %vm3309_vm10, %v3279_v61, %v2731_v62  ;;  %v3023_v60 = vsel %vm2984_vm5, %v2958_v24, %v18120_v31  ;;  %v18121_v9 = vld [vmem:[#allocation340_spill] sm:$0xff]  ;;  %v18123_v34 = vld [vmem:[#allocation277_spill] sm:$0xff]  ;;  %v18125_v18 = vld [vmem:[#allocation338_spill] sm:$0xff]  ;;  %v2737_v24 = vpop.permute.xlu1 %2736  ;;  %18126 = vst [vmem:[#allocation114_spill] sm:$0xff] %v12599_v39 }
 0x4a6   : > { %v3345_v36 = vsel %vm3309_vm10, %v3280_v7, %v2733_v43  ;;  %v3089_v13 = vsel %vm3049_vm6, %v3024_v45, %v18121_v9  ;;  %v3217_v14 = vsel %vm3179_vm8, %v3152_v42, %v18122_v48  ;;  %v3216_v28 = vsel %vm3179_vm8, %v3151_v27, %v18123_v34  ;;  %8085 = vmatprep.mubr.msk.f32.mxu0 %vm3386_vm11, %v3344_v51  ;;  %v18124_v50 = vld [vmem:[#allocation153_spill] sm:$0xff]  ;;  %v18127_v0 = vld [vmem:[#allocation238_spill] sm:$0xff]  ;;  %v18129_v37 = vld [vmem:[#allocation371_spill] sm:$0xff]  ;;  %v2739_v46 = vpop.permute.xlu0 %2738 }
 0x4a7   : > { %v3282_v5 = vsel %vm3244_vm9, %v3217_v14, %v18124_v50  ;;  %v3281_v32 = vsel %vm3244_vm9, %v3216_v28, %v18125_v18  ;;  %8086 = vmatmul.mubr.msk.f32.gmra.mxu0 %vm3386_vm11, %v3345_v36  ;;  %v12603_v15 = vsel %vm4097_vm12, %v12580_v40, 0.0  ;;  %v4420_v1 = vrot.slane %v12599_v39, 1  ;;  %v18128_v53 = vld [vmem:[#allocation341_spill] sm:$0xff]  ;;  %v18130_v23 = vld [vmem:[#allocation372_spill] sm:$0xff]  ;;  %v18131_v63 = vld [vmem:[#allocation411_spill] sm:$0xff] }
 0x4a8   : > { %v3347_v29 = vsel %vm3309_vm10, %v3282_v5, %v2737_v24  ;;  %v4421_v2 = vrot.slane %v12580_v40, 1  ;;  %v4423_v4 = vrot.slane %v12603_v15, 1  ;;  %v2960_v11 = vsel %vm2919_vm4, %v12439_v20, %v18127_v0  ;;  %v18132_v30 = vld [vmem:[#allocation45_spill] sm:$0xff]  ;;  %v18133_v44 = vld [vmem:[#allocation412_spill] sm:$0xff]  ;;  %v18136_v54 = vld [vmem:[#allocation46_spill] sm:$0xff] }
 0x4a9   : > { %v3088_v6 = vsel %vm3049_vm6, %v3023_v60, %v18128_v53  ;;  %v3154_v22 = vsel %vm3114_vm7, %v3089_v13, %v18129_v37  ;;  %v3346_v41 = vsel %vm3309_vm10, %v3281_v32, %v2735_v12  ;;  %v3026_v16 = vsel %vm2984_vm5, %v2961_v10, %v18132_v30  ;;  %v18134_v56 = vld [vmem:[#allocation425_spill] sm:$0xff]  ;;  %v2741_v57 = vpop.permute.xlu1 %2740  ;;  %v18138_v25 = vld [vmem:[#allocation426_spill] sm:$0xff]  ;;  %v8446_v47 = vld [vmem:[%s8869_s22 + $0x230] sm:$0xff] }
 0x4aa   : > { %v3153_v55 = vsel %vm3114_vm7, %v3088_v6, %v18130_v23  ;;  %v3219_v59 = vsel %vm3179_vm8, %v3154_v22, %v18131_v63  ;;  %8088 = vmatprep.mubr.msk.f32.mxu0 %vm3386_vm11, %v3346_v41  ;;  %v4422_v19 = vsel %vm944_vm0, %v4420_v1, %v4421_v2  ;;  %v4424_v20 = vsel %vm944_vm0, %v4421_v2, %v4423_v4  ;;  %v18137_v35 = vld [vmem:[#allocation41_spill] sm:$0xff]  ;;  %v18139_v17 = vld [vmem:[#allocation47_spill] sm:$0xff]  ;;  %v18144_v31 = vld [vmem:[#allocation374_spill] sm:$0xff]  ;;  %v2743_v53 = vpop.permute.xlu0 %2742 }
 0x4ab   : > { %v3218_v33 = vsel %vm3179_vm8, %v3153_v55, %v18133_v44  ;;  %v3284_v45 = vsel %vm3244_vm9, %v3219_v59, %v18134_v56  ;;  %8089 = vmatmul.mubr.msk.f32.gmra.mxu0 %vm3386_vm11, %v3347_v29  ;;  %v12631_v38 = vpack.i.bf16 %v4424_v20, %v4422_v19  ;;  %v3025_v3 = vsel %vm2984_vm5, %v2960_v11, %v18136_v54  ;;  %v18140_v43 = vld [vmem:[#allocation43_spill] sm:$0xff]  ;;  %v18141_v42 = vld [vmem:[#allocation373_spill] sm:$0xff]  ;;  %v18145_v9 = vld [vmem:[#allocation50_spill] sm:$0xff] }
 0x4ac   : > { %v3091_v26 = vsel %vm3049_vm6, %v3026_v16, %v18137_v35  ;;  %v3283_v10 = vsel %vm3244_vm9, %v3218_v33, %v18138_v25  ;;  %v3349_v49 = vsel %vm3309_vm10, %v3284_v45, %v2741_v57  ;;  %v2898_v7 = vsel %vm2854_vm3, %v8446_v47, %v18139_v17  ;;  %v8447_v36 = vld [vmem:[%s8869_s22 + $0x228] sm:$0xff]  ;;  %v18142_v62 = vld [vmem:[#allocation49_spill] sm:$0xff]  ;;  %v18146_v48 = vld [vmem:[#allocation240_spill] sm:$0xff] }
 0x4ad   : > { %18135 = vst [vmem:[#allocation98_spill] sm:$0xff] %v12631_v38  ;;  %v3090_v21 = vsel %vm3049_vm6, %v3025_v3, %v18140_v43  ;;  %v3156_v52 = vsel %vm3114_vm7, %v3091_v26, %v18141_v42  ;;  %v3348_v61 = vsel %vm3309_vm10, %v3283_v10, %v2739_v46  ;;  %8320 = vrot.lane.b32.xlu0 %v12631_v38, %s8535_s29  ;;  %v18143_v27 = vld [vmem:[#allocation239_spill] sm:$0xff]  ;;  %v18147_v34 = vld [vmem:[#allocation281_spill] sm:$0xff]  ;;  %v18149_v18 = vld [vmem:[#allocation154_spill] sm:$0xff]  ;;  %v2745_v24 = vpop.permute.xlu1 %2744 }
 0x4ae   : > { %v2897_v58 = vsel %vm2854_vm3, %v8447_v36, %v18142_v62  ;;  %v2963_v51 = vsel %vm2919_vm4, %v2898_v7, %v18143_v27  ;;  %v3155_v60 = vsel %vm3114_vm7, %v3090_v21, %v18144_v31  ;;  %v3221_v13 = vsel %vm3179_vm8, %v3156_v52, %v18145_v9  ;;  %8091 = vmatprep.mubr.msk.f32.mxu0 %vm3386_vm11, %v3348_v61  ;;  %v18148_v50 = vld [vmem:[#allocation51_spill] sm:$0xff]  ;;  %v18150_v29 = vld [vmem:[#allocation282_spill] sm:$0xff]  ;;  %v18152_v4 = vld [vmem:[#allocation48_spill] sm:$0xff]  ;;  %v2747_v36 = vpop.permute.xlu0 %2746 }
 0x4af   : > { %v2962_v14 = vsel %vm2919_vm4, %v2897_v58, %v18146_v48  ;;  %v3028_v28 = vsel %vm2984_vm5, %v2963_v51, %v18147_v34  ;;  %v3220_v5 = vsel %vm3179_vm8, %v3155_v60, %v18148_v50  ;;  %v3286_v32 = vsel %vm3244_vm9, %v3221_v13, %v18149_v18  ;;  %8092 = vmatmul.mubr.msk.f32.gmra.mxu0 %vm3386_vm11, %v3349_v49  ;;  %v18151_v1 = vld [vmem:[#allocation342_spill] sm:$0xff]  ;;  %v18153_v37 = vld [vmem:[#allocation52_spill] sm:$0xff]  ;;  %v18154_v41 = vld [vmem:[#allocation343_spill] sm:$0xff] }
 0x4b0   : > { %v3027_v12 = vsel %vm2984_vm5, %v2962_v14, %v18150_v29  ;;  %v3093_v2 = vsel %vm3049_vm6, %v3028_v28, %v18151_v1  ;;  %v3285_v0 = vsel %vm3244_vm9, %v3220_v5, %v18152_v4  ;;  %v3351_v11 = vsel %vm3309_vm10, %v3286_v32, %v2745_v24  ;;  %v8448_v6 = vld [vmem:[%s8869_s22 + $0x248] sm:$0xff]  ;;  %v8449_v19 = vld [vmem:[%s8869_s22 + $0x240] sm:$0xff]  ;;  %v18158_v33 = vld [vmem:[#allocation376_spill] sm:$0xff] }
 0x4b1   : > { %v2900_v22 = vsel %vm2854_vm3, %v8448_v6, %v18153_v37  ;;  %v3092_v23 = vsel %vm3049_vm6, %v3027_v12, %v18154_v41  ;;  %v18155_v55 = vld [vmem:[#allocation375_spill] sm:$0xff]  ;;  %v3350_v59 = vsel %vm3309_vm10, %v3285_v0, %v2743_v53  ;;  %v18156_v20 = vld [vmem:[#allocation54_spill] sm:$0xff]  ;;  %v18157_v16 = vld [vmem:[#allocation241_spill] sm:$0xff]  ;;  %v2749_v47 = vpop.permute.xlu1 %2748 }
 0x4b2   : > { %v3158_v63 = vsel %vm3114_vm7, %v3093_v2, %v18155_v55  ;;  %v2899_v30 = vsel %vm2854_vm3, %v8449_v19, %v18156_v20  ;;  %v2965_v44 = vsel %vm2919_vm4, %v2900_v22, %v18157_v16  ;;  %v3157_v56 = vsel %vm3114_vm7, %v3092_v23, %v18158_v33  ;;  %v18159_v45 = vld [vmem:[#allocation55_spill] sm:$0xff]  ;;  %8094 = vmatprep.mubr.msk.f32.mxu0 %vm3386_vm11, %v3350_v59  ;;  %v18160_v54 = vld [vmem:[#allocation242_spill] sm:$0xff]  ;;  %v18162_v25 = vld [vmem:[#allocation56_spill] sm:$0xff]  ;;  %v2751_v19 = vpop.permute.xlu0 %2750 }
 0x4b3   : > { %v3223_v57 = vsel %vm3179_vm8, %v3158_v63, %v18159_v45  ;;  %v2964_v3 = vsel %vm2919_vm4, %v2899_v30, %v18160_v54  ;;  %v18161_v35 = vld [vmem:[#allocation283_spill] sm:$0xff]  ;;  %v3222_v10 = vsel %vm3179_vm8, %v3157_v56, %v18162_v25  ;;  %8095 = vmatmul.mubr.msk.f32.gmra.mxu0 %vm3386_vm11, %v3351_v11  ;;  %v18164_v17 = vld [vmem:[#allocation284_spill] sm:$0xff]  ;;  %v18166_v42 = vld [vmem:[#allocation53_spill] sm:$0xff] }
 0x4b4   : > { %v3030_v26 = vsel %vm2984_vm5, %v2965_v44, %v18161_v35  ;;  %v18163_v49 = vld [vmem:[#allocation155_spill] sm:$0xff]  ;;  %v3029_v7 = vsel %vm2984_vm5, %v2964_v3, %v18164_v17  ;;  %v18165_v43 = vld [vmem:[#allocation344_spill] sm:$0xff]  ;;  %v3287_v52 = vsel %vm3244_vm9, %v3222_v10, %v18166_v42  ;;  %v8450_v62 = vld [vmem:[%s8869_s22 + $0x260] sm:$0xff] }
 0x4b5   : > { %v3288_v46 = vsel %vm3244_vm9, %v3223_v57, %v18163_v49  ;;  %v3095_v21 = vsel %vm3049_vm6, %v3030_v26, %v18165_v43  ;;  %v18167_v58 = vld [vmem:[#allocation57_spill] sm:$0xff]  ;;  %v3352_v13 = vsel %vm3309_vm10, %v3287_v52, %v2747_v36  ;;  %v18170_v14 = vld [vmem:[#allocation59_spill] sm:$0xff]  ;;  %v18172_v5 = vld [vmem:[#allocation378_spill] sm:$0xff]  ;;  %v2753_v6 = vpop.permute.xlu1 %2752 }
 0x4b6   : > { %v3353_v61 = vsel %vm3309_vm10, %v3288_v46, %v2749_v47  ;;  %v2902_v27 = vsel %vm2854_vm3, %v8450_v62, %v18167_v58  ;;  %v18168_v51 = vld [vmem:[#allocation345_spill] sm:$0xff]  ;;  %v18171_v28 = vld [vmem:[#allocation243_spill] sm:$0xff]  ;;  %v18173_v32 = vld [vmem:[#allocation60_spill] sm:$0xff]  ;;  %8097 = vmatprep.mubr.msk.f32.mxu0 %vm3386_vm11, %v3352_v13 }
 0x4b7   : > { %v3094_v31 = vsel %vm3049_vm6, %v3029_v7, %v18168_v51  ;;  %v18169_v60 = vld [vmem:[#allocation377_spill] sm:$0xff]  ;;  %v2967_v50 = vsel %vm2919_vm4, %v2902_v27, %v18171_v28  ;;  %v18174_v29 = vld [vmem:[#allocation244_spill] sm:$0xff]  ;;  %8098 = vmatmul.mubr.msk.f32.gmra.mxu0 %vm3386_vm11, %v3353_v61  ;;  %v18178_v37 = vld [vmem:[#allocation286_spill] sm:$0xff] }
 0x4b8   : > { %v3160_v9 = vsel %vm3114_vm7, %v3095_v21, %v18169_v60  ;;  %v8451_v48 = vld [vmem:[%s8869_s22 + $0x258] sm:$0xff]  ;;  %v3159_v18 = vsel %vm3114_vm7, %v3094_v31, %v18172_v5  ;;  %v18179_v41 = vld [vmem:[#allocation346_spill] sm:$0xff]  ;;  %v18182_v44 = vld [vmem:[#allocation347_spill] sm:$0xff] }
 0x4b9   : > { %v2901_v34 = vsel %vm2854_vm3, %v8451_v48, %v18170_v14  ;;  %v3225_v24 = vsel %vm3179_vm8, %v3160_v9, %v18173_v32  ;;  %v18175_v1 = vld [vmem:[#allocation285_spill] sm:$0xff]  ;;  %v18177_v11 = vld [vmem:[#allocation156_spill] sm:$0xff]  ;;  %v18180_v55 = vld [vmem:[#allocation58_spill] sm:$0xff]  ;;  %v2757_v62 = vpop.permute.xlu1 %2756  ;;  %v2755_v48 = vpop.permute.xlu0 %2754 }
 0x4ba   : > { %v2966_v12 = vsel %vm2919_vm4, %v2901_v34, %v18174_v29  ;;  %v3032_v2 = vsel %vm2984_vm5, %v2967_v50, %v18175_v1  ;;  %v18176_v4 = vld [vmem:[#allocation61_spill] sm:$0xff]  ;;  %v3290_v53 = vsel %vm3244_vm9, %v3225_v24, %v18177_v11  ;;  %v18181_v30 = vld [vmem:[#allocation62_spill] sm:$0xff]  ;;  %v18183_v56 = vld [vmem:[#allocation379_spill] sm:$0xff] }
 0x4bb   : > { %v3224_v0 = vsel %vm3179_vm8, %v3159_v18, %v18176_v4  ;;  %v3031_v22 = vsel %vm2984_vm5, %v2966_v12, %v18178_v37  ;;  %v3097_v23 = vsel %vm3049_vm6, %v3032_v2, %v18179_v41  ;;  %v3355_v59 = vsel %vm3309_vm10, %v3290_v53, %v2753_v6  ;;  %v8452_v20 = vld [vmem:[%s8869_s22 + $0x278] sm:$0xff]  ;;  %v8453_v54 = vld [vmem:[%s8869_s22 + $0x270] sm:$0xff]  ;;  %v18188_v17 = vld [vmem:[#allocation246_spill] sm:$0xff] }
 0x4bc   : > { %v3289_v63 = vsel %vm3244_vm9, %v3224_v0, %v18180_v55  ;;  %v2904_v16 = vsel %vm2854_vm3, %v8452_v20, %v18181_v30  ;;  %v3096_v33 = vsel %vm3049_vm6, %v3031_v22, %v18182_v44  ;;  %v3162_v45 = vsel %vm3114_vm7, %v3097_v23, %v18183_v56  ;;  %v18184_v3 = vld [vmem:[#allocation64_spill] sm:$0xff]  ;;  %v18185_v26 = vld [vmem:[#allocation245_spill] sm:$0xff]  ;;  %v18189_v43 = vld [vmem:[#allocation287_spill] sm:$0xff] }
 0x4bd   : > { %v3354_v57 = vsel %vm3309_vm10, %v3289_v63, %v2751_v19  ;;  %v2903_v35 = vsel %vm2854_vm3, %v8453_v54, %v18184_v3  ;;  %v2969_v25 = vsel %vm2919_vm4, %v2904_v16, %v18185_v26  ;;  %v18186_v10 = vld [vmem:[#allocation380_spill] sm:$0xff]  ;;  %v18187_v46 = vld [vmem:[#allocation65_spill] sm:$0xff]  ;;  %v18190_v42 = vld [vmem:[#allocation66_spill] sm:$0xff]  ;;  %v2761_v20 = vpop.permute.xlu1 %2760  ;;  %v2759_v54 = vpop.permute.xlu0 %2758 }
 0x4be   : > { %v3161_v49 = vsel %vm3114_vm7, %v3096_v33, %v18186_v10  ;;  %v3227_v47 = vsel %vm3179_vm8, %v3162_v45, %v18187_v46  ;;  %8100 = vmatprep.mubr.msk.f32.mxu0 %vm3386_vm11, %v3354_v57  ;;  %v2968_v7 = vsel %vm2919_vm4, %v2903_v35, %v18188_v17  ;;  %v3034_v21 = vsel %vm2984_vm5, %v2969_v25, %v18189_v43  ;;  %v18191_v61 = vld [vmem:[#allocation157_spill] sm:$0xff]  ;;  %v18192_v58 = vld [vmem:[#allocation288_spill] sm:$0xff]  ;;  %v18194_v60 = vld [vmem:[#allocation63_spill] sm:$0xff] }
 0x4bf   : > { %v3226_v52 = vsel %vm3179_vm8, %v3161_v49, %v18190_v42  ;;  %v3292_v36 = vsel %vm3244_vm9, %v3227_v47, %v18191_v61  ;;  %8101 = vmatmul.mubr.msk.f32.gmra.mxu0 %vm3386_vm11, %v3355_v59  ;;  %v3033_v27 = vsel %vm2984_vm5, %v2968_v7, %v18192_v58  ;;  %v18193_v51 = vld [vmem:[#allocation348_spill] sm:$0xff]  ;;  %v18195_v34 = vld [vmem:[#allocation67_spill] sm:$0xff]  ;;  %v18196_v50 = vld [vmem:[#allocation349_spill] sm:$0xff] }
 0x4c0   : > { %v3099_v31 = vsel %vm3049_vm6, %v3034_v21, %v18193_v51  ;;  %v3291_v9 = vsel %vm3244_vm9, %v3226_v52, %v18194_v60  ;;  %v3357_v13 = vsel %vm3309_vm10, %v3292_v36, %v2757_v62  ;;  %v8454_v14 = vld [vmem:[%s8869_s22 + $0x290] sm:$0xff]  ;;  %v3098_v5 = vsel %vm3049_vm6, %v3033_v27, %v18196_v50  ;;  %v18197_v18 = vld [vmem:[#allocation381_spill] sm:$0xff]  ;;  %v8455_v29 = vld [vmem:[%s8869_s22 + $0x288] sm:$0xff] }
 0x4c1   : > { %v2906_v28 = vsel %vm2854_vm3, %v8454_v14, %v18195_v34  ;;  %v3164_v32 = vsel %vm3114_vm7, %v3099_v31, %v18197_v18  ;;  %v3356_v24 = vsel %vm3309_vm10, %v3291_v9, %v2755_v48  ;;  %v18198_v12 = vld [vmem:[#allocation69_spill] sm:$0xff]  ;;  %v18199_v2 = vld [vmem:[#allocation247_spill] sm:$0xff]  ;;  %v18200_v0 = vld [vmem:[#allocation382_spill] sm:$0xff]  ;;  %v2765_v14 = vpop.permute.xlu1 %2764 }
 0x4c2   : > { %v2905_v1 = vsel %vm2854_vm3, %v8455_v29, %v18198_v12  ;;  %v2971_v4 = vsel %vm2919_vm4, %v2906_v28, %v18199_v2  ;;  %v3163_v11 = vsel %vm3114_vm7, %v3098_v5, %v18200_v0  ;;  %v18201_v53 = vld [vmem:[#allocation70_spill] sm:$0xff]  ;;  %8103 = vmatprep.mubr.msk.f32.mxu0 %vm3386_vm11, %v3356_v24  ;;  %v18202_v37 = vld [vmem:[#allocation248_spill] sm:$0xff]  ;;  %v18203_v41 = vld [vmem:[#allocation289_spill] sm:$0xff]  ;;  %v2763_v29 = vpop.permute.xlu0 %2762 }
 0x4c3   : > { %v3229_v6 = vsel %vm3179_vm8, %v3164_v32, %v18201_v53  ;;  %v2970_v22 = vsel %vm2919_vm4, %v2905_v1, %v18202_v37  ;;  %v3036_v23 = vsel %vm2984_vm5, %v2971_v4, %v18203_v41  ;;  %v18204_v55 = vld [vmem:[#allocation71_spill] sm:$0xff]  ;;  %v18205_v59 = vld [vmem:[#allocation158_spill] sm:$0xff]  ;;  %8104 = vmatmul.mubr.msk.f32.gmra.mxu0 %vm3386_vm11, %v3357_v13  ;;  %v18208_v56 = vld [vmem:[#allocation68_spill] sm:$0xff] }
 0x4c4   : > { %v3228_v63 = vsel %vm3179_vm8, %v3163_v11, %v18204_v55  ;;  %v3294_v19 = vsel %vm3244_vm9, %v3229_v6, %v18205_v59  ;;  %v18206_v30 = vld [vmem:[#allocation290_spill] sm:$0xff]  ;;  %v18209_v35 = vld [vmem:[#allocation72_spill] sm:$0xff]  ;;  %v18210_v25 = vld [vmem:[#allocation351_spill] sm:$0xff] }
 0x4c5   : > { %v3035_v16 = vsel %vm2984_vm5, %v2970_v22, %v18206_v30  ;;  %v18207_v44 = vld [vmem:[#allocation350_spill] sm:$0xff]  ;;  %v3293_v45 = vsel %vm3244_vm9, %v3228_v63, %v18208_v56  ;;  %v3359_v57 = vsel %vm3309_vm10, %v3294_v19, %v2761_v20  ;;  %v18211_v49 = vld [vmem:[#allocation383_spill] sm:$0xff]  ;;  %v18213_v21 = vld [vmem:[#allocation249_spill] sm:$0xff] }
 0x4c6   : > { %v3101_v33 = vsel %vm3049_vm6, %v3036_v23, %v18207_v44  ;;  %v8456_v3 = vld [vmem:[%s8869_s22 + $0x2a8] sm:$0xff]  ;;  %v3100_v10 = vsel %vm3049_vm6, %v3035_v16, %v18210_v25  ;;  %v3358_v47 = vsel %vm3309_vm10, %v3293_v45, %v2759_v54  ;;  %v8457_v17 = vld [vmem:[%s8869_s22 + $0x2a0] sm:$0xff]  ;;  %v18214_v52 = vld [vmem:[#allocation384_spill] sm:$0xff] }
 0x4c7   : > { %v2908_v26 = vsel %vm2854_vm3, %v8456_v3, %v18209_v35  ;;  %v3166_v46 = vsel %vm3114_vm7, %v3101_v33, %v18211_v49  ;;  %v18212_v7 = vld [vmem:[#allocation74_spill] sm:$0xff]  ;;  %v3165_v61 = vsel %vm3114_vm7, %v3100_v10, %v18214_v52  ;;  %v18215_v36 = vld [vmem:[#allocation75_spill] sm:$0xff]  ;;  %8106 = vmatprep.mubr.msk.f32.mxu0 %vm3386_vm11, %v3358_v47  ;;  %v18218_v60 = vld [vmem:[#allocation76_spill] sm:$0xff]  ;;  %v2769_v3 = vpop.permute.xlu1 %2768 }
 0x4c8   : > { %v2907_v43 = vsel %vm2854_vm3, %v8457_v17, %v18212_v7  ;;  %v2973_v42 = vsel %vm2919_vm4, %v2908_v26, %v18213_v21  ;;  %v3231_v62 = vsel %vm3179_vm8, %v3166_v46, %v18215_v36  ;;  %v18216_v58 = vld [vmem:[#allocation250_spill] sm:$0xff]  ;;  %v18217_v51 = vld [vmem:[#allocation291_spill] sm:$0xff]  ;;  %v3230_v9 = vsel %vm3179_vm8, %v3165_v61, %v18218_v60  ;;  %8107 = vmatmul.mubr.msk.f32.gmra.mxu0 %vm3386_vm11, %v3359_v57  ;;  %v18220_v34 = vld [vmem:[#allocation292_spill] sm:$0xff]  ;;  %v2767_v17 = vpop.permute.xlu0 %2766 }
 0x4c9   : > { %v2972_v27 = vsel %vm2919_vm4, %v2907_v43, %v18216_v58  ;;  %v3038_v31 = vsel %vm2984_vm5, %v2973_v42, %v18217_v51  ;;  %v18219_v13 = vld [vmem:[#allocation159_spill] sm:$0xff]  ;;  %v18221_v50 = vld [vmem:[#allocation352_spill] sm:$0xff]  ;;  %v18222_v18 = vld [vmem:[#allocation73_spill] sm:$0xff] }
 0x4ca   : > { %v3296_v48 = vsel %vm3244_vm9, %v3231_v62, %v18219_v13  ;;  %v3037_v28 = vsel %vm2984_vm5, %v2972_v27, %v18220_v34  ;;  %v3103_v5 = vsel %vm3049_vm6, %v3038_v31, %v18221_v50  ;;  %v3295_v32 = vsel %vm3244_vm9, %v3230_v9, %v18222_v18  ;;  %v8458_v12 = vld [vmem:[%s8869_s22 + $0x2c0] sm:$0xff]  ;;  %v8459_v37 = vld [vmem:[%s8869_s22 + $0x2b8] sm:$0xff]  ;;  %v18226_v22 = vld [vmem:[#allocation79_spill] sm:$0xff] }
 0x4cb   : > { %v3361_v24 = vsel %vm3309_vm10, %v3296_v48, %v2765_v14  ;;  %v18223_v1 = vld [vmem:[#allocation77_spill] sm:$0xff]  ;;  %v3360_v6 = vsel %vm3309_vm10, %v3295_v32, %v2763_v29  ;;  %v2909_v41 = vsel %vm2854_vm3, %v8459_v37, %v18226_v22  ;;  %v18227_v23 = vld [vmem:[#allocation251_spill] sm:$0xff]  ;;  %v18228_v63 = vld [vmem:[#allocation386_spill] sm:$0xff] }
 0x4cc   : > { %v2910_v2 = vsel %vm2854_vm3, %v8458_v12, %v18223_v1  ;;  %v18224_v4 = vld [vmem:[#allocation353_spill] sm:$0xff]  ;;  %v18229_v19 = vld [vmem:[#allocation80_spill] sm:$0xff]  ;;  %8109 = vmatprep.mubr.msk.f32.mxu0 %vm3386_vm11, %v3360_v6  ;;  %v18234_v35 = vld [vmem:[#allocation294_spill] sm:$0xff]  ;;  %v2773_v12 = vpop.permute.xlu1 %2772  ;;  %v2771_v37 = vpop.permute.xlu0 %2770 }
 0x4cd   : > { %v3102_v0 = vsel %vm3049_vm6, %v3037_v28, %v18224_v4  ;;  %v18225_v11 = vld [vmem:[#allocation385_spill] sm:$0xff]  ;;  %v2975_v55 = vsel %vm2919_vm4, %v2910_v2, %v18227_v23  ;;  %v18230_v30 = vld [vmem:[#allocation252_spill] sm:$0xff]  ;;  %8110 = vmatmul.mubr.msk.f32.gmra.mxu0 %vm3386_vm11, %v3361_v24  ;;  %v18235_v25 = vld [vmem:[#allocation354_spill] sm:$0xff] }
 0x4ce   : > { %v3168_v53 = vsel %vm3114_vm7, %v3103_v5, %v18225_v11  ;;  %v3167_v59 = vsel %vm3114_vm7, %v3102_v0, %v18228_v63  ;;  %v2974_v16 = vsel %vm2919_vm4, %v2909_v41, %v18230_v30  ;;  %v18231_v44 = vld [vmem:[#allocation293_spill] sm:$0xff]  ;;  %v18233_v57 = vld [vmem:[#allocation160_spill] sm:$0xff]  ;;  %v18236_v49 = vld [vmem:[#allocation78_spill] sm:$0xff] }
 0x4cf   : > { %v3233_v20 = vsel %vm3179_vm8, %v3168_v53, %v18229_v19  ;;  %v3040_v33 = vsel %vm2984_vm5, %v2975_v55, %v18231_v44  ;;  %v18232_v56 = vld [vmem:[#allocation81_spill] sm:$0xff]  ;;  %v3039_v26 = vsel %vm2984_vm5, %v2974_v16, %v18234_v35  ;;  %v18237_v43 = vld [vmem:[#allocation82_spill] sm:$0xff]  ;;  %v18238_v42 = vld [vmem:[#allocation355_spill] sm:$0xff] }
 0x4d0   : > { %v3232_v45 = vsel %vm3179_vm8, %v3167_v59, %v18232_v56  ;;  %v3298_v54 = vsel %vm3244_vm9, %v3233_v20, %v18233_v57  ;;  %v3105_v10 = vsel %vm3049_vm6, %v3040_v33, %v18235_v25  ;;  %v8460_v7 = vld [vmem:[%s8869_s22 + $0x2d8] sm:$0xff]  ;;  %v3104_v52 = vsel %vm3049_vm6, %v3039_v26, %v18238_v42  ;;  %v18239_v61 = vld [vmem:[#allocation387_spill] sm:$0xff]  ;;  %v18244_v34 = vld [vmem:[#allocation254_spill] sm:$0xff] }
 0x4d1   : > { %v3297_v46 = vsel %vm3244_vm9, %v3232_v45, %v18236_v49  ;;  %v3363_v47 = vsel %vm3309_vm10, %v3298_v54, %v2769_v3  ;;  %v2912_v21 = vsel %vm2854_vm3, %v8460_v7, %v18237_v43  ;;  %v3170_v36 = vsel %vm3114_vm7, %v3105_v10, %v18239_v61  ;;  %v8461_v58 = vld [vmem:[%s8869_s22 + $0x2d0] sm:$0xff]  ;;  %v18241_v31 = vld [vmem:[#allocation253_spill] sm:$0xff]  ;;  %v18246_v18 = vld [vmem:[#allocation86_spill] sm:$0xff]  ;;  %v2777_v7 = vpop.permute.xlu1 %2776 }
 0x4d2   : > { %v3362_v62 = vsel %vm3309_vm10, %v3297_v46, %v2767_v17  ;;  %v18240_v27 = vld [vmem:[#allocation84_spill] sm:$0xff]  ;;  %v2977_v60 = vsel %vm2919_vm4, %v2912_v21, %v18241_v31  ;;  %v18243_v48 = vld [vmem:[#allocation85_spill] sm:$0xff]  ;;  %v18245_v50 = vld [vmem:[#allocation295_spill] sm:$0xff] }
 0x4d3   : > { %v2911_v51 = vsel %vm2854_vm3, %v8461_v58, %v18240_v27  ;;  %v18242_v9 = vld [vmem:[#allocation388_spill] sm:$0xff]  ;;  %v3235_v14 = vsel %vm3179_vm8, %v3170_v36, %v18243_v48  ;;  %8112 = vmatprep.mubr.msk.f32.mxu0 %vm3386_vm11, %v3362_v62  ;;  %v3042_v5 = vsel %vm2984_vm5, %v2977_v60, %v18245_v50  ;;  %v18247_v24 = vld [vmem:[#allocation161_spill] sm:$0xff]  ;;  %v18250_v11 = vld [vmem:[#allocation83_spill] sm:$0xff]  ;;  %v2775_v58 = vpop.permute.xlu0 %2774 }
 0x4d4   : > { %v3169_v13 = vsel %vm3114_vm7, %v3104_v52, %v18242_v9  ;;  %v2976_v28 = vsel %vm2919_vm4, %v2911_v51, %v18244_v34  ;;  %v3300_v29 = vsel %vm3244_vm9, %v3235_v14, %v18247_v24  ;;  %8113 = vmatmul.mubr.msk.f32.gmra.mxu0 %vm3386_vm11, %v3363_v47  ;;  %v18248_v1 = vld [vmem:[#allocation296_spill] sm:$0xff]  ;;  %v18251_v41 = vld [vmem:[#allocation87_spill] sm:$0xff]  ;;  %v18252_v55 = vld [vmem:[#allocation357_spill] sm:$0xff] }
 0x4d5   : > { %v3234_v32 = vsel %vm3179_vm8, %v3169_v13, %v18246_v18  ;;  %v3041_v2 = vsel %vm2984_vm5, %v2976_v28, %v18248_v1  ;;  %v18249_v4 = vld [vmem:[#allocation356_spill] sm:$0xff]  ;;  %v3365_v6 = vsel %vm3309_vm10, %v3300_v29, %v2773_v12  ;;  %v18253_v59 = vld [vmem:[#allocation389_spill] sm:$0xff]  ;;  %v8463_v30 = vld [vmem:[%s8869_s22 + $0x2e8] sm:$0xff] }
 0x4d6   : > { %v3107_v0 = vsel %vm3049_vm6, %v3042_v5, %v18249_v4  ;;  %v3299_v53 = vsel %vm3244_vm9, %v3234_v32, %v18250_v11  ;;  %v8462_v22 = vld [vmem:[%s8869_s22 + $0x2f0] sm:$0xff]  ;;  %v3106_v63 = vsel %vm3049_vm6, %v3041_v2, %v18252_v55  ;;  %v18254_v16 = vld [vmem:[#allocation89_spill] sm:$0xff]  ;;  %v18256_v45 = vld [vmem:[#allocation390_spill] sm:$0xff] }
 0x4d7   : > { %v2914_v23 = vsel %vm2854_vm3, %v8462_v22, %v18251_v41  ;;  %v3172_v19 = vsel %vm3114_vm7, %v3107_v0, %v18253_v59  ;;  %v3364_v20 = vsel %vm3309_vm10, %v3299_v53, %v2771_v37  ;;  %v2913_v44 = vsel %vm2854_vm3, %v8463_v30, %v18254_v16  ;;  %v18255_v33 = vld [vmem:[#allocation255_spill] sm:$0xff]  ;;  %v18257_v54 = vld [vmem:[#allocation90_spill] sm:$0xff]  ;;  %v18258_v35 = vld [vmem:[#allocation256_spill] sm:$0xff]  ;;  %v2781_v22 = vpop.permute.xlu1 %2780  ;;  %v2779_v30 = vpop.permute.xlu0 %2778 }
 0x4d8   : > { %v2979_v56 = vsel %vm2919_vm4, %v2914_v23, %v18255_v33  ;;  %v3171_v57 = vsel %vm3114_vm7, %v3106_v63, %v18256_v45  ;;  %v3237_v3 = vsel %vm3179_vm8, %v3172_v19, %v18257_v54  ;;  %8115 = vmatprep.mubr.msk.f32.mxu0 %vm3386_vm11, %v3364_v20  ;;  %v2978_v26 = vsel %vm2919_vm4, %v2913_v44, %v18258_v35  ;;  %v18259_v25 = vld [vmem:[#allocation297_spill] sm:$0xff]  ;;  %v18260_v49 = vld [vmem:[#allocation91_spill] sm:$0xff]  ;;  %v18262_v43 = vld [vmem:[#allocation298_spill] sm:$0xff] }
 0x4d9   : > { %v3044_v10 = vsel %vm2984_vm5, %v2979_v56, %v18259_v25  ;;  %v3236_v46 = vsel %vm3179_vm8, %v3171_v57, %v18260_v49  ;;  %v18261_v47 = vld [vmem:[#allocation427_spill] sm:$0xff]  ;;  %8116 = vmatmul.mubr.msk.f32.gmra.mxu0 %vm3386_vm11, %v3365_v6  ;;  %v3043_v21 = vsel %vm2984_vm5, %v2978_v26, %v18262_v43  ;;  %v18263_v42 = vld [vmem:[#allocation162_spill] sm:$0xff]  ;;  %v18264_v61 = vld [vmem:[#allocation428_spill] sm:$0xff] }
 0x4da   : > { %v3302_v17 = vsel %vm3244_vm9, %v3237_v3, %v18261_v47  ;;  %v3109_v52 = vsel %vm3049_vm6, %v3044_v10, %v18263_v42  ;;  %v3301_v36 = vsel %vm3244_vm9, %v3236_v46, %v18264_v61  ;;  %v8464_v27 = vld [vmem:[%s8869_s22 + $0x308] sm:$0xff]  ;;  %v18265_v51 = vld [vmem:[#allocation92_spill] sm:$0xff]  ;;  %v8465_v34 = vld [vmem:[%s8869_s22 + $0x300] sm:$0xff] }
 0x4db   : > { %v3367_v62 = vsel %vm3309_vm10, %v3302_v17, %v2777_v7  ;;  %v2916_v31 = vsel %vm2854_vm3, %v8464_v27, %v18265_v51  ;;  %v18266_v60 = vld [vmem:[#allocation88_spill] sm:$0xff]  ;;  %v18267_v13 = vld [vmem:[#allocation391_spill] sm:$0xff]  ;;  %v3366_v14 = vsel %vm3309_vm10, %v3301_v36, %v2775_v58  ;;  %v18268_v28 = vld [vmem:[#allocation94_spill] sm:$0xff]  ;;  %v2785_v27 = vpop.permute.xlu1 %2784 }
 0x4dc   : > { %v3108_v9 = vsel %vm3049_vm6, %v3043_v21, %v18266_v60  ;;  %v3174_v48 = vsel %vm3114_vm7, %v3109_v52, %v18267_v13  ;;  %v2915_v50 = vsel %vm2854_vm3, %v8465_v34, %v18268_v28  ;;  %v18269_v5 = vld [vmem:[#allocation257_spill] sm:$0xff]  ;;  %v18270_v32 = vld [vmem:[#allocation392_spill] sm:$0xff]  ;;  %v18271_v29 = vld [vmem:[#allocation95_spill] sm:$0xff]  ;;  %8118 = vmatprep.mubr.msk.f32.mxu0 %vm3386_vm11, %v3366_v14  ;;  %v2783_v34 = vpop.permute.xlu0 %2782 }
 0x4dd   : > { %v2981_v18 = vsel %vm2919_vm4, %v2916_v31, %v18269_v5  ;;  %v3173_v24 = vsel %vm3114_vm7, %v3108_v9, %v18270_v32  ;;  %v3239_v12 = vsel %vm3179_vm8, %v3174_v48, %v18271_v29  ;;  %v18272_v1 = vld [vmem:[#allocation258_spill] sm:$0xff]  ;;  %v18273_v4 = vld [vmem:[#allocation299_spill] sm:$0xff]  ;;  %v18274_v11 = vld [vmem:[#allocation96_spill] sm:$0xff]  ;;  %8119 = vmatmul.mubr.msk.f32.gmra.mxu0 %vm3386_vm11, %v3367_v62 }
 0x4de   : > { %v2980_v2 = vsel %vm2919_vm4, %v2915_v50, %v18272_v1  ;;  %v3046_v0 = vsel %vm2984_vm5, %v2981_v18, %v18273_v4  ;;  %v3238_v53 = vsel %vm3179_vm8, %v3173_v24, %v18274_v11  ;;  %v18275_v6 = vld [vmem:[#allocation93_spill] sm:$0xff]  ;;  %v18276_v41 = vld [vmem:[#allocation300_spill] sm:$0xff]  ;;  %v18277_v55 = vld [vmem:[#allocation163_spill] sm:$0xff] }
 0x4df   : > { %v3304_v37 = vsel %vm3244_vm9, %v3239_v12, %v18275_v6  ;;  %v3045_v23 = vsel %vm2984_vm5, %v2980_v2, %v18276_v41  ;;  %v3111_v63 = vsel %vm3049_vm6, %v3046_v0, %v18277_v55  ;;  %v18278_v59 = vld [vmem:[#allocation429_spill] sm:$0xff]  ;;  %v18280_v56 = vld [vmem:[#allocation358_spill] sm:$0xff]  ;;  %v18282_v26 = vld [vmem:[#allocation99_spill] sm:$0xff] }
 0x4e0   : > { %v3303_v19 = vsel %vm3244_vm9, %v3238_v53, %v18278_v59  ;;  %v3369_v20 = vsel %vm3309_vm10, %v3304_v37, %v2781_v22  ;;  %v8466_v16 = vld [vmem:[%s8869_s22 + $0x320] sm:$0xff]  ;;  %v3110_v45 = vsel %vm3049_vm6, %v3045_v23, %v18280_v56  ;;  %v8467_v35 = vld [vmem:[%s8869_s22 + $0x318] sm:$0xff]  ;;  %v18283_v10 = vld [vmem:[#allocation259_spill] sm:$0xff]  ;;  %v2789_v53 = vpop.permute.xlu1 %2788  ;;  %v2787_v41 = vpop.permute.xlu0 %2786  ;;  %s8545_s22 = smov 56  }
 0x4e1   : > { %v18279_v44 = vld [vmem:[#allocation97_spill] sm:$0xff]  ;;  %v3368_v3 = vsel %vm3309_vm10, %v3303_v19, %v2779_v30  ;;  %v2917_v25 = vsel %vm2854_vm3, %v8467_v35, %v18282_v26  ;;  %v18284_v46 = vld [vmem:[#allocation394_spill] sm:$0xff]  ;;  %v18286_v43 = vld [vmem:[#allocation260_spill] sm:$0xff] }
 0x4e2   : > { %v2918_v33 = vsel %vm2854_vm3, %v8466_v16, %v18279_v44  ;;  %v18281_v57 = vld [vmem:[#allocation393_spill] sm:$0xff]  ;;  %v3175_v47 = vsel %vm3114_vm7, %v3110_v45, %v18284_v46  ;;  %8121 = vmatprep.mubr.msk.f32.mxu0 %vm3386_vm11, %v3368_v3  ;;  %v2982_v21 = vsel %vm2919_vm4, %v2917_v25, %v18286_v43  ;;  %v18287_v42 = vld [vmem:[#allocation100_spill] sm:$0xff]  ;;  %v18291_v60 = vld [vmem:[#allocation359_spill] sm:$0xff]  ;;  %vm6788_vm3 = vcmask 588800  }
 0x4e3   : > { %v3176_v54 = vsel %vm3114_vm7, %v3111_v63, %v18281_v57  ;;  %v2983_v49 = vsel %vm2919_vm4, %v2918_v33, %v18283_v10  ;;  %v18285_v17 = vld [vmem:[#allocation101_spill] sm:$0xff]  ;;  %8122 = vmatmul.mubr.msk.f32.gmra.mxu0 %vm3386_vm11, %v3369_v20  ;;  %v18292_v13 = vld [vmem:[#allocation107_spill] sm:$0xff]  ;;  %v18293_v28 = vld [vmem:[#allocation360_spill] sm:$0xff] }
 0x4e4   : > { %v3241_v7 = vsel %vm3179_vm8, %v3176_v54, %v18285_v17  ;;  %v3048_v52 = vsel %vm2984_vm5, %v2983_v49, %v18287_v42  ;;  %v18288_v61 = vld [vmem:[#allocation413_spill] sm:$0xff]  ;;  %v18294_v5 = vld [vmem:[#allocation395_spill] sm:$0xff]  ;;  %v18295_v24 = vld [vmem:[#allocation396_spill] sm:$0xff] }
 0x4e5   : > { %v3240_v36 = vsel %vm3179_vm8, %v3175_v47, %v18288_v61  ;;  %v18289_v62 = vld [vmem:[#allocation105_spill] sm:$0xff]  ;;  %v3113_v9 = vsel %vm3049_vm6, %v3048_v52, %v18291_v60  ;;  %v18296_v12 = vld [vmem:[#allocation104_spill] sm:$0xff]  ;;  %v18297_v2 = vld [vmem:[#allocation106_spill] sm:$0xff] }
 0x4e6   : > { %v3306_v58 = vsel %vm3244_vm9, %v3241_v7, %v18289_v62  ;;  %v18290_v51 = vld [vmem:[#allocation301_spill] sm:$0xff]  ;;  %v3305_v48 = vsel %vm3244_vm9, %v3240_v36, %v18292_v13  ;;  %v3178_v18 = vsel %vm3114_vm7, %v3113_v9, %v18294_v5  ;;  %v18298_v0 = vld [vmem:[#allocation111_spill] sm:$0xff]  ;;  %v18299_v6 = vld [vmem:[#allocation112_spill] sm:$0xff] }
 0x4e7   : > { %v3047_v31 = vsel %vm2984_vm5, %v2982_v21, %v18290_v51  ;;  %v3371_v14 = vsel %vm3309_vm10, %v3306_v58, %v2785_v27  ;;  %v3370_v32 = vsel %vm3309_vm10, %v3305_v48, %v2783_v34  ;;  %v3243_v1 = vsel %vm3179_vm8, %v3178_v18, %v18296_v12  ;;  %v13040_v55 = vld [vmem:[%s16404_s2] ss:$0 sm:$0xff] }
 0x4e8   : > { %v3112_v50 = vsel %vm3049_vm6, %v3047_v31, %v18293_v28  ;;  %8124 = vmatprep.mubr.msk.f32.mxu0 %vm3386_vm11, %v3370_v32  ;;  %v3308_v11 = vsel %vm3244_vm9, %v3243_v1, %v18298_v0 }
 0x4e9   : > { %v3177_v29 = vsel %vm3114_vm7, %v3112_v50, %v18295_v24  ;;  %8125 = vmatmul.mubr.msk.f32.gmra.mxu0 %vm3386_vm11, %v3371_v14  ;;  %v3373_v22 = vsel %vm3309_vm10, %v3308_v11, %v2789_v53 }
 0x4ea   : > { %v3242_v4 = vsel %vm3179_vm8, %v3177_v29, %v18297_v2 }
 0x4eb   : > { %v3307_v37 = vsel %vm3244_vm9, %v3242_v4, %v18299_v6 }
 0x4ec   : > { %v3372_v23 = vsel %vm3309_vm10, %v3307_v37, %v2787_v41 }
 0x4ed   : > { %8127 = vmatprep.mubr.msk.f32.mxu0 %vm3386_vm11, %v3372_v23 }
 0x4ee   : > { %8128 = vmatmul.mubr.msk.f32.gmra.mxu0 %vm3386_vm11, %v3373_v22 }
 0x51a   : > { %v8036_v63 = vpop.f32.mrf.mxu0 }
 0x51b   : > { %v3655_v59 = vadd.f32 %v8036_v63, %v13040_v55 }
 0x51c   : > { %v3649_v19 = vpop.f32.mrf.mxu0 }
 0x51d   : > { %v3969_v20 = vmax.f32 %v3655_v59, 0.0  ;;  %v3650_v30 = vadd.f32 %v13040_v55, %v3649_v19 }
 0x51e   : > { %v8039_v16 = vpop.f32.mrf.mxu0 }
 0x51f   : > { %v4101_v44 = vrot.slane %v3969_v20, 7  ;;  %v3968_v33 = vmax.f32 %v3650_v30, 0.0  ;;  %v3665_v56 = vadd.f32 %v8039_v16, %v13040_v55 }
 0x520   : > { %v3659_v45 = vpop.f32.mrf.mxu0 }
 0x521   : > { %v13046_v57 = vsel %vm4097_vm12, %v4101_v44, 0.0  ;;  %v4100_v54 = vrot.slane %v3968_v33, 7  ;;  %v3971_v3 = vmax.f32 %v3665_v56, 0.0  ;;  %v3660_v35 = vadd.f32 %v13040_v55, %v3659_v45 }
 0x522   : > { %v8042_v26 = vpop.f32.mrf.mxu0  ;;  %v4428_v47 = vrot.slane %v13046_v57, 1 }
 0x523   : > { %v13050_v25 = vsel %vm4097_vm12, %v4100_v54, %v4101_v44  ;;  %v13053_v10 = vsel %vm4097_vm12, 0.0, %v4100_v54  ;;  %v4104_v49 = vrot.slane %v3971_v3, 7  ;;  %v3970_v46 = vmax.f32 %v3660_v35, 0.0 }
 0x524   : > { %v4425_v17 = vrot.slane %v13053_v10, 1  ;;  %v3675_v7 = vadd.f32 %v8042_v26, %v13040_v55  ;;  %v3669_v43 = vpop.f32.mrf.mxu0  ;;  %v4426_v21 = vrot.slane %v13050_v25, 1 }
 0x525   : > { %v13060_v42 = vsel %vm4097_vm12, %v4104_v49, 0.0  ;;  %v4103_v52 = vrot.slane %v3970_v46, 7  ;;  %v3670_v61 = vadd.f32 %v13040_v55, %v3669_v43 }
 0x526   : > { %v4433_v36 = vrot.slane %v13060_v42, 1  ;;  %v3973_v62 = vmax.f32 %v3675_v7, 0.0  ;;  %v8045_v58 = vpop.f32.mrf.mxu0  ;;  %v13065_v27 = vsel %vm944_vm0, %v4426_v21, %v4428_v47  ;;  %v13077_v48 = vsel %vm944_vm0, %v4425_v17, %v4426_v21 }
 0x527   : > { %18300 = vst [vmem:[#allocation115_spill] sm:$0xff] %v13065_v27  ;;  %v13068_v51 = vsel %vm4097_vm12, %v4103_v52, %v4104_v49  ;;  %v13071_v31 = vsel %vm4097_vm12, 0.0, %v4103_v52  ;;  %v3972_v60 = vmax.f32 %v3670_v61, 0.0  ;;  %v3685_v9 = vadd.f32 %v8045_v58, %v13040_v55  ;;  %4581 = vrot.lane.b32.xlu0 %v13065_v27, %s8535_s29  ;;  %18301 = vst [vmem:[#allocation116_spill] sm:$0xff] %v13077_v48 }
 0x528   : > { %v4107_v13 = vrot.slane %v3973_v62, 7  ;;  %v3679_v14 = vpop.f32.mrf.mxu0  ;;  %v4431_v34 = vrot.slane %v13068_v51, 1  ;;  %v4430_v28 = vrot.slane %v13071_v31, 1  ;;  %4579 = vrot.lane.b32.xlu1 %v13077_v48, %s8535_s29 }
 0x529   : > { %v4106_v50 = vrot.slane %v3972_v60, 7  ;;  %v3975_v5 = vmax.f32 %v3685_v9, 0.0  ;;  %v3680_v18 = vadd.f32 %v13040_v55, %v3679_v14 }
 0x52a   : > { %v13085_v32 = vsel %vm4097_vm12, %v4107_v13, 0.0  ;;  %v8048_v24 = vpop.f32.mrf.mxu0  ;;  %v13088_v29 = vsel %vm944_vm0, %v4431_v34, %v4433_v36  ;;  %v13091_v12 = vsel %vm944_vm0, %v4430_v28, %v4431_v34 }
 0x52b   : > { %18302 = vst [vmem:[#allocation117_spill] sm:$0xff] %v13088_v29  ;;  %18303 = vst [vmem:[#allocation118_spill] sm:$0xff] %v13091_v12  ;;  %v4438_v1 = vrot.slane %v13085_v32, 1  ;;  %v13095_v2 = vsel %vm4097_vm12, %v4106_v50, %v4107_v13  ;;  %v13098_v4 = vsel %vm4097_vm12, 0.0, %v4106_v50  ;;  %4585 = vrot.lane.b32.xlu0 %v13088_v29, %s8535_s29  ;;  %v4110_v0 = vrot.slane %v3975_v5, 7 }
 0x52c   : > { %v3974_v11 = vmax.f32 %v3680_v18, 0.0  ;;  %v3695_v53 = vadd.f32 %v8048_v24, %v13040_v55  ;;  %v3689_v6 = vpop.f32.mrf.mxu0  ;;  %v4436_v37 = vrot.slane %v13095_v2, 1  ;;  %4583 = vrot.lane.b32.xlu1 %v13091_v12, %s8535_s29  ;;  %v4435_v41 = vrot.slane %v13098_v4, 1 }
 0x52d   : > { %v3690_v22 = vadd.f32 %v13040_v55, %v3689_v6  ;;  %v13112_v20 = vsel %vm4097_vm12, %v4110_v0, 0.0 }
 0x52e   : > { %v4109_v23 = vrot.slane %v3974_v11, 7  ;;  %v3977_v63 = vmax.f32 %v3695_v53, 0.0  ;;  %v8051_v59 = vpop.f32.mrf.mxu0  ;;  %v13109_v19 = vsel %vm944_vm0, %v4436_v37, %v4438_v1  ;;  %v13124_v45 = vsel %vm944_vm0, %v4435_v41, %v4436_v37 }
 0x52f   : > { %18304 = vst [vmem:[#allocation119_spill] sm:$0xff] %v13109_v19  ;;  %v3976_v30 = vmax.f32 %v3690_v22, 0.0  ;;  %v3705_v16 = vadd.f32 %v8051_v59, %v13040_v55  ;;  %4589 = vrot.lane.b32.xlu0 %v13109_v19, %s8535_s29  ;;  %18305 = vst [vmem:[#allocation120_spill] sm:$0xff] %v13124_v45  ;;  %v4443_v46 = vrot.slane %v13112_v20, 1 }
 0x530   : > { %v13118_v44 = vsel %vm4097_vm12, %v4109_v23, %v4110_v0  ;;  %v13121_v33 = vsel %vm4097_vm12, 0.0, %v4109_v23  ;;  %v4113_v56 = vrot.slane %v3977_v63, 7  ;;  %v3699_v54 = vpop.f32.mrf.mxu0  ;;  %4587 = vrot.lane.b32.xlu1 %v13124_v45, %s8535_s29 }
 0x531   : > { %v4112_v3 = vrot.slane %v3976_v30, 7  ;;  %v3979_v35 = vmax.f32 %v3705_v16, 0.0  ;;  %v3700_v26 = vadd.f32 %v13040_v55, %v3699_v54  ;;  %v4441_v49 = vrot.slane %v13118_v44, 1 }
 0x532   : > { %v8054_v47 = vpop.f32.mrf.mxu0  ;;  %v4440_v17 = vrot.slane %v13121_v33, 1  ;;  %v13133_v7 = vsel %vm4097_vm12, %v4113_v56, 0.0 }
 0x533   : > { %v13136_v43 = vsel %vm4097_vm12, %v4112_v3, %v4113_v56  ;;  %v13139_v21 = vsel %vm4097_vm12, 0.0, %v4112_v3  ;;  %v4116_v52 = vrot.slane %v3979_v35, 7  ;;  %v3978_v61 = vmax.f32 %v3700_v26, 0.0 }
 0x534   : > { %v3715_v36 = vadd.f32 %v8054_v47, %v13040_v55  ;;  %v13143_v62 = vsel %vm944_vm0, %v4441_v49, %v4443_v46  ;;  %v3709_v58 = vpop.f32.mrf.mxu0  ;;  %v13148_v60 = vsel %vm944_vm0, %v4440_v17, %v4441_v49  ;;  %v4446_v13 = vrot.slane %v13136_v43, 1 }
 0x535   : > { %18306 = vst [vmem:[#allocation121_spill] sm:$0xff] %v13143_v62  ;;  %4593 = vrot.lane.b32.xlu0 %v13143_v62, %s8535_s29  ;;  %18307 = vst [vmem:[#allocation122_spill] sm:$0xff] %v13148_v60  ;;  %v3710_v9 = vadd.f32 %v13040_v55, %v3709_v58  ;;  %v4445_v14 = vrot.slane %v13139_v21, 1  ;;  %v4448_v34 = vrot.slane %v13133_v7, 1  ;;  %v4115_v28 = vrot.slane %v3978_v61, 7  ;;  %4591 = vrot.lane.b32.xlu1 %v13148_v60, %s8535_s29 }
 0x536   : > { %v3981_v50 = vmax.f32 %v3715_v36, 0.0  ;;  %v8057_v5 = vpop.f32.mrf.mxu0  ;;  %v13157_v18 = vsel %vm4097_vm12, %v4116_v52, 0.0 }
 0x537   : > { %v3980_v24 = vmax.f32 %v3710_v9, 0.0  ;;  %v3725_v1 = vadd.f32 %v8057_v5, %v13040_v55  ;;  %v13161_v0 = vsel %vm4097_vm12, %v4115_v28, %v4116_v52  ;;  %v13164_v11 = vsel %vm4097_vm12, 0.0, %v4115_v28 }
 0x538   : > { %18308 = vst [vmem:[#allocation123_spill] sm:$0xff] %v13161_v0  ;;  %v4119_v53 = vrot.slane %v3981_v50, 7  ;;  %v13167_v6 = vsel %vm944_vm0, %v4446_v13, %v4448_v34  ;;  %v3719_v37 = vpop.f32.mrf.mxu0  ;;  %v13172_v23 = vsel %vm944_vm0, %v4445_v14, %v4446_v13  ;;  %v4453_v59 = vrot.slane %v13157_v18, 1 }
 0x539   : > { %18309 = vst [vmem:[#allocation124_spill] sm:$0xff] %v13167_v6  ;;  %v4118_v22 = vrot.slane %v3980_v24, 7  ;;  %v3983_v41 = vmax.f32 %v3725_v1, 0.0  ;;  %4597 = vrot.lane.b32.xlu0 %v13167_v6, %s8535_s29  ;;  %18310 = vst [vmem:[#allocation165_spill] sm:$0xff] %v13172_v23  ;;  %v3720_v63 = vadd.f32 %v13040_v55, %v3719_v37  ;;  %4595 = vrot.lane.b32.xlu1 %v13172_v23, %s8535_s29  ;;  %v4451_v16 = vrot.slane %v13161_v0, 1 }
 0x53a   : > { %v4450_v56 = vrot.slane %v13164_v11, 1  ;;  %v13181_v54 = vsel %vm4097_vm12, %v4119_v53, 0.0 }
 0x53b   : > { %v8060_v30 = vpop.f32.mrf.mxu0  ;;  %v13184_v3 = vsel %vm4097_vm12, %v4118_v22, %v4119_v53  ;;  %v13187_v35 = vsel %vm4097_vm12, 0.0, %v4118_v22  ;;  %v4122_v26 = vrot.slane %v3983_v41, 7  ;;  %v3982_v49 = vmax.f32 %v3720_v63, 0.0 }
 0x53c   : > { %18311 = vst [vmem:[#allocation125_spill] sm:$0xff] %v13184_v3  ;;  %18312 = vst [vmem:[#allocation126_spill] sm:$0xff] %v13187_v35  ;;  %v3735_v46 = vadd.f32 %v8060_v30, %v13040_v55  ;;  %v13191_v47 = vsel %vm944_vm0, %v4451_v16, %v4453_v59  ;;  %v13196_v52 = vsel %vm944_vm0, %v4450_v56, %v4451_v16  ;;  %v4456_v36 = vrot.slane %v13184_v3, 1 }
 0x53d   : > { %18313 = vst [vmem:[#allocation102_spill] sm:$0xff] %v13191_v47  ;;  %v3729_v17 = vpop.f32.mrf.mxu0  ;;  %4601 = vrot.lane.b32.xlu0 %v13191_v47, %s8535_s29  ;;  %18314 = vst [vmem:[#allocation166_spill] sm:$0xff] %v13196_v52  ;;  %v4455_v58 = vrot.slane %v13187_v35, 1  ;;  %v4458_v9 = vrot.slane %v13181_v54, 1  ;;  %v4121_v13 = vrot.slane %v3982_v49, 7  ;;  %4599 = vrot.lane.b32.xlu1 %v13196_v52, %s8535_s29  ;;  %v13205_v28 = vsel %vm4097_vm12, %v4122_v26, 0.0 }
 0x53e   : > { %v3730_v61 = vadd.f32 %v13040_v55, %v3729_v17  ;;  %v3985_v14 = vmax.f32 %v3735_v46, 0.0  ;;  %v4463_v16 = vrot.slane %v13205_v28, 1 }
 0x53f   : > { %v13209_v24 = vsel %vm4097_vm12, %v4121_v13, %v4122_v26  ;;  %v13212_v1 = vsel %vm4097_vm12, 0.0, %v4121_v13  ;;  %v13215_v37 = vsel %vm944_vm0, %v4456_v36, %v4458_v9  ;;  %v13220_v59 = vsel %vm944_vm0, %v4455_v58, %v4456_v36 }
 0x540   : > { %v8063_v34 = vpop.f32.mrf.mxu0  ;;  %v3984_v50 = vmax.f32 %v3730_v61, 0.0  ;;  %v4125_v53 = vrot.slane %v3985_v14, 7  ;;  %18315 = vst [vmem:[#allocation127_spill] sm:$0xff] %v13215_v37  ;;  %18316 = vst [vmem:[#allocation103_spill] sm:$0xff] %v13220_v59  ;;  %v4461_v26 = vrot.slane %v13209_v24, 1  ;;  %v4460_v49 = vrot.slane %v13212_v1, 1 }
 0x541   : > { %v3745_v5 = vadd.f32 %v8063_v34, %v13040_v55  ;;  %4605 = vrot.lane.b32.xlu0 %v13215_v37, %s8535_s29  ;;  %4603 = vrot.lane.b32.xlu1 %v13220_v59, %s8535_s29 }
 0x542   : > { %v3739_v22 = vpop.f32.mrf.mxu0  ;;  %v4124_v41 = vrot.slane %v3984_v50, 7  ;;  %v13229_v46 = vsel %vm4097_vm12, %v4125_v53, 0.0  ;;  %v13239_v13 = vsel %vm944_vm0, %v4461_v26, %v4463_v16  ;;  %v13244_v34 = vsel %vm944_vm0, %v4460_v49, %v4461_v26 }
 0x543   : > { %v3987_v63 = vmax.f32 %v3745_v5, 0.0  ;;  %v3740_v30 = vadd.f32 %v13040_v55, %v3739_v22  ;;  %18317 = vst [vmem:[#allocation261_spill] sm:$0xff] %v13239_v13  ;;  %18318 = vst [vmem:[#allocation168_spill] sm:$0xff] %v13244_v34  ;;  %v4468_v22 = vrot.slane %v13229_v46, 1 }
 0x544   : > { %v13232_v17 = vsel %vm4097_vm12, %v4124_v41, %v4125_v53  ;;  %v13235_v61 = vsel %vm4097_vm12, 0.0, %v4124_v41 }
 0x545   : > { %v4128_v36 = vrot.slane %v3987_v63, 7  ;;  %v3986_v58 = vmax.f32 %v3740_v30, 0.0  ;;  %4609 = vrot.lane.b32.xlu0 %v13239_v13, %s8535_s29  ;;  %v4466_v5 = vrot.slane %v13232_v17, 1  ;;  %v4465_v53 = vrot.slane %v13235_v61, 1  ;;  %4607 = vrot.lane.b32.xlu1 %v13244_v34, %s8535_s29 }
 0x546   : > { %v8066_v56 = vpop.f32.mrf.mxu0 }
 0x547   : > { %v3755_v9 = vadd.f32 %v8066_v56, %v13040_v55  ;;  %v4127_v41 = vrot.slane %v3986_v58, 7  ;;  %v13253_v16 = vsel %vm4097_vm12, %v4128_v36, 0.0  ;;  %v13263_v58 = vsel %vm944_vm0, %v4466_v5, %v4468_v22 }
 0x548   : > { %v3749_v14 = vpop.f32.mrf.mxu0  ;;  %18319 = vst [vmem:[#allocation262_spill] sm:$0xff] %v13263_v58 }
 0x549   : > { %v3750_v50 = vadd.f32 %v13040_v55, %v3749_v14  ;;  %v3989_v63 = vmax.f32 %v3755_v9, 0.0  ;;  %v13257_v49 = vsel %vm4097_vm12, %v4127_v41, %v4128_v36  ;;  %v13260_v14 = vsel %vm4097_vm12, 0.0, %v4127_v41  ;;  %4613 = vrot.lane.b32.xlu0 %v13263_v58, %s8535_s29 }
 0x54a   : > { %v4473_v36 = vrot.slane %v13253_v16, 1  ;;  %v4471_v22 = vrot.slane %v13257_v49, 1 }
 0x54b   : > { %v8069_v30 = vpop.f32.mrf.mxu0  ;;  %v3988_v56 = vmax.f32 %v3750_v50, 0.0  ;;  %v4131_v8 = vrot.slane %v3989_v63, 7  ;;  %v13268_v50 = vsel %vm944_vm0, %v4465_v53, %v4466_v5  ;;  %v4470_v63 = vrot.slane %v13260_v14, 1 }
 0x54c   : > { %v3765_v26 = vadd.f32 %v8069_v30, %v13040_v55  ;;  %18320 = vst [vmem:[#allocation302_spill] sm:$0xff] %v13268_v50  ;;  %4611 = vrot.lane.b32.xlu1 %v13268_v50, %s8535_s29  ;;  %v13287_v50 = vsel %vm944_vm0, %v4471_v22, %v4473_v36 }
 0x54d   : > { %v3759_v9 = vpop.f32.mrf.mxu0  ;;  %v4130_v38 = vrot.slane %v3988_v56, 7  ;;  %v13277_v56 = vsel %vm4097_vm12, %v4131_v8, 0.0  ;;  %18321 = vst [vmem:[#allocation170_spill] sm:$0xff] %v13287_v50  ;;  %4617 = vrot.lane.b32.xlu0 %v13287_v50, %s8535_s29  ;;  %v13292_v37 = vsel %vm944_vm0, %v4470_v63, %v4471_v22 }
 0x54e   : > { %v3991_v13 = vmax.f32 %v3765_v26, 0.0  ;;  %v3760_v30 = vadd.f32 %v13040_v55, %v3759_v9  ;;  %18322 = vst [vmem:[#allocation303_spill] sm:$0xff] %v13292_v37 }
 0x54f   : > { %v8072_v41 = vpop.f32.mrf.mxu0  ;;  %v13280_v26 = vsel %vm4097_vm12, %v4130_v38, %v4131_v8  ;;  %v13283_v5 = vsel %vm4097_vm12, 0.0, %v4130_v38 }
 0x550   : > { %v4134_v53 = vrot.slane %v3991_v13, 7  ;;  %v3990_v9 = vmax.f32 %v3760_v30, 0.0  ;;  %v3775_v58 = vadd.f32 %v8072_v41, %v13040_v55  ;;  %v4476_v59 = vrot.slane %v13280_v26, 1  ;;  %4615 = vrot.lane.b32.xlu1 %v13292_v37, %s8535_s29 }
 0x551   : > { %v3769_v34 = vpop.f32.mrf.mxu0  ;;  %v4475_v38 = vrot.slane %v13283_v5, 1  ;;  %v4478_v13 = vrot.slane %v13277_v56, 1 }
 0x552   : > { %v3770_v8 = vadd.f32 %v13040_v55, %v3769_v34  ;;  %v4133_v30 = vrot.slane %v3990_v9, 7  ;;  %v3993_v41 = vmax.f32 %v3775_v58, 0.0  ;;  %v13301_v47 = vsel %vm4097_vm12, %v4134_v53, 0.0 }
 0x553   : > { %v13311_v9 = vsel %vm944_vm0, %v4476_v59, %v4478_v13 }
 0x554   : > { %v3992_v50 = vmax.f32 %v3770_v8, 0.0  ;;  %v13305_v34 = vsel %vm4097_vm12, %v4133_v30, %v4134_v53  ;;  %v13308_v63 = vsel %vm4097_vm12, 0.0, %v4133_v30  ;;  %v4137_v52 = vrot.slane %v3993_v41, 7  ;;  %18323 = vst [vmem:[#allocation361_spill] sm:$0xff] %v13311_v9  ;;  %4621 = vrot.lane.b32.xlu0 %v13311_v9, %s8535_s29 }
 0x555   : > { %v8075_v36 = vpop.f32.mrf.mxu0  ;;  %v13316_v8 = vsel %vm944_vm0, %v4475_v38, %v4476_v59  ;;  %v4483_v53 = vrot.slane %v13301_v47, 1  ;;  %v4481_v13 = vrot.slane %v13305_v34, 1  ;;  %v4480_v41 = vrot.slane %v13308_v63, 1 }
 0x556   : > { %v3785_v22 = vadd.f32 %v8075_v36, %v13040_v55  ;;  %v4136_v6 = vrot.slane %v3992_v50, 7  ;;  %18324 = vst [vmem:[#allocation167_spill] sm:$0xff] %v13316_v8  ;;  %4619 = vrot.lane.b32.xlu1 %v13316_v8, %s8535_s29  ;;  %v13325_v50 = vsel %vm4097_vm12, %v4137_v52, 0.0 }
 0x557   : > { %v3779_v58 = vpop.f32.mrf.mxu0  ;;  %18325 = vst [vmem:[#allocation172_spill] sm:$0xff] %v13325_v50  ;;  %v13335_v8 = vsel %vm944_vm0, %v4481_v13, %v4483_v53  ;;  %v13340_v62 = vsel %vm944_vm0, %v4480_v41, %v4481_v13 }
 0x558   : > { %v3995_v37 = vmax.f32 %v3785_v22, 0.0  ;;  %v3780_v36 = vadd.f32 %v13040_v55, %v3779_v58  ;;  %v13328_v22 = vsel %vm4097_vm12, %v4136_v6, %v4137_v52  ;;  %v13331_v59 = vsel %vm4097_vm12, 0.0, %v4136_v6  ;;  %18326 = vst [vmem:[#allocation174_spill] sm:$0xff] %v13335_v8  ;;  %4625 = vrot.lane.b32.xlu0 %v13335_v8, %s8535_s29  ;;  %18327 = vst [vmem:[#allocation362_spill] sm:$0xff] %v13340_v62 }
 0x559   : > { %v4486_v60 = vrot.slane %v13328_v22, 1  ;;  %v4485_v6 = vrot.slane %v13331_v59, 1 }
 0x55a   : > { %v8078_v30 = vpop.f32.mrf.mxu0  ;;  %v4140_v38 = vrot.slane %v3995_v37, 7  ;;  %v3994_v58 = vmax.f32 %v3780_v36, 0.0  ;;  %v4488_v37 = vrot.slane %v13325_v50, 1  ;;  %4623 = vrot.lane.b32.xlu1 %v13340_v62, %s8535_s29 }
 0x55b   : > { %v3795_v9 = vadd.f32 %v8078_v30, %v13040_v55  ;;  %v13367_v62 = vsel %vm944_vm0, %v4485_v6, %v4486_v60 }
 0x55c   : > { %v3789_v23 = vpop.f32.mrf.mxu0  ;;  %v4139_v36 = vrot.slane %v3994_v58, 7  ;;  %v13351_v8 = vsel %vm4097_vm12, %v4140_v38, 0.0  ;;  %v13360_v45 = vsel %vm944_vm0, %v4486_v60, %v4488_v37  ;;  %18334 = vst [vmem:[#allocation171_spill] sm:$0xff] %v13367_v62 }
 0x55d   : > { %v3790_v52 = vadd.f32 %v13040_v55, %v3789_v23  ;;  %v3997_v30 = vmax.f32 %v3795_v9, 0.0  ;;  %18329 = vst [vmem:[#allocation263_spill] sm:$0xff] %v13351_v8  ;;  %18332 = vst [vmem:[#allocation175_spill] sm:$0xff] %v13360_v45  ;;  %4629 = vrot.lane.b32.xlu0 %v13360_v45, %s8535_s29 }
 0x55e   : > { %v13348_v53 = vpop.f32.mrf.mxu0  ;;  %v13354_v41 = vsel %vm4097_vm12, %v4139_v36, %v4140_v38  ;;  %v13357_v23 = vsel %vm4097_vm12, 0.0, %v4139_v36  ;;  %4627 = vrot.lane.b32.xlu1 %v13367_v62, %s8535_s29 }
 0x55f   : > { %18328 = vst [vmem:[#allocation169_spill] sm:$0xff] %v13348_v53  ;;  %v3996_v13 = vmax.f32 %v3790_v52, 0.0  ;;  %18330 = vst [vmem:[#allocation264_spill] sm:$0xff] %v13354_v41  ;;  %v4143_v19 = vrot.slane %v3997_v30, 7  ;;  %v4493_v52 = vrot.slane %v13351_v8, 1  ;;  %v4491_v36 = vrot.slane %v13354_v41, 1 }
 0x560   : > { %18331 = vst [vmem:[#allocation304_spill] sm:$0xff] %v13357_v23  ;;  %v13362_v9 = vpop.f32.mrf.mxu0  ;;  %v4490_v37 = vrot.slane %v13357_v23, 1 }
 0x561   : > { %18333 = vst [vmem:[#allocation305_spill] sm:$0xff] %v13362_v9  ;;  %v4142_v58 = vrot.slane %v3996_v13, 7  ;;  %v13375_v30 = vsel %vm4097_vm12, %v4143_v19, 0.0  ;;  %v13385_v6 = vsel %vm944_vm0, %v4491_v36, %v4493_v52 }
 0x562   : > { %18335 = vst [vmem:[#allocation363_spill] sm:$0xff] %v13375_v30  ;;  %18338 = vst [vmem:[#allocation306_spill] sm:$0xff] %v13385_v6  ;;  %4633 = vrot.lane.b32.xlu0 %v13385_v6, %s8535_s29  ;;  %v13390_v29 = vsel %vm944_vm0, %v4490_v37, %v4491_v36 }
 0x563   : > { %v8084_v38 = vpop.f32.mrf.mxu0  ;;  %v13378_v13 = vsel %vm4097_vm12, %v4142_v58, %v4143_v19  ;;  %v13381_v45 = vsel %vm4097_vm12, 0.0, %v4142_v58  ;;  %18339 = vst [vmem:[#allocation176_spill] sm:$0xff] %v13390_v29  ;;  %v4498_v58 = vrot.slane %v13375_v30, 1  ;;  %4631 = vrot.lane.b32.xlu1 %v13390_v29, %s8535_s29 }
 0x564   : > { %18336 = vst [vmem:[#allocation265_spill] sm:$0xff] %v13378_v13  ;;  %18337 = vst [vmem:[#allocation266_spill] sm:$0xff] %v13381_v45  ;;  %v3815_v60 = vadd.f32 %v8084_v38, %v13040_v55  ;;  %v4496_v19 = vrot.slane %v13378_v13, 1  ;;  %v4495_v27 = vrot.slane %v13381_v45, 1 }
 0x565   : > { %v3809_v62 = vpop.f32.mrf.mxu0 }
 0x566   : > { %v3810_v12 = vadd.f32 %v13040_v55, %v3809_v62  ;;  %v4001_v48 = vmax.f32 %v3815_v60, 0.0  ;;  %v13400_v36 = vsel %vm944_vm0, %v4496_v19, %v4498_v58  ;;  %v13403_v62 = vsel %vm944_vm0, %v4495_v27, %v4496_v19 }
 0x567   : > { %v8087_v52 = vpop.f32.mrf.mxu0  ;;  %18340 = vst [vmem:[#allocation307_spill] sm:$0xff] %v13400_v36  ;;  %18341 = vst [vmem:[#allocation364_spill] sm:$0xff] %v13403_v62  ;;  %4637 = vrot.lane.b32.xlu0 %v13400_v36, %s8535_s29  ;;  %4635 = vrot.lane.b32.xlu1 %v13403_v62, %s8535_s29 }
 0x568   : > { %v4000_v38 = vmax.f32 %v3810_v12, 0.0  ;;  %v3825_v53 = vadd.f32 %v8087_v52, %v13040_v55  ;;  %v4149_v6 = vrot.slane %v4001_v48, 7 }
 0x569   : > { %v3819_v37 = vpop.f32.mrf.mxu0 }
 0x56a   : > { %v4148_v9 = vrot.slane %v4000_v38, 7  ;;  %v4003_v8 = vmax.f32 %v3825_v53, 0.0  ;;  %v3820_v60 = vadd.f32 %v13040_v55, %v3819_v37  ;;  %v13411_v48 = vsel %vm4097_vm12, %v4149_v6, 0.0 }
 0x56b   : > { %v8090_v12 = vpop.f32.mrf.mxu0  ;;  %18342 = vst [vmem:[#allocation173_spill] sm:$0xff] %v13411_v48  ;;  %v4503_v29 = vrot.slane %v13411_v48, 1 }
 0x56c   : > { %v13414_v58 = vsel %vm4097_vm12, %v4148_v9, %v4149_v6  ;;  %v13417_v27 = vsel %vm4097_vm12, 0.0, %v4148_v9  ;;  %v4152_v19 = vrot.slane %v4003_v8, 7  ;;  %v4002_v53 = vmax.f32 %v3820_v60, 0.0 }
 0x56d   : > { %18343 = vst [vmem:[#allocation366_spill] sm:$0xff] %v13414_v58  ;;  %18344 = vst [vmem:[#allocation365_spill] sm:$0xff] %v13417_v27  ;;  %v3829_v52 = vpop.f32.mrf.mxu0  ;;  %v4500_v38 = vrot.slane %v13417_v27, 1  ;;  %v3835_v37 = vadd.f32 %v8090_v12, %v13040_v55  ;;  %v4501_v62 = vrot.slane %v13414_v58, 1 }
 0x56e   : > { %v3830_v36 = vadd.f32 %v13040_v55, %v3829_v52  ;;  %v4151_v30 = vrot.slane %v4002_v53, 7  ;;  %v13425_v6 = vsel %vm4097_vm12, %v4152_v19, 0.0 }
 0x56f   : > { %v8093_v13 = vpop.f32.mrf.mxu0  ;;  %18345 = vst [vmem:[#allocation267_spill] sm:$0xff] %v13425_v6  ;;  %v4005_v9 = vmax.f32 %v3835_v37, 0.0  ;;  %v13435_v52 = vsel %vm944_vm0, %v4501_v62, %v4503_v29  ;;  %v13440_v37 = vsel %vm944_vm0, %v4500_v38, %v4501_v62 }
 0x570   : > { %v4004_v45 = vmax.f32 %v3830_v36, 0.0  ;;  %v13428_v8 = vsel %vm4097_vm12, %v4151_v30, %v4152_v19  ;;  %v13431_v60 = vsel %vm4097_vm12, 0.0, %v4151_v30  ;;  %v3845_v12 = vadd.f32 %v8093_v13, %v13040_v55  ;;  %18348 = vst [vmem:[#allocation128_spill] sm:$0xff] %v13435_v52  ;;  %4641 = vrot.lane.b32.xlu0 %v13435_v52, %s8535_s29  ;;  %18349 = vst [vmem:[#allocation309_spill] sm:$0xff] %v13440_v37 }
 0x571   : > { %18346 = vst [vmem:[#allocation268_spill] sm:$0xff] %v13428_v8  ;;  %18347 = vst [vmem:[#allocation308_spill] sm:$0xff] %v13431_v60  ;;  %v3839_v58 = vpop.f32.mrf.mxu0  ;;  %v4155_v48 = vrot.slane %v4005_v9, 7  ;;  %v4508_v19 = vrot.slane %v13425_v6, 1  ;;  %4639 = vrot.lane.b32.xlu1 %v13440_v37, %s8535_s29  ;;  %v4506_v29 = vrot.slane %v13428_v8, 1  ;;  %v4505_v9 = vrot.slane %v13431_v60, 1 }
 0x572   : > { %v4154_v53 = vrot.slane %v4004_v45, 7  ;;  %v3840_v36 = vadd.f32 %v13040_v55, %v3839_v58  ;;  %v4007_v30 = vmax.f32 %v3845_v12, 0.0 }
 0x573   : > { %v8096_v13 = vpop.f32.mrf.mxu0  ;;  %v13449_v45 = vsel %vm4097_vm12, %v4155_v48, 0.0  ;;  %v13459_v27 = vsel %vm944_vm0, %v4506_v29, %v4508_v19  ;;  %v13462_v8 = vsel %vm944_vm0, %v4505_v9, %v4506_v29 }
 0x574   : > { %18350 = vst [vmem:[#allocation367_spill] sm:$0xff] %v13449_v45  ;;  %v13452_v52 = vsel %vm4097_vm12, %v4154_v53, %v4155_v48  ;;  %v13455_v62 = vsel %vm4097_vm12, 0.0, %v4154_v53  ;;  %v4006_v58 = vmax.f32 %v3840_v36, 0.0  ;;  %v4158_v38 = vrot.slane %v4007_v30, 7  ;;  %18353 = vst [vmem:[#allocation178_spill] sm:$0xff] %v13459_v27  ;;  %4645 = vrot.lane.b32.xlu0 %v13459_v27, %s8535_s29 }
 0x575   : > { %18351 = vst [vmem:[#allocation177_spill] sm:$0xff] %v13452_v52  ;;  %18352 = vst [vmem:[#allocation368_spill] sm:$0xff] %v13455_v62  ;;  %v3855_v12 = vadd.f32 %v8096_v13, %v13040_v55  ;;  %v3849_v6 = vpop.f32.mrf.mxu0  ;;  %v4513_v48 = vrot.slane %v13449_v45, 1  ;;  %4643 = vrot.lane.b32.xlu1 %v13462_v8, %s8535_s29  ;;  %v4511_v36 = vrot.slane %v13452_v52, 1  ;;  %v4510_v19 = vrot.slane %v13455_v62, 1 }
 0x576   : > { %v4157_v37 = vrot.slane %v4006_v58, 7  ;;  %18354 = vst [vmem:[#allocation7_spill] sm:$0xff] %v13462_v8  ;;  %v3850_v60 = vadd.f32 %v13040_v55, %v3849_v6  ;;  %v13473_v30 = vsel %vm4097_vm12, %v4158_v38, 0.0 }
 0x577   : > { %v4009_v50 = vmax.f32 %v3855_v12, 0.0  ;;  %v8099_v53 = vpop.f32.mrf.mxu0  ;;  %18355 = vst [vmem:[#allocation397_spill] sm:$0xff] %v13473_v30  ;;  %v13483_v12 = vsel %vm944_vm0, %v4511_v36, %v4513_v48  ;;  %v13486_v8 = vsel %vm944_vm0, %v4510_v19, %v4511_v36 }
 0x578   : > { %v13476_v13 = vsel %vm4097_vm12, %v4157_v37, %v4158_v38  ;;  %v13479_v6 = vsel %vm4097_vm12, 0.0, %v4157_v37  ;;  %v4008_v9 = vmax.f32 %v3850_v60, 0.0  ;;  %v3865_v58 = vadd.f32 %v8099_v53, %v13040_v55  ;;  %18358 = vst [vmem:[#allocation129_spill] sm:$0xff] %v13483_v12  ;;  %18359 = vst [vmem:[#allocation311_spill] sm:$0xff] %v13486_v8  ;;  %4649 = vrot.lane.b32.xlu0 %v13483_v12, %s8535_s29 }
 0x579   : > { %18356 = vst [vmem:[#allocation6_spill] sm:$0xff] %v13476_v13  ;;  %18357 = vst [vmem:[#allocation310_spill] sm:$0xff] %v13479_v6  ;;  %v4161_v29 = vrot.slane %v4009_v50, 7  ;;  %v3859_v27 = vpop.f32.mrf.mxu0  ;;  %v4516_v52 = vrot.slane %v13476_v13, 1  ;;  %v4515_v38 = vrot.slane %v13479_v6, 1  ;;  %v4518_v37 = vrot.slane %v13473_v30, 1  ;;  %4647 = vrot.lane.b32.xlu1 %v13486_v8, %s8535_s29 }
 0x57a   : > { %v3860_v45 = vadd.f32 %v13040_v55, %v3859_v27  ;;  %v4160_v62 = vrot.slane %v4008_v9, 7  ;;  %v4011_v50 = vmax.f32 %v3865_v58, 0.0 }
 0x57b   : > { %v13497_v48 = vsel %vm4097_vm12, %v4161_v29, 0.0  ;;  %v13507_v58 = vsel %vm944_vm0, %v4516_v52, %v4518_v37  ;;  %v13510_v13 = vsel %vm944_vm0, %v4515_v38, %v4516_v52 }
 0x57c   : > { %18360 = vst [vmem:[#allocation179_spill] sm:$0xff] %v13497_v48  ;;  %v4010_v53 = vmax.f32 %v3860_v45, 0.0  ;;  %v13501_v36 = vsel %vm4097_vm12, %v4160_v62, %v4161_v29  ;;  %v13504_v19 = vsel %vm4097_vm12, 0.0, %v4160_v62  ;;  %v4164_v9 = vrot.slane %v4011_v50, 7  ;;  %18363 = vst [vmem:[#allocation180_spill] sm:$0xff] %v13507_v58  ;;  %4653 = vrot.lane.b32.xlu0 %v13507_v58, %s8535_s29 }
 0x57d   : > { %18361 = vst [vmem:[#allocation130_spill] sm:$0xff] %v13501_v36  ;;  %18362 = vst [vmem:[#allocation181_spill] sm:$0xff] %v13504_v19  ;;  %4651 = vrot.lane.b32.xlu1 %v13510_v13, %s8535_s29  ;;  %v4521_v29 = vrot.slane %v13501_v36, 1  ;;  %v4520_v37 = vrot.slane %v13504_v19, 1 }
 0x57e   : > { %v4163_v30 = vrot.slane %v4010_v53, 7  ;;  %18364 = vst [vmem:[#allocation182_spill] sm:$0xff] %v13510_v13  ;;  %v13521_v50 = vsel %vm4097_vm12, %v4164_v9, 0.0 }
 0x57f   : > { %v8102_v60 = vpop.f32.mrf.mxu0  ;;  %18365 = vst [vmem:[#allocation8_spill] sm:$0xff] %v13521_v50 }
 0x580   : > { %v3875_v27 = vadd.f32 %v8102_v60, %v13040_v55  ;;  %v4523_v60 = vrot.slane %v13497_v48, 1  ;;  %v13524_v52 = vsel %vm4097_vm12, %v4163_v30, %v4164_v9  ;;  %v13534_v48 = vsel %vm944_vm0, %v4520_v37, %v4521_v29 }
 0x581   : > { %v3869_v12 = vpop.f32.mrf.mxu0  ;;  %18366 = vst [vmem:[#allocation9_spill] sm:$0xff] %v13524_v52  ;;  %18369 = vst [vmem:[#allocation313_spill] sm:$0xff] %v13534_v48  ;;  %v4526_v19 = vrot.slane %v13524_v52, 1  ;;  %4655 = vrot.lane.b32.xlu1 %v13534_v48, %s8535_s29 }
 0x582   : > { %v4013_v8 = vmax.f32 %v3875_v27, 0.0  ;;  %v3870_v45 = vadd.f32 %v13040_v55, %v3869_v12  ;;  %v13527_v12 = vsel %vm4097_vm12, 0.0, %v4163_v30  ;;  %v13531_v58 = vsel %vm944_vm0, %v4521_v29, %v4523_v60 }
 0x583   : > { %v8105_v62 = vpop.f32.mrf.mxu0  ;;  %18367 = vst [vmem:[#allocation312_spill] sm:$0xff] %v13527_v12  ;;  %18368 = vst [vmem:[#allocation131_spill] sm:$0xff] %v13531_v58  ;;  %v4525_v9 = vrot.slane %v13527_v12, 1  ;;  %v4528_v30 = vrot.slane %v13521_v50, 1  ;;  %4657 = vrot.lane.b32.xlu0 %v13531_v58, %s8535_s29 }
 0x584   : > { %v4167_v38 = vrot.slane %v4013_v8, 7  ;;  %v4012_v53 = vmax.f32 %v3870_v45, 0.0  ;;  %v3885_v27 = vadd.f32 %v8105_v62, %v13040_v55 }
 0x585   : > { %v3879_v13 = vpop.f32.mrf.mxu0  ;;  %v13558_v52 = vsel %vm944_vm0, %v4525_v9, %v4526_v19 }
 0x586   : > { %v3880_v36 = vadd.f32 %v13040_v55, %v3879_v13  ;;  %v4166_v6 = vrot.slane %v4012_v53, 7  ;;  %v4015_v8 = vmax.f32 %v3885_v27, 0.0  ;;  %v13545_v60 = vsel %vm4097_vm12, %v4167_v38, 0.0  ;;  %18374 = vst [vmem:[#allocation186_spill] sm:$0xff] %v13558_v52  ;;  %4659 = vrot.lane.b32.xlu1 %v13558_v52, %s8535_s29 }
 0x587   : > { %18370 = vst [vmem:[#allocation183_spill] sm:$0xff] %v13545_v60  ;;  %v13555_v27 = vsel %vm944_vm0, %v4526_v19, %v4528_v30 }
 0x588   : > { %v8108_v45 = vpop.f32.mrf.mxu0  ;;  %v4014_v62 = vmax.f32 %v3880_v36, 0.0  ;;  %v13549_v29 = vsel %vm4097_vm12, %v4166_v6, %v4167_v38  ;;  %v13552_v37 = vsel %vm4097_vm12, 0.0, %v4166_v6  ;;  %v4170_v53 = vrot.slane %v4015_v8, 7  ;;  %18373 = vst [vmem:[#allocation184_spill] sm:$0xff] %v13555_v27  ;;  %4661 = vrot.lane.b32.xlu0 %v13555_v27, %s8535_s29 }
 0x589   : > { %v3895_v13 = vadd.f32 %v8108_v45, %v13040_v55  ;;  %18371 = vst [vmem:[#allocation132_spill] sm:$0xff] %v13549_v29  ;;  %18372 = vst [vmem:[#allocation185_spill] sm:$0xff] %v13552_v37  ;;  %v4533_v45 = vrot.slane %v13545_v60, 1  ;;  %v4531_v38 = vrot.slane %v13549_v29, 1  ;;  %v4530_v30 = vrot.slane %v13552_v37, 1 }
 0x58a   : > { %v3889_v58 = vpop.f32.mrf.mxu0  ;;  %v4169_v50 = vrot.slane %v4014_v62, 7  ;;  %v13569_v8 = vsel %vm4097_vm12, %v4170_v53, 0.0 }
 0x58b   : > { %v4017_v48 = vmax.f32 %v3895_v13, 0.0  ;;  %v3890_v36 = vadd.f32 %v13040_v55, %v3889_v58  ;;  %18375 = vst [vmem:[#allocation10_spill] sm:$0xff] %v13569_v8  ;;  %v13579_v27 = vsel %vm944_vm0, %v4531_v38, %v4533_v45  ;;  %v13582_v60 = vsel %vm944_vm0, %v4530_v30, %v4531_v38 }
 0x58c   : > { %v13572_v19 = vsel %vm4097_vm12, %v4169_v50, %v4170_v53  ;;  %v13575_v58 = vsel %vm4097_vm12, 0.0, %v4169_v50  ;;  %18378 = vst [vmem:[#allocation133_spill] sm:$0xff] %v13579_v27  ;;  %18379 = vst [vmem:[#allocation315_spill] sm:$0xff] %v13582_v60  ;;  %v4538_v50 = vrot.slane %v13569_v8, 1  ;;  %4665 = vrot.lane.b32.xlu0 %v13579_v27, %s8535_s29  ;;  %4663 = vrot.lane.b32.xlu1 %v13582_v60, %s8535_s29 }
 0x58d   : > { %v8111_v6 = vpop.f32.mrf.mxu0  ;;  %18376 = vst [vmem:[#allocation11_spill] sm:$0xff] %v13572_v19  ;;  %18377 = vst [vmem:[#allocation314_spill] sm:$0xff] %v13575_v58  ;;  %v4173_v9 = vrot.slane %v4017_v48, 7  ;;  %v4016_v62 = vmax.f32 %v3890_v36, 0.0  ;;  %v4536_v37 = vrot.slane %v13572_v19, 1  ;;  %v4535_v53 = vrot.slane %v13575_v58, 1 }
 0x58e   : > { %v3905_v13 = vadd.f32 %v8111_v6, %v13040_v55 }
 0x58f   : > { %v3899_v52 = vpop.f32.mrf.mxu0  ;;  %v4172_v12 = vrot.slane %v4016_v62, 7  ;;  %v13593_v45 = vsel %vm4097_vm12, %v4173_v9, 0.0  ;;  %v13606_v19 = vsel %vm944_vm0, %v4535_v53, %v4536_v37 }
 0x590   : > { %v3900_v29 = vadd.f32 %v13040_v55, %v3899_v52  ;;  %v4019_v48 = vmax.f32 %v3905_v13, 0.0  ;;  %18380 = vst [vmem:[#allocation187_spill] sm:$0xff] %v13593_v45  ;;  %v13603_v13 = vsel %vm944_vm0, %v4536_v37, %v4538_v50  ;;  %18384 = vst [vmem:[#allocation190_spill] sm:$0xff] %v13606_v19  ;;  %4667 = vrot.lane.b32.xlu1 %v13606_v19, %s8535_s29 }
 0x591   : > { %v13597_v38 = vsel %vm4097_vm12, %v4172_v12, %v4173_v9  ;;  %v13600_v30 = vsel %vm4097_vm12, 0.0, %v4172_v12  ;;  %18383 = vst [vmem:[#allocation188_spill] sm:$0xff] %v13603_v13  ;;  %4669 = vrot.lane.b32.xlu0 %v13603_v13, %s8535_s29 }
 0x592   : > { %v4018_v6 = vmax.f32 %v3900_v29, 0.0  ;;  %18381 = vst [vmem:[#allocation134_spill] sm:$0xff] %v13597_v38  ;;  %18382 = vst [vmem:[#allocation189_spill] sm:$0xff] %v13600_v30  ;;  %v4176_v62 = vrot.slane %v4019_v48, 7  ;;  %v4541_v9 = vrot.slane %v13597_v38, 1  ;;  %v4540_v50 = vrot.slane %v13600_v30, 1 }
 0x594   : > { %v8114_v36 = vpop.f32.mrf.mxu0  ;;  %v4175_v8 = vrot.slane %v4018_v6, 7  ;;  %v13617_v48 = vsel %vm4097_vm12, %v4176_v62, 0.0 }
 0x595   : > { %v3915_v52 = vadd.f32 %v8114_v36, %v13040_v55  ;;  %v4543_v36 = vrot.slane %v13593_v45, 1  ;;  %18385 = vst [vmem:[#allocation12_spill] sm:$0xff] %v13617_v48  ;;  %v13630_v45 = vsel %vm944_vm0, %v4540_v50, %v4541_v9 }
 0x596   : > { %v3909_v27 = vpop.f32.mrf.mxu0  ;;  %v13620_v37 = vsel %vm4097_vm12, %v4175_v8, %v4176_v62  ;;  %18389 = vst [vmem:[#allocation317_spill] sm:$0xff] %v13630_v45  ;;  %4671 = vrot.lane.b32.xlu1 %v13630_v45, %s8535_s29 }
 0x597   : > { %v4021_v60 = vmax.f32 %v3915_v52, 0.0  ;;  %v3910_v29 = vadd.f32 %v13040_v55, %v3909_v27  ;;  %18386 = vst [vmem:[#allocation13_spill] sm:$0xff] %v13620_v37  ;;  %v13623_v27 = vsel %vm4097_vm12, 0.0, %v4175_v8  ;;  %v13627_v13 = vsel %vm944_vm0, %v4541_v9, %v4543_v36 }
 0x598   : > { %18387 = vst [vmem:[#allocation316_spill] sm:$0xff] %v13623_v27  ;;  %18388 = vst [vmem:[#allocation136_spill] sm:$0xff] %v13627_v13  ;;  %v4546_v30 = vrot.slane %v13620_v37, 1  ;;  %v4545_v62 = vrot.slane %v13623_v27, 1  ;;  %v4548_v8 = vrot.slane %v13617_v48, 1  ;;  %4673 = vrot.lane.b32.xlu0 %v13627_v13, %s8535_s29 }
 0x599   : > { %v8117_v12 = vpop.f32.mrf.mxu0  ;;  %v4179_v53 = vrot.slane %v4021_v60, 7  ;;  %v4020_v6 = vmax.f32 %v3910_v29, 0.0 }
 0x59a   : > { %v3925_v52 = vadd.f32 %v8117_v12, %v13040_v55  ;;  %v13654_v37 = vsel %vm944_vm0, %v4545_v62, %v4546_v30 }
 0x59b   : > { %v3919_v19 = vpop.f32.mrf.mxu0  ;;  %v4178_v58 = vrot.slane %v4020_v6, 7  ;;  %v13641_v36 = vsel %vm4097_vm12, %v4179_v53, 0.0  ;;  %18394 = vst [vmem:[#allocation194_spill] sm:$0xff] %v13654_v37  ;;  %4675 = vrot.lane.b32.xlu1 %v13654_v37, %s8535_s29 }
 0x59c   : > { %v3920_v38 = vadd.f32 %v13040_v55, %v3919_v19  ;;  %v4023_v60 = vmax.f32 %v3925_v52, 0.0  ;;  %18390 = vst [vmem:[#allocation191_spill] sm:$0xff] %v13641_v36  ;;  %v13651_v52 = vsel %vm944_vm0, %v4546_v30, %v4548_v8 }
 0x59d   : > { %v8120_v29 = vpop.f32.mrf.mxu0  ;;  %v13645_v9 = vsel %vm4097_vm12, %v4178_v58, %v4179_v53  ;;  %v13648_v50 = vsel %vm4097_vm12, 0.0, %v4178_v58  ;;  %18393 = vst [vmem:[#allocation192_spill] sm:$0xff] %v13651_v52  ;;  %4677 = vrot.lane.b32.xlu0 %v13651_v52, %s8535_s29 }
 0x59e   : > { %v4022_v12 = vmax.f32 %v3920_v38, 0.0  ;;  %v3935_v19 = vadd.f32 %v8120_v29, %v13040_v55  ;;  %18391 = vst [vmem:[#allocation138_spill] sm:$0xff] %v13645_v9  ;;  %18392 = vst [vmem:[#allocation193_spill] sm:$0xff] %v13648_v50  ;;  %v4182_v6 = vrot.slane %v4023_v60, 7  ;;  %v4553_v29 = vrot.slane %v13641_v36, 1 }
 0x59f   : > { %v3929_v13 = vpop.f32.mrf.mxu0  ;;  %v4551_v53 = vrot.slane %v13645_v9, 1  ;;  %v4550_v8 = vrot.slane %v13648_v50, 1 }
 0x5a0   : > { %v4181_v48 = vrot.slane %v4022_v12, 7  ;;  %v4025_v45 = vmax.f32 %v3935_v19, 0.0  ;;  %v3930_v38 = vadd.f32 %v13040_v55, %v3929_v13  ;;  %v13665_v60 = vsel %vm4097_vm12, %v4182_v6, 0.0 }
 0x5a1   : > { %18395 = vst [vmem:[#allocation109_spill] sm:$0xff] %v13665_v60  ;;  %v13675_v52 = vsel %vm944_vm0, %v4551_v53, %v4553_v29  ;;  %v13678_v36 = vsel %vm944_vm0, %v4550_v8, %v4551_v53  ;;  %v13692_v53 = vpop.permute.xlu0 %8320 }
 0x5a2   : > { %v13668_v30 = vsel %vm4097_vm12, %v4181_v48, %v4182_v6  ;;  %v13671_v13 = vsel %vm4097_vm12, 0.0, %v4181_v48  ;;  %v4185_v62 = vrot.slane %v4025_v45, 7  ;;  %v4024_v12 = vmax.f32 %v3930_v38, 0.0  ;;  %18398 = vst [vmem:[#allocation108_spill] sm:$0xff] %v13675_v52  ;;  %18399 = vst [vmem:[#allocation15_spill] sm:$0xff] %v13678_v36  ;;  %4681 = vrot.lane.b32.xlu0 %v13675_v52, %s8535_s29  ;;  %4679 = vrot.lane.b32.xlu1 %v13678_v36, %s8535_s29 }
 0x5a3   : > { %v8123_v58 = vpop.f32.mrf.mxu0  ;;  %18396 = vst [vmem:[#allocation14_spill] sm:$0xff] %v13668_v30  ;;  %18397 = vst [vmem:[#allocation398_spill] sm:$0xff] %v13671_v13  ;;  %v4556_v50 = vrot.slane %v13668_v30, 1  ;;  %v4555_v6 = vrot.slane %v13671_v13, 1  ;;  %v4558_v48 = vrot.slane %v13665_v60, 1 }
 0x5a4   : > { %v3945_v19 = vadd.f32 %v8123_v58, %v13040_v55  ;;  %v4184_v27 = vrot.slane %v4024_v12, 7  ;;  %v13689_v29 = vsel %vm4097_vm12, %v4185_v62, 0.0  ;;  %18400 = vst [vmem:[#allocation318_spill] sm:$0xff] %v13692_v53 }
 0x5a5   : > { %v3939_v37 = vpop.f32.mrf.mxu0  ;;  %v13701_v52 = vsel %vm944_vm0, %v4556_v50, %v4558_v48  ;;  %v13704_v13 = vsel %vm944_vm0, %v4555_v6, %v4556_v50 }
 0x5a6   : > { %v3940_v9 = vadd.f32 %v13040_v55, %v3939_v37  ;;  %v4027_v45 = vmax.f32 %v3945_v19, 0.0  ;;  %v13695_v8 = vsel %vm4097_vm12, %v4184_v27, %v4185_v62  ;;  %v13698_v12 = vsel %vm4097_vm12, 0.0, %v4184_v27  ;;  %18403 = vst [vmem:[#allocation319_spill] sm:$0xff] %v13701_v52  ;;  %18404 = vst [vmem:[#allocation195_spill] sm:$0xff] %v13704_v13  ;;  %4685 = vrot.lane.b32.xlu0 %v13701_v52, %s8535_s29  ;;  %v13730_v52 = vpop.permute.xlu0 %4581 }
 0x5a7   : > { %18401 = vst [vmem:[#allocation110_spill] sm:$0xff] %v13695_v8  ;;  %18402 = vst [vmem:[#allocation140_spill] sm:$0xff] %v13698_v12  ;;  %4683 = vrot.lane.b32.xlu1 %v13704_v13, %s8535_s29  ;;  %v4561_v27 = vrot.slane %v13695_v8, 1  ;;  %v4560_v48 = vrot.slane %v13698_v12, 1 }
 0x5a8   : > { %v4026_v58 = vmax.f32 %v3940_v9, 0.0  ;;  %v4188_v19 = vrot.slane %v4027_v45, 7  ;;  %18409 = vst [vmem:[#allocation399_spill] sm:$0xff] %v13730_v52 }
 0x5a9   : > { %v8126_v38 = vpop.f32.mrf.mxu0 }
 0x5aa   : > { %v3955_v37 = vadd.f32 %v8126_v38, %v13040_v55  ;;  %v4187_v60 = vrot.slane %v4026_v58, 7  ;;  %v4563_v38 = vrot.slane %v13689_v29, 1  ;;  %v13709_v62 = vsel %vm4097_vm12, %v4188_v19, 0.0 }
 0x5ab   : > { %v3949_v36 = vpop.f32.mrf.mxu0  ;;  %v4568_v58 = vrot.slane %v13709_v62, 1 }
 0x5ac   : > { %v4029_v30 = vmax.f32 %v3955_v37, 0.0  ;;  %v3950_v9 = vadd.f32 %v13040_v55, %v3949_v36  ;;  %v13718_v50 = vsel %vm4097_vm12, %v4187_v60, %v4188_v19  ;;  %v13721_v55 = vsel %vm4097_vm12, 0.0, %v4187_v60 }
 0x5ad   : > { %18405 = vst [vmem:[#allocation142_spill] sm:$0xff] %v13718_v50  ;;  %18406 = vst [vmem:[#allocation197_spill] sm:$0xff] %v13721_v55  ;;  %v13724_v45 = vsel %vm944_vm0, %v4561_v27, %v4563_v38  ;;  %v13728_v37 = vsel %vm944_vm0, %v4560_v48, %v4561_v27  ;;  %v4566_v13 = vrot.slane %v13718_v50, 1  ;;  %v4565_v19 = vrot.slane %v13721_v55, 1 }
 0x5ae   : > { %v4191_v36 = vrot.slane %v4029_v30, 7  ;;  %v4028_v6 = vmax.f32 %v3950_v9, 0.0  ;;  %18407 = vst [vmem:[#allocation164_spill] sm:$0xff] %v13724_v45  ;;  %18408 = vst [vmem:[#allocation196_spill] sm:$0xff] %v13728_v37  ;;  %4689 = vrot.lane.b32.xlu0 %v13724_v45, %s8535_s29  ;;  %4687 = vrot.lane.b32.xlu1 %v13728_v37, %s8535_s29  ;;  %v13741_v30 = vpop.permute.xlu1 %4579  ;;  %v4761_v38 = vrot.slane %v12599_v39, 2  ;;  %v4762_v27 = vrot.slane %v12580_v40, 2 }
 0x5af   : > { %18410 = vst [vmem:[#allocation198_spill] sm:$0xff] %v13741_v30  ;;  %v13744_v9 = vsel %vm944_vm0, %v4566_v13, %v4568_v58  ;;  %v4764_v48 = vrot.slane %v12603_v15, 2  ;;  %v13757_v37 = vsel %vm944_vm0, %v4565_v19, %v4566_v13  ;;  %v13759_v30 = vpop.permute.xlu0 %4585 }
 0x5b0   : > { %v13735_v53 = vsel %vm4097_vm12, %v4191_v36, 0.0  ;;  %v4190_v60 = vrot.slane %v4028_v6, 7  ;;  %18411 = vst [vmem:[#allocation16_spill] sm:$0xff] %v13744_v9  ;;  %18414 = vst [vmem:[#allocation17_spill] sm:$0xff] %v13757_v37  ;;  %v4763_v19 = vsel %vm1297_vm1, %v4761_v38, %v4762_v27 }
 0x5b1   : > { %v4573_v45 = vrot.slane %v13735_v53, 1  ;;  %18415 = vst [vmem:[#allocation320_spill] sm:$0xff] %v13759_v30  ;;  %v4766_v30 = vrot.slane %v13053_v10, 2 }
 0x5b2   : > { %v13750_v52 = vsel %vm4097_vm12, %v4190_v60, %v4191_v36  ;;  %v13753_v6 = vsel %vm4097_vm12, 0.0, %v4190_v60  ;;  %4693 = vrot.lane.b32.xlu0 %v13744_v9, %s8535_s29  ;;  %4691 = vrot.lane.b32.xlu1 %v13757_v37, %s8535_s29  ;;  %v13767_v15 = vpop.permute.xlu1 %4583  ;;  %v4765_v60 = vsel %vm1297_vm1, %v4762_v27, %v4764_v48  ;;  %v4767_v9 = vrot.slane %v13050_v25, 2 }
 0x5b3   : > { %18412 = vst [vmem:[#allocation400_spill] sm:$0xff] %v13750_v52  ;;  %18413 = vst [vmem:[#allocation414_spill] sm:$0xff] %v13753_v6  ;;  %v4571_v58 = vrot.slane %v13750_v52, 1  ;;  %v4570_v39 = vrot.slane %v13753_v6, 1  ;;  %v13778_v40 = vpop.permute.xlu0 %4589  ;;  %v4771_v27 = vrot.slane %v13071_v31, 2  ;;  %v4772_v48 = vrot.slane %v13068_v51, 2 }
 0x5b4   : > { %18416 = vst [vmem:[#allocation415_spill] sm:$0xff] %v13767_v15  ;;  %18419 = vst [vmem:[#allocation199_spill] sm:$0xff] %v13778_v40  ;;  %v13790_v38 = vsel %vm1297_vm1, %v4766_v30, %v4767_v9  ;;  %v4777_v37 = vrot.slane %v13095_v2, 2  ;;  %v4787_v40 = vrot.slane %v13136_v43, 2  ;;  %v4797_v15 = vrot.slane %v13184_v3, 2 }
 0x5b5   : > { %v13770_v36 = vsel %vm944_vm0, %v4571_v58, %v4573_v45  ;;  %v13773_v13 = vsel %vm944_vm0, %v4570_v39, %v4571_v58  ;;  %v13785_v45 = vpack.i.bf16 %v4765_v60, %v4763_v19  ;;  %18422 = vst [vmem:[#allocation200_spill] sm:$0xff] %v13790_v38  ;;  %v4769_v58 = vrot.slane %v13046_v57, 2 }
 0x5b6   : > { %18417 = vst [vmem:[#allocation144_spill] sm:$0xff] %v13770_v36  ;;  %18418 = vst [vmem:[#allocation321_spill] sm:$0xff] %v13773_v13  ;;  %4697 = vrot.lane.b32.xlu0 %v13770_v36, %s8535_s29  ;;  %4695 = vrot.lane.b32.xlu1 %v13773_v13, %s8535_s29  ;;  %v13787_v39 = vpop.permute.xlu1 %4587  ;;  %v13804_v60 = vsel %vm1297_vm1, %v4771_v27, %v4772_v48  ;;  %v4776_v13 = vrot.slane %v13098_v4, 2  ;;  %v4774_v57 = vrot.slane %v13060_v42, 2  ;;  %v4779_v42 = vrot.slane %v13085_v32, 2 }
 0x5b7   : > { %18420 = vst [vmem:[#allocation146_spill] sm:$0xff] %v13785_v45  ;;  %18421 = vst [vmem:[#allocation201_spill] sm:$0xff] %v13787_v39  ;;  %v13799_v36 = vpop.permute.xlu0 %4593  ;;  %v13807_v30 = vsel %vm1297_vm1, %v4767_v9, %v4769_v58  ;;  %v4781_v58 = vrot.slane %v13121_v33, 2  ;;  %v4784_v32 = vrot.slane %v13112_v20, 2  ;;  %v4792_v39 = vrot.slane %v13161_v0, 2 }
 0x5b8   : > { %18423 = vst [vmem:[#allocation401_spill] sm:$0xff] %v13799_v36  ;;  %18425 = vst [vmem:[#allocation18_spill] sm:$0xff] %v13804_v60  ;;  %v13821_v27 = vsel %vm1297_vm1, %v4776_v13, %v4777_v37  ;;  %v13824_v9 = vsel %vm1297_vm1, %v4772_v48, %v4774_v57  ;;  %v13841_v48 = vsel %vm1297_vm1, %v4777_v37, %v4779_v42  ;;  %v4786_v57 = vrot.slane %v13139_v21, 2 }
 0x5b9   : > { %18426 = vst [vmem:[#allocation402_spill] sm:$0xff] %v13807_v30  ;;  %18429 = vst [vmem:[#allocation322_spill] sm:$0xff] %v13821_v27  ;;  %v4791_v42 = vrot.slane %v13164_v11, 2  ;;  %v4789_v20 = vrot.slane %v13133_v7, 2  ;;  %v4794_v7 = vrot.slane %v13157_v18, 2  ;;  %v4799_v18 = vrot.slane %v13181_v54, 2 }
 0x5ba   : > { %4920 = vrot.lane.b32.xlu0 %v13790_v38, %s8537_s9  ;;  %8325 = vrot.lane.b32.xlu1 %v13785_v45, %s8537_s9  ;;  %v13801_v19 = vpop.permute.xlu1 %4591  ;;  %18430 = vst [vmem:[#allocation417_spill] sm:$0xff] %v13824_v9  ;;  %18434 = vst [vmem:[#allocation150_spill] sm:$0xff] %v13841_v48  ;;  %v4804_v54 = vrot.slane %v13205_v28, 2  ;;  %v4809_v28 = vrot.slane %v13229_v46, 2  ;;  %v4814_v46 = vrot.slane %v13253_v16, 2  ;;  %v4819_v16 = vrot.slane %v13277_v56, 2 }
 0x5bb   : > { %18424 = vst [vmem:[#allocation202_spill] sm:$0xff] %v13801_v19  ;;  %v13816_v45 = vpop.permute.xlu0 %4597  ;;  %v4782_v19 = vrot.slane %v13118_v44, 2  ;;  %v4824_v56 = vrot.slane %v13301_v47, 2 }
 0x5bc   : > { %18427 = vst [vmem:[#allocation416_spill] sm:$0xff] %v13816_v45 }
 0x5bd   : > { %v13838_v13 = vsel %vm1297_vm1, %v4781_v58, %v4782_v19  ;;  %v13855_v58 = vsel %vm1297_vm1, %v4786_v57, %v4787_v40  ;;  %v13858_v37 = vsel %vm1297_vm1, %v4782_v19, %v4784_v32  ;;  %v13872_v57 = vsel %vm1297_vm1, %v4791_v42, %v4792_v39 }
 0x5be   : > { %4924 = vrot.lane.b32.xlu0 %v13804_v60, %s8537_s9  ;;  %4922 = vrot.lane.b32.xlu1 %v13807_v30, %s8537_s9  ;;  %v13818_v36 = vpop.permute.xlu1 %4595  ;;  %18433 = vst [vmem:[#allocation203_spill] sm:$0xff] %v13838_v13  ;;  %18437 = vst [vmem:[#allocation403_spill] sm:$0xff] %v13855_v58  ;;  %v13875_v19 = vsel %vm1297_vm1, %v4787_v40, %v4789_v20  ;;  %v4796_v32 = vrot.slane %v13187_v35, 2  ;;  %v13892_v40 = vsel %vm1297_vm1, %v4792_v39, %v4794_v7  ;;  %v18517_v30 = vld [vmem:[#allocation9_spill] sm:$0xff] }
 0x5bf   : > { %18428 = vst [vmem:[#allocation19_spill] sm:$0xff] %v13818_v36  ;;  %v13833_v45 = vpop.permute.xlu0 %4601  ;;  %18438 = vst [vmem:[#allocation206_spill] sm:$0xff] %v13858_v37  ;;  %v4801_v20 = vrot.slane %v13212_v1, 2  ;;  %v13909_v39 = vsel %vm1297_vm1, %v4797_v15, %v4799_v18  ;;  %v4806_v7 = vrot.slane %v13235_v61, 2  ;;  %v4811_v18 = vrot.slane %v13260_v14, 2 }
 0x5c0   : > { %18431 = vst [vmem:[#allocation148_spill] sm:$0xff] %v13833_v45  ;;  %18441 = vst [vmem:[#allocation418_spill] sm:$0xff] %v13872_v57  ;;  %v13889_v42 = vsel %vm1297_vm1, %v4796_v32, %v4797_v15  ;;  %v4867_v38 = vrot.slane %v18517_v30, 2  ;;  %v18524_v30 = vld [vmem:[#allocation132_spill] sm:$0xff] }
 0x5c1   : > { %18442 = vst [vmem:[#allocation21_spill] sm:$0xff] %v13875_v19  ;;  %18445 = vst [vmem:[#allocation152_spill] sm:$0xff] %v13889_v42 }
 0x5c2   : > { %4928 = vrot.lane.b32.xlu0 %v13821_v27, %s8537_s9  ;;  %4926 = vrot.lane.b32.xlu1 %v13824_v9, %s8537_s9  ;;  %v13835_v36 = vpop.permute.xlu1 %4599  ;;  %18446 = vst [vmem:[#allocation325_spill] sm:$0xff] %v13892_v40  ;;  %18450 = vst [vmem:[#allocation208_spill] sm:$0xff] %v13909_v39  ;;  %v18510_v9 = vld [vmem:[#allocation130_spill] sm:$0xff] }
 0x5c3   : > { %18432 = vst [vmem:[#allocation323_spill] sm:$0xff] %v13835_v36  ;;  %v13850_v45 = vpop.permute.xlu0 %4605  ;;  %v4862_v60 = vrot.slane %v18510_v9, 2 }
 0x5c4   : > { %18435 = vst [vmem:[#allocation205_spill] sm:$0xff] %v13850_v45 }
 0x5c6   : > { %4932 = vrot.lane.b32.xlu0 %v13838_v13, %s8537_s9  ;;  %4930 = vrot.lane.b32.xlu1 %v13841_v48, %s8537_s9  ;;  %v13852_v36 = vpop.permute.xlu1 %4603  ;;  %v18503_v48 = vld [vmem:[#allocation6_spill] sm:$0xff] }
 0x5c7   : > { %18436 = vst [vmem:[#allocation204_spill] sm:$0xff] %v13852_v36  ;;  %v13867_v45 = vpop.permute.xlu0 %4609  ;;  %v4857_v27 = vrot.slane %v18503_v48, 2 }
 0x5c8   : > { %18439 = vst [vmem:[#allocation20_spill] sm:$0xff] %v13867_v45 }
 0x5ca   : > { %4936 = vrot.lane.b32.xlu0 %v13855_v58, %s8537_s9  ;;  %4934 = vrot.lane.b32.xlu1 %v13858_v37, %s8537_s9  ;;  %v13869_v36 = vpop.permute.xlu1 %4607  ;;  %v4802_v58 = vrot.slane %v13209_v24, 2  ;;  %v18496_v37 = vld [vmem:[#allocation177_spill] sm:$0xff] }
 0x5cb   : > { %18440 = vst [vmem:[#allocation404_spill] sm:$0xff] %v13869_v36  ;;  %v13884_v45 = vpop.permute.xlu0 %4613  ;;  %v4852_v13 = vrot.slane %v18496_v37, 2 }
 0x5cc   : > { %18443 = vst [vmem:[#allocation324_spill] sm:$0xff] %v13884_v45  ;;  %v13906_v32 = vsel %vm1297_vm1, %v4801_v20, %v4802_v58  ;;  %v13926_v15 = vsel %vm1297_vm1, %v4802_v58, %v4804_v54  ;;  %v4816_v54 = vrot.slane %v13283_v5, 2 }
 0x5cd   : > { %18449 = vst [vmem:[#allocation209_spill] sm:$0xff] %v13906_v32  ;;  %18454 = vst [vmem:[#allocation406_spill] sm:$0xff] %v13926_v15 }
 0x5ce   : > { %4940 = vrot.lane.b32.xlu0 %v13872_v57, %s8537_s9  ;;  %4938 = vrot.lane.b32.xlu1 %v13875_v19, %s8537_s9  ;;  %v13886_v36 = vpop.permute.xlu1 %4611  ;;  %v4807_v57 = vrot.slane %v13232_v17, 2 }
 0x5cf   : > { %18444 = vst [vmem:[#allocation419_spill] sm:$0xff] %v13886_v36  ;;  %v13901_v45 = vpop.permute.xlu0 %4617 }
 0x5d0   : > { %18447 = vst [vmem:[#allocation207_spill] sm:$0xff] %v13901_v45  ;;  %v13923_v20 = vsel %vm1297_vm1, %v4806_v7, %v4807_v57  ;;  %v13943_v58 = vsel %vm1297_vm1, %v4807_v57, %v4809_v28  ;;  %v4821_v28 = vrot.slane %v13308_v63, 2 }
 0x5d1   : > { %18453 = vst [vmem:[#allocation22_spill] sm:$0xff] %v13923_v20  ;;  %18458 = vst [vmem:[#allocation421_spill] sm:$0xff] %v13943_v58 }
 0x5d2   : > { %4944 = vrot.lane.b32.xlu0 %v13889_v42, %s8537_s9  ;;  %4942 = vrot.lane.b32.xlu1 %v13892_v40, %s8537_s9  ;;  %v13903_v36 = vpop.permute.xlu1 %4615  ;;  %v4812_v42 = vrot.slane %v13257_v49, 2  ;;  %v18489_v40 = vld [vmem:[#allocation268_spill] sm:$0xff] }
 0x5d3   : > { %18448 = vst [vmem:[#allocation34_spill] sm:$0xff] %v13903_v36  ;;  %v13918_v45 = vpop.permute.xlu0 %4621  ;;  %v4847_v19 = vrot.slane %v18489_v40, 2 }
 0x5d4   : > { %18451 = vst [vmem:[#allocation405_spill] sm:$0xff] %v13918_v45  ;;  %v13940_v7 = vsel %vm1297_vm1, %v4811_v18, %v4812_v42  ;;  %v13960_v57 = vsel %vm1297_vm1, %v4812_v42, %v4814_v46  ;;  %v4826_v46 = vrot.slane %v13331_v59, 2 }
 0x5d5   : > { %18457 = vst [vmem:[#allocation326_spill] sm:$0xff] %v13940_v7  ;;  %18462 = vst [vmem:[#allocation39_spill] sm:$0xff] %v13960_v57 }
 0x5d6   : > { %4948 = vrot.lane.b32.xlu0 %v13906_v32, %s8537_s9  ;;  %4946 = vrot.lane.b32.xlu1 %v13909_v39, %s8537_s9  ;;  %v13920_v36 = vpop.permute.xlu1 %4619  ;;  %v4817_v32 = vrot.slane %v13280_v26, 2 }
 0x5d7   : > { %18452 = vst [vmem:[#allocation210_spill] sm:$0xff] %v13920_v36  ;;  %v13935_v45 = vpop.permute.xlu0 %4625 }
 0x5d8   : > { %18455 = vst [vmem:[#allocation420_spill] sm:$0xff] %v13935_v45  ;;  %v13957_v18 = vsel %vm1297_vm1, %v4816_v54, %v4817_v32  ;;  %v13975_v42 = vsel %vm1297_vm1, %v4817_v32, %v4819_v16  ;;  %v4831_v16 = vrot.slane %v13357_v23, 2 }
 0x5d9   : > { %18461 = vst [vmem:[#allocation211_spill] sm:$0xff] %v13957_v18  ;;  %18465 = vst [vmem:[#allocation407_spill] sm:$0xff] %v13975_v42 }
 0x5da   : > { %4952 = vrot.lane.b32.xlu0 %v13923_v20, %s8537_s9  ;;  %4950 = vrot.lane.b32.xlu1 %v13926_v15, %s8537_s9  ;;  %v13937_v36 = vpop.permute.xlu1 %4623  ;;  %v4822_v20 = vrot.slane %v13305_v34, 2  ;;  %v18482_v15 = vld [vmem:[#allocation366_spill] sm:$0xff] }
 0x5db   : > { %18456 = vst [vmem:[#allocation23_spill] sm:$0xff] %v13937_v36  ;;  %v13952_v45 = vpop.permute.xlu0 %4629  ;;  %v4842_v39 = vrot.slane %v18482_v15, 2 }
 0x5dc   : > { %18459 = vst [vmem:[#allocation36_spill] sm:$0xff] %v13952_v45  ;;  %v13972_v54 = vsel %vm1297_vm1, %v4821_v28, %v4822_v20  ;;  %v13990_v32 = vsel %vm1297_vm1, %v4822_v20, %v4824_v56  ;;  %v18474_v56 = vld [vmem:[#allocation266_spill] sm:$0xff] }
 0x5dd   : > { %18464 = vst [vmem:[#allocation212_spill] sm:$0xff] %v13972_v54  ;;  %18468 = vst [vmem:[#allocation408_spill] sm:$0xff] %v13990_v32 }
 0x5de   : > { %4956 = vrot.lane.b32.xlu0 %v13940_v7, %s8537_s9  ;;  %4954 = vrot.lane.b32.xlu1 %v13943_v58, %s8537_s9  ;;  %v13954_v36 = vpop.permute.xlu1 %4627 }
 0x5df   : > { %18460 = vst [vmem:[#allocation327_spill] sm:$0xff] %v13954_v36  ;;  %v13969_v45 = vpop.permute.xlu0 %4633  ;;  %v4827_v36 = vrot.slane %v13328_v22, 2 }
 0x5e0   : > { %18463 = vst [vmem:[#allocation213_spill] sm:$0xff] %v13969_v45  ;;  %v4832_v45 = vrot.slane %v13354_v41, 2 }
 0x5e1   : > { %v13987_v28 = vsel %vm1297_vm1, %v4826_v46, %v4827_v36 }
 0x5e2   : > { %4960 = vrot.lane.b32.xlu0 %v13957_v18, %s8537_s9  ;;  %4958 = vrot.lane.b32.xlu1 %v13960_v57, %s8537_s9  ;;  %v13979_v7 = vpop.permute.xlu1 %4631  ;;  %18467 = vst [vmem:[#allocation24_spill] sm:$0xff] %v13987_v28  ;;  %v14004_v46 = vsel %vm1297_vm1, %v4831_v16, %v4832_v45  ;;  %v4836_v18 = vrot.slane %v18474_v56, 2  ;;  %v18475_v57 = vld [vmem:[#allocation265_spill] sm:$0xff] }
 0x5e3   : > { %18466 = vst [vmem:[#allocation214_spill] sm:$0xff] %v13979_v7  ;;  %v18469_v7 = vld [vmem:[#allocation172_spill] sm:$0xff]  ;;  %18472 = vst [vmem:[#allocation328_spill] sm:$0xff] %v14004_v46  ;;  %v4837_v58 = vrot.slane %v18475_v57, 2  ;;  %v18479_v16 = vld [vmem:[#allocation365_spill] sm:$0xff] }
 0x5e6   : > { %4964 = vrot.lane.b32.xlu0 %v13972_v54, %s8537_s9  ;;  %4962 = vrot.lane.b32.xlu1 %v13975_v42, %s8537_s9  ;;  %v4829_v54 = vrot.slane %v18469_v7, 2  ;;  %v13999_v42 = vpop.permute.xlu0 %4637  ;;  %v14001_v47 = vpop.permute.xlu1 %4635  ;;  %v18476_v7 = vld [vmem:[#allocation263_spill] sm:$0xff] }
 0x5e7   : > { %18470 = vst [vmem:[#allocation135_spill] sm:$0xff] %v13999_v42  ;;  %18471 = vst [vmem:[#allocation25_spill] sm:$0xff] %v14001_v47  ;;  %v4834_v42 = vrot.slane %v18476_v7, 2  ;;  %v18483_v7 = vld [vmem:[#allocation363_spill] sm:$0xff] }
 0x5e8   : > { %v14007_v20 = vsel %vm1297_vm1, %v4827_v36, %v4829_v54  ;;  %v14022_v36 = vsel %vm1297_vm1, %v4836_v18, %v4837_v58 }
 0x5e9   : > { %18473 = vst [vmem:[#allocation422_spill] sm:$0xff] %v14007_v20  ;;  %18480 = vst [vmem:[#allocation215_spill] sm:$0xff] %v14022_v36  ;;  %v14025_v54 = vsel %vm1297_vm1, %v4832_v45, %v4834_v42  ;;  %v18488_v42 = vld [vmem:[#allocation308_spill] sm:$0xff] }
 0x5ea   : > { %4968 = vrot.lane.b32.xlu0 %v13987_v28, %s8537_s9  ;;  %4966 = vrot.lane.b32.xlu1 %v13990_v32, %s8537_s9  ;;  %v14016_v28 = vpop.permute.xlu0 %4641  ;;  %v14018_v47 = vpop.permute.xlu1 %4639  ;;  %v4841_v32 = vrot.slane %v18479_v16, 2  ;;  %18481 = vst [vmem:[#allocation42_spill] sm:$0xff] %v14025_v54 }
 0x5eb   : > { %18477 = vst [vmem:[#allocation40_spill] sm:$0xff] %v14016_v28  ;;  %18478 = vst [vmem:[#allocation329_spill] sm:$0xff] %v14018_v47  ;;  %v4839_v28 = vrot.slane %v18483_v7, 2  ;;  %v18490_v7 = vld [vmem:[#allocation173_spill] sm:$0xff] }
 0x5ec   : > { %v14038_v18 = vsel %vm1297_vm1, %v4841_v32, %v4842_v39 }
 0x5ed   : > { %18486 = vst [vmem:[#allocation26_spill] sm:$0xff] %v14038_v18  ;;  %v14041_v45 = vsel %vm1297_vm1, %v4837_v58, %v4839_v28  ;;  %v18495_v28 = vld [vmem:[#allocation368_spill] sm:$0xff] }
 0x5ee   : > { %4972 = vrot.lane.b32.xlu0 %v14004_v46, %s8537_s9  ;;  %4970 = vrot.lane.b32.xlu1 %v14007_v20, %s8537_s9  ;;  %v14033_v46 = vpop.permute.xlu1 %4643  ;;  %v14035_v47 = vpop.permute.xlu0 %4645  ;;  %18487 = vst [vmem:[#allocation218_spill] sm:$0xff] %v14041_v45  ;;  %v4846_v20 = vrot.slane %v18488_v42, 2 }
 0x5ef   : > { %18484 = vst [vmem:[#allocation217_spill] sm:$0xff] %v14033_v46  ;;  %18485 = vst [vmem:[#allocation216_spill] sm:$0xff] %v14035_v47  ;;  %v4844_v46 = vrot.slane %v18490_v7, 2  ;;  %v18497_v7 = vld [vmem:[#allocation267_spill] sm:$0xff] }
 0x5f0   : > { %v14055_v32 = vsel %vm1297_vm1, %v4846_v20, %v4847_v19 }
 0x5f1   : > { %18493 = vst [vmem:[#allocation137_spill] sm:$0xff] %v14055_v32  ;;  %v14058_v58 = vsel %vm1297_vm1, %v4842_v39, %v4844_v46  ;;  %v18502_v46 = vld [vmem:[#allocation310_spill] sm:$0xff] }
 0x5f2   : > { %4976 = vrot.lane.b32.xlu0 %v14022_v36, %s8537_s9  ;;  %4974 = vrot.lane.b32.xlu1 %v14025_v54, %s8537_s9  ;;  %v14050_v36 = vpop.permute.xlu1 %4647  ;;  %v14052_v47 = vpop.permute.xlu0 %4649  ;;  %18494 = vst [vmem:[#allocation270_spill] sm:$0xff] %v14058_v58  ;;  %v4851_v54 = vrot.slane %v18495_v28, 2 }
 0x5f3   : > { %18491 = vst [vmem:[#allocation269_spill] sm:$0xff] %v14050_v36  ;;  %18492 = vst [vmem:[#allocation27_spill] sm:$0xff] %v14052_v47  ;;  %v4849_v36 = vrot.slane %v18497_v7, 2  ;;  %v18504_v7 = vld [vmem:[#allocation367_spill] sm:$0xff] }
 0x5f4   : > { %v14075_v39 = vsel %vm1297_vm1, %v4851_v54, %v4852_v13  ;;  %v18509_v54 = vld [vmem:[#allocation181_spill] sm:$0xff] }
 0x5f5   : > { %v14072_v20 = vsel %vm1297_vm1, %v4847_v19, %v4849_v36  ;;  %18501 = vst [vmem:[#allocation331_spill] sm:$0xff] %v14075_v39 }
 0x5f6   : > { %4980 = vrot.lane.b32.xlu0 %v14038_v18, %s8537_s9  ;;  %4978 = vrot.lane.b32.xlu1 %v14041_v45, %s8537_s9  ;;  %v14067_v18 = vpop.permute.xlu1 %4651  ;;  %v14069_v47 = vpop.permute.xlu0 %4653  ;;  %18500 = vst [vmem:[#allocation44_spill] sm:$0xff] %v14072_v20  ;;  %v4856_v45 = vrot.slane %v18502_v46, 2 }
 0x5f7   : > { %18498 = vst [vmem:[#allocation330_spill] sm:$0xff] %v14067_v18  ;;  %18499 = vst [vmem:[#allocation139_spill] sm:$0xff] %v14069_v47  ;;  %v4854_v18 = vrot.slane %v18504_v7, 2  ;;  %v18511_v7 = vld [vmem:[#allocation397_spill] sm:$0xff] }
 0x5f8   : > { %v14092_v36 = vsel %vm1297_vm1, %v4856_v45, %v4857_v27  ;;  %v18516_v45 = vld [vmem:[#allocation312_spill] sm:$0xff] }
 0x5f9   : > { %v14089_v19 = vsel %vm1297_vm1, %v4852_v13, %v4854_v18  ;;  %18508 = vst [vmem:[#allocation220_spill] sm:$0xff] %v14092_v36 }
 0x5fa   : > { %4984 = vrot.lane.b32.xlu0 %v14055_v32, %s8537_s9  ;;  %4982 = vrot.lane.b32.xlu1 %v14058_v58, %s8537_s9  ;;  %v14084_v32 = vpop.permute.xlu1 %4655  ;;  %v14086_v47 = vpop.permute.xlu0 %4657  ;;  %18507 = vst [vmem:[#allocation222_spill] sm:$0xff] %v14089_v19  ;;  %v4861_v58 = vrot.slane %v18509_v54, 2 }
 0x5fb   : > { %18505 = vst [vmem:[#allocation219_spill] sm:$0xff] %v14084_v32  ;;  %18506 = vst [vmem:[#allocation221_spill] sm:$0xff] %v14086_v47  ;;  %v4859_v32 = vrot.slane %v18511_v7, 2  ;;  %v18518_v7 = vld [vmem:[#allocation179_spill] sm:$0xff] }
 0x5fc   : > { %v14109_v18 = vsel %vm1297_vm1, %v4861_v58, %v4862_v60  ;;  %v18523_v58 = vld [vmem:[#allocation185_spill] sm:$0xff] }
 0x5fd   : > { %v14106_v13 = vsel %vm1297_vm1, %v4857_v27, %v4859_v32  ;;  %18515 = vst [vmem:[#allocation29_spill] sm:$0xff] %v14109_v18 }
 0x5fe   : > { %4986 = vrot.lane.b32.xlu1 %v14072_v20, %s8537_s9  ;;  %4988 = vrot.lane.b32.xlu0 %v14075_v39, %s8537_s9  ;;  %v14101_v39 = vpop.permute.xlu1 %4659  ;;  %v14103_v47 = vpop.permute.xlu0 %4661  ;;  %18514 = vst [vmem:[#allocation271_spill] sm:$0xff] %v14106_v13  ;;  %v4866_v20 = vrot.slane %v18516_v45, 2  ;;  %v4872_v45 = vrot.slane %v18524_v30, 2  ;;  %v18531_v30 = vld [vmem:[#allocation11_spill] sm:$0xff] }
 0x5ff   : > { %18512 = vst [vmem:[#allocation28_spill] sm:$0xff] %v14101_v39  ;;  %18513 = vst [vmem:[#allocation225_spill] sm:$0xff] %v14103_v47  ;;  %v4864_v39 = vrot.slane %v18518_v7, 2  ;;  %v18525_v7 = vld [vmem:[#allocation8_spill] sm:$0xff] }
 0x600   : > { %v14126_v32 = vsel %vm1297_vm1, %v4866_v20, %v4867_v38 }
 0x601   : > { %v14123_v27 = vsel %vm1297_vm1, %v4862_v60, %v4864_v39  ;;  %18522 = vst [vmem:[#allocation143_spill] sm:$0xff] %v14126_v32  ;;  %v18530_v39 = vld [vmem:[#allocation314_spill] sm:$0xff] }
 0x602   : > { %4990 = vrot.lane.b32.xlu1 %v14089_v19, %s8537_s9  ;;  %4992 = vrot.lane.b32.xlu0 %v14092_v36, %s8537_s9  ;;  %v14118_v36 = vpop.permute.xlu1 %4663  ;;  %v14120_v47 = vpop.permute.xlu0 %4665  ;;  %18521 = vst [vmem:[#allocation332_spill] sm:$0xff] %v14123_v27  ;;  %v4871_v19 = vrot.slane %v18523_v58, 2  ;;  %v4877_v58 = vrot.slane %v18531_v30, 2  ;;  %v18538_v30 = vld [vmem:[#allocation134_spill] sm:$0xff] }
 0x603   : > { %18519 = vst [vmem:[#allocation141_spill] sm:$0xff] %v14118_v36  ;;  %18520 = vst [vmem:[#allocation272_spill] sm:$0xff] %v14120_v47  ;;  %v4869_v36 = vrot.slane %v18525_v7, 2  ;;  %v18532_v7 = vld [vmem:[#allocation183_spill] sm:$0xff] }
 0x604   : > { %v14143_v20 = vsel %vm1297_vm1, %v4871_v19, %v4872_v45 }
 0x605   : > { %v14140_v60 = vsel %vm1297_vm1, %v4867_v38, %v4869_v36  ;;  %18529 = vst [vmem:[#allocation229_spill] sm:$0xff] %v14143_v20  ;;  %v18537_v36 = vld [vmem:[#allocation189_spill] sm:$0xff] }
 0x606   : > { %4994 = vrot.lane.b32.xlu1 %v14106_v13, %s8537_s9  ;;  %4996 = vrot.lane.b32.xlu0 %v14109_v18, %s8537_s9  ;;  %v14135_v18 = vpop.permute.xlu1 %4667  ;;  %v14137_v47 = vpop.permute.xlu0 %4669  ;;  %18528 = vst [vmem:[#allocation223_spill] sm:$0xff] %v14140_v60  ;;  %v4876_v13 = vrot.slane %v18530_v39, 2  ;;  %v4882_v39 = vrot.slane %v18538_v30, 2 }
 0x607   : > { %18526 = vst [vmem:[#allocation226_spill] sm:$0xff] %v14135_v18  ;;  %18527 = vst [vmem:[#allocation333_spill] sm:$0xff] %v14137_v47  ;;  %v4874_v18 = vrot.slane %v18532_v7, 2  ;;  %v18539_v7 = vld [vmem:[#allocation10_spill] sm:$0xff] }
 0x608   : > { %v14160_v19 = vsel %vm1297_vm1, %v4876_v13, %v4877_v58 }
 0x609   : > { %v14157_v38 = vsel %vm1297_vm1, %v4872_v45, %v4874_v18  ;;  %18536 = vst [vmem:[#allocation233_spill] sm:$0xff] %v14160_v19  ;;  %v18544_v45 = vld [vmem:[#allocation316_spill] sm:$0xff] }
 0x60a   : > { %4998 = vrot.lane.b32.xlu1 %v14123_v27, %s8537_s9  ;;  %5000 = vrot.lane.b32.xlu0 %v14126_v32, %s8537_s9  ;;  %v14152_v32 = vpop.permute.xlu1 %4671  ;;  %v14154_v47 = vpop.permute.xlu0 %4673  ;;  %18535 = vst [vmem:[#allocation30_spill] sm:$0xff] %v14157_v38  ;;  %v4881_v27 = vrot.slane %v18537_v36, 2  ;;  %v4886_v30 = vrot.slane %v18544_v45, 2  ;;  %v18552_v45 = vld [vmem:[#allocation138_spill] sm:$0xff] }
 0x60b   : > { %18533 = vst [vmem:[#allocation230_spill] sm:$0xff] %v14152_v32  ;;  %18534 = vst [vmem:[#allocation224_spill] sm:$0xff] %v14154_v47  ;;  %v4879_v32 = vrot.slane %v18539_v7, 2  ;;  %v18546_v7 = vld [vmem:[#allocation187_spill] sm:$0xff] }
 0x60c   : > { %v14177_v13 = vsel %vm1297_vm1, %v4881_v27, %v4882_v39 }
 0x60d   : > { %v14174_v18 = vsel %vm1297_vm1, %v4877_v58, %v4879_v32  ;;  %18543 = vst [vmem:[#allocation274_spill] sm:$0xff] %v14177_v13  ;;  %v18551_v58 = vld [vmem:[#allocation193_spill] sm:$0xff] }
 0x60e   : > { %5002 = vrot.lane.b32.xlu1 %v14140_v60, %s8537_s9  ;;  %5004 = vrot.lane.b32.xlu0 %v14143_v20, %s8537_s9  ;;  %v14169_v20 = vpop.permute.xlu1 %4675  ;;  %18542 = vst [vmem:[#allocation145_spill] sm:$0xff] %v14174_v18  ;;  %v18545_v60 = vld [vmem:[#allocation13_spill] sm:$0xff] }
 0x60f   : > { %18540 = vst [vmem:[#allocation273_spill] sm:$0xff] %v14169_v20  ;;  %v14171_v47 = vpop.permute.xlu0 %4677  ;;  %v4887_v36 = vrot.slane %v18545_v60, 2  ;;  %v4884_v20 = vrot.slane %v18546_v7, 2  ;;  %v4891_v60 = vrot.slane %v18551_v58, 2  ;;  %v18553_v7 = vld [vmem:[#allocation12_spill] sm:$0xff]  ;;  %v18559_v58 = vld [vmem:[#allocation14_spill] sm:$0xff] }
 0x610   : > { %18541 = vst [vmem:[#allocation31_spill] sm:$0xff] %v14171_v47 }
 0x611   : > { %v14191_v32 = vsel %vm1297_vm1, %v4882_v39, %v4884_v20  ;;  %v14194_v27 = vsel %vm1297_vm1, %v4886_v30, %v4887_v36  ;;  %v18558_v39 = vld [vmem:[#allocation398_spill] sm:$0xff] }
 0x612   : > { %5006 = vrot.lane.b32.xlu1 %v14157_v38, %s8537_s9  ;;  %5008 = vrot.lane.b32.xlu0 %v14160_v19, %s8537_s9  ;;  %18549 = vst [vmem:[#allocation234_spill] sm:$0xff] %v14191_v32  ;;  %18550 = vst [vmem:[#allocation335_spill] sm:$0xff] %v14194_v27  ;;  %v4892_v38 = vrot.slane %v18552_v45, 2  ;;  %v4896_v45 = vrot.slane %v18558_v39, 2 }
 0x614   : > { %v14186_v19 = vpop.permute.xlu1 %4679  ;;  %v14188_v47 = vpop.permute.xlu0 %4681  ;;  %v14211_v30 = vsel %vm1297_vm1, %v4891_v60, %v4892_v38 }
 0x615   : > { %18547 = vst [vmem:[#allocation334_spill] sm:$0xff] %v14186_v19  ;;  %18548 = vst [vmem:[#allocation147_spill] sm:$0xff] %v14188_v47  ;;  %v4889_v19 = vrot.slane %v18553_v7, 2  ;;  %v18560_v7 = vld [vmem:[#allocation191_spill] sm:$0xff] }
 0x616   : > { %5010 = vrot.lane.b32.xlu1 %v14174_v18, %s8537_s9  ;;  %5012 = vrot.lane.b32.xlu0 %v14177_v13, %s8537_s9  ;;  %18557 = vst [vmem:[#allocation228_spill] sm:$0xff] %v14211_v30  ;;  %v4897_v18 = vrot.slane %v18559_v58, 2  ;;  %v4902_v58 = vrot.slane %v13695_v8, 2  ;;  %v4907_v8 = vrot.slane %v13718_v50, 2  ;;  %v4912_v50 = vrot.slane %v13750_v52, 2 }
 0x617   : > { %v14208_v20 = vsel %vm1297_vm1, %v4887_v36, %v4889_v19  ;;  %v4901_v36 = vrot.slane %v13698_v12, 2 }
 0x618   : > { %v14205_v47 = vpop.permute.xlu0 %4685  ;;  %18556 = vst [vmem:[#allocation236_spill] sm:$0xff] %v14208_v20  ;;  %v14228_v60 = vsel %vm1297_vm1, %v4896_v45, %v4897_v18  ;;  %v4906_v45 = vrot.slane %v13721_v55, 2 }
 0x619   : > { %v14203_v13 = vpop.permute.xlu1 %4683  ;;  %18555 = vst [vmem:[#allocation235_spill] sm:$0xff] %v14205_v47  ;;  %18564 = vst [vmem:[#allocation33_spill] sm:$0xff] %v14228_v60 }
 0x61a   : > { %5014 = vrot.lane.b32.xlu1 %v14191_v32, %s8537_s9  ;;  %5016 = vrot.lane.b32.xlu0 %v14194_v27, %s8537_s9  ;;  %18554 = vst [vmem:[#allocation227_spill] sm:$0xff] %v14203_v13  ;;  %v4894_v13 = vrot.slane %v18560_v7, 2  ;;  %v18565_v7 = vld [vmem:[#allocation109_spill] sm:$0xff] }
 0x61c   : > { %v14225_v19 = vsel %vm1297_vm1, %v4892_v38, %v4894_v13  ;;  %v14245_v13 = vsel %vm1297_vm1, %v4901_v36, %v4902_v58  ;;  %v4911_v36 = vrot.slane %v13753_v6, 2 }
 0x61d   : > { %18563 = vst [vmem:[#allocation275_spill] sm:$0xff] %v14225_v19  ;;  %18569 = vst [vmem:[#allocation151_spill] sm:$0xff] %v14245_v13 }
 0x61e   : > { %5018 = vrot.lane.b32.xlu1 %v14208_v20, %s8537_s9  ;;  %5020 = vrot.lane.b32.xlu0 %v14211_v30, %s8537_s9 }
 0x620   : > { %v14220_v27 = vpop.permute.xlu1 %4687  ;;  %v14222_v47 = vpop.permute.xlu0 %4689 }
 0x621   : > { %18561 = vst [vmem:[#allocation32_spill] sm:$0xff] %v14220_v27  ;;  %18562 = vst [vmem:[#allocation237_spill] sm:$0xff] %v14222_v47  ;;  %v4899_v27 = vrot.slane %v18565_v7, 2  ;;  %v4904_v7 = vrot.slane %v13689_v29, 2  ;;  %v4909_v29 = vrot.slane %v13709_v62, 2 }
 0x622   : > { %5022 = vrot.lane.b32.xlu1 %v14225_v19, %s8537_s9  ;;  %5024 = vrot.lane.b32.xlu0 %v14228_v60, %s8537_s9 }
 0x623   : > { %v14242_v38 = vsel %vm1297_vm1, %v4897_v18, %v4899_v27  ;;  %v14259_v18 = vsel %vm1297_vm1, %v4902_v58, %v4904_v7  ;;  %v14262_v27 = vsel %vm1297_vm1, %v4906_v45, %v4907_v8  ;;  %v14276_v58 = vsel %vm1297_vm1, %v4907_v8, %v4909_v29 }
 0x624   : > { %v14237_v39 = vpop.permute.xlu1 %4691  ;;  %v14239_v47 = vpop.permute.xlu0 %4693  ;;  %18568 = vst [vmem:[#allocation336_spill] sm:$0xff] %v14242_v38  ;;  %18572 = vst [vmem:[#allocation231_spill] sm:$0xff] %v14259_v18  ;;  %v14279_v45 = vsel %vm1297_vm1, %v4911_v36, %v4912_v50  ;;  %v4914_v7 = vrot.slane %v13735_v53, 2 }
 0x625   : > { %18566 = vst [vmem:[#allocation149_spill] sm:$0xff] %v14237_v39  ;;  %18567 = vst [vmem:[#allocation276_spill] sm:$0xff] %v14239_v47 }
 0x626   : > { %5026 = vrot.lane.b32.xlu1 %v14242_v38, %s8537_s9  ;;  %5028 = vrot.lane.b32.xlu0 %v14245_v13, %s8537_s9  ;;  %18573 = vst [vmem:[#allocation278_spill] sm:$0xff] %v14262_v27  ;;  %18574 = vst [vmem:[#allocation279_spill] sm:$0xff] %v14276_v58  ;;  %v14291_v6 = vsel %vm1297_vm1, %v4912_v50, %v4914_v7 }
 0x627   : > { %18575 = vst [vmem:[#allocation232_spill] sm:$0xff] %v14279_v45  ;;  %18576 = vst [vmem:[#allocation409_spill] sm:$0xff] %v14291_v6 }
 0x628   : > { %v14254_v39 = vpop.permute.xlu1 %4695  ;;  %v14256_v47 = vpop.permute.xlu0 %4697 }
 0x629   : > { %18570 = vst [vmem:[#allocation38_spill] sm:$0xff] %v14254_v39  ;;  %18571 = vst [vmem:[#allocation337_spill] sm:$0xff] %v14256_v47 }
 0x62a   : > { %5030 = vrot.lane.b32.xlu1 %v14259_v18, %s8537_s9  ;;  %5032 = vrot.lane.b32.xlu0 %v14262_v27, %s8537_s9 }
 0x62c   : > { %v14271_v39 = vpop.permute.xlu1 %8325  ;;  %v14273_v47 = vpop.permute.xlu0 %4920 }
 0x62e   : > { %5034 = vrot.lane.b32.xlu1 %v14276_v58, %s8537_s9  ;;  %5036 = vrot.lane.b32.xlu0 %v14279_v45, %s8537_s9 }
 0x630   : > { %v14286_v52 = vpop.permute.xlu1 %4922  ;;  %v14288_v62 = vpop.permute.xlu0 %4924 }
 0x632   : > { %5038 = vrot.lane.b32.xlu1 %v14291_v6, %s8537_s9  ;;  %5104 = vrot.lane.b32.xlu0 %v13053_v10, %s8539_s14  ;;  %s8543_s9 = smov 40  }
 0x634   : > { %v14297_v8 = vpop.permute.xlu1 %4926  ;;  %v14299_v36 = vpop.permute.xlu0 %4928 }
 0x636   : > { %5106 = vrot.lane.b32.xlu1 %v13050_v25, %s8539_s14  ;;  %5108 = vrot.lane.b32.xlu0 %v13071_v31, %s8539_s14 }
 0x638   : > { %v14305_v53 = vpop.permute.xlu1 %4930  ;;  %v14307_v50 = vpop.permute.xlu0 %4932 }
 0x63a   : > { %5110 = vrot.lane.b32.xlu1 %v13068_v51, %s8539_s14  ;;  %5112 = vrot.lane.b32.xlu0 %v13098_v4, %s8539_s14 }
 0x63c   : > { %v14313_v29 = vpop.permute.xlu1 %4934  ;;  %v14315_v7 = vpop.permute.xlu0 %4936 }
 0x63e   : > { %5114 = vrot.lane.b32.xlu1 %v13095_v2, %s8539_s14  ;;  %5116 = vrot.lane.b32.xlu0 %v13121_v33, %s8539_s14 }
 0x640   : > { %v14321_v6 = vpop.permute.xlu1 %4938  ;;  %v14323_v45 = vpop.permute.xlu0 %4940 }
 0x642   : > { %5118 = vrot.lane.b32.xlu1 %v13118_v44, %s8539_s14  ;;  %5120 = vrot.lane.b32.xlu0 %v13139_v21, %s8539_s14 }
 0x644   : > { %v14329_v58 = vpop.permute.xlu1 %4942  ;;  %v14331_v27 = vpop.permute.xlu0 %4944 }
 0x645   : > { %18577 = vst [vmem:[#allocation35_spill] sm:$0xff] %v14329_v58  ;;  %18578 = vst [vmem:[#allocation339_spill] sm:$0xff] %v14331_v27 }
 0x646   : > { %5122 = vrot.lane.b32.xlu1 %v13136_v43, %s8539_s14  ;;  %5124 = vrot.lane.b32.xlu0 %v13164_v11, %s8539_s14 }
 0x648   : > { %v14337_v55 = vpop.permute.xlu1 %4946  ;;  %v14339_v18 = vpop.permute.xlu0 %4948 }
 0x649   : > { %18579 = vst [vmem:[#allocation410_spill] sm:$0xff] %v14337_v55  ;;  %18580 = vst [vmem:[#allocation423_spill] sm:$0xff] %v14339_v18 }
 0x64a   : > { %5126 = vrot.lane.b32.xlu1 %v13161_v0, %s8539_s14  ;;  %5128 = vrot.lane.b32.xlu0 %v13187_v35, %s8539_s14 }
 0x64c   : > { %v14345_v13 = vpop.permute.xlu1 %4950  ;;  %v14347_v12 = vpop.permute.xlu0 %4952 }
 0x64d   : > { %18581 = vst [vmem:[#allocation369_spill] sm:$0xff] %v14345_v13  ;;  %18582 = vst [vmem:[#allocation424_spill] sm:$0xff] %v14347_v12 }
 0x64e   : > { %5130 = vrot.lane.b32.xlu1 %v13184_v3, %s8539_s14  ;;  %5132 = vrot.lane.b32.xlu0 %v13212_v1, %s8539_s14 }
 0x650   : > { %v14353_v38 = vpop.permute.xlu1 %4954  ;;  %v14355_v60 = vpop.permute.xlu0 %4956 }
 0x651   : > { %18583 = vst [vmem:[#allocation370_spill] sm:$0xff] %v14353_v38  ;;  %18584 = vst [vmem:[#allocation280_spill] sm:$0xff] %v14355_v60  ;;  %v18593_v38 = vld [vmem:[#allocation305_spill] sm:$0xff] }
 0x652   : > { %5134 = vrot.lane.b32.xlu1 %v13209_v24, %s8539_s14  ;;  %5136 = vrot.lane.b32.xlu0 %v13235_v61, %s8539_s14 }
 0x654   : > { %v14361_v19 = vpop.permute.xlu1 %4958  ;;  %v14363_v30 = vpop.permute.xlu0 %4960 }
 0x655   : > { %18585 = vst [vmem:[#allocation340_spill] sm:$0xff] %v14361_v19  ;;  %18586 = vst [vmem:[#allocation37_spill] sm:$0xff] %v14363_v30 }
 0x656   : > { %5138 = vrot.lane.b32.xlu1 %v13232_v17, %s8539_s14  ;;  %5140 = vrot.lane.b32.xlu0 %v13260_v14, %s8539_s14 }
 0x658   : > { %v14369_v20 = vpop.permute.xlu1 %4962  ;;  %v14371_v32 = vpop.permute.xlu0 %4964 }
 0x659   : > { %18587 = vst [vmem:[#allocation277_spill] sm:$0xff] %v14369_v20  ;;  %18588 = vst [vmem:[#allocation153_spill] sm:$0xff] %v14371_v32  ;;  %v8468_v32 = vld [vmem:[%s16404_s2] ss:$0 sm:$0xff] }
 0x65a   : > { %5142 = vrot.lane.b32.xlu1 %v13257_v49, %s8539_s14  ;;  %5144 = vrot.lane.b32.xlu0 %v13283_v5, %s8539_s14  ;;  %v3800_v12 = vadd.f32 %v8468_v32, %v18593_v38 }
 0x65c   : > { %v14377_v60 = vpop.permute.xlu1 %4966  ;;  %v14379_v19 = vpop.permute.xlu0 %4968  ;;  %v3998_v13 = vmax.f32 %v3800_v12, 0.0 }
 0x65d   : > { %18589 = vst [vmem:[#allocation338_spill] sm:$0xff] %v14377_v60  ;;  %18590 = vst [vmem:[#allocation238_spill] sm:$0xff] %v14379_v19 }
 0x65e   : > { %5146 = vrot.lane.b32.xlu1 %v13280_v26, %s8539_s14  ;;  %5148 = vrot.lane.b32.xlu0 %v13308_v63, %s8539_s14  ;;  %v4145_v55 = vrot.slane %v3998_v13, 7 }
 0x660   : > { %v14385_v30 = vpop.permute.xlu1 %4970  ;;  %v14387_v20 = vpop.permute.xlu0 %4972  ;;  %v14419_v27 = vsel %vm4097_vm12, 0.0, %v4145_v55 }
 0x661   : > { %18591 = vst [vmem:[#allocation341_spill] sm:$0xff] %v14385_v30  ;;  %18592 = vst [vmem:[#allocation371_spill] sm:$0xff] %v14387_v20  ;;  %v18596_v20 = vld [vmem:[#allocation169_spill] sm:$0xff] }
 0x662   : > { %5150 = vrot.lane.b32.xlu1 %v13305_v34, %s8539_s14  ;;  %5152 = vrot.lane.b32.xlu0 %v13331_v59, %s8539_s14  ;;  %v3805_v30 = vadd.f32 %v8468_v32, %v18596_v20  ;;  %18601 = vst [vmem:[#allocation41_spill] sm:$0xff] %v14419_v27 }
 0x664   : > { %v14397_v19 = vpop.permute.xlu1 %4974  ;;  %v14399_v60 = vpop.permute.xlu0 %4976  ;;  %v3999_v12 = vmax.f32 %v3805_v30, 0.0 }
 0x665   : > { %18594 = vst [vmem:[#allocation372_spill] sm:$0xff] %v14397_v19  ;;  %18595 = vst [vmem:[#allocation411_spill] sm:$0xff] %v14399_v60 }
 0x666   : > { %5154 = vrot.lane.b32.xlu1 %v13328_v22, %s8539_s14  ;;  %5156 = vrot.lane.b32.xlu0 %v13357_v23, %s8539_s14  ;;  %v14425_v32 = vrot.slane %v3999_v12, 7 }
 0x668   : > { %v14406_v38 = vpop.permute.xlu1 %4978  ;;  %v14408_v18 = vpop.permute.xlu0 %4980  ;;  %18602 = vst [vmem:[#allocation426_spill] sm:$0xff] %v14425_v32  ;;  %v14433_v30 = vsel %vm4097_vm12, %v4145_v55, %v14425_v32 }
 0x669   : > { %18597 = vst [vmem:[#allocation45_spill] sm:$0xff] %v14406_v38  ;;  %18598 = vst [vmem:[#allocation412_spill] sm:$0xff] %v14408_v18 }
 0x66a   : > { %5158 = vrot.lane.b32.xlu1 %v13354_v41, %s8539_s14  ;;  %5160 = vrot.lane.b32.xlu0 %v18474_v56, %s8539_s14  ;;  %18605 = vst [vmem:[#allocation373_spill] sm:$0xff] %v14433_v30 }
 0x66c   : > { %v14414_v60 = vpop.permute.xlu1 %4982  ;;  %v14416_v19 = vpop.permute.xlu0 %4984 }
 0x66d   : > { %18599 = vst [vmem:[#allocation425_spill] sm:$0xff] %v14414_v60  ;;  %18600 = vst [vmem:[#allocation46_spill] sm:$0xff] %v14416_v19 }
 0x66e   : > { %5162 = vrot.lane.b32.xlu1 %v18475_v57, %s8539_s14  ;;  %5164 = vrot.lane.b32.xlu0 %v14419_v27, %s8539_s14  ;;  %v18657_v27 = vld [vmem:[#allocation122_spill] sm:$0xff]  ;;  %v18661_v57 = vld [vmem:[#allocation203_spill] sm:$0xff] }
 0x670   : > { %v14427_v20 = vpop.permute.xlu1 %4986  ;;  %v14429_v13 = vpop.permute.xlu0 %4988 }
 0x671   : > { %18603 = vst [vmem:[#allocation47_spill] sm:$0xff] %v14427_v20  ;;  %18604 = vst [vmem:[#allocation43_spill] sm:$0xff] %v14429_v13 }
 0x672   : > { %5166 = vrot.lane.b32.xlu1 %v14433_v30, %s8539_s14  ;;  %5168 = vrot.lane.b32.xlu0 %v18479_v16, %s8539_s14  ;;  %v18624_v16 = vld [vmem:[#allocation314_spill] sm:$0xff] }
 0x674   : > { %v14439_v19 = vpop.permute.xlu1 %4990  ;;  %v14441_v60 = vpop.permute.xlu0 %4992 }
 0x675   : > { %18606 = vst [vmem:[#allocation49_spill] sm:$0xff] %v14439_v19  ;;  %18607 = vst [vmem:[#allocation239_spill] sm:$0xff] %v14441_v60 }
 0x676   : > { %5170 = vrot.lane.b32.xlu1 %v18482_v15, %s8539_s14  ;;  %5172 = vrot.lane.b32.xlu0 %v18488_v42, %s8539_s14  ;;  %v18620_v15 = vld [vmem:[#allocation185_spill] sm:$0xff]  ;;  %v18652_v42 = vld [vmem:[#allocation150_spill] sm:$0xff] }
 0x678   : > { %v14447_v12 = vpop.permute.xlu1 %4994  ;;  %v14449_v55 = vpop.permute.xlu0 %4996 }
 0x679   : > { %18608 = vst [vmem:[#allocation374_spill] sm:$0xff] %v14447_v12  ;;  %18609 = vst [vmem:[#allocation50_spill] sm:$0xff] %v14449_v55 }
 0x67a   : > { %5174 = vrot.lane.b32.xlu1 %v18489_v40, %s8539_s14  ;;  %5176 = vrot.lane.b32.xlu0 %v18495_v28, %s8539_s14 }
 0x67c   : > { %v14455_v13 = vpop.permute.xlu1 %4998  ;;  %v14457_v19 = vpop.permute.xlu0 %5000 }
 0x67d   : > { %18610 = vst [vmem:[#allocation240_spill] sm:$0xff] %v14455_v13  ;;  %18611 = vst [vmem:[#allocation281_spill] sm:$0xff] %v14457_v19  ;;  %v18616_v19 = vld [vmem:[#allocation312_spill] sm:$0xff] }
 0x67e   : > { %5178 = vrot.lane.b32.xlu1 %v18496_v37, %s8539_s14  ;;  %5180 = vrot.lane.b32.xlu0 %v18502_v46, %s8539_s14  ;;  %v18648_v46 = vld [vmem:[#allocation322_spill] sm:$0xff] }
 0x680   : > { %v14463_v60 = vpop.permute.xlu1 %5002  ;;  %v14465_v12 = vpop.permute.xlu0 %5004 }
 0x681   : > { %18612 = vst [vmem:[#allocation51_spill] sm:$0xff] %v14463_v60  ;;  %18613 = vst [vmem:[#allocation154_spill] sm:$0xff] %v14465_v12  ;;  %v18619_v12 = vld [vmem:[#allocation9_spill] sm:$0xff] }
 0x682   : > { %5182 = vrot.lane.b32.xlu1 %v18503_v48, %s8539_s14  ;;  %5184 = vrot.lane.b32.xlu0 %v18509_v54, %s8539_s14  ;;  %v18647_v48 = vld [vmem:[#allocation119_spill] sm:$0xff] }
 0x684   : > { %v14471_v55 = vpop.permute.xlu1 %5006  ;;  %v14473_v13 = vpop.permute.xlu0 %5008 }
 0x685   : > { %18614 = vst [vmem:[#allocation282_spill] sm:$0xff] %v14471_v55  ;;  %18615 = vst [vmem:[#allocation342_spill] sm:$0xff] %v14473_v13  ;;  %v18623_v13 = vld [vmem:[#allocation132_spill] sm:$0xff] }
 0x686   : > { %5186 = vrot.lane.b32.xlu1 %v18510_v9, %s8539_s14  ;;  %5188 = vrot.lane.b32.xlu0 %v18616_v19, %s8539_s14  ;;  %v18646_v9 = vld [vmem:[#allocation120_spill] sm:$0xff] }
 0x688   : > { %v14479_v20 = vpop.permute.xlu1 %5010  ;;  %v14481_v60 = vpop.permute.xlu0 %5012 }
 0x689   : > { %18617 = vst [vmem:[#allocation48_spill] sm:$0xff] %v14479_v20  ;;  %18618 = vst [vmem:[#allocation52_spill] sm:$0xff] %v14481_v60  ;;  %v6781_v60 = vld [vmem:[%s16405_s3 + $0x40] sm:$0xff] }
 0x68a   : > { %5190 = vrot.lane.b32.xlu1 %v18619_v12, %s8539_s14  ;;  %5192 = vrot.lane.b32.xlu0 %v18620_v15, %s8539_s14 }
 0x68b   : > { %8130 = vmatprep.subr.mxu1 %v6781_v60 }
 0x68c   : > { %v14487_v18 = vpop.permute.xlu1 %5014  ;;  %v14489_v55 = vpop.permute.xlu0 %5016  ;;  %8131 = vmatpush3.msra.mxu1 %v6781_v60  ;;  %v6778_v60 = vld [vmem:[%s16405_s3 + $0x28] sm:$0xff] }
 0x68d   : > { %18621 = vst [vmem:[#allocation343_spill] sm:$0xff] %v14487_v18  ;;  %18622 = vst [vmem:[#allocation375_spill] sm:$0xff] %v14489_v55  ;;  %v6780_v55 = vld [vmem:[%s16405_s3 + $0x38] sm:$0xff]  ;;  %v18627_v18 = vld [vmem:[#allocation11_spill] sm:$0xff] }
 0x68e   : > { %5194 = vrot.lane.b32.xlu1 %v18623_v13, %s8539_s14  ;;  %5196 = vrot.lane.b32.xlu0 %v18624_v16, %s8539_s14  ;;  %v18628_v13 = vld [vmem:[#allocation189_spill] sm:$0xff]  ;;  %v6779_v16 = vld [vmem:[%s16405_s3 + $0x30] sm:$0xff] }
 0x68f   : > { %8132 = vmatprep.subr.mxu1 %v6780_v55 }
 0x690   : > { %v14498_v20 = vpop.permute.xlu1 %5018  ;;  %v14500_v38 = vpop.permute.xlu0 %5020  ;;  %8133 = vmatpush3.msra.mxu1 %v6780_v55  ;;  %v6777_v55 = vld [vmem:[%s16405_s3 + $0x20] sm:$0xff] }
 0x691   : > { %18625 = vst [vmem:[#allocation54_spill] sm:$0xff] %v14498_v20  ;;  %18626 = vst [vmem:[#allocation241_spill] sm:$0xff] %v14500_v38  ;;  %8134 = vmatprep.subr.mxu1 %v6779_v16  ;;  %v18631_v38 = vld [vmem:[#allocation116_spill] sm:$0xff] }
 0x692   : > { %5198 = vrot.lane.b32.xlu1 %v18627_v18, %s8539_s14  ;;  %5200 = vrot.lane.b32.xlu0 %v18628_v13, %s8539_s14  ;;  %v18632_v13 = vld [vmem:[#allocation115_spill] sm:$0xff] }
 0x693   : > { %8135 = vmatpush3.msra.mxu1 %v6779_v16  ;;  %v6776_v16 = vld [vmem:[%s16405_s3 + $0x18] sm:$0xff] }
 0x694   : > { %v14512_v15 = vpop.permute.xlu1 %5022  ;;  %v14514_v20 = vpop.permute.xlu0 %5024  ;;  %8136 = vmatprep.subr.mxu1 %v6778_v60 }
 0x695   : > { %18629 = vst [vmem:[#allocation376_spill] sm:$0xff] %v14512_v15  ;;  %18630 = vst [vmem:[#allocation55_spill] sm:$0xff] %v14514_v20  ;;  %8137 = vmatpush3.msra.mxu1 %v6778_v60  ;;  %v18635_v20 = vld [vmem:[#allocation200_spill] sm:$0xff]  ;;  %v18645_v15 = vld [vmem:[#allocation417_spill] sm:$0xff] }
 0x696   : > { %5308 = vrot.lane.b32.xlu1 %v18631_v38, %s8541_s18  ;;  %5310 = vrot.lane.b32.xlu0 %v18632_v13, %s8541_s18  ;;  %v18636_v38 = vld [vmem:[#allocation402_spill] sm:$0xff]  ;;  %v6775_v60 = vld [vmem:[%s16405_s3 + $0x10] sm:$0xff] }
 0x697   : > { %8138 = vmatprep.subr.mxu1 %v6777_v55 }
 0x698   : > { %v14523_v18 = vpop.permute.xlu1 %5026  ;;  %v14525_v12 = vpop.permute.xlu0 %5028  ;;  %8139 = vmatpush3.msra.mxu1 %v6777_v55  ;;  %v6774_v55 = vld [vmem:[%s16405_s3 + $0x8] sm:$0xff] }
 0x699   : > { %18633 = vst [vmem:[#allocation242_spill] sm:$0xff] %v14523_v18  ;;  %18634 = vst [vmem:[#allocation283_spill] sm:$0xff] %v14525_v12  ;;  %8140 = vmatprep.subr.mxu1 %v6776_v16 }
 0x69a   : > { %5510 = vrot.lane.b32.xlu1 %v18635_v20, %s8543_s9  ;;  %5512 = vrot.lane.b32.xlu0 %v18636_v38, %s8543_s9 }
 0x69b   : > { %8141 = vmatpush3.msra.mxu1 %v6776_v16  ;;  %v6773_v16 = vld [vmem:[%s16405_s3] sm:$0xff] }
 0x69c   : > { %v14537_v13 = vpop.permute.xlu1 %5030  ;;  %v14539_v12 = vpop.permute.xlu0 %5032  ;;  %8142 = vmatprep.subr.mxu1 %v6775_v60 }
 0x69d   : > { %18637 = vst [vmem:[#allocation56_spill] sm:$0xff] %v14537_v13  ;;  %18638 = vst [vmem:[#allocation155_spill] sm:$0xff] %v14539_v12  ;;  %8143 = vmatpush3.msra.mxu1 %v6775_v60  ;;  %v18641_v12 = vld [vmem:[#allocation118_spill] sm:$0xff]  ;;  %v18643_v60 = vld [vmem:[#allocation117_spill] sm:$0xff] }
 0x69e   : > { %5702 = vrot.lane.b32.xlu1 %v13071_v31, %s8544_s13  ;;  %5704 = vrot.lane.b32.xlu0 %v13068_v51, %s8544_s13  ;;  %v18644_v13 = vld [vmem:[#allocation18_spill] sm:$0xff] }
 0x69f   : > { %8144 = vmatprep.subr.mxu1 %v6774_v55 }
 0x6a0   : > { %v14548_v20 = vpop.permute.xlu1 %5034  ;;  %v14550_v38 = vpop.permute.xlu0 %5036  ;;  %8145 = vmatpush3.msra.mxu1 %v6774_v55 }
 0x6a1   : > { %18639 = vst [vmem:[#allocation284_spill] sm:$0xff] %v14548_v20  ;;  %18640 = vst [vmem:[#allocation344_spill] sm:$0xff] %v14550_v38  ;;  %8146 = vmatprep.subr.mxu1 %v6773_v16 }
 0x6a2   : > { %5888 = vrot.lane.b32.xlu1 %v18641_v12, %s8545_s22  ;;  %5312 = vrot.lane.b32.xlu0 %v18641_v12, %s8541_s18 }
 0x6a3   : > { %8147 = vmatpush3.msra.mxu1 %v6773_v16 }
 0x6a4   : > { %v14562_v20 = vpop.permute.xlu1 %5038  ;;  %v14564_v38 = vpop.permute.xlu0 %5104 }
 0x6a5   : > { %18642 = vst [vmem:[#allocation53_spill] sm:$0xff] %v14562_v20 }
 0x6a6   : > { %5890 = vrot.lane.b32.xlu1 %v18643_v60, %s8545_s22  ;;  %6074 = vrot.lane.b32.xlu0 %v18644_v13, %s8546_s19 }
 0x6a8   : > { %v14570_v12 = vpop.permute.xlu1 %5106  ;;  %v14572_v18 = vpop.permute.xlu0 %5108 }
 0x6aa   : > { %5314 = vrot.lane.b32.xlu1 %v18643_v60, %s8541_s18  ;;  %5514 = vrot.lane.b32.xlu0 %v18644_v13, %s8543_s9 }
 0x6ac   : > { %v14578_v55 = vpop.permute.xlu1 %5110  ;;  %v14580_v20 = vpop.permute.xlu0 %5112 }
 0x6ae   : > { %6076 = vrot.lane.b32.xlu1 %v18645_v15, %s8546_s19  ;;  %5516 = vrot.lane.b32.xlu0 %v18645_v15, %s8543_s9 }
 0x6b0   : > { %v14586_v16 = vpop.permute.xlu1 %5114  ;;  %v14588_v19 = vpop.permute.xlu0 %5116 }
 0x6b2   : > { %5706 = vrot.lane.b32.xlu1 %v13098_v4, %s8544_s13  ;;  %5708 = vrot.lane.b32.xlu0 %v13095_v2, %s8544_s13 }
 0x6b4   : > { %v14594_v13 = vpop.permute.xlu1 %5118  ;;  %v14596_v60 = vpop.permute.xlu0 %5120 }
 0x6b6   : > { %5892 = vrot.lane.b32.xlu1 %v18646_v9, %s8545_s22  ;;  %5316 = vrot.lane.b32.xlu0 %v18646_v9, %s8541_s18 }
 0x6b8   : > { %v14602_v15 = vpop.permute.xlu1 %5122  ;;  %v14604_v54 = vpop.permute.xlu0 %5124 }
 0x6ba   : > { %5894 = vrot.lane.b32.xlu1 %v18647_v48, %s8545_s22  ;;  %6078 = vrot.lane.b32.xlu0 %v18648_v46, %s8546_s19 }
 0x6bc   : > { %v14610_v37 = vpop.permute.xlu1 %5126  ;;  %v14612_v28 = vpop.permute.xlu0 %5128 }
 0x6bd   : > { %18649 = vst [vmem:[#allocation57_spill] sm:$0xff] %v14612_v28 }
 0x6be   : > { %5318 = vrot.lane.b32.xlu1 %v18647_v48, %s8541_s18  ;;  %5518 = vrot.lane.b32.xlu0 %v18648_v46, %s8543_s9 }
 0x6c0   : > { %v14618_v9 = vpop.permute.xlu1 %5130  ;;  %v14620_v40 = vpop.permute.xlu0 %5132 }
 0x6c1   : > { %18650 = vst [vmem:[#allocation345_spill] sm:$0xff] %v14618_v9  ;;  %18651 = vst [vmem:[#allocation377_spill] sm:$0xff] %v14620_v40  ;;  %v18702_v40 = vld [vmem:[#allocation318_spill] sm:$0xff] }
 0x6c2   : > { %6080 = vrot.lane.b32.xlu1 %v18652_v42, %s8546_s19  ;;  %5520 = vrot.lane.b32.xlu0 %v18652_v42, %s8543_s9  ;;  %v18703_v9 = vld [vmem:[#allocation114_spill] sm:$0xff] }
 0x6c4   : > { %v14626_v32 = vpop.permute.xlu1 %5134  ;;  %v14628_v30 = vpop.permute.xlu0 %5136 }
 0x6c5   : > { %18653 = vst [vmem:[#allocation59_spill] sm:$0xff] %v14626_v32  ;;  %18654 = vst [vmem:[#allocation243_spill] sm:$0xff] %v14628_v30  ;;  %v18660_v30 = vld [vmem:[#allocation121_spill] sm:$0xff] }
 0x6c6   : > { %5710 = vrot.lane.b32.xlu1 %v13121_v33, %s8544_s13  ;;  %5712 = vrot.lane.b32.xlu0 %v13118_v44, %s8544_s13 }
 0x6c8   : > { %v14634_v48 = vpop.permute.xlu1 %5138  ;;  %v14636_v46 = vpop.permute.xlu0 %5140 }
 0x6c9   : > { %18655 = vst [vmem:[#allocation378_spill] sm:$0xff] %v14634_v48  ;;  %18656 = vst [vmem:[#allocation60_spill] sm:$0xff] %v14636_v46 }
 0x6ca   : > { %5896 = vrot.lane.b32.xlu1 %v18657_v27, %s8545_s22  ;;  %5320 = vrot.lane.b32.xlu0 %v18657_v27, %s8541_s18 }
 0x6cc   : > { %v14642_v42 = vpop.permute.xlu1 %5142  ;;  %v14644_v32 = vpop.permute.xlu0 %5144 }
 0x6cd   : > { %18658 = vst [vmem:[#allocation244_spill] sm:$0xff] %v14642_v42  ;;  %18659 = vst [vmem:[#allocation285_spill] sm:$0xff] %v14644_v32  ;;  %v18666_v32 = vld [vmem:[#allocation206_spill] sm:$0xff] }
 0x6ce   : > { %5898 = vrot.lane.b32.xlu1 %v18660_v30, %s8545_s22  ;;  %6082 = vrot.lane.b32.xlu0 %v18661_v57, %s8546_s19 }
 0x6d0   : > { %v14650_v56 = vpop.permute.xlu1 %5146  ;;  %v14652_v48 = vpop.permute.xlu0 %5148 }
 0x6d1   : > { %18662 = vst [vmem:[#allocation61_spill] sm:$0xff] %v14650_v56  ;;  %18663 = vst [vmem:[#allocation156_spill] sm:$0xff] %v14652_v48 }
 0x6d2   : > { %5322 = vrot.lane.b32.xlu1 %v18660_v30, %s8541_s18  ;;  %5522 = vrot.lane.b32.xlu0 %v18661_v57, %s8543_s9 }
 0x6d4   : > { %v14658_v27 = vpop.permute.xlu1 %5150  ;;  %v14660_v42 = vpop.permute.xlu0 %5152 }
 0x6d5   : > { %18664 = vst [vmem:[#allocation286_spill] sm:$0xff] %v14658_v27  ;;  %18665 = vst [vmem:[#allocation346_spill] sm:$0xff] %v14660_v42  ;;  %v18671_v42 = vld [vmem:[#allocation165_spill] sm:$0xff]  ;;  %v18675_v27 = vld [vmem:[#allocation403_spill] sm:$0xff] }
 0x6d6   : > { %6084 = vrot.lane.b32.xlu1 %v18666_v32, %s8546_s19  ;;  %5524 = vrot.lane.b32.xlu0 %v18666_v32, %s8543_s9 }
 0x6d8   : > { %v14666_v46 = vpop.permute.xlu1 %5154  ;;  %v14668_v56 = vpop.permute.xlu0 %5156 }
 0x6d9   : > { %18667 = vst [vmem:[#allocation58_spill] sm:$0xff] %v14666_v46  ;;  %18668 = vst [vmem:[#allocation62_spill] sm:$0xff] %v14668_v56  ;;  %v18674_v56 = vld [vmem:[#allocation124_spill] sm:$0xff] }
 0x6da   : > { %5714 = vrot.lane.b32.xlu1 %v13139_v21, %s8544_s13  ;;  %5716 = vrot.lane.b32.xlu0 %v13136_v43, %s8544_s13 }
 0x6dc   : > { %v14674_v57 = vpop.permute.xlu1 %5158  ;;  %v14676_v30 = vpop.permute.xlu0 %5160 }
 0x6dd   : > { %18669 = vst [vmem:[#allocation347_spill] sm:$0xff] %v14674_v57  ;;  %18670 = vst [vmem:[#allocation379_spill] sm:$0xff] %v14676_v30 }
 0x6de   : > { %5900 = vrot.lane.b32.xlu1 %v18671_v42, %s8545_s22  ;;  %5324 = vrot.lane.b32.xlu0 %v18671_v42, %s8541_s18 }
 0x6e0   : > { %v14682_v32 = vpop.permute.xlu1 %5162  ;;  %v14684_v46 = vpop.permute.xlu0 %5164 }
 0x6e1   : > { %18672 = vst [vmem:[#allocation64_spill] sm:$0xff] %v14682_v32  ;;  %18673 = vst [vmem:[#allocation245_spill] sm:$0xff] %v14684_v46  ;;  %v18680_v46 = vld [vmem:[#allocation21_spill] sm:$0xff] }
 0x6e2   : > { %5902 = vrot.lane.b32.xlu1 %v18674_v56, %s8545_s22  ;;  %6086 = vrot.lane.b32.xlu0 %v18675_v27, %s8546_s19 }
 0x6e4   : > { %v14690_v48 = vpop.permute.xlu1 %5166  ;;  %v14692_v57 = vpop.permute.xlu0 %5168 }
 0x6e5   : > { %18676 = vst [vmem:[#allocation380_spill] sm:$0xff] %v14690_v48  ;;  %18677 = vst [vmem:[#allocation65_spill] sm:$0xff] %v14692_v57 }
 0x6e6   : > { %5326 = vrot.lane.b32.xlu1 %v18674_v56, %s8541_s18  ;;  %5526 = vrot.lane.b32.xlu0 %v18675_v27, %s8543_s9 }
 0x6e8   : > { %v14698_v42 = vpop.permute.xlu1 %5170  ;;  %v14700_v32 = vpop.permute.xlu0 %5172 }
 0x6e9   : > { %18678 = vst [vmem:[#allocation246_spill] sm:$0xff] %v14698_v42  ;;  %18679 = vst [vmem:[#allocation287_spill] sm:$0xff] %v14700_v32  ;;  %v18685_v32 = vld [vmem:[#allocation166_spill] sm:$0xff] }
 0x6ea   : > { %6088 = vrot.lane.b32.xlu1 %v18680_v46, %s8546_s19  ;;  %5528 = vrot.lane.b32.xlu0 %v18680_v46, %s8543_s9  ;;  %v18689_v42 = vld [vmem:[#allocation418_spill] sm:$0xff] }
 0x6ec   : > { %v14706_v30 = vpop.permute.xlu1 %5174  ;;  %v14708_v48 = vpop.permute.xlu0 %5176 }
 0x6ed   : > { %18681 = vst [vmem:[#allocation66_spill] sm:$0xff] %v14706_v30  ;;  %18682 = vst [vmem:[#allocation157_spill] sm:$0xff] %v14708_v48  ;;  %v18688_v48 = vld [vmem:[#allocation102_spill] sm:$0xff] }
 0x6ee   : > { %5718 = vrot.lane.b32.xlu1 %v13164_v11, %s8544_s13  ;;  %5720 = vrot.lane.b32.xlu0 %v13161_v0, %s8544_s13  ;;  %v18704_v0 = vld [vmem:[#allocation208_spill] sm:$0xff] }
 0x6f0   : > { %v14714_v56 = vpop.permute.xlu1 %5178  ;;  %v14716_v27 = vpop.permute.xlu0 %5180 }
 0x6f1   : > { %18683 = vst [vmem:[#allocation288_spill] sm:$0xff] %v14714_v56  ;;  %18684 = vst [vmem:[#allocation348_spill] sm:$0xff] %v14716_v27 }
 0x6f2   : > { %5904 = vrot.lane.b32.xlu1 %v18685_v32, %s8545_s22  ;;  %5328 = vrot.lane.b32.xlu0 %v18685_v32, %s8541_s18 }
 0x6f4   : > { %v14722_v46 = vpop.permute.xlu1 %5182  ;;  %v14724_v30 = vpop.permute.xlu0 %5184 }
 0x6f5   : > { %18686 = vst [vmem:[#allocation63_spill] sm:$0xff] %v14722_v46  ;;  %18687 = vst [vmem:[#allocation67_spill] sm:$0xff] %v14724_v30  ;;  %v18694_v30 = vld [vmem:[#allocation325_spill] sm:$0xff] }
 0x6f6   : > { %5906 = vrot.lane.b32.xlu1 %v18688_v48, %s8545_s22  ;;  %6090 = vrot.lane.b32.xlu0 %v18689_v42, %s8546_s19 }
 0x6f8   : > { %v14730_v57 = vpop.permute.xlu1 %5186  ;;  %v14732_v56 = vpop.permute.xlu0 %5188 }
 0x6f9   : > { %18690 = vst [vmem:[#allocation349_spill] sm:$0xff] %v14730_v57  ;;  %18691 = vst [vmem:[#allocation381_spill] sm:$0xff] %v14732_v56 }
 0x6fa   : > { %5330 = vrot.lane.b32.xlu1 %v18688_v48, %s8541_s18  ;;  %5530 = vrot.lane.b32.xlu0 %v18689_v42, %s8543_s9 }
 0x6fc   : > { %v14738_v32 = vpop.permute.xlu1 %5190  ;;  %v14740_v46 = vpop.permute.xlu0 %5192 }
 0x6fd   : > { %18692 = vst [vmem:[#allocation69_spill] sm:$0xff] %v14738_v32  ;;  %18693 = vst [vmem:[#allocation247_spill] sm:$0xff] %v14740_v46  ;;  %v18699_v46 = vld [vmem:[#allocation103_spill] sm:$0xff]  ;;  %v18701_v32 = vld [vmem:[#allocation152_spill] sm:$0xff] }
 0x6fe   : > { %6092 = vrot.lane.b32.xlu1 %v18694_v30, %s8546_s19  ;;  %5532 = vrot.lane.b32.xlu0 %v18694_v30, %s8543_s9 }
 0x700   : > { %v14746_v27 = vpop.permute.xlu1 %5194  ;;  %v14748_v57 = vpop.permute.xlu0 %5196 }
 0x701   : > { %18695 = vst [vmem:[#allocation382_spill] sm:$0xff] %v14746_v27  ;;  %18696 = vst [vmem:[#allocation70_spill] sm:$0xff] %v14748_v57  ;;  %v18700_v57 = vld [vmem:[#allocation127_spill] sm:$0xff] }
 0x702   : > { %5722 = vrot.lane.b32.xlu1 %v13187_v35, %s8544_s13  ;;  %5724 = vrot.lane.b32.xlu0 %v13184_v3, %s8544_s13 }
 0x704   : > { %v14754_v48 = vpop.permute.xlu1 %5198  ;;  %v14756_v42 = vpop.permute.xlu0 %5200 }
 0x705   : > { %18697 = vst [vmem:[#allocation248_spill] sm:$0xff] %v14754_v48  ;;  %18698 = vst [vmem:[#allocation289_spill] sm:$0xff] %v14756_v42  ;;  %v8322_v48 = vunpack.i.l.bf16 %v18702_v40 }
 0x706   : > { %5908 = vrot.lane.b32.xlu1 %v18699_v46, %s8545_s22  ;;  %5332 = vrot.lane.b32.xlu0 %v18699_v46, %s8541_s18  ;;  %v8327_v46 = vunpack.i.l.bf16 %v14271_v39 }
 0x707   : > { %v6260_v58 = vsel %vm2919_vm4, %v18703_v9, %v8322_v48  ;;  %v8323_v48 = vunpack.i.h.bf16 %v18702_v40 }
 0x708   : > { %v5309_v30 = vpop.permute.xlu1 %5308  ;;  %v5311_v27 = vpop.permute.xlu0 %5310  ;;  %v14779_v41 = vsel %vm3049_vm6, %v6260_v58, %v8327_v46 }
 0x70a   : > { %5910 = vrot.lane.b32.xlu1 %v18700_v57, %s8545_s22  ;;  %6094 = vrot.lane.b32.xlu0 %v18701_v32, %s8546_s19 }
 0x70c   : > { %v5511_v56 = vpop.permute.xlu1 %5510  ;;  %v5513_v3 = vpop.permute.xlu0 %5512 }
 0x70e   : > { %5334 = vrot.lane.b32.xlu1 %v18700_v57, %s8541_s18  ;;  %5534 = vrot.lane.b32.xlu0 %v18701_v32, %s8543_s9  ;;  %v6384_v57 = vsel %vm3179_vm8, %v14779_v41, %v14564_v38 }
 0x70f   : > { %v6448_v28 = vsel %vm3309_vm10, %v6384_v57, %v5309_v30  ;;  %v18705_v57 = vld [vmem:[#allocation113_spill] sm:$0xff] }
 0x710   : > { %v5703_v42 = vpop.permute.xlu1 %5702  ;;  %v5705_v35 = vpop.permute.xlu0 %5704  ;;  %v6513_v9 = vsel %vm6512_vm13, %v6448_v28, %v5511_v56  ;;  %v6261_v28 = vsel %vm2919_vm4, %v18705_v57, %v8323_v48  ;;  %v18706_v56 = vld [vmem:[#allocation168_spill] sm:$0xff] }
 0x711   : > { %v6578_v58 = vsel %vm6577_vm14, %v6513_v9, %v5703_v42 }
 0x712   : > { %6096 = vrot.lane.b32.xlu1 %v18704_v0, %s8546_s19  ;;  %5536 = vrot.lane.b32.xlu0 %v18704_v0, %s8543_s9  ;;  %v8328_v0 = vunpack.i.h.bf16 %v14271_v39 }
 0x714   : > { %v5889_v32 = vpop.permute.xlu1 %5888  ;;  %v5313_v23 = vpop.permute.xlu0 %5312  ;;  %v14802_v39 = vsel %vm3049_vm6, %v6261_v28, %v8328_v0 }
 0x715   : > { %v6643_v38 = vsel %vm6642_vm15, %v6578_v58, %v5889_v32  ;;  %v6385_v9 = vsel %vm3179_vm8, %v14802_v39, %v14570_v12 }
 0x716   : > { %5726 = vrot.lane.b32.xlu1 %v13212_v1, %s8544_s13  ;;  %5728 = vrot.lane.b32.xlu0 %v13209_v24, %s8544_s13  ;;  %v6449_v58 = vsel %vm3309_vm10, %v6385_v9, %v5311_v27  ;;  %v18709_v9 = vld [vmem:[#allocation198_spill] sm:$0xff] }
 0x717   : > { %v6514_v48 = vsel %vm6512_vm13, %v6449_v58, %v5513_v3 }
 0x718   : > { %v5891_v46 = vpop.permute.xlu1 %5890  ;;  %v6075_v30 = vpop.permute.xlu0 %6074  ;;  %v6579_v0 = vsel %vm6577_vm14, %v6514_v48, %v5705_v35  ;;  %v6262_v35 = vsel %vm2919_vm4, %v13053_v10, %v18709_v9  ;;  %v18711_v9 = vld [vmem:[#allocation399_spill] sm:$0xff] }
 0x719   : > { %v6708_v40 = vsel %vm6707_vm2, %v6643_v38, %v6075_v30  ;;  %v18707_v38 = vld [vmem:[#allocation261_spill] sm:$0xff]  ;;  %v6324_v58 = vsel %vm3049_vm6, %v6262_v35, %v14273_v47 }
 0x71a   : > { %5912 = vrot.lane.b32.xlu1 %v18706_v56, %s8545_s22  ;;  %5336 = vrot.lane.b32.xlu0 %v18706_v56, %s8541_s18  ;;  %v18708_v30 = vld [vmem:[#allocation209_spill] sm:$0xff]  ;;  %v6386_v48 = vsel %vm3179_vm8, %v6324_v58, %v14572_v18 }
 0x71b   : > { %8148 = vmatprep.mubr.msk.f32.mxu1 %vm6788_vm3, %v6708_v40  ;;  %v6644_v40 = vsel %vm6642_vm15, %v6579_v0, %v5891_v46  ;;  %v18710_v46 = vld [vmem:[#allocation406_spill] sm:$0xff]  ;;  %v6450_v0 = vsel %vm3309_vm10, %v6386_v48, %v5313_v23  ;;  %v6263_v23 = vsel %vm2919_vm4, %v13050_v25, %v18711_v9 }
 0x71c   : > { %v5315_v42 = vpop.permute.xlu1 %5314  ;;  %v5515_v32 = vpop.permute.xlu0 %5514  ;;  %v6325_v35 = vsel %vm3049_vm6, %v6263_v23, %v14286_v52 }
 0x71e   : > { %5914 = vrot.lane.b32.xlu1 %v18707_v38, %s8545_s22  ;;  %6098 = vrot.lane.b32.xlu0 %v18708_v30, %s8546_s19 }
 0x720   : > { %v6077_v28 = vpop.permute.xlu1 %6076  ;;  %v5517_v56 = vpop.permute.xlu0 %5516 }
 0x721   : > { %v6709_v12 = vsel %vm6707_vm2, %v6644_v40, %v6077_v28  ;;  %v6515_v40 = vsel %vm6512_vm13, %v6450_v0, %v5515_v32  ;;  %v18712_v32 = vld [vmem:[#allocation302_spill] sm:$0xff] }
 0x722   : > { %5338 = vrot.lane.b32.xlu1 %v18707_v38, %s8541_s18  ;;  %5538 = vrot.lane.b32.xlu0 %v18708_v30, %s8543_s9  ;;  %v18714_v0 = vld [vmem:[#allocation22_spill] sm:$0xff] }
 0x723   : > { %8149 = vmatmul.mubr.msk.f32.vlgmr.msra.gmra.mxu1 %vm6788_vm3, %v6709_v12 }
 0x724   : > { %v5707_v3 = vpop.permute.xlu1 %5706  ;;  %v5709_v27 = vpop.permute.xlu0 %5708 }
 0x725   : > { %v6580_v10 = vsel %vm6577_vm14, %v6515_v40, %v5707_v3  ;;  %v6387_v3 = vsel %vm3179_vm8, %v6325_v35, %v14578_v55 }
 0x726   : > { %6100 = vrot.lane.b32.xlu1 %v18710_v46, %s8546_s19  ;;  %5540 = vrot.lane.b32.xlu0 %v18710_v46, %s8543_s9  ;;  %v6451_v48 = vsel %vm3309_vm10, %v6387_v3, %v5315_v42 }
 0x727   : > { %v6516_v25 = vsel %vm6512_vm13, %v6451_v48, %v5517_v56 }
 0x728   : > { %v5893_v38 = vpop.permute.xlu1 %5892  ;;  %v5317_v30 = vpop.permute.xlu0 %5316  ;;  %v6581_v40 = vsel %vm6577_vm14, %v6516_v25, %v5709_v27 }
 0x729   : > { %v6645_v28 = vsel %vm6642_vm15, %v6580_v10, %v5893_v38  ;;  %v18713_v38 = vld [vmem:[#allocation262_spill] sm:$0xff] }
 0x72a   : > { %5730 = vrot.lane.b32.xlu1 %v13235_v61, %s8544_s13  ;;  %5732 = vrot.lane.b32.xlu0 %v13232_v17, %s8544_s13 }
 0x72c   : > { %v5895_v47 = vpop.permute.xlu1 %5894  ;;  %v6079_v12 = vpop.permute.xlu0 %6078 }
 0x72d   : > { %v6710_v18 = vsel %vm6707_vm2, %v6645_v28, %v6079_v12  ;;  %v6646_v52 = vsel %vm6642_vm15, %v6581_v40, %v5895_v47  ;;  %v18715_v12 = vld [vmem:[#allocation415_spill] sm:$0xff]  ;;  %v18716_v47 = vld [vmem:[#allocation421_spill] sm:$0xff] }
 0x72e   : > { %5916 = vrot.lane.b32.xlu1 %v18712_v32, %s8545_s22  ;;  %5340 = vrot.lane.b32.xlu0 %v18712_v32, %s8541_s18  ;;  %v6264_v27 = vsel %vm2919_vm4, %v13071_v31, %v18715_v12  ;;  %v18720_v12 = vld [vmem:[#allocation326_spill] sm:$0xff] }
 0x72f   : > { %8151 = vmatprep.mubr.msk.f32.mxu1 %vm6788_vm3, %v6710_v18  ;;  %v6326_v18 = vsel %vm3049_vm6, %v6264_v27, %v14288_v62 }
 0x730   : > { %v5319_v46 = vpop.permute.xlu1 %5318  ;;  %v5519_v58 = vpop.permute.xlu0 %5518  ;;  %v6388_v9 = vsel %vm3179_vm8, %v6326_v18, %v14580_v20 }
 0x731   : > { %v6452_v35 = vsel %vm3309_vm10, %v6388_v9, %v5317_v30  ;;  %v18721_v9 = vld [vmem:[#allocation201_spill] sm:$0xff] }
 0x732   : > { %5918 = vrot.lane.b32.xlu1 %v18713_v38, %s8545_s22  ;;  %6102 = vrot.lane.b32.xlu0 %v18714_v0, %s8546_s19  ;;  %v6517_v3 = vsel %vm6512_vm13, %v6452_v35, %v5519_v58  ;;  %v18718_v58 = vld [vmem:[#allocation303_spill] sm:$0xff] }
 0x734   : > { %v6081_v10 = vpop.permute.xlu1 %6080  ;;  %v5521_v28 = vpop.permute.xlu0 %5520 }
 0x735   : > { %v6711_v55 = vsel %vm6707_vm2, %v6646_v52, %v6081_v10 }
 0x736   : > { %5342 = vrot.lane.b32.xlu1 %v18713_v38, %s8541_s18  ;;  %5542 = vrot.lane.b32.xlu0 %v18714_v0, %s8543_s9  ;;  %v18717_v38 = vld [vmem:[#allocation320_spill] sm:$0xff] }
 0x737   : > { %8152 = vmatmul.mubr.msk.f32.gmra.mxu1 %vm6788_vm3, %v6711_v55  ;;  %v6265_v30 = vsel %vm2919_vm4, %v13068_v51, %v18717_v38 }
 0x738   : > { %v5711_v42 = vpop.permute.xlu1 %5710  ;;  %v5713_v56 = vpop.permute.xlu0 %5712  ;;  %v6327_v0 = vsel %vm3049_vm6, %v6265_v30, %v14297_v8  ;;  %v18723_v30 = vld [vmem:[#allocation199_spill] sm:$0xff] }
 0x739   : > { %v6582_v31 = vsel %vm6577_vm14, %v6517_v3, %v5711_v42  ;;  %v6389_v40 = vsel %vm3179_vm8, %v6327_v0, %v14586_v16  ;;  %v18719_v42 = vld [vmem:[#allocation170_spill] sm:$0xff] }
 0x73a   : > { %6104 = vrot.lane.b32.xlu1 %v18716_v47, %s8546_s19  ;;  %5544 = vrot.lane.b32.xlu0 %v18716_v47, %s8543_s9  ;;  %v6453_v55 = vsel %vm3309_vm10, %v6389_v40, %v5319_v46 }
 0x73b   : > { %v6518_v51 = vsel %vm6512_vm13, %v6453_v55, %v5521_v28 }
 0x73c   : > { %v5897_v23 = vpop.permute.xlu1 %5896  ;;  %v5321_v32 = vpop.permute.xlu0 %5320  ;;  %v6583_v27 = vsel %vm6577_vm14, %v6518_v51, %v5713_v56  ;;  %v6266_v56 = vsel %vm2919_vm4, %v13098_v4, %v18721_v9 }
 0x73d   : > { %v6647_v48 = vsel %vm6642_vm15, %v6582_v31, %v5897_v23  ;;  %v18722_v23 = vld [vmem:[#allocation39_spill] sm:$0xff]  ;;  %v6328_v35 = vsel %vm3049_vm6, %v6266_v56, %v14299_v36 }
 0x73e   : > { %5734 = vrot.lane.b32.xlu1 %v13260_v14, %s8544_s13  ;;  %5736 = vrot.lane.b32.xlu0 %v13257_v49, %s8544_s13  ;;  %v6390_v3 = vsel %vm3179_vm8, %v6328_v35, %v14588_v19 }
 0x740   : > { %v5899_v62 = vpop.permute.xlu1 %5898  ;;  %v6083_v25 = vpop.permute.xlu0 %6082 }
 0x741   : > { %v6712_v20 = vsel %vm6707_vm2, %v6647_v48, %v6083_v25  ;;  %v6648_v8 = vsel %vm6642_vm15, %v6583_v27, %v5899_v62  ;;  %v6454_v62 = vsel %vm3309_vm10, %v6390_v3, %v5321_v32  ;;  %v6267_v32 = vsel %vm2919_vm4, %v13095_v2, %v18723_v30 }
 0x742   : > { %5920 = vrot.lane.b32.xlu1 %v18718_v58, %s8545_s22  ;;  %5344 = vrot.lane.b32.xlu0 %v18718_v58, %s8541_s18  ;;  %v18724_v58 = vld [vmem:[#allocation167_spill] sm:$0xff]  ;;  %v6329_v0 = vsel %vm3049_vm6, %v6267_v32, %v14305_v53 }
 0x743   : > { %8154 = vmatprep.mubr.msk.f32.mxu1 %vm6788_vm3, %v6712_v20  ;;  %v6391_v40 = vsel %vm3179_vm8, %v6329_v0, %v14594_v13  ;;  %v18732_v0 = vld [vmem:[#allocation212_spill] sm:$0xff] }
 0x744   : > { %v5323_v52 = vpop.permute.xlu1 %5322  ;;  %v5523_v10 = vpop.permute.xlu0 %5522 }
 0x745   : > { %v6519_v25 = vsel %vm6512_vm13, %v6454_v62, %v5523_v10  ;;  %v6455_v51 = vsel %vm3309_vm10, %v6391_v40, %v5323_v52 }
 0x746   : > { %5922 = vrot.lane.b32.xlu1 %v18719_v42, %s8545_s22  ;;  %6106 = vrot.lane.b32.xlu0 %v18720_v12, %s8546_s19 }
 0x748   : > { %v6085_v47 = vpop.permute.xlu1 %6084  ;;  %v5525_v18 = vpop.permute.xlu0 %5524 }
 0x749   : > { %v6713_v16 = vsel %vm6707_vm2, %v6648_v8, %v6085_v47  ;;  %v6520_v2 = vsel %vm6512_vm13, %v6455_v51, %v5525_v18 }
 0x74a   : > { %5346 = vrot.lane.b32.xlu1 %v18719_v42, %s8541_s18  ;;  %5546 = vrot.lane.b32.xlu0 %v18720_v12, %s8543_s9  ;;  %v18725_v42 = vld [vmem:[#allocation361_spill] sm:$0xff]  ;;  %v18726_v12 = vld [vmem:[#allocation211_spill] sm:$0xff] }
 0x74b   : > { %8155 = vmatmul.mubr.msk.f32.gmra.mxu1 %vm6788_vm3, %v6713_v16  ;;  %v18727_v16 = vld [vmem:[#allocation202_spill] sm:$0xff] }
 0x74c   : > { %v5715_v46 = vpop.permute.xlu1 %5714  ;;  %v5717_v28 = vpop.permute.xlu0 %5716 }
 0x74d   : > { %v6584_v4 = vsel %vm6577_vm14, %v6519_v25, %v5715_v46  ;;  %v6585_v27 = vsel %vm6577_vm14, %v6520_v2, %v5717_v28  ;;  %v6268_v46 = vsel %vm2919_vm4, %v13121_v33, %v18727_v16  ;;  %v18728_v28 = vld [vmem:[#allocation407_spill] sm:$0xff] }
 0x74e   : > { %6108 = vrot.lane.b32.xlu1 %v18722_v23, %s8546_s19  ;;  %5548 = vrot.lane.b32.xlu0 %v18722_v23, %s8543_s9  ;;  %v6330_v9 = vsel %vm3049_vm6, %v6268_v46, %v14307_v50 }
 0x74f   : > { %v6392_v56 = vsel %vm3179_vm8, %v6330_v9, %v14596_v60 }
 0x750   : > { %v5901_v31 = vpop.permute.xlu1 %5900  ;;  %v5325_v48 = vpop.permute.xlu0 %5324 }
 0x751   : > { %v6649_v20 = vsel %vm6642_vm15, %v6584_v4, %v5901_v31  ;;  %v6456_v3 = vsel %vm3309_vm10, %v6392_v56, %v5325_v48  ;;  %v18729_v4 = vld [vmem:[#allocation401_spill] sm:$0xff]  ;;  %v18736_v56 = vld [vmem:[#allocation171_spill] sm:$0xff] }
 0x752   : > { %5738 = vrot.lane.b32.xlu1 %v13283_v5, %s8544_s13  ;;  %5740 = vrot.lane.b32.xlu0 %v13280_v26, %s8544_s13  ;;  %v6269_v48 = vsel %vm2919_vm4, %v13118_v44, %v18729_v4 }
 0x754   : > { %v5903_v36 = vpop.permute.xlu1 %5902  ;;  %v6087_v38 = vpop.permute.xlu0 %6086 }
 0x755   : > { %v6714_v19 = vsel %vm6707_vm2, %v6649_v20, %v6087_v38  ;;  %v6650_v53 = vsel %vm6642_vm15, %v6585_v27, %v5903_v36  ;;  %v18730_v20 = vld [vmem:[#allocation362_spill] sm:$0xff]  ;;  %v6331_v36 = vsel %vm3049_vm6, %v6269_v48, %v14313_v29  ;;  %v18734_v27 = vld [vmem:[#allocation408_spill] sm:$0xff] }
 0x756   : > { %5924 = vrot.lane.b32.xlu1 %v18724_v58, %s8545_s22  ;;  %5348 = vrot.lane.b32.xlu0 %v18724_v58, %s8541_s18  ;;  %v6393_v38 = vsel %vm3179_vm8, %v6331_v36, %v14602_v15  ;;  %v18731_v58 = vld [vmem:[#allocation174_spill] sm:$0xff]  ;;  %v18739_v36 = vld [vmem:[#allocation323_spill] sm:$0xff] }
 0x757   : > { %8157 = vmatprep.mubr.msk.f32.mxu1 %vm6788_vm3, %v6714_v19 }
 0x758   : > { %v5327_v10 = vpop.permute.xlu1 %5326  ;;  %v5527_v55 = vpop.permute.xlu0 %5526 }
 0x759   : > { %v6521_v31 = vsel %vm6512_vm13, %v6456_v3, %v5527_v55  ;;  %v6457_v32 = vsel %vm3309_vm10, %v6393_v38, %v5327_v10  ;;  %v6272_v38 = vsel %vm2919_vm4, %v13164_v11, %v18739_v36  ;;  %v18742_v11 = vld [vmem:[#allocation304_spill] sm:$0xff] }
 0x75a   : > { %5926 = vrot.lane.b32.xlu1 %v18725_v42, %s8545_s22  ;;  %6110 = vrot.lane.b32.xlu0 %v18726_v12, %s8546_s19 }
 0x75c   : > { %v6089_v8 = vpop.permute.xlu1 %6088  ;;  %v5529_v47 = vpop.permute.xlu0 %5528 }
 0x75d   : > { %v6715_v13 = vsel %vm6707_vm2, %v6650_v53, %v6089_v8  ;;  %v6522_v44 = vsel %vm6512_vm13, %v6457_v32, %v5529_v47  ;;  %v18741_v32 = vld [vmem:[#allocation57_spill] sm:$0xff] }
 0x75e   : > { %5350 = vrot.lane.b32.xlu1 %v18725_v42, %s8541_s18  ;;  %5550 = vrot.lane.b32.xlu0 %v18726_v12, %s8543_s9  ;;  %v18733_v42 = vld [vmem:[#allocation19_spill] sm:$0xff] }
 0x75f   : > { %8158 = vmatmul.mubr.msk.f32.gmra.mxu1 %vm6788_vm3, %v6715_v13  ;;  %v6270_v12 = vsel %vm2919_vm4, %v13139_v21, %v18733_v42  ;;  %v18744_v42 = vld [vmem:[#allocation148_spill] sm:$0xff] }
 0x760   : > { %v5719_v52 = vpop.permute.xlu1 %5718  ;;  %v5721_v18 = vpop.permute.xlu0 %5720  ;;  %v6332_v53 = vsel %vm3049_vm6, %v6270_v12, %v14315_v7  ;;  %v18745_v12 = vld [vmem:[#allocation123_spill] sm:$0xff] }
 0x761   : > { %v6586_v33 = vsel %vm6577_vm14, %v6521_v31, %v5719_v52  ;;  %v6587_v40 = vsel %vm6577_vm14, %v6522_v44, %v5721_v18  ;;  %v6394_v8 = vsel %vm3179_vm8, %v6332_v53, %v14604_v54  ;;  %v18746_v53 = vld [vmem:[#allocation176_spill] sm:$0xff] }
 0x762   : > { %6112 = vrot.lane.b32.xlu1 %v18728_v28, %s8546_s19  ;;  %5552 = vrot.lane.b32.xlu0 %v18728_v28, %s8543_s9  ;;  %v18735_v28 = vld [vmem:[#allocation416_spill] sm:$0xff] }
 0x763   : > { %v6271_v9 = vsel %vm2919_vm4, %v13136_v43, %v18735_v28 }
 0x764   : > { %v5905_v23 = vpop.permute.xlu1 %5904  ;;  %v5329_v35 = vpop.permute.xlu0 %5328 }
 0x765   : > { %v6651_v62 = vsel %vm6642_vm15, %v6586_v33, %v5905_v23  ;;  %v6458_v52 = vsel %vm3309_vm10, %v6394_v8, %v5329_v35  ;;  %v6333_v23 = vsel %vm3049_vm6, %v6271_v9, %v14321_v6  ;;  %v18747_v8 = vld [vmem:[#allocation35_spill] sm:$0xff] }
 0x766   : > { %5742 = vrot.lane.b32.xlu1 %v13308_v63, %s8544_s13  ;;  %5744 = vrot.lane.b32.xlu0 %v13305_v34, %s8544_s13  ;;  %v6395_v35 = vsel %vm3179_vm8, %v6333_v23, %v14610_v37 }
 0x768   : > { %v5907_v50 = vpop.permute.xlu1 %5906  ;;  %v6091_v25 = vpop.permute.xlu0 %6090 }
 0x769   : > { %v6716_v60 = vsel %vm6707_vm2, %v6651_v62, %v6091_v25  ;;  %v6652_v29 = vsel %vm6642_vm15, %v6587_v40, %v5907_v50  ;;  %v18737_v62 = vld [vmem:[#allocation175_spill] sm:$0xff]  ;;  %v18738_v50 = vld [vmem:[#allocation24_spill] sm:$0xff] }
 0x76a   : > { %5928 = vrot.lane.b32.xlu1 %v18730_v20, %s8545_s22  ;;  %5352 = vrot.lane.b32.xlu0 %v18730_v20, %s8541_s18 }
 0x76b   : > { %8160 = vmatprep.mubr.msk.f32.mxu1 %vm6788_vm3, %v6716_v60 }
 0x76c   : > { %v5331_v19 = vpop.permute.xlu1 %5330  ;;  %v5531_v30 = vpop.permute.xlu0 %5530 }
 0x76d   : > { %v6523_v18 = vsel %vm6512_vm13, %v6458_v52, %v5531_v30  ;;  %v6459_v33 = vsel %vm3309_vm10, %v6395_v35, %v5331_v19  ;;  %v18740_v19 = vld [vmem:[#allocation422_spill] sm:$0xff]  ;;  %v6334_v30 = vsel %vm3049_vm6, %v6272_v38, %v14323_v45 }
 0x76e   : > { %5930 = vrot.lane.b32.xlu1 %v18731_v58, %s8545_s22  ;;  %6114 = vrot.lane.b32.xlu0 %v18732_v0, %s8546_s19  ;;  %v6396_v44 = vsel %vm3179_vm8, %v6334_v30, %v18741_v32  ;;  %v18756_v38 = vld [vmem:[#allocation266_spill] sm:$0xff] }
 0x770   : > { %v6093_v55 = vpop.permute.xlu1 %6092  ;;  %v5533_v51 = vpop.permute.xlu0 %5532 }
 0x771   : > { %v6717_v15 = vsel %vm6707_vm2, %v6652_v29, %v6093_v55  ;;  %v6524_v43 = vsel %vm6512_vm13, %v6459_v33, %v5533_v51  ;;  %v18743_v55 = vld [vmem:[#allocation264_spill] sm:$0xff] }
 0x772   : > { %5354 = vrot.lane.b32.xlu1 %v18731_v58, %s8541_s18  ;;  %5554 = vrot.lane.b32.xlu0 %v18732_v0, %s8543_s9  ;;  %v18751_v33 = vld [vmem:[#allocation204_spill] sm:$0xff] }
 0x773   : > { %8161 = vmatmul.mubr.msk.f32.gmra.mxu1 %vm6788_vm3, %v6717_v15 }
 0x774   : > { %v5723_v10 = vpop.permute.xlu1 %5722  ;;  %v5725_v2 = vpop.permute.xlu0 %5724 }
 0x775   : > { %v6588_v21 = vsel %vm6577_vm14, %v6523_v18, %v5723_v10  ;;  %v6589_v25 = vsel %vm6577_vm14, %v6524_v43, %v5725_v2  ;;  %v18752_v43 = vld [vmem:[#allocation126_spill] sm:$0xff] }
 0x776   : > { %6116 = vrot.lane.b32.xlu1 %v18734_v27, %s8546_s19  ;;  %5556 = vrot.lane.b32.xlu0 %v18734_v27, %s8543_s9  ;;  %v6273_v27 = vsel %vm2919_vm4, %v18745_v12, %v18744_v42 }
 0x778   : > { %v5909_v47 = vpop.permute.xlu1 %5908  ;;  %v5333_v13 = vpop.permute.xlu0 %5332 }
 0x779   : > { %v6653_v16 = vsel %vm6642_vm15, %v6588_v21, %v5909_v47  ;;  %v6460_v40 = vsel %vm3309_vm10, %v6396_v44, %v5333_v13  ;;  %v6335_v47 = vsel %vm3049_vm6, %v6273_v27, %v18747_v8  ;;  %v18748_v13 = vld [vmem:[#allocation345_spill] sm:$0xff] }
 0x77a   : > { %5746 = vrot.lane.b32.xlu1 %v13331_v59, %s8544_s13  ;;  %5748 = vrot.lane.b32.xlu0 %v13328_v22, %s8544_s13  ;;  %v6397_v52 = vsel %vm3179_vm8, %v6335_v47, %v18748_v13  ;;  %v18763_v47 = vld [vmem:[#allocation307_spill] sm:$0xff] }
 0x77b   : > { %v18764_v13 = vld [vmem:[#allocation215_spill] sm:$0xff] }
 0x77c   : > { %v5911_v7 = vpop.permute.xlu1 %5910  ;;  %v6095_v46 = vpop.permute.xlu0 %6094 }
 0x77d   : > { %v6718_v54 = vsel %vm6707_vm2, %v6653_v16, %v6095_v46  ;;  %v6654_v6 = vsel %vm6642_vm15, %v6589_v25, %v5911_v7  ;;  %v18749_v46 = vld [vmem:[#allocation306_spill] sm:$0xff]  ;;  %v18754_v25 = vld [vmem:[#allocation339_spill] sm:$0xff] }
 0x77e   : > { %5932 = vrot.lane.b32.xlu1 %v18736_v56, %s8545_s22  ;;  %5356 = vrot.lane.b32.xlu0 %v18736_v56, %s8541_s18 }
 0x77f   : > { %8163 = vmatprep.mubr.msk.f32.mxu1 %vm6788_vm3, %v6718_v54  ;;  %v18750_v54 = vld [vmem:[#allocation328_spill] sm:$0xff] }
 0x780   : > { %v5335_v3 = vpop.permute.xlu1 %5334  ;;  %v5535_v31 = vpop.permute.xlu0 %5534 }
 0x781   : > { %v6525_v29 = vsel %vm6512_vm13, %v6460_v40, %v5535_v31  ;;  %v6461_v16 = vsel %vm3309_vm10, %v6397_v52, %v5335_v3 }
 0x782   : > { %5934 = vrot.lane.b32.xlu1 %v18737_v62, %s8545_s22  ;;  %6118 = vrot.lane.b32.xlu0 %v18738_v50, %s8546_s19 }
 0x784   : > { %v6097_v60 = vpop.permute.xlu1 %6096  ;;  %v5537_v4 = vpop.permute.xlu0 %5536 }
 0x785   : > { %v6719_v37 = vsel %vm6707_vm2, %v6654_v6, %v6097_v60  ;;  %v6526_v7 = vsel %vm6512_vm13, %v6461_v16, %v5537_v4  ;;  %v18755_v60 = vld [vmem:[#allocation377_spill] sm:$0xff] }
 0x786   : > { %5358 = vrot.lane.b32.xlu1 %v18737_v62, %s8541_s18  ;;  %5558 = vrot.lane.b32.xlu0 %v18738_v50, %s8543_s9  ;;  %v6274_v62 = vsel %vm2919_vm4, %v18752_v43, %v18751_v33  ;;  %v18753_v50 = vld [vmem:[#allocation42_spill] sm:$0xff] }
 0x787   : > { %8164 = vmatmul.mubr.msk.f32.gmra.mxu1 %vm6788_vm3, %v6719_v37  ;;  %v6336_v6 = vsel %vm3049_vm6, %v6274_v62, %v18754_v25  ;;  %v18769_v62 = vld [vmem:[#allocation41_spill] sm:$0xff] }
 0x788   : > { %v5727_v48 = vpop.permute.xlu1 %5726  ;;  %v5729_v20 = vpop.permute.xlu0 %5728  ;;  %v6398_v4 = vsel %vm3179_vm8, %v6336_v6, %v18755_v60  ;;  %v18770_v25 = vld [vmem:[#allocation373_spill] sm:$0xff] }
 0x789   : > { %v6590_v51 = vsel %vm6577_vm14, %v6525_v29, %v5727_v48  ;;  %v6591_v28 = vsel %vm6577_vm14, %v6526_v7, %v5729_v20  ;;  %v18758_v29 = vld [vmem:[#allocation205_spill] sm:$0xff]  ;;  %v5299_v6 = vrot.slane %v18770_v25, 1 }
 0x78a   : > { %6120 = vrot.lane.b32.xlu1 %v18740_v19, %s8546_s19  ;;  %5560 = vrot.lane.b32.xlu0 %v18740_v19, %s8543_s9  ;;  %v18757_v19 = vld [vmem:[#allocation265_spill] sm:$0xff] }
 0x78c   : > { %v5913_v58 = vpop.permute.xlu1 %5912  ;;  %v5337_v0 = vpop.permute.xlu0 %5336 }
 0x78d   : > { %v6655_v15 = vsel %vm6642_vm15, %v6590_v51, %v5913_v58  ;;  %v6462_v20 = vsel %vm3309_vm10, %v6398_v4, %v5337_v0  ;;  %v18759_v51 = vld [vmem:[#allocation125_spill] sm:$0xff] }
 0x78e   : > { %5750 = vrot.lane.b32.xlu1 %v18742_v11, %s8544_s13  ;;  %5752 = vrot.lane.b32.xlu0 %v18743_v55, %s8544_s13  ;;  %v6275_v0 = vsel %vm2919_vm4, %v18759_v51, %v18758_v29  ;;  %v18772_v29 = vld [vmem:[#allocation20_spill] sm:$0xff] }
 0x78f   : > { %v6277_v51 = vsel %vm2919_vm4, %v13209_v24, %v18772_v29 }
 0x790   : > { %v5915_v45 = vpop.permute.xlu1 %5914  ;;  %v6099_v10 = vpop.permute.xlu0 %6098 }
 0x791   : > { %v6720_v2 = vsel %vm6707_vm2, %v6655_v15, %v6099_v10  ;;  %v6656_v9 = vsel %vm6642_vm15, %v6591_v28, %v5915_v45  ;;  %v18760_v15 = vld [vmem:[#allocation364_spill] sm:$0xff]  ;;  %v18761_v45 = vld [vmem:[#allocation410_spill] sm:$0xff] }
 0x792   : > { %5936 = vrot.lane.b32.xlu1 %v18746_v53, %s8545_s22  ;;  %5360 = vrot.lane.b32.xlu0 %v18746_v53, %s8541_s18  ;;  %v6337_v10 = vsel %vm3049_vm6, %v6275_v0, %v18761_v45  ;;  %v18765_v28 = vld [vmem:[#allocation404_spill] sm:$0xff] }
 0x793   : > { %8166 = vmatprep.mubr.msk.f32.mxu1 %vm6788_vm3, %v6720_v2  ;;  %v18762_v2 = vld [vmem:[#allocation59_spill] sm:$0xff] }
 0x794   : > { %v5339_v18 = vpop.permute.xlu1 %5338  ;;  %v5539_v21 = vpop.permute.xlu0 %5538  ;;  %v6399_v42 = vsel %vm3179_vm8, %v6337_v10, %v18762_v2  ;;  %v18774_v10 = vld [vmem:[#allocation378_spill] sm:$0xff] }
 0x795   : > { %v6527_v36 = vsel %vm6512_vm13, %v6462_v20, %v5539_v21  ;;  %v6463_v53 = vsel %vm3309_vm10, %v6399_v42, %v5339_v18 }
 0x796   : > { %5938 = vrot.lane.b32.xlu1 %v18749_v46, %s8545_s22  ;;  %6122 = vrot.lane.b32.xlu0 %v18750_v54, %s8546_s19 }
 0x798   : > { %v6101_v56 = vpop.permute.xlu1 %6100  ;;  %v5541_v23 = vpop.permute.xlu0 %5540 }
 0x799   : > { %v6721_v35 = vsel %vm6707_vm2, %v6656_v9, %v6101_v56  ;;  %v6528_v8 = vsel %vm6512_vm13, %v6463_v53, %v5541_v23  ;;  %v6276_v9 = vsel %vm2919_vm4, %v13212_v1, %v18765_v28  ;;  %v18766_v56 = vld [vmem:[#allocation218_spill] sm:$0xff]  ;;  %v18767_v23 = vld [vmem:[#allocation423_spill] sm:$0xff] }
 0x79a   : > { %5362 = vrot.lane.b32.xlu1 %v18749_v46, %s8541_s18  ;;  %5562 = vrot.lane.b32.xlu0 %v18750_v54, %s8543_s9 }
 0x79b   : > { %8167 = vmatmul.mubr.msk.f32.gmra.mxu1 %vm6788_vm3, %v6721_v35  ;;  %v6338_v35 = vsel %vm3049_vm6, %v6276_v9, %v18767_v23  ;;  %v18775_v9 = vld [vmem:[#allocation419_spill] sm:$0xff] }
 0x79c   : > { %v5731_v3 = vpop.permute.xlu1 %5730  ;;  %v5733_v31 = vpop.permute.xlu0 %5732 }
 0x79d   : > { %v6592_v30 = vsel %vm6577_vm14, %v6527_v36, %v5731_v3  ;;  %v6593_v52 = vsel %vm6577_vm14, %v6528_v8, %v5733_v31  ;;  %v18768_v3 = vld [vmem:[#allocation243_spill] sm:$0xff] }
 0x79e   : > { %6124 = vrot.lane.b32.xlu1 %v18753_v50, %s8546_s19  ;;  %5564 = vrot.lane.b32.xlu0 %v18753_v50, %s8543_s9  ;;  %v6400_v31 = vsel %vm3179_vm8, %v6338_v35, %v18768_v3  ;;  %v5298_v50 = vrot.slane %v18769_v62, 1  ;;  %v18777_v35 = vld [vmem:[#allocation424_spill] sm:$0xff] }
 0x7a0   : > { %v5917_v37 = vpop.permute.xlu1 %5916  ;;  %v5341_v48 = vpop.permute.xlu0 %5340 }
 0x7a1   : > { %v6657_v32 = vsel %vm6642_vm15, %v6592_v30, %v5917_v37  ;;  %v6464_v1 = vsel %vm3309_vm10, %v6400_v31, %v5341_v48  ;;  %v18771_v37 = vld [vmem:[#allocation426_spill] sm:$0xff]  ;;  %v5501_v48 = vrot.slane %v18770_v25, 2  ;;  %v18778_v31 = vld [vmem:[#allocation60_spill] sm:$0xff] }
 0x7a2   : > { %5754 = vrot.lane.b32.xlu1 %v18756_v38, %s8544_s13  ;;  %5756 = vrot.lane.b32.xlu0 %v18757_v19, %s8544_s13  ;;  %v4341_v20 = vsel %vm4097_vm12, %v18771_v37, 0.0 }
 0x7a3   : > { %v5301_v0 = vrot.slane %v4341_v20, 1 }
 0x7a4   : > { %v5919_v44 = vpop.permute.xlu1 %5918  ;;  %v6103_v58 = vpop.permute.xlu0 %6102 }
 0x7a5   : > { %v6722_v40 = vsel %vm6707_vm2, %v6657_v32, %v6103_v58  ;;  %v6658_v21 = vsel %vm6642_vm15, %v6593_v52, %v5919_v44  ;;  %v5500_v44 = vrot.slane %v18769_v62, 2  ;;  %v5302_v8 = vsel %vm944_vm0, %v5299_v6, %v5301_v0  ;;  %v18785_v0 = vld [vmem:[#allocation128_spill] sm:$0xff] }
 0x7a6   : > { %5940 = vrot.lane.b32.xlu1 %v18760_v15, %s8545_s22  ;;  %5364 = vrot.lane.b32.xlu0 %v18760_v15, %s8541_s18  ;;  %v18773_v15 = vld [vmem:[#allocation369_spill] sm:$0xff] }
 0x7a7   : > { %8169 = vmatprep.mubr.msk.f32.mxu1 %vm6788_vm3, %v6722_v40  ;;  %v5300_v40 = vsel %vm944_vm0, %v5298_v50, %v5299_v6  ;;  %v6339_v45 = vsel %vm3049_vm6, %v6277_v51, %v18773_v15  ;;  %v5502_v24 = vsel %vm1297_vm1, %v5500_v44, %v5501_v48  ;;  %v18786_v15 = vld [vmem:[#allocation26_spill] sm:$0xff] }
 0x7a8   : > { %v5343_v12 = vpop.permute.xlu1 %5342  ;;  %v5543_v27 = vpop.permute.xlu0 %5542  ;;  %v6401_v2 = vsel %vm3179_vm8, %v6339_v45, %v18774_v10 }
 0x7a9   : > { %v6529_v60 = vsel %vm6512_vm13, %v6464_v1, %v5543_v27  ;;  %v6465_v53 = vsel %vm3309_vm10, %v6401_v2, %v5343_v12  ;;  %v5503_v12 = vrot.slane %v4341_v20, 2  ;;  %v18780_v20 = vld [vmem:[#allocation324_spill] sm:$0xff] }
 0x7aa   : > { %5942 = vrot.lane.b32.xlu1 %v18763_v47, %s8545_s22  ;;  %6126 = vrot.lane.b32.xlu0 %v18764_v13, %s8546_s19 }
 0x7ab   : > { %v5504_v28 = vsel %vm1297_vm1, %v5501_v48, %v5503_v12  ;;  %v18784_v48 = vld [vmem:[#allocation244_spill] sm:$0xff] }
 0x7ac   : > { %v6105_v16 = vpop.permute.xlu1 %6104  ;;  %v5545_v7 = vpop.permute.xlu0 %5544 }
 0x7ad   : > { %v6723_v46 = vsel %vm6707_vm2, %v6658_v21, %v6105_v16 }
 0x7ae   : > { %5366 = vrot.lane.b32.xlu1 %v18763_v47, %s8541_s18  ;;  %5566 = vrot.lane.b32.xlu0 %v18764_v13, %s8543_s9  ;;  %v6530_v47 = vsel %vm6512_vm13, %v6465_v53, %v5545_v7 }
 0x7af   : > { %8170 = vmatmul.mubr.msk.f32.gmra.mxu1 %vm6788_vm3, %v6723_v46 }
 0x7b0   : > { %v5735_v18 = vpop.permute.xlu1 %5734  ;;  %v5737_v54 = vpop.permute.xlu0 %5736 }
 0x7b1   : > { %v6594_v4 = vsel %vm6577_vm14, %v6529_v60, %v5735_v18  ;;  %v6595_v13 = vsel %vm6577_vm14, %v6530_v47, %v5737_v54  ;;  %v6278_v54 = vsel %vm2919_vm4, %v13235_v61, %v18775_v9  ;;  %v18779_v61 = vld [vmem:[#allocation98_spill] sm:$0xff] }
 0x7b2   : > { %6128 = vrot.lane.b32.xlu1 %v18766_v56, %s8546_s19  ;;  %5568 = vrot.lane.b32.xlu0 %v18766_v56, %s8543_s9  ;;  %v18776_v56 = vld [vmem:[#allocation114_spill] sm:$0xff]  ;;  %v6340_v3 = vsel %vm3049_vm6, %v6278_v54, %v18777_v35 }
 0x7b3   : > { %v8329_v23 = vpack.i.bf16 %v18705_v57, %v18776_v56 }
 0x7b4   : > { %v5921_v33 = vpop.permute.xlu1 %5920  ;;  %v5345_v43 = vpop.permute.xlu0 %5344 }
 0x7b5   : > { %v6659_v36 = vsel %vm6642_vm15, %v6594_v4, %v5921_v33  ;;  %v6402_v33 = vsel %vm3179_vm8, %v6340_v3, %v18778_v31 }
 0x7b6   : > { %5758 = vrot.lane.b32.xlu1 %v18769_v62, %s8544_s13  ;;  %5760 = vrot.lane.b32.xlu0 %v18770_v25, %s8544_s13  ;;  %v6466_v25 = vsel %vm3309_vm10, %v6402_v33, %v5345_v43  ;;  %v18781_v43 = vld [vmem:[#allocation309_spill] sm:$0xff] }
 0x7b8   : > { %v5923_v30 = vpop.permute.xlu1 %5922  ;;  %v6107_v32 = vpop.permute.xlu0 %6106 }
 0x7b9   : > { %v6724_v58 = vsel %vm6707_vm2, %v6659_v36, %v6107_v32  ;;  %v6660_v52 = vsel %vm6642_vm15, %v6595_v13, %v5923_v30  ;;  %v6279_v36 = vsel %vm2919_vm4, %v13232_v17, %v18780_v20  ;;  %v18782_v30 = vld [vmem:[#allocation146_spill] sm:$0xff] }
 0x7ba   : > { %5944 = vrot.lane.b32.xlu1 %v5300_v40, %s8545_s22  ;;  %5368 = vrot.lane.b32.xlu0 %v5300_v40, %s8541_s18  ;;  %v18783_v32 = vld [vmem:[#allocation370_spill] sm:$0xff] }
 0x7bb   : > { %8172 = vmatprep.mubr.msk.f32.mxu1 %vm6788_vm3, %v6724_v58  ;;  %v6341_v44 = vsel %vm3049_vm6, %v6279_v36, %v18783_v32  ;;  %v18789_v13 = vld [vmem:[#allocation34_spill] sm:$0xff] }
 0x7bc   : > { %v5347_v42 = vpop.permute.xlu1 %5346  ;;  %v5547_v27 = vpop.permute.xlu0 %5546  ;;  %v6403_v58 = vsel %vm3179_vm8, %v6341_v44, %v18784_v48  ;;  %v18799_v48 = vld [vmem:[#allocation44_spill] sm:$0xff] }
 0x7bd   : > { %v6531_v6 = vsel %vm6512_vm13, %v6466_v25, %v5547_v27  ;;  %v6467_v51 = vsel %vm3309_vm10, %v6403_v58, %v5347_v42  ;;  %v18788_v42 = vld [vmem:[#allocation308_spill] sm:$0xff] }
 0x7be   : > { %5946 = vrot.lane.b32.xlu1 %v5302_v8, %s8545_s22  ;;  %6130 = vrot.lane.b32.xlu0 %v5502_v24, %s8546_s19 }
 0x7c0   : > { %v6109_v21 = vpop.permute.xlu1 %6108  ;;  %v5549_v16 = vpop.permute.xlu0 %5548 }
 0x7c1   : > { %v6725_v46 = vsel %vm6707_vm2, %v6660_v52, %v6109_v21  ;;  %v6532_v17 = vsel %vm6512_vm13, %v6467_v51, %v5549_v16  ;;  %v6280_v52 = vsel %vm2919_vm4, %v13260_v14, %v18789_v13  ;;  %v18790_v21 = vld [vmem:[#allocation268_spill] sm:$0xff]  ;;  %v18791_v16 = vld [vmem:[#allocation7_spill] sm:$0xff]  ;;  %v18794_v14 = vld [vmem:[#allocation178_spill] sm:$0xff] }
 0x7c2   : > { %5370 = vrot.lane.b32.xlu1 %v5302_v8, %s8541_s18  ;;  %5570 = vrot.lane.b32.xlu0 %v5502_v24, %s8543_s9  ;;  %v18787_v8 = vld [vmem:[#allocation270_spill] sm:$0xff]  ;;  %v18803_v13 = vld [vmem:[#allocation311_spill] sm:$0xff] }
 0x7c3   : > { %8173 = vmatmul.mubr.msk.f32.gmra.mxu1 %vm6788_vm3, %v6725_v46  ;;  %v18792_v46 = vld [vmem:[#allocation280_spill] sm:$0xff] }
 0x7c4   : > { %v5739_v7 = vpop.permute.xlu1 %5738  ;;  %v5741_v18 = vpop.permute.xlu0 %5740  ;;  %v6342_v12 = vsel %vm3049_vm6, %v6280_v52, %v18792_v46  ;;  %v18804_v52 = vld [vmem:[#allocation37_spill] sm:$0xff]  ;;  %v18805_v46 = vld [vmem:[#allocation156_spill] sm:$0xff] }
 0x7c5   : > { %v6596_v1 = vsel %vm6577_vm14, %v6531_v6, %v5739_v7  ;;  %v6597_v45 = vsel %vm6577_vm14, %v6532_v17, %v5741_v18  ;;  %v18793_v7 = vld [vmem:[#allocation285_spill] sm:$0xff] }
 0x7c6   : > { %6132 = vrot.lane.b32.xlu1 %v5504_v28, %s8546_s19  ;;  %5572 = vrot.lane.b32.xlu0 %v5504_v28, %s8543_s9  ;;  %v6404_v18 = vsel %vm3179_vm8, %v6342_v12, %v18793_v7  ;;  %v18796_v6 = vld [vmem:[#allocation137_spill] sm:$0xff] }
 0x7c8   : > { %v5925_v62 = vpop.permute.xlu1 %5924  ;;  %v5349_v50 = vpop.permute.xlu0 %5348 }
 0x7c9   : > { %v6661_v57 = vsel %vm6642_vm15, %v6596_v1, %v5925_v62  ;;  %v6468_v54 = vsel %vm3309_vm10, %v6404_v18, %v5349_v50  ;;  %v15262_v62 = vld [vmem:[%s16406_s4] ss:$0 sm:$0xff]  ;;  %v18795_v50 = vld [vmem:[#allocation207_spill] sm:$0xff] }
 0x7ca   : > { %8330 = vrot.lane.b32.xlu1 %v8329_v23, %s8544_s13  ;;  %8335 = vrot.lane.b32.xlu0 %v18779_v61, %s8545_s22  ;;  %v6281_v25 = vsel %vm2919_vm4, %v13257_v49, %v18795_v50  ;;  %v18797_v61 = vld [vmem:[#allocation340_spill] sm:$0xff]  ;;  %v18809_v50 = vld [vmem:[#allocation277_spill] sm:$0xff] }
 0x7cb   : > { %v6343_v1 = vsel %vm3049_vm6, %v6281_v25, %v18797_v61  ;;  %v18810_v61 = vld [vmem:[#allocation286_spill] sm:$0xff] }
 0x7cc   : > { %v5927_v60 = vpop.permute.xlu1 %5926  ;;  %v6111_v4 = vpop.permute.xlu0 %6110 }
 0x7cd   : > { %v6726_v37 = vsel %vm6707_vm2, %v6661_v57, %v6111_v4  ;;  %v6662_v10 = vsel %vm6642_vm15, %v6597_v45, %v5927_v60  ;;  %v18798_v60 = vld [vmem:[#allocation61_spill] sm:$0xff] }
 0x7ce   : > { %5372 = vrot.lane.b32.xlu1 %v18781_v43, %s8541_s18  ;;  %8340 = vrot.lane.b32.xlu0 %v18782_v30, %s8546_s19  ;;  %v6405_v4 = vsel %vm3179_vm8, %v6343_v1, %v18798_v60 }
 0x7cf   : > { %8175 = vmatprep.mubr.msk.f32.mxu1 %vm6788_vm3, %v6726_v37 }
 0x7d0   : > { %v5351_v40 = vpop.permute.xlu1 %5350  ;;  %v5551_v29 = vpop.permute.xlu0 %5550 }
 0x7d1   : > { %v6533_v56 = vsel %vm6512_vm13, %v6468_v54, %v5551_v29  ;;  %v6469_v49 = vsel %vm3309_vm10, %v6405_v4, %v5351_v40 }
 0x7d2   : > { %5374 = vrot.lane.b32.xlu1 %v18785_v0, %s8541_s18  ;;  %5574 = vrot.lane.b32.xlu0 %v18786_v15, %s8543_s9 }
 0x7d4   : > { %v6113_v2 = vpop.permute.xlu1 %6112  ;;  %v5553_v27 = vpop.permute.xlu0 %5552 }
 0x7d5   : > { %v6727_v53 = vsel %vm6707_vm2, %v6662_v10, %v6113_v2  ;;  %v6534_v30 = vsel %vm6512_vm13, %v6469_v49, %v5553_v27  ;;  %v18800_v10 = vld [vmem:[#allocation368_spill] sm:$0xff] }
 0x7d6   : > { %5576 = vrot.lane.b32.xlu1 %v18787_v8, %s8543_s9  ;;  %5766 = vrot.lane.b32.xlu0 %v18788_v42, %s8544_s13  ;;  %v18801_v8 = vld [vmem:[#allocation210_spill] sm:$0xff] }
 0x7d7   : > { %8176 = vmatmul.mubr.msk.f32.gmra.mxu1 %vm6788_vm3, %v6727_v53 }
 0x7d8   : > { %v5743_v24 = vpop.permute.xlu1 %5742  ;;  %v5745_v47 = vpop.permute.xlu0 %5744 }
 0x7d9   : > { %v6598_v23 = vsel %vm6577_vm14, %v6533_v56, %v5743_v24  ;;  %v6599_v58 = vsel %vm6577_vm14, %v6534_v30, %v5745_v47  ;;  %v6282_v24 = vsel %vm2919_vm4, %v13283_v5, %v18801_v8  ;;  %v18802_v47 = vld [vmem:[#allocation177_spill] sm:$0xff] }
 0x7da   : > { %5768 = vrot.lane.b32.xlu1 %v18790_v21, %s8544_s13  ;;  %5952 = vrot.lane.b32.xlu0 %v18791_v16, %s8545_s22  ;;  %v18806_v5 = vld [vmem:[#allocation129_spill] sm:$0xff] }
 0x7dc   : > { %v5929_v28 = vpop.permute.xlu1 %5928  ;;  %v5353_v9 = vpop.permute.xlu0 %5352 }
 0x7dd   : > { %v6663_v35 = vsel %vm6642_vm15, %v6598_v23, %v5929_v28 }
 0x7de   : > { %5376 = vrot.lane.b32.xlu1 %v18791_v16, %s8541_s18  ;;  %5954 = vrot.lane.b32.xlu0 %v18794_v14, %s8545_s22  ;;  %v6344_v16 = vsel %vm3049_vm6, %v6282_v24, %v18804_v52  ;;  %v18814_v24 = vld [vmem:[#allocation6_spill] sm:$0xff]  ;;  %v18816_v52 = vld [vmem:[#allocation153_spill] sm:$0xff] }
 0x7df   : > { %v6406_v12 = vsel %vm3179_vm8, %v6344_v16, %v18805_v46  ;;  %v18817_v16 = vld [vmem:[#allocation346_spill] sm:$0xff] }
 0x7e0   : > { %v5931_v3 = vpop.permute.xlu1 %5930  ;;  %v6115_v31 = vpop.permute.xlu0 %6114  ;;  %v6470_v28 = vsel %vm3309_vm10, %v6406_v12, %v5353_v9 }
 0x7e1   : > { %v6728_v33 = vsel %vm6707_vm2, %v6663_v35, %v6115_v31  ;;  %v6664_v29 = vsel %vm6642_vm15, %v6599_v58, %v5931_v3  ;;  %v18807_v31 = vld [vmem:[#allocation405_spill] sm:$0xff] }
 0x7e2   : > { %6138 = vrot.lane.b32.xlu1 %v18796_v6, %s8546_s19  ;;  %5378 = vrot.lane.b32.xlu0 %v18794_v14, %s8541_s18  ;;  %v6283_v9 = vsel %vm2919_vm4, %v13280_v26, %v18807_v31  ;;  %v18820_v31 = vld [vmem:[#allocation220_spill] sm:$0xff] }
 0x7e3   : > { %v8150_v57 = vpop.f32.mrf.mxu1  ;;  %8178 = vmatprep.mubr.msk.f32.mxu1 %vm6788_vm3, %v6728_v33  ;;  %v18808_v33 = vld [vmem:[#allocation331_spill] sm:$0xff]  ;;  %v6345_v25 = vsel %vm3049_vm6, %v6283_v9, %v18809_v50  ;;  %v18821_v9 = vld [vmem:[#allocation338_spill] sm:$0xff] }
 0x7e4   : > { %v7053_v37 = vadd.f32 %v8150_v57, %v15262_v62  ;;  %v5355_v20 = vpop.permute.xlu1 %5354  ;;  %v5555_v36 = vpop.permute.xlu0 %5554  ;;  %v6407_v1 = vsel %vm3179_vm8, %v6345_v25, %v18810_v61  ;;  %v18822_v25 = vld [vmem:[#allocation58_spill] sm:$0xff] }
 0x7e5   : > { %v7047_v43 = vpop.f32.mrf.mxu1  ;;  %v6535_v54 = vsel %vm6512_vm13, %v6470_v28, %v5555_v36  ;;  %v6471_v26 = vsel %vm3309_vm10, %v6407_v1, %v5355_v20 }
 0x7e6   : > { %v7367_v32 = vmax.f32 %v7053_v37, 0.0  ;;  %v7048_v44 = vadd.f32 %v15262_v62, %v7047_v43  ;;  %5578 = vrot.lane.b32.xlu1 %v18796_v6, %s8543_s9  ;;  %6140 = vrot.lane.b32.xlu0 %v18799_v48, %s8546_s19  ;;  %v18811_v43 = vld [vmem:[#allocation222_spill] sm:$0xff] }
 0x7e8   : > { %v7366_v51 = vmax.f32 %v7048_v44, 0.0  ;;  %v6117_v17 = vpop.permute.xlu1 %6116  ;;  %v5557_v0 = vpop.permute.xlu0 %5556  ;;  %v7431_v15 = vsel %vm3309_vm10, %v7367_v32, 0.0 }
 0x7e9   : > { %v6729_v40 = vsel %vm6707_vm2, %v6664_v29, %v6117_v17  ;;  %v6536_v36 = vsel %vm6512_vm13, %v6471_v26, %v5557_v0  ;;  %v18812_v17 = vld [vmem:[#allocation310_spill] sm:$0xff] }
 0x7ea   : > { %v7430_v45 = vsel %vm3309_vm10, %v7366_v51, 0.0  ;;  %5580 = vrot.lane.b32.xlu1 %v18799_v48, %s8543_s9  ;;  %5770 = vrot.lane.b32.xlu0 %v18800_v10, %s8544_s13 }
 0x7eb   : > { %v7432_v2 = vadd.f32 %v7431_v15, %v7430_v45  ;;  %8179 = vmatmul.mubr.msk.f32.gmra.mxu1 %vm6788_vm3, %v6729_v40 }
 0x7ec   : > { %v5747_v27 = vpop.permute.xlu1 %5746  ;;  %v5749_v53 = vpop.permute.xlu0 %5748 }
 0x7ed   : > { %v6600_v56 = vsel %vm6577_vm14, %v6535_v54, %v5747_v27  ;;  %v6601_v30 = vsel %vm6577_vm14, %v6536_v36, %v5749_v53  ;;  %v18813_v53 = vld [vmem:[#allocation23_spill] sm:$0xff] }
 0x7ee   : > { %5772 = vrot.lane.b32.xlu1 %v18802_v47, %s8544_s13  ;;  %5956 = vrot.lane.b32.xlu0 %v18803_v13, %s8545_s22  ;;  %v6284_v8 = vsel %vm2919_vm4, %v13308_v63, %v18813_v53  ;;  %v18818_v63 = vld [vmem:[#allocation180_spill] sm:$0xff]  ;;  %v18823_v36 = vld [vmem:[#allocation271_spill] sm:$0xff] }
 0x7f0   : > { %v5933_v7 = vpop.permute.xlu1 %5932  ;;  %v5357_v18 = vpop.permute.xlu0 %5356 }
 0x7f1   : > { %v6665_v14 = vsel %vm6642_vm15, %v6600_v56, %v5933_v7 }
 0x7f2   : > { %5380 = vrot.lane.b32.xlu1 %v18803_v13, %s8541_s18  ;;  %5958 = vrot.lane.b32.xlu0 %v18806_v5, %s8545_s22  ;;  %v18815_v13 = vld [vmem:[#allocation182_spill] sm:$0xff] }
 0x7f4   : > { %v5935_v23 = vpop.permute.xlu1 %5934  ;;  %v6119_v35 = vpop.permute.xlu0 %6118 }
 0x7f5   : > { %v6730_v3 = vsel %vm6707_vm2, %v6665_v14, %v6119_v35  ;;  %v6666_v32 = vsel %vm6642_vm15, %v6601_v30, %v5935_v23 }
 0x7f6   : > { %6142 = vrot.lane.b32.xlu1 %v18808_v33, %s8546_s19  ;;  %5382 = vrot.lane.b32.xlu0 %v18806_v5, %s8541_s18 }
 0x7f7   : > { %v8153_v6 = vpop.f32.mrf.mxu1  ;;  %8181 = vmatprep.mubr.msk.f32.mxu1 %vm6788_vm3, %v6730_v3  ;;  %v18819_v3 = vld [vmem:[#allocation420_spill] sm:$0xff] }
 0x7f8   : > { %v7063_v57 = vadd.f32 %v8153_v6, %v15262_v62  ;;  %v5359_v60 = vpop.permute.xlu1 %5358  ;;  %v5559_v4 = vpop.permute.xlu0 %5558 }
 0x7f9   : > { %v7057_v37 = vpop.f32.mrf.mxu1 }
 0x7fa   : > { %v7058_v49 = vadd.f32 %v15262_v62, %v7057_v37  ;;  %5582 = vrot.lane.b32.xlu1 %v18808_v33, %s8543_s9  ;;  %6144 = vrot.lane.b32.xlu0 %v18811_v43, %s8546_s19  ;;  %v7369_v44 = vmax.f32 %v7063_v57, 0.0 }
 0x7fc   : > { %v7368_v48 = vmax.f32 %v7058_v49, 0.0  ;;  %v6121_v58 = vpop.permute.xlu1 %6120  ;;  %v5561_v29 = vpop.permute.xlu0 %5560  ;;  %v7435_v40 = vsel %vm3309_vm10, %v7369_v44, 0.0 }
 0x7fd   : > { %v6731_v20 = vsel %vm6707_vm2, %v6666_v32, %v6121_v58 }
 0x7fe   : > { %v7433_v51 = vsel %vm3309_vm10, %v7368_v48, 0.0  ;;  %5584 = vrot.lane.b32.xlu1 %v18811_v43, %s8543_s9  ;;  %5774 = vrot.lane.b32.xlu0 %v18812_v17, %s8544_s13 }
 0x7ff   : > { %v7434_v0 = vadd.f32 %v7433_v51, %v7432_v2  ;;  %8182 = vmatmul.mubr.msk.f32.gmra.mxu1 %vm6788_vm3, %v6731_v20  ;;  %v6346_v2 = vsel %vm3049_vm6, %v6284_v8, %v18816_v52  ;;  %v18826_v8 = vld [vmem:[#allocation130_spill] sm:$0xff] }
 0x800   : > { %v5751_v15 = vpop.permute.xlu1 %5750  ;;  %v5753_v45 = vpop.permute.xlu0 %5752  ;;  %v6408_v46 = vsel %vm3179_vm8, %v6346_v2, %v18817_v16  ;;  %v18828_v52 = vld [vmem:[#allocation238_spill] sm:$0xff] }
 0x801   : > { %v7436_v27 = vadd.f32 %v7435_v40, %v7434_v0  ;;  %v6472_v28 = vsel %vm3309_vm10, %v6408_v46, %v5357_v18  ;;  %v6285_v18 = vsel %vm2919_vm4, %v13305_v34, %v18819_v3  ;;  %v18829_v2 = vld [vmem:[#allocation62_spill] sm:$0xff]  ;;  %v18832_v3 = vld [vmem:[#allocation29_spill] sm:$0xff] }
 0x802   : > { %5776 = vrot.lane.b32.xlu1 %v18814_v24, %s8544_s13  ;;  %5960 = vrot.lane.b32.xlu0 %v18815_v13, %s8545_s22  ;;  %v6537_v54 = vsel %vm6512_vm13, %v6472_v28, %v5559_v4  ;;  %v6347_v33 = vsel %vm3049_vm6, %v6285_v18, %v18821_v9  ;;  %v18833_v18 = vld [vmem:[#allocation341_spill] sm:$0xff] }
 0x803   : > { %v6602_v5 = vsel %vm6577_vm14, %v6537_v54, %v5751_v15  ;;  %v6409_v6 = vsel %vm3179_vm8, %v6347_v33, %v18822_v25  ;;  %v18834_v33 = vld [vmem:[#allocation347_spill] sm:$0xff] }
 0x804   : > { %v5937_v12 = vpop.permute.xlu1 %5936  ;;  %v5361_v7 = vpop.permute.xlu0 %5360  ;;  %v6473_v34 = vsel %vm3309_vm10, %v6409_v6, %v5359_v60 }
 0x805   : > { %v6667_v56 = vsel %vm6642_vm15, %v6602_v5, %v5937_v12  ;;  %v6538_v26 = vsel %vm6512_vm13, %v6473_v34, %v5561_v29  ;;  %v18824_v29 = vld [vmem:[#allocation181_spill] sm:$0xff] }
 0x806   : > { %5384 = vrot.lane.b32.xlu1 %v18815_v13, %s8541_s18  ;;  %5962 = vrot.lane.b32.xlu0 %v18818_v63, %s8545_s22  ;;  %v6603_v49 = vsel %vm6577_vm14, %v6538_v26, %v5753_v45  ;;  %v18825_v45 = vld [vmem:[#allocation327_spill] sm:$0xff]  ;;  %v18827_v13 = vld [vmem:[#allocation313_spill] sm:$0xff]  ;;  %v18835_v26 = vld [vmem:[#allocation332_spill] sm:$0xff] }
 0x807   : > { %v6286_v53 = vsel %vm2919_vm4, %v13331_v59, %v18825_v45  ;;  %v18830_v59 = vld [vmem:[#allocation131_spill] sm:$0xff] }
 0x808   : > { %v5939_v14 = vpop.permute.xlu1 %5938  ;;  %v6123_v23 = vpop.permute.xlu0 %6122 }
 0x809   : > { %v6732_v35 = vsel %vm6707_vm2, %v6667_v56, %v6123_v23  ;;  %v6668_v43 = vsel %vm6642_vm15, %v6603_v49, %v5939_v14 }
 0x80a   : > { %6146 = vrot.lane.b32.xlu1 %v18820_v31, %s8546_s19  ;;  %5386 = vrot.lane.b32.xlu0 %v18818_v63, %s8541_s18 }
 0x80b   : > { %v8156_v50 = vpop.f32.mrf.mxu1  ;;  %8184 = vmatprep.mubr.msk.f32.mxu1 %vm6788_vm3, %v6732_v35  ;;  %v18831_v35 = vld [vmem:[#allocation36_spill] sm:$0xff] }
 0x80c   : > { %v7073_v61 = vadd.f32 %v8156_v50, %v15262_v62  ;;  %v5363_v1 = vpop.permute.xlu1 %5362  ;;  %v5563_v57 = vpop.permute.xlu0 %5562 }
 0x80d   : > { %v7067_v4 = vpop.f32.mrf.mxu1 }
 0x80e   : > { %v7068_v37 = vadd.f32 %v15262_v62, %v7067_v4  ;;  %5586 = vrot.lane.b32.xlu1 %v18820_v31, %s8543_s9  ;;  %6148 = vrot.lane.b32.xlu0 %v18823_v36, %s8546_s19  ;;  %v7371_v30 = vmax.f32 %v7073_v61, 0.0 }
 0x810   : > { %v7370_v32 = vmax.f32 %v7068_v37, 0.0  ;;  %v6125_v44 = vpop.permute.xlu1 %6124  ;;  %v5565_v48 = vpop.permute.xlu0 %5564  ;;  %v7439_v51 = vsel %vm3309_vm10, %v7371_v30, 0.0 }
 0x811   : > { %v6733_v60 = vsel %vm6707_vm2, %v6668_v43, %v6125_v44 }
 0x812   : > { %v7437_v58 = vsel %vm3309_vm10, %v7370_v32, 0.0  ;;  %5588 = vrot.lane.b32.xlu1 %v18823_v36, %s8543_s9  ;;  %5778 = vrot.lane.b32.xlu0 %v18824_v29, %s8544_s13 }
 0x813   : > { %v7438_v20 = vadd.f32 %v7437_v58, %v7436_v27  ;;  %8185 = vmatmul.mubr.msk.f32.gmra.mxu1 %vm6788_vm3, %v6733_v60  ;;  %v6348_v27 = vsel %vm3049_vm6, %v6286_v53, %v18828_v52  ;;  %v18838_v53 = vld [vmem:[#allocation9_spill] sm:$0xff]  ;;  %v18840_v52 = vld [vmem:[#allocation371_spill] sm:$0xff] }
 0x814   : > { %v5755_v0 = vpop.permute.xlu1 %5754  ;;  %v5757_v40 = vpop.permute.xlu0 %5756  ;;  %v6410_v16 = vsel %vm3179_vm8, %v6348_v27, %v18829_v2  ;;  %v18841_v27 = vld [vmem:[#allocation379_spill] sm:$0xff] }
 0x815   : > { %v7440_v15 = vadd.f32 %v7439_v51, %v7438_v20  ;;  %v6474_v28 = vsel %vm3309_vm10, %v6410_v16, %v5361_v7  ;;  %v6287_v7 = vsel %vm2919_vm4, %v13328_v22, %v18831_v35  ;;  %v18844_v35 = vld [vmem:[#allocation143_spill] sm:$0xff] }
 0x816   : > { %5780 = vrot.lane.b32.xlu1 %v18826_v8, %s8544_s13  ;;  %5964 = vrot.lane.b32.xlu0 %v18827_v13, %s8545_s22  ;;  %v6539_v54 = vsel %vm6512_vm13, %v6474_v28, %v5563_v57  ;;  %v6349_v31 = vsel %vm3049_vm6, %v6287_v7, %v18833_v18  ;;  %v18845_v7 = vld [vmem:[#allocation372_spill] sm:$0xff] }
 0x817   : > { %v6604_v63 = vsel %vm6577_vm14, %v6539_v54, %v5755_v0  ;;  %v6411_v50 = vsel %vm3179_vm8, %v6349_v31, %v18834_v33  ;;  %v18846_v31 = vld [vmem:[#allocation64_spill] sm:$0xff] }
 0x818   : > { %v5941_v46 = vpop.permute.xlu1 %5940  ;;  %v5365_v12 = vpop.permute.xlu0 %5364  ;;  %v6475_v22 = vsel %vm3309_vm10, %v6411_v50, %v5363_v1 }
 0x819   : > { %v6669_v5 = vsel %vm6642_vm15, %v6604_v63, %v5941_v46  ;;  %v6540_v34 = vsel %vm6512_vm13, %v6475_v22, %v5565_v48  ;;  %v18836_v48 = vld [vmem:[#allocation312_spill] sm:$0xff] }
 0x81a   : > { %5388 = vrot.lane.b32.xlu1 %v18827_v13, %s8541_s18  ;;  %5966 = vrot.lane.b32.xlu0 %v18830_v59, %s8545_s22  ;;  %v6605_v37 = vsel %vm6577_vm14, %v6540_v34, %v5757_v40  ;;  %v18837_v40 = vld [vmem:[#allocation214_spill] sm:$0xff]  ;;  %v18847_v34 = vld [vmem:[#allocation223_spill] sm:$0xff] }
 0x81b   : > { %v6288_v45 = vsel %vm2919_vm4, %v18742_v11, %v18837_v40  ;;  %v18839_v13 = vld [vmem:[#allocation186_spill] sm:$0xff]  ;;  %v18842_v11 = vld [vmem:[#allocation184_spill] sm:$0xff] }
 0x81c   : > { %v5943_v56 = vpop.permute.xlu1 %5942  ;;  %v6127_v14 = vpop.permute.xlu0 %6126 }
 0x81d   : > { %v6734_v23 = vsel %vm6707_vm2, %v6669_v5, %v6127_v14  ;;  %v6670_v36 = vsel %vm6642_vm15, %v6605_v37, %v5943_v56 }
 0x81e   : > { %6150 = vrot.lane.b32.xlu1 %v18832_v3, %s8546_s19  ;;  %5390 = vrot.lane.b32.xlu0 %v18830_v59, %s8541_s18 }
 0x81f   : > { %v8159_v9 = vpop.f32.mrf.mxu1  ;;  %8187 = vmatprep.mubr.msk.f32.mxu1 %vm6788_vm3, %v6734_v23  ;;  %v18843_v23 = vld [vmem:[#allocation213_spill] sm:$0xff] }
 0x820   : > { %v7083_v25 = vadd.f32 %v8159_v9, %v15262_v62  ;;  %v5367_v6 = vpop.permute.xlu1 %5366  ;;  %v5567_v61 = vpop.permute.xlu0 %5566 }
 0x821   : > { %v7077_v57 = vpop.f32.mrf.mxu1 }
 0x822   : > { %v7078_v4 = vadd.f32 %v15262_v62, %v7077_v57  ;;  %5590 = vrot.lane.b32.xlu1 %v18832_v3, %s8543_s9  ;;  %6152 = vrot.lane.b32.xlu0 %v18835_v26, %s8546_s19  ;;  %v7373_v49 = vmax.f32 %v7083_v25, 0.0 }
 0x824   : > { %v7372_v43 = vmax.f32 %v7078_v4, 0.0  ;;  %v6129_v30 = vpop.permute.xlu1 %6128  ;;  %v5569_v32 = vpop.permute.xlu0 %5568  ;;  %v7443_v58 = vsel %vm3309_vm10, %v7373_v49, 0.0  ;;  %v18848_v49 = vld [vmem:[#allocation25_spill] sm:$0xff] }
 0x825   : > { %v6735_v1 = vsel %vm6707_vm2, %v6670_v36, %v6129_v30  ;;  %v18849_v30 = vld [vmem:[#allocation135_spill] sm:$0xff] }
 0x826   : > { %v7441_v44 = vsel %vm3309_vm10, %v7372_v43, 0.0  ;;  %5592 = vrot.lane.b32.xlu1 %v18835_v26, %s8543_s9  ;;  %5782 = vrot.lane.b32.xlu0 %v18836_v48, %s8544_s13  ;;  %v6290_v43 = vsel %vm2919_vm4, %v18756_v38, %v18848_v49  ;;  %v18852_v38 = vld [vmem:[#allocation185_spill] sm:$0xff]  ;;  %v18859_v49 = vld [vmem:[#allocation30_spill] sm:$0xff] }
 0x827   : > { %v7442_v60 = vadd.f32 %v7441_v44, %v7440_v15  ;;  %8188 = vmatmul.mubr.msk.f32.gmra.mxu1 %vm6788_vm3, %v6735_v1  ;;  %v6350_v15 = vsel %vm3049_vm6, %v6288_v45, %v18840_v52  ;;  %v18853_v45 = vld [vmem:[#allocation245_spill] sm:$0xff] }
 0x828   : > { %v5759_v20 = vpop.permute.xlu1 %5758  ;;  %v5761_v51 = vpop.permute.xlu0 %5760  ;;  %v6412_v2 = vsel %vm3179_vm8, %v6350_v15, %v18841_v27 }
 0x829   : > { %v7444_v0 = vadd.f32 %v7443_v58, %v7442_v60  ;;  %v6476_v28 = vsel %vm3309_vm10, %v6412_v2, %v5365_v12  ;;  %v6289_v12 = vsel %vm2919_vm4, %v18743_v55, %v18843_v23  ;;  %v18850_v60 = vld [vmem:[#allocation411_spill] sm:$0xff] }
 0x82a   : > { %5784 = vrot.lane.b32.xlu1 %v18838_v53, %s8544_s13  ;;  %5968 = vrot.lane.b32.xlu0 %v18839_v13, %s8545_s22  ;;  %v6541_v54 = vsel %vm6512_vm13, %v6476_v28, %v5567_v61  ;;  %v6351_v3 = vsel %vm3049_vm6, %v6289_v12, %v18845_v7  ;;  %v6352_v58 = vsel %vm3049_vm6, %v6290_v43, %v18850_v60  ;;  %v18860_v60 = vld [vmem:[#allocation314_spill] sm:$0xff] }
 0x82b   : > { %v6606_v59 = vsel %vm6577_vm14, %v6541_v54, %v5759_v20  ;;  %v6413_v9 = vsel %vm3179_vm8, %v6351_v3, %v18846_v31  ;;  %v18851_v20 = vld [vmem:[#allocation45_spill] sm:$0xff] }
 0x82c   : > { %v5945_v16 = vpop.permute.xlu1 %5944  ;;  %v5369_v46 = vpop.permute.xlu0 %5368  ;;  %v6477_v25 = vsel %vm3309_vm10, %v6413_v9, %v5367_v6  ;;  %v18857_v9 = vld [vmem:[#allocation133_spill] sm:$0xff] }
 0x82d   : > { %v6671_v63 = vsel %vm6642_vm15, %v6606_v59, %v5945_v16  ;;  %v6542_v22 = vsel %vm6512_vm13, %v6477_v25, %v5569_v32  ;;  %v6291_v32 = vsel %vm2919_vm4, %v18757_v19, %v18849_v30  ;;  %v6414_v19 = vsel %vm3179_vm8, %v6352_v58, %v18853_v45 }
 0x82e   : > { %5392 = vrot.lane.b32.xlu1 %v18839_v13, %s8541_s18  ;;  %5970 = vrot.lane.b32.xlu0 %v18842_v11, %s8545_s22  ;;  %v6607_v4 = vsel %vm6577_vm14, %v6542_v22, %v5761_v51  ;;  %v6353_v51 = vsel %vm3049_vm6, %v6291_v32, %v18851_v20  ;;  %v18854_v13 = vld [vmem:[#allocation380_spill] sm:$0xff]  ;;  %v6478_v27 = vsel %vm3309_vm10, %v6414_v19, %v5369_v46  ;;  %v18861_v20 = vld [vmem:[#allocation65_spill] sm:$0xff] }
 0x82f   : > { %v6415_v52 = vsel %vm3179_vm8, %v6353_v51, %v18854_v13  ;;  %v6416_v51 = vsel %vm3179_vm8, %v14779_v41, %v18861_v20  ;;  %v18870_v20 = vld [vmem:[#allocation189_spill] sm:$0xff] }
 0x830   : > { %v5947_v5 = vpop.permute.xlu1 %5946  ;;  %v6131_v56 = vpop.permute.xlu0 %6130 }
 0x831   : > { %v6736_v14 = vsel %vm6707_vm2, %v6671_v63, %v6131_v56  ;;  %v6672_v26 = vsel %vm6642_vm15, %v6607_v4, %v5947_v5  ;;  %v18855_v56 = vld [vmem:[#allocation132_spill] sm:$0xff] }
 0x832   : > { %6154 = vrot.lane.b32.xlu1 %v18844_v35, %s8546_s19  ;;  %5394 = vrot.lane.b32.xlu0 %v18842_v11, %s8541_s18 }
 0x833   : > { %v8162_v18 = vpop.f32.mrf.mxu1  ;;  %8190 = vmatprep.mubr.msk.f32.mxu1 %vm6788_vm3, %v6736_v14  ;;  %v18856_v14 = vld [vmem:[#allocation315_spill] sm:$0xff] }
 0x834   : > { %v5371_v33 = vpop.permute.xlu1 %5370  ;;  %v5571_v50 = vpop.permute.xlu0 %5570  ;;  %v7093_v55 = vadd.f32 %v8162_v18, %v15262_v62 }
 0x835   : > { %v7087_v61 = vpop.f32.mrf.mxu1  ;;  %v6479_v2 = vsel %vm3309_vm10, %v6415_v52, %v5371_v33  ;;  %v6543_v11 = vsel %vm6512_vm13, %v6478_v27, %v5571_v50  ;;  %v18862_v27 = vld [vmem:[#allocation11_spill] sm:$0xff] }
 0x836   : > { %v7088_v57 = vadd.f32 %v15262_v62, %v7087_v61  ;;  %5594 = vrot.lane.b32.xlu1 %v18844_v35, %s8543_s9  ;;  %6156 = vrot.lane.b32.xlu0 %v18847_v34, %s8546_s19  ;;  %v7375_v1 = vmax.f32 %v7093_v55, 0.0 }
 0x838   : > { %v7374_v37 = vmax.f32 %v7088_v57, 0.0  ;;  %v6133_v36 = vpop.permute.xlu1 %6132  ;;  %v5573_v6 = vpop.permute.xlu0 %5572  ;;  %v7447_v54 = vsel %vm3309_vm10, %v7375_v1, 0.0  ;;  %v18858_v57 = vld [vmem:[#allocation229_spill] sm:$0xff] }
 0x839   : > { %v6737_v44 = vsel %vm6707_vm2, %v6672_v26, %v6133_v36 }
 0x83a   : > { %v7445_v40 = vsel %vm3309_vm10, %v7374_v37, 0.0  ;;  %5596 = vrot.lane.b32.xlu1 %v18847_v34, %s8543_s9  ;;  %5786 = vrot.lane.b32.xlu0 %v18852_v38, %s8544_s13 }
 0x83b   : > { %v7446_v15 = vadd.f32 %v7445_v40, %v7444_v0  ;;  %8191 = vmatmul.mubr.msk.f32.gmra.mxu1 %vm6788_vm3, %v6737_v44  ;;  %v6544_v0 = vsel %vm6512_vm13, %v6479_v2, %v5573_v6  ;;  %v18863_v2 = vld [vmem:[#allocation190_spill] sm:$0xff] }
 0x83c   : > { %v15509_v16 = vpop.permute.xlu1 %8330  ;;  %v15511_v28 = vpop.permute.xlu0 %8335 }
 0x83d   : > { %v8333_v59 = vunpack.i.h.bf16 %v15509_v16  ;;  %v8332_v63 = vunpack.i.l.bf16 %v15509_v16  ;;  %v8338_v5 = vunpack.i.h.bf16 %v15511_v28  ;;  %v8337_v46 = vunpack.i.l.bf16 %v15511_v28  ;;  %v7583_v16 = vld [vmem:[%s16407_s5 + $0x38] sm:$0xff]  ;;  %v7581_v28 = vld [vmem:[%s16407_s5 + $0x28] sm:$0xff] }
 0x83e   : > { %5788 = vrot.lane.b32.xlu1 %v18855_v56, %s8544_s13  ;;  %5972 = vrot.lane.b32.xlu0 %v18856_v14, %s8545_s22  ;;  %v7448_v23 = vadd.f32 %v7447_v54, %v7446_v15 }
 0x83f   : > { %v6608_v12 = vsel %vm6577_vm14, %v6543_v11, %v8332_v63  ;;  %v6609_v35 = vsel %vm6577_vm14, %v6544_v0, %v8333_v59  ;;  %v18864_v11 = vld [vmem:[#allocation246_spill] sm:$0xff]  ;;  %8245 = vmatpush3.msra.mxu0 %v7583_v16 }
 0x840   : > { %v5373_v7 = vpop.permute.xlu1 %5372  ;;  %v15530_v3 = vpop.permute.xlu0 %8340  ;;  %v6673_v33 = vsel %vm6642_vm15, %v6608_v12, %v8337_v46  ;;  %v6674_v50 = vsel %vm6642_vm15, %v6609_v35, %v8338_v5  ;;  %v6417_v41 = vsel %vm3179_vm8, %v14802_v39, %v18864_v11 }
 0x841   : > { %v8343_v18 = vunpack.i.h.bf16 %v15530_v3  ;;  %v8342_v31 = vunpack.i.l.bf16 %v15530_v3  ;;  %v6480_v13 = vsel %vm3309_vm10, %v6416_v51, %v5373_v7  ;;  %v18871_v51 = vld [vmem:[#allocation412_spill] sm:$0xff] }
 0x842   : > { %5396 = vrot.lane.b32.xlu1 %v18856_v14, %s8541_s18  ;;  %5974 = vrot.lane.b32.xlu0 %v18857_v9, %s8545_s22 }
 0x843   : > { %v6738_v25 = vsel %vm6707_vm2, %v6673_v33, %v8342_v31  ;;  %v6739_v55 = vsel %vm6707_vm2, %v6674_v50, %v8343_v18 }
 0x844   : > { %v5375_v61 = vpop.permute.xlu1 %5374  ;;  %v5575_v22 = vpop.permute.xlu0 %5574  ;;  %8193 = vmatprep.mubr.msk.f32.mxu1 %vm6788_vm3, %v6738_v25 }
 0x845   : > { %8194 = vmatmul.mubr.msk.f32.gmra.mxu1 %vm6788_vm3, %v6739_v55  ;;  %v6545_v15 = vsel %vm6512_vm13, %v6480_v13, %v5575_v22  ;;  %v6481_v12 = vsel %vm3309_vm10, %v6417_v41, %v5375_v61  ;;  %v18866_v61 = vld [vmem:[#allocation233_spill] sm:$0xff]  ;;  %v18872_v13 = vld [vmem:[#allocation287_spill] sm:$0xff] }
 0x846   : > { %6158 = vrot.lane.b32.xlu1 %v18858_v57, %s8546_s19  ;;  %5398 = vrot.lane.b32.xlu0 %v18857_v9, %s8541_s18  ;;  %v18865_v9 = vld [vmem:[#allocation188_spill] sm:$0xff] }
 0x847   : > { %v8165_v34 = vpop.f32.mrf.mxu1 }
 0x848   : > { %v7103_v4 = vadd.f32 %v8165_v34, %v15262_v62  ;;  %v5577_v26 = vpop.permute.xlu1 %5576  ;;  %v5767_v37 = vpop.permute.xlu0 %5766 }
 0x849   : > { %v7097_v36 = vpop.f32.mrf.mxu1  ;;  %v6610_v54 = vsel %vm6577_vm14, %v6545_v15, %v5767_v37  ;;  %v6546_v7 = vsel %vm6512_vm13, %v6481_v12, %v5577_v26  ;;  %v18874_v12 = vld [vmem:[#allocation366_spill] sm:$0xff] }
 0x84a   : > { %v7098_v6 = vadd.f32 %v15262_v62, %v7097_v36  ;;  %5598 = vrot.lane.b32.xlu1 %v18858_v57, %s8543_s9  ;;  %6160 = vrot.lane.b32.xlu0 %v18859_v49, %s8546_s19  ;;  %v7377_v43 = vmax.f32 %v7103_v4, 0.0  ;;  %v18867_v36 = vld [vmem:[#allocation145_spill] sm:$0xff] }
 0x84c   : > { %v7376_v30 = vmax.f32 %v7098_v6, 0.0  ;;  %v5769_v32 = vpop.permute.xlu1 %5768  ;;  %v5953_v1 = vpop.permute.xlu0 %5952  ;;  %v7451_v40 = vsel %vm3309_vm10, %v7377_v43, 0.0 }
 0x84d   : > { %v6675_v0 = vsel %vm6642_vm15, %v6610_v54, %v5953_v1  ;;  %v6611_v33 = vsel %vm6577_vm14, %v6546_v7, %v5769_v32  ;;  %v18868_v32 = vld [vmem:[#allocation329_spill] sm:$0xff] }
 0x84e   : > { %v7449_v44 = vsel %vm3309_vm10, %v7376_v30, 0.0  ;;  %5600 = vrot.lane.b32.xlu1 %v18859_v49, %s8543_s9  ;;  %5790 = vrot.lane.b32.xlu0 %v18860_v60, %s8544_s13  ;;  %v18869_v1 = vld [vmem:[#allocation365_spill] sm:$0xff] }
 0x84f   : > { %v7450_v58 = vadd.f32 %v7449_v44, %v7448_v23  ;;  %v6292_v44 = vsel %vm2919_vm4, %v18869_v1, %v18868_v32 }
 0x850   : > { %v5377_v45 = vpop.permute.xlu1 %5376  ;;  %v5955_v19 = vpop.permute.xlu0 %5954 }
 0x851   : > { %v7452_v52 = vadd.f32 %v7451_v40, %v7450_v58  ;;  %v6676_v39 = vsel %vm6642_vm15, %v6611_v33, %v5955_v19  ;;  %v6354_v40 = vsel %vm3049_vm6, %v6292_v44, %v18871_v51  ;;  %v18877_v33 = vld [vmem:[#allocation425_spill] sm:$0xff] }
 0x852   : > { %5792 = vrot.lane.b32.xlu1 %v18862_v27, %s8544_s13  ;;  %5976 = vrot.lane.b32.xlu0 %v18863_v2, %s8545_s22  ;;  %v6418_v15 = vsel %vm3179_vm8, %v6354_v40, %v18872_v13 }
 0x853   : > { %v6482_v41 = vsel %vm3309_vm10, %v6418_v15, %v5377_v45 }
 0x854   : > { %v6139_v14 = vpop.permute.xlu1 %6138  ;;  %v5379_v23 = vpop.permute.xlu0 %5378 }
 0x855   : > { %v6740_v35 = vsel %vm6707_vm2, %v6675_v0, %v6139_v14  ;;  %v18873_v14 = vld [vmem:[#allocation40_spill] sm:$0xff] }
 0x856   : > { %5400 = vrot.lane.b32.xlu1 %v18863_v2, %s8541_s18  ;;  %5978 = vrot.lane.b32.xlu0 %v18865_v9, %s8545_s22 }
 0x857   : > { %8196 = vmatprep.mubr.msk.f32.mxu1 %vm6788_vm3, %v6740_v35  ;;  %v6293_v35 = vsel %vm2919_vm4, %v18874_v12, %v18873_v14  ;;  %v18882_v14 = vld [vmem:[#allocation234_spill] sm:$0xff] }
 0x858   : > { %v5579_v50 = vpop.permute.xlu1 %5578  ;;  %v6141_v25 = vpop.permute.xlu0 %6140  ;;  %v18883_v12 = vld [vmem:[#allocation46_spill] sm:$0xff] }
 0x859   : > { %v6741_v55 = vsel %vm6707_vm2, %v6676_v39, %v6141_v25  ;;  %v6547_v7 = vsel %vm6512_vm13, %v6482_v41, %v5579_v50  ;;  %v6355_v39 = vsel %vm3049_vm6, %v6293_v35, %v18877_v33 }
 0x85a   : > { %6162 = vrot.lane.b32.xlu1 %v18866_v61, %s8546_s19  ;;  %5402 = vrot.lane.b32.xlu0 %v18865_v9, %s8541_s18  ;;  %v18875_v9 = vld [vmem:[#allocation134_spill] sm:$0xff] }
 0x85b   : > { %v8168_v22 = vpop.f32.mrf.mxu1  ;;  %8197 = vmatmul.mubr.msk.f32.gmra.mxu1 %vm6788_vm3, %v6741_v55  ;;  %v18878_v55 = vld [vmem:[#allocation66_spill] sm:$0xff] }
 0x85c   : > { %v7113_v57 = vadd.f32 %v8168_v22, %v15262_v62  ;;  %v5581_v34 = vpop.permute.xlu1 %5580  ;;  %v5771_v4 = vpop.permute.xlu0 %5770  ;;  %v6419_v45 = vsel %vm3179_vm8, %v6355_v39, %v18878_v55 }
 0x85d   : > { %v7107_v26 = vpop.f32.mrf.mxu1  ;;  %v6612_v25 = vsel %vm6577_vm14, %v6547_v7, %v5771_v4  ;;  %v6483_v50 = vsel %vm3309_vm10, %v6419_v45, %v5379_v23 }
 0x85e   : > { %v7108_v37 = vadd.f32 %v15262_v62, %v7107_v26  ;;  %5602 = vrot.lane.b32.xlu1 %v18866_v61, %s8543_s9  ;;  %6164 = vrot.lane.b32.xlu0 %v18867_v36, %s8546_s19  ;;  %v7379_v6 = vmax.f32 %v7113_v57, 0.0 }
 0x860   : > { %v7378_v49 = vmax.f32 %v7108_v37, 0.0  ;;  %v5773_v43 = vpop.permute.xlu1 %5772  ;;  %v5957_v30 = vpop.permute.xlu0 %5956  ;;  %v7455_v2 = vsel %vm3309_vm10, %v7379_v6, 0.0  ;;  %v6548_v37 = vsel %vm6512_vm13, %v6483_v50, %v5581_v34  ;;  %v18880_v34 = vld [vmem:[#allocation274_spill] sm:$0xff] }
 0x861   : > { %v6677_v61 = vsel %vm6642_vm15, %v6612_v25, %v5957_v30  ;;  %v6613_v4 = vsel %vm6577_vm14, %v6548_v37, %v5773_v43  ;;  %v18879_v30 = vld [vmem:[#allocation136_spill] sm:$0xff] }
 0x862   : > { %v7453_v58 = vsel %vm3309_vm10, %v7378_v49, 0.0  ;;  %5604 = vrot.lane.b32.xlu1 %v18867_v36, %s8543_s9  ;;  %5794 = vrot.lane.b32.xlu0 %v18870_v20, %s8544_s13 }
 0x863   : > { %v7454_v19 = vadd.f32 %v7453_v58, %v7452_v52  ;;  %v18876_v52 = vld [vmem:[#allocation317_spill] sm:$0xff] }
 0x864   : > { %v5381_v54 = vpop.permute.xlu1 %5380  ;;  %v5959_v11 = vpop.permute.xlu0 %5958 }
 0x865   : > { %v7456_v0 = vadd.f32 %v7455_v2, %v7454_v19  ;;  %v6678_v36 = vsel %vm6642_vm15, %v6613_v4, %v5959_v11  ;;  %v18881_v2 = vld [vmem:[#allocation217_spill] sm:$0xff] }
 0x866   : > { %5796 = vrot.lane.b32.xlu1 %v18875_v9, %s8544_s13  ;;  %5980 = vrot.lane.b32.xlu0 %v18876_v52, %s8545_s22  ;;  %v6294_v11 = vsel %vm2919_vm4, %v18788_v42, %v18881_v2 }
 0x867   : > { %v6356_v35 = vsel %vm3049_vm6, %v6294_v11, %v18883_v12 }
 0x868   : > { %v6143_v22 = vpop.permute.xlu1 %6142  ;;  %v5383_v57 = vpop.permute.xlu0 %5382 }
 0x869   : > { %v6742_v26 = vsel %vm6707_vm2, %v6677_v61, %v6143_v22  ;;  %v18885_v61 = vld [vmem:[#allocation216_spill] sm:$0xff] }
 0x86a   : > { %5202 = vrot.lane.b32.xlu1 %v18875_v9, %s8539_s14  ;;  %5404 = vrot.lane.b32.xlu0 %v18876_v52, %s8541_s18  ;;  %v18884_v52 = vld [vmem:[#allocation157_spill] sm:$0xff]  ;;  %v6295_v22 = vsel %vm2919_vm4, %v18790_v21, %v18885_v61 }
 0x86b   : > { %8199 = vmatprep.mubr.msk.f32.mxu1 %vm6788_vm3, %v6742_v26  ;;  %v6420_v33 = vsel %vm3179_vm8, %v6356_v35, %v18884_v52  ;;  %v18886_v26 = vld [vmem:[#allocation316_spill] sm:$0xff] }
 0x86c   : > { %v5583_v6 = vpop.permute.xlu1 %5582  ;;  %v6145_v49 = vpop.permute.xlu0 %6144  ;;  %v6484_v42 = vsel %vm3309_vm10, %v6420_v33, %v5381_v54  ;;  %v18893_v33 = vld [vmem:[#allocation269_spill] sm:$0xff] }
 0x86d   : > { %v6743_v23 = vsel %vm6707_vm2, %v6678_v36, %v6145_v49  ;;  %v6549_v50 = vsel %vm6512_vm13, %v6484_v42, %v5583_v6  ;;  %v18888_v36 = vld [vmem:[#allocation288_spill] sm:$0xff]  ;;  %v18894_v42 = vld [vmem:[#allocation43_spill] sm:$0xff] }
 0x86e   : > { %5982 = vrot.lane.b32.xlu1 %v18879_v30, %s8545_s22  ;;  %6166 = vrot.lane.b32.xlu0 %v18880_v34, %s8546_s19 }
 0x86f   : > { %v8171_v32 = vpop.f32.mrf.mxu1  ;;  %8200 = vmatmul.mubr.msk.f32.gmra.mxu1 %vm6788_vm3, %v6743_v23 }
 0x870   : > { %v7123_v1 = vadd.f32 %v8171_v32, %v15262_v62  ;;  %v5585_v43 = vpop.permute.xlu1 %5584  ;;  %v5775_v44 = vpop.permute.xlu0 %5774  ;;  %v18889_v32 = vld [vmem:[#allocation13_spill] sm:$0xff] }
 0x871   : > { %v7117_v58 = vpop.f32.mrf.mxu1  ;;  %v6614_v4 = vsel %vm6577_vm14, %v6549_v50, %v5775_v44  ;;  %v18895_v50 = vld [vmem:[#allocation348_spill] sm:$0xff] }
 0x872   : > { %v7118_v51 = vadd.f32 %v15262_v62, %v7117_v58  ;;  %5406 = vrot.lane.b32.xlu1 %v18879_v30, %s8541_s18  ;;  %5606 = vrot.lane.b32.xlu0 %v18880_v34, %s8543_s9  ;;  %v7381_v40 = vmax.f32 %v7123_v1, 0.0  ;;  %v18890_v1 = vld [vmem:[#allocation194_spill] sm:$0xff] }
 0x874   : > { %v7380_v19 = vmax.f32 %v7118_v51, 0.0  ;;  %v5777_v13 = vpop.permute.xlu1 %5776  ;;  %v5961_v15 = vpop.permute.xlu0 %5960  ;;  %v7459_v39 = vsel %vm3309_vm10, %v7381_v40, 0.0 }
 0x875   : > { %v6679_v49 = vsel %vm6642_vm15, %v6614_v4, %v5961_v15 }
 0x876   : > { %v7457_v41 = vsel %vm3309_vm10, %v7380_v19, 0.0  ;;  %6168 = vrot.lane.b32.xlu1 %v18882_v14, %s8546_s19  ;;  %5608 = vrot.lane.b32.xlu0 %v18882_v14, %s8543_s9  ;;  %v18892_v14 = vld [vmem:[#allocation335_spill] sm:$0xff] }
 0x877   : > { %v7458_v7 = vadd.f32 %v7457_v41, %v7456_v0  ;;  %v18887_v0 = vld [vmem:[#allocation47_spill] sm:$0xff]  ;;  %v18891_v41 = vld [vmem:[#allocation192_spill] sm:$0xff] }
 0x878   : > { %v5385_v25 = vpop.permute.xlu1 %5384  ;;  %v5963_v55 = vpop.permute.xlu0 %5962  ;;  %v6357_v37 = vsel %vm3049_vm6, %v6295_v22, %v18887_v0 }
 0x879   : > { %v7460_v45 = vadd.f32 %v7459_v39, %v7458_v7  ;;  %v6421_v54 = vsel %vm3179_vm8, %v6357_v37, %v18888_v36  ;;  %v6296_v39 = vsel %vm2919_vm4, %v18800_v10, %v18893_v33 }
 0x87a   : > { %5798 = vrot.lane.b32.xlu1 %v18886_v26, %s8544_s13  ;;  %5204 = vrot.lane.b32.xlu0 %v18886_v26, %s8539_s14  ;;  %v6485_v6 = vsel %vm3309_vm10, %v6421_v54, %v5383_v57  ;;  %v6358_v61 = vsel %vm3049_vm6, %v6296_v39, %v18894_v42 }
 0x87b   : > { %v6550_v34 = vsel %vm6512_vm13, %v6485_v6, %v5585_v43  ;;  %v6422_v0 = vsel %vm3179_vm8, %v6358_v61, %v18895_v50  ;;  %v18903_v50 = vld [vmem:[#allocation330_spill] sm:$0xff] }
 0x87c   : > { %v6147_v23 = vpop.permute.xlu1 %6146  ;;  %v5387_v21 = vpop.permute.xlu0 %5386  ;;  %v6615_v44 = vsel %vm6577_vm14, %v6550_v34, %v5777_v13  ;;  %v6486_v10 = vsel %vm3309_vm10, %v6422_v0, %v5385_v25  ;;  %v6298_v0 = vsel %vm2919_vm4, %v18812_v17, %v18903_v50 }
 0x87d   : > { %v6744_v30 = vsel %vm6707_vm2, %v6679_v49, %v6147_v23  ;;  %v6680_v58 = vsel %vm6642_vm15, %v6615_v44, %v5963_v55  ;;  %v18896_v49 = vld [vmem:[#allocation27_spill] sm:$0xff] }
 0x87e   : > { %5800 = vrot.lane.b32.xlu1 %v18889_v32, %s8544_s13  ;;  %5984 = vrot.lane.b32.xlu0 %v18890_v1, %s8545_s22  ;;  %v6297_v23 = vsel %vm2919_vm4, %v18802_v47, %v18896_v49  ;;  %v18899_v44 = vld [vmem:[#allocation63_spill] sm:$0xff] }
 0x87f   : > { %8202 = vmatprep.mubr.msk.f32.mxu1 %vm6788_vm3, %v6744_v30  ;;  %v18897_v30 = vld [vmem:[#allocation236_spill] sm:$0xff]  ;;  %v18906_v49 = vld [vmem:[#allocation239_spill] sm:$0xff] }
 0x880   : > { %v5587_v51 = vpop.permute.xlu1 %5586  ;;  %v6149_v40 = vpop.permute.xlu0 %6148 }
 0x881   : > { %v6745_v57 = vsel %vm6707_vm2, %v6680_v58, %v6149_v40  ;;  %v6551_v6 = vsel %vm6512_vm13, %v6486_v10, %v5587_v51  ;;  %v18905_v10 = vld [vmem:[#allocation228_spill] sm:$0xff] }
 0x882   : > { %5206 = vrot.lane.b32.xlu1 %v18889_v32, %s8539_s14  ;;  %5408 = vrot.lane.b32.xlu0 %v18890_v1, %s8541_s18 }
 0x883   : > { %v8174_v43 = vpop.f32.mrf.mxu1  ;;  %8203 = vmatmul.mubr.msk.f32.gmra.mxu1 %vm6788_vm3, %v6745_v57 }
 0x884   : > { %v7133_v19 = vadd.f32 %v8174_v43, %v15262_v62  ;;  %v5589_v13 = vpop.permute.xlu1 %5588  ;;  %v5779_v15 = vpop.permute.xlu0 %5778 }
 0x885   : > { %v7127_v2 = vpop.f32.mrf.mxu1  ;;  %v6616_v1 = vsel %vm6577_vm14, %v6551_v6, %v5779_v15 }
 0x886   : > { %v7128_v11 = vadd.f32 %v15262_v62, %v7127_v2  ;;  %5986 = vrot.lane.b32.xlu1 %v18891_v41, %s8545_s22  ;;  %6170 = vrot.lane.b32.xlu0 %v18892_v14, %s8546_s19  ;;  %v7383_v12 = vmax.f32 %v7133_v19, 0.0  ;;  %v18900_v19 = vld [vmem:[#allocation193_spill] sm:$0xff] }
 0x888   : > { %v7382_v35 = vmax.f32 %v7128_v11, 0.0  ;;  %v5781_v7 = vpop.permute.xlu1 %5780  ;;  %v5965_v52 = vpop.permute.xlu0 %5964  ;;  %v7463_v37 = vsel %vm3309_vm10, %v7383_v12, 0.0 }
 0x889   : > { %v6681_v58 = vsel %vm6642_vm15, %v6616_v1, %v5965_v52 }
 0x88a   : > { %v7461_v55 = vsel %vm3309_vm10, %v7382_v35, 0.0  ;;  %5410 = vrot.lane.b32.xlu1 %v18891_v41, %s8541_s18  ;;  %5610 = vrot.lane.b32.xlu0 %v18892_v14, %s8543_s9  ;;  %v18901_v14 = vld [vmem:[#allocation138_spill] sm:$0xff] }
 0x88b   : > { %v7462_v22 = vadd.f32 %v7461_v55, %v7460_v45  ;;  %v18898_v45 = vld [vmem:[#allocation49_spill] sm:$0xff] }
 0x88c   : > { %v5389_v4 = vpop.permute.xlu1 %5388  ;;  %v5967_v36 = vpop.permute.xlu0 %5966  ;;  %v6359_v34 = vsel %vm3049_vm6, %v6297_v23, %v18898_v45  ;;  %v6360_v23 = vsel %vm3049_vm6, %v6298_v0, %v18906_v49 }
 0x88d   : > { %v7464_v54 = vadd.f32 %v7463_v37, %v7462_v22  ;;  %v6423_v25 = vsel %vm3179_vm8, %v6359_v34, %v18899_v44 }
 0x88e   : > { %6172 = vrot.lane.b32.xlu1 %v18897_v30, %s8546_s19  ;;  %5612 = vrot.lane.b32.xlu0 %v18897_v30, %s8543_s9  ;;  %v6487_v51 = vsel %vm3309_vm10, %v6423_v25, %v5387_v21  ;;  %v18907_v30 = vld [vmem:[#allocation67_spill] sm:$0xff] }
 0x88f   : > { %v6552_v43 = vsel %vm6512_vm13, %v6487_v51, %v5589_v13  ;;  %v18902_v13 = vld [vmem:[#allocation15_spill] sm:$0xff]  ;;  %v6424_v45 = vsel %vm3179_vm8, %v6360_v23, %v18907_v30 }
 0x890   : > { %v6151_v40 = vpop.permute.xlu1 %6150  ;;  %v5391_v47 = vpop.permute.xlu0 %5390  ;;  %v6617_v15 = vsel %vm6577_vm14, %v6552_v43, %v5781_v7  ;;  %v6488_v17 = vsel %vm3309_vm10, %v6424_v45, %v5389_v4  ;;  %v18915_v30 = vld [vmem:[#allocation219_spill] sm:$0xff] }
 0x891   : > { %v6746_v57 = vsel %vm6707_vm2, %v6681_v58, %v6151_v40  ;;  %v6682_v2 = vsel %vm6642_vm15, %v6617_v15, %v5967_v36  ;;  %v18904_v36 = vld [vmem:[#allocation108_spill] sm:$0xff]  ;;  %v18908_v58 = vld [vmem:[#allocation139_spill] sm:$0xff]  ;;  %v18910_v15 = vld [vmem:[#allocation349_spill] sm:$0xff]  ;;  %v6300_v45 = vsel %vm2919_vm4, %v18824_v29, %v18915_v30 }
 0x892   : > { %5802 = vrot.lane.b32.xlu1 %v18900_v19, %s8544_s13  ;;  %5208 = vrot.lane.b32.xlu0 %v18900_v19, %s8539_s14  ;;  %v6299_v40 = vsel %vm2919_vm4, %v18814_v24, %v18908_v58  ;;  %v18917_v58 = vld [vmem:[#allocation381_spill] sm:$0xff] }
 0x893   : > { %8205 = vmatprep.mubr.msk.f32.mxu1 %vm6788_vm3, %v6746_v57 }
 0x894   : > { %v5591_v11 = vpop.permute.xlu1 %5590  ;;  %v6153_v41 = vpop.permute.xlu0 %6152 }
 0x895   : > { %v6747_v21 = vsel %vm6707_vm2, %v6682_v2, %v6153_v41  ;;  %v6553_v51 = vsel %vm6512_vm13, %v6488_v17, %v5591_v11 }
 0x896   : > { %5804 = vrot.lane.b32.xlu1 %v18901_v14, %s8544_s13  ;;  %5988 = vrot.lane.b32.xlu0 %v18902_v13, %s8545_s22 }
 0x897   : > { %v8177_v12 = vpop.f32.mrf.mxu1  ;;  %8206 = vmatmul.mubr.msk.f32.gmra.mxu1 %vm6788_vm3, %v6747_v21 }
 0x898   : > { %v7143_v35 = vadd.f32 %v8177_v12, %v15262_v62  ;;  %v5593_v7 = vpop.permute.xlu1 %5592  ;;  %v5783_v52 = vpop.permute.xlu0 %5782  ;;  %v18911_v12 = vld [vmem:[#allocation275_spill] sm:$0xff] }
 0x899   : > { %v7137_v33 = vpop.f32.mrf.mxu1  ;;  %v6618_v43 = vsel %vm6577_vm14, %v6553_v51, %v5783_v52 }
 0x89a   : > { %v7138_v39 = vadd.f32 %v15262_v62, %v7137_v33  ;;  %5210 = vrot.lane.b32.xlu1 %v18901_v14, %s8539_s14  ;;  %5412 = vrot.lane.b32.xlu0 %v18902_v13, %s8541_s18  ;;  %v7385_v55 = vmax.f32 %v7143_v35, 0.0 }
 0x89c   : > { %v7384_v42 = vmax.f32 %v7138_v39, 0.0  ;;  %v5785_v61 = vpop.permute.xlu1 %5784  ;;  %v5969_v22 = vpop.permute.xlu0 %5968  ;;  %v7467_v34 = vsel %vm3309_vm10, %v7385_v55, 0.0  ;;  %v18912_v55 = vld [vmem:[#allocation398_spill] sm:$0xff] }
 0x89d   : > { %v6683_v2 = vsel %vm6642_vm15, %v6618_v43, %v5969_v22 }
 0x89e   : > { %v7465_v37 = vsel %vm3309_vm10, %v7384_v42, 0.0  ;;  %5990 = vrot.lane.b32.xlu1 %v18904_v36, %s8545_s22  ;;  %6174 = vrot.lane.b32.xlu0 %v18905_v10, %s8546_s19 }
 0x89f   : > { %v7466_v6 = vadd.f32 %v7465_v37, %v7464_v54  ;;  %v18909_v54 = vld [vmem:[#allocation374_spill] sm:$0xff] }
 0x8a0   : > { %v5393_v1 = vpop.permute.xlu1 %5392  ;;  %v5971_v44 = vpop.permute.xlu0 %5970  ;;  %v6361_v57 = vsel %vm3049_vm6, %v6299_v40, %v18909_v54  ;;  %v18913_v37 = vld [vmem:[#allocation14_spill] sm:$0xff] }
 0x8a1   : > { %v7468_v25 = vadd.f32 %v7467_v34, %v7466_v6  ;;  %v6425_v4 = vsel %vm3179_vm8, %v6361_v57, %v18910_v15  ;;  %v18918_v15 = vld [vmem:[#allocation221_spill] sm:$0xff] }
 0x8a2   : > { %5414 = vrot.lane.b32.xlu1 %v18904_v36, %s8541_s18  ;;  %5614 = vrot.lane.b32.xlu0 %v18905_v10, %s8543_s9  ;;  %v6489_v11 = vsel %vm3309_vm10, %v6425_v4, %v5391_v47  ;;  %v18914_v36 = vld [vmem:[#allocation195_spill] sm:$0xff]  ;;  %v6301_v4 = vsel %vm2919_vm4, %v18826_v8, %v18918_v15  ;;  %v18928_v15 = vld [vmem:[#allocation281_spill] sm:$0xff] }
 0x8a3   : > { %v6554_v13 = vsel %vm6512_vm13, %v6489_v11, %v5593_v7  ;;  %v18921_v11 = vld [vmem:[#allocation240_spill] sm:$0xff] }
 0x8a4   : > { %v6155_v41 = vpop.permute.xlu1 %6154  ;;  %v5395_v24 = vpop.permute.xlu0 %5394  ;;  %v6619_v35 = vsel %vm6577_vm14, %v6554_v13, %v5785_v61 }
 0x8a5   : > { %v6748_v21 = vsel %vm6707_vm2, %v6683_v2, %v6155_v41  ;;  %v6684_v52 = vsel %vm6642_vm15, %v6619_v35, %v5971_v44  ;;  %v18919_v41 = vld [vmem:[#allocation319_spill] sm:$0xff] }
 0x8a6   : > { %6176 = vrot.lane.b32.xlu1 %v18911_v12, %s8546_s19  ;;  %5616 = vrot.lane.b32.xlu0 %v18911_v12, %s8543_s9  ;;  %v18922_v12 = vld [vmem:[#allocation69_spill] sm:$0xff] }
 0x8a7   : > { %8208 = vmatprep.mubr.msk.f32.mxu1 %vm6788_vm3, %v6748_v21  ;;  %v6363_v21 = vsel %vm3049_vm6, %v6301_v4, %v18921_v11 }
 0x8a8   : > { %v5595_v33 = vpop.permute.xlu1 %5594  ;;  %v6157_v39 = vpop.permute.xlu0 %6156 }
 0x8a9   : > { %v6749_v47 = vsel %vm6707_vm2, %v6684_v52, %v6157_v39 }
 0x8aa   : > { %5806 = vrot.lane.b32.xlu1 %v18912_v55, %s8544_s13  ;;  %5212 = vrot.lane.b32.xlu0 %v18912_v55, %s8539_s14 }
 0x8ab   : > { %v8180_v7 = vpop.f32.mrf.mxu1  ;;  %8209 = vmatmul.mubr.msk.f32.gmra.mxu1 %vm6788_vm3, %v6749_v47 }
 0x8ac   : > { %v7153_v42 = vadd.f32 %v8180_v7, %v15262_v62  ;;  %v5597_v61 = vpop.permute.xlu1 %5596  ;;  %v5787_v22 = vpop.permute.xlu0 %5786 }
 0x8ad   : > { %v7147_v50 = vpop.f32.mrf.mxu1 }
 0x8ae   : > { %v7148_v0 = vadd.f32 %v15262_v62, %v7147_v50  ;;  %5808 = vrot.lane.b32.xlu1 %v18913_v37, %s8544_s13  ;;  %5992 = vrot.lane.b32.xlu0 %v18914_v36, %s8545_s22  ;;  %v7387_v10 = vmax.f32 %v7153_v42, 0.0  ;;  %v18916_v62 = vld [vmem:[#allocation50_spill] sm:$0xff] }
 0x8af   : > { %v6362_v44 = vsel %vm3049_vm6, %v6300_v45, %v18916_v62  ;;  %v18924_v45 = vld [vmem:[#allocation140_spill] sm:$0xff] }
 0x8b0   : > { %v7386_v49 = vmax.f32 %v7148_v0, 0.0  ;;  %v5789_v23 = vpop.permute.xlu1 %5788  ;;  %v5973_v6 = vpop.permute.xlu0 %5972  ;;  %v6426_v40 = vsel %vm3179_vm8, %v6362_v44, %v18917_v58  ;;  %v7471_v51 = vsel %vm3309_vm10, %v7387_v10, 0.0  ;;  %v18923_v0 = vld [vmem:[#allocation336_spill] sm:$0xff] }
 0x8b1   : > { %v6490_v29 = vsel %vm3309_vm10, %v6426_v40, %v5393_v1  ;;  %v6427_v1 = vsel %vm3179_vm8, %v6363_v21, %v18922_v12  ;;  %v18925_v58 = vld [vmem:[#allocation28_spill] sm:$0xff] }
 0x8b2   : > { %v7469_v34 = vsel %vm3309_vm10, %v7386_v49, 0.0  ;;  %5214 = vrot.lane.b32.xlu1 %v18913_v37, %s8539_s14  ;;  %5416 = vrot.lane.b32.xlu0 %v18914_v36, %s8541_s18  ;;  %v6555_v2 = vsel %vm6512_vm13, %v6490_v29, %v5595_v33  ;;  %v6491_v33 = vsel %vm3309_vm10, %v6427_v1, %v5395_v24  ;;  %v15851_v36 = vld [vmem:[%s16406_s4] ss:$0 sm:$0xff]  ;;  %v6302_v40 = vsel %vm2919_vm4, %v18836_v48, %v18925_v58  ;;  %v18927_v29 = vld [vmem:[#allocation196_spill] sm:$0xff] }
 0x8b3   : > { %v7470_v17 = vadd.f32 %v7469_v34, %v7468_v25  ;;  %v18920_v25 = vld [vmem:[#allocation33_spill] sm:$0xff]  ;;  %v6620_v13 = vsel %vm6577_vm14, %v6555_v2, %v5787_v22  ;;  %v6556_v47 = vsel %vm6512_vm13, %v6491_v33, %v5597_v61  ;;  %v6364_v4 = vsel %vm3049_vm6, %v6302_v40, %v18928_v15  ;;  %v18935_v40 = vld [vmem:[#allocation231_spill] sm:$0xff] }
 0x8b4   : > { %v5397_v54 = vpop.permute.xlu1 %5396  ;;  %v5975_v57 = vpop.permute.xlu0 %5974  ;;  %v6685_v35 = vsel %vm6642_vm15, %v6620_v13, %v5973_v6  ;;  %v6621_v7 = vsel %vm6577_vm14, %v6556_v47, %v5789_v23  ;;  %v18930_v1 = vld [vmem:[#allocation225_spill] sm:$0xff]  ;;  %v18932_v47 = vld [vmem:[#allocation382_spill] sm:$0xff] }
 0x8b5   : > { %v7472_v43 = vadd.f32 %v7471_v51, %v7470_v17  ;;  %v6686_v42 = vsel %vm6642_vm15, %v6621_v7, %v5975_v57  ;;  %v18926_v57 = vld [vmem:[#allocation110_spill] sm:$0xff] }
 0x8b6   : > { %5994 = vrot.lane.b32.xlu1 %v18919_v41, %s8545_s22  ;;  %6178 = vrot.lane.b32.xlu0 %v18920_v25, %s8546_s19 }
 0x8b8   : > { %v6159_v52 = vpop.permute.xlu1 %6158  ;;  %v5399_v8 = vpop.permute.xlu0 %5398 }
 0x8b9   : > { %v6750_v39 = vsel %vm6707_vm2, %v6685_v35, %v6159_v52  ;;  %v6303_v35 = vsel %vm2919_vm4, %v18838_v53, %v18930_v1 }
 0x8ba   : > { %5418 = vrot.lane.b32.xlu1 %v18919_v41, %s8541_s18  ;;  %5618 = vrot.lane.b32.xlu0 %v18920_v25, %s8543_s9  ;;  %v18929_v41 = vld [vmem:[#allocation247_spill] sm:$0xff] }
 0x8bb   : > { %8211 = vmatprep.mubr.msk.f32.mxu1 %vm6788_vm3, %v6750_v39  ;;  %v6428_v25 = vsel %vm3179_vm8, %v6364_v4, %v18929_v41 }
 0x8bc   : > { %v5599_v22 = vpop.permute.xlu1 %5598  ;;  %v6161_v50 = vpop.permute.xlu0 %6160  ;;  %v6492_v48 = vsel %vm3309_vm10, %v6428_v25, %v5397_v54 }
 0x8bd   : > { %v6751_v24 = vsel %vm6707_vm2, %v6686_v42, %v6161_v50  ;;  %v6557_v52 = vsel %vm6512_vm13, %v6492_v48, %v5599_v22 }
 0x8be   : > { %6180 = vrot.lane.b32.xlu1 %v18923_v0, %s8546_s19  ;;  %5620 = vrot.lane.b32.xlu0 %v18923_v0, %s8543_s9  ;;  %v18933_v0 = vld [vmem:[#allocation164_spill] sm:$0xff] }
 0x8bf   : > { %v8183_v61 = vpop.f32.mrf.mxu1  ;;  %8212 = vmatmul.mubr.msk.f32.gmra.mxu1 %vm6788_vm3, %v6751_v24 }
 0x8c0   : > { %v7163_v10 = vadd.f32 %v15851_v36, %v8183_v61  ;;  %v5601_v49 = vpop.permute.xlu1 %5600  ;;  %v5791_v23 = vpop.permute.xlu0 %5790  ;;  %v18934_v61 = vld [vmem:[#allocation151_spill] sm:$0xff] }
 0x8c1   : > { %v7157_v6 = vpop.f32.mrf.mxu1  ;;  %v6622_v39 = vsel %vm6577_vm14, %v6557_v52, %v5791_v23 }
 0x8c2   : > { %v7158_v30 = vadd.f32 %v15851_v36, %v7157_v6  ;;  %5810 = vrot.lane.b32.xlu1 %v18924_v45, %s8544_s13  ;;  %5216 = vrot.lane.b32.xlu0 %v18924_v45, %s8539_s14  ;;  %v7389_v34 = vmax.f32 %v7163_v10, 0.0 }
 0x8c4   : > { %v7388_v62 = vmax.f32 %v7158_v30, 0.0  ;;  %v5793_v44 = vpop.permute.xlu1 %5792  ;;  %v5977_v17 = vpop.permute.xlu0 %5976  ;;  %v7475_v11 = vsel %vm3309_vm10, %v7389_v34, 0.0 }
 0x8c5   : > { %v6687_v7 = vsel %vm6642_vm15, %v6622_v39, %v5977_v17 }
 0x8c6   : > { %v7473_v51 = vsel %vm3309_vm10, %v7388_v62, 0.0  ;;  %5812 = vrot.lane.b32.xlu1 %v18926_v57, %s8544_s13  ;;  %5996 = vrot.lane.b32.xlu0 %v18927_v29, %s8545_s22 }
 0x8c7   : > { %v7474_v2 = vadd.f32 %v7473_v51, %v7472_v43  ;;  %v18931_v43 = vld [vmem:[#allocation51_spill] sm:$0xff] }
 0x8c8   : > { %v5401_v21 = vpop.permute.xlu1 %5400  ;;  %v5979_v13 = vpop.permute.xlu0 %5978  ;;  %v6365_v33 = vsel %vm3049_vm6, %v6303_v35, %v18931_v43  ;;  %v18939_v35 = vld [vmem:[#allocation70_spill] sm:$0xff] }
 0x8c9   : > { %v7476_v12 = vadd.f32 %v7475_v11, %v7474_v2  ;;  %v6429_v54 = vsel %vm3179_vm8, %v6365_v33, %v18932_v47  ;;  %v18936_v2 = vld [vmem:[#allocation141_spill] sm:$0xff] }
 0x8ca   : > { %5218 = vrot.lane.b32.xlu1 %v18926_v57, %s8539_s14  ;;  %5420 = vrot.lane.b32.xlu0 %v18927_v29, %s8541_s18  ;;  %v6493_v22 = vsel %vm3309_vm10, %v6429_v54, %v5399_v8  ;;  %v6304_v41 = vsel %vm2919_vm4, %v18852_v38, %v18936_v2  ;;  %v18937_v11 = vld [vmem:[#allocation197_spill] sm:$0xff] }
 0x8cb   : > { %v6558_v24 = vsel %vm6512_vm13, %v6493_v22, %v5601_v49 }
 0x8cc   : > { %v6163_v42 = vpop.permute.xlu1 %6162  ;;  %v5403_v53 = vpop.permute.xlu0 %5402  ;;  %v6623_v10 = vsel %vm6577_vm14, %v6558_v24, %v5793_v44 }
 0x8cd   : > { %v6752_v50 = vsel %vm6707_vm2, %v6687_v7, %v6163_v42  ;;  %v6688_v23 = vsel %vm6642_vm15, %v6623_v10, %v5979_v13  ;;  %v18938_v13 = vld [vmem:[#allocation154_spill] sm:$0xff]  ;;  %v18941_v42 = vld [vmem:[#allocation17_spill] sm:$0xff] }
 0x8ce   : > { %5998 = vrot.lane.b32.xlu1 %v18933_v0, %s8545_s22  ;;  %6182 = vrot.lane.b32.xlu0 %v18934_v61, %s8546_s19  ;;  %v6366_v48 = vsel %vm3049_vm6, %v6304_v41, %v18938_v13  ;;  %v18940_v7 = vld [vmem:[#allocation142_spill] sm:$0xff] }
 0x8cf   : > { %8214 = vmatprep.mubr.msk.f32.mxu1 %vm6788_vm3, %v6752_v50  ;;  %v6430_v52 = vsel %vm3179_vm8, %v6366_v48, %v18939_v35  ;;  %v18943_v10 = vld [vmem:[#allocation282_spill] sm:$0xff]  ;;  %v18947_v35 = vld [vmem:[#allocation279_spill] sm:$0xff] }
 0x8d0   : > { %v5603_v6 = vpop.permute.xlu1 %5602  ;;  %v6165_v30 = vpop.permute.xlu0 %6164  ;;  %v6494_v39 = vsel %vm3309_vm10, %v6430_v52, %v5401_v21 }
 0x8d1   : > { %v6753_v8 = vsel %vm6707_vm2, %v6688_v23, %v6165_v30  ;;  %v6559_v54 = vsel %vm6512_vm13, %v6494_v39, %v5603_v6  ;;  %v18944_v6 = vld [vmem:[#allocation248_spill] sm:$0xff] }
 0x8d2   : > { %5422 = vrot.lane.b32.xlu1 %v18933_v0, %s8541_s18  ;;  %5622 = vrot.lane.b32.xlu0 %v18934_v61, %s8543_s9  ;;  %v18942_v61 = vld [vmem:[#allocation272_spill] sm:$0xff] }
 0x8d3   : > { %v8186_v49 = vpop.f32.mrf.mxu1  ;;  %8215 = vmatmul.mubr.msk.f32.gmra.mxu1 %vm6788_vm3, %v6753_v8  ;;  %v6305_v21 = vsel %vm2919_vm4, %v18855_v56, %v18942_v61 }
 0x8d4   : > { %v7173_v34 = vadd.f32 %v15851_v36, %v8186_v49  ;;  %v5605_v62 = vpop.permute.xlu1 %5604  ;;  %v5795_v44 = vpop.permute.xlu0 %5794  ;;  %v6367_v23 = vsel %vm3049_vm6, %v6305_v21, %v18943_v10 }
 0x8d5   : > { %v7167_v17 = vpop.f32.mrf.mxu1  ;;  %v6431_v30 = vsel %vm3179_vm8, %v6367_v23, %v18944_v6 }
 0x8d6   : > { %v7168_v58 = vadd.f32 %v15851_v36, %v7167_v17  ;;  %6184 = vrot.lane.b32.xlu1 %v18935_v40, %s8546_s19  ;;  %5624 = vrot.lane.b32.xlu0 %v18935_v40, %s8543_s9  ;;  %v7391_v51 = vmax.f32 %v7173_v34, 0.0  ;;  %v6495_v34 = vsel %vm3309_vm10, %v6431_v30, %v5403_v53  ;;  %v18946_v17 = vld [vmem:[#allocation278_spill] sm:$0xff]  ;;  %v18952_v30 = vld [vmem:[#allocation400_spill] sm:$0xff] }
 0x8d7   : > { %v6560_v56 = vsel %vm6512_vm13, %v6495_v34, %v5605_v62  ;;  %v18953_v34 = vld [vmem:[#allocation321_spill] sm:$0xff] }
 0x8d8   : > { %v7390_v29 = vmax.f32 %v7168_v58, 0.0  ;;  %v5797_v15 = vpop.permute.xlu1 %5796  ;;  %v5981_v4 = vpop.permute.xlu0 %5980  ;;  %v7479_v43 = vsel %vm3309_vm10, %v7391_v51, 0.0 }
 0x8d9   : > { %v6625_v58 = vsel %vm6577_vm14, %v6560_v56, %v5797_v15 }
 0x8da   : > { %v7477_v25 = vsel %vm3309_vm10, %v7390_v29, 0.0  ;;  %5814 = vrot.lane.b32.xlu1 %v18937_v11, %s8544_s13  ;;  %5220 = vrot.lane.b32.xlu0 %v18937_v11, %s8539_s14 }
 0x8db   : > { %v7478_v1 = vadd.f32 %v7477_v25, %v7476_v12  ;;  %v6624_v12 = vsel %vm6577_vm14, %v6559_v54, %v5795_v44  ;;  %v18945_v44 = vld [vmem:[#allocation16_spill] sm:$0xff] }
 0x8dc   : > { %v15922_v33 = vpop.permute.xlu1 %5202  ;;  %v5405_v38 = vpop.permute.xlu0 %5404  ;;  %v6689_v22 = vsel %vm6642_vm15, %v6624_v12, %v5981_v4  ;;  %v18948_v12 = vld [vmem:[#allocation226_spill] sm:$0xff] }
 0x8dd   : > { %v7480_v47 = vadd.f32 %v7479_v43, %v7478_v1 }
 0x8de   : > { %5816 = vrot.lane.b32.xlu1 %v18940_v7, %s8544_s13  ;;  %6000 = vrot.lane.b32.xlu0 %v18941_v42, %s8545_s22 }
 0x8e0   : > { %v5983_v50 = vpop.permute.xlu1 %5982  ;;  %v6167_v24 = vpop.permute.xlu0 %6166 }
 0x8e1   : > { %v6754_v0 = vsel %vm6707_vm2, %v6689_v22, %v6167_v24  ;;  %v6690_v51 = vsel %vm6642_vm15, %v6625_v58, %v5983_v50  ;;  %v6306_v22 = vsel %vm2919_vm4, %v18860_v60, %v18948_v12  ;;  %v18949_v50 = vld [vmem:[#allocation414_spill] sm:$0xff]  ;;  %v8129_v24 = vpop.f32.mrf.mxu0 }
 0x8e2   : > { %5222 = vrot.lane.b32.xlu1 %v18940_v7, %s8539_s14  ;;  %5424 = vrot.lane.b32.xlu0 %v18941_v42, %s8541_s18 }
 0x8e3   : > { %8217 = vmatprep.mubr.msk.f32.mxu1 %vm6788_vm3, %v6754_v0  ;;  %v18950_v0 = vld [vmem:[#allocation342_spill] sm:$0xff]  ;;  %v3959_v56 = vpop.f32.mrf.mxu0 }
 0x8e4   : > { %v5407_v8 = vpop.permute.xlu1 %5406  ;;  %v5607_v49 = vpop.permute.xlu0 %5606  ;;  %v6368_v61 = vsel %vm3049_vm6, %v6306_v22, %v18950_v0  ;;  %v18956_v22 = vld [vmem:[#allocation144_spill] sm:$0xff] }
 0x8e6   : > { %6002 = vrot.lane.b32.xlu1 %v18945_v44, %s8545_s22  ;;  %6186 = vrot.lane.b32.xlu0 %v18946_v17, %s8546_s19 }
 0x8e7   : > { %v8189_v40 = vpop.f32.mrf.mxu1 }
 0x8e8   : > { %v7183_v29 = vadd.f32 %v15851_v36, %v8189_v40  ;;  %v6169_v4 = vpop.permute.xlu1 %6168  ;;  %v5609_v2 = vpop.permute.xlu0 %5608 }
 0x8e9   : > { %v6755_v41 = vsel %vm6707_vm2, %v6690_v51, %v6169_v4  ;;  %v7177_v53 = vpop.f32.mrf.mxu1 }
 0x8ea   : > { %v7178_v62 = vadd.f32 %v15851_v36, %v7177_v53  ;;  %5426 = vrot.lane.b32.xlu1 %v18945_v44, %s8541_s18  ;;  %5626 = vrot.lane.b32.xlu0 %v18946_v17, %s8543_s9  ;;  %v7393_v15 = vmax.f32 %v7183_v29, 0.0  ;;  %v18954_v29 = vld [vmem:[#allocation333_spill] sm:$0xff] }
 0x8eb   : > { %8218 = vmatmul.mubr.msk.f32.gmra.mxu1 %vm6788_vm3, %v6755_v41  ;;  %v6307_v4 = vsel %vm2919_vm4, %v18862_v27, %v18954_v29  ;;  %v18955_v41 = vld [vmem:[#allocation48_spill] sm:$0xff] }
 0x8ec   : > { %v7392_v25 = vmax.f32 %v7178_v62, 0.0  ;;  %v5799_v13 = vpop.permute.xlu1 %5798  ;;  %v15961_v48 = vpop.permute.xlu0 %5204  ;;  %v7483_v43 = vsel %vm3309_vm10, %v7393_v15, 0.0  ;;  %v6369_v53 = vsel %vm3049_vm6, %v6307_v4, %v18955_v41 }
 0x8ee   : > { %v7481_v1 = vsel %vm3309_vm10, %v7392_v25, 0.0  ;;  %6188 = vrot.lane.b32.xlu1 %v18947_v35, %s8546_s19  ;;  %5628 = vrot.lane.b32.xlu0 %v18947_v35, %s8543_s9  ;;  %v6433_v25 = vsel %vm3179_vm8, %v6369_v53, %v15922_v33 }
 0x8ef   : > { %v7482_v52 = vadd.f32 %v7481_v1, %v7480_v47  ;;  %v18951_v47 = vld [vmem:[#allocation289_spill] sm:$0xff]  ;;  %v6497_v35 = vsel %vm3309_vm10, %v6433_v25, %v5407_v8 }
 0x8f0   : > { %v5801_v39 = vpop.permute.xlu1 %5800  ;;  %v5985_v54 = vpop.permute.xlu0 %5984  ;;  %v6432_v21 = vsel %vm3179_vm8, %v6368_v61, %v18951_v47 }
 0x8f1   : > { %v7484_v42 = vadd.f32 %v7483_v43, %v7482_v52  ;;  %v6496_v6 = vsel %vm3309_vm10, %v6432_v21, %v5405_v38  ;;  %v8470_v38 = vld [vmem:[%s16404_s2] ss:$0 sm:$0xff] }
 0x8f2   : > { %5818 = vrot.lane.b32.xlu1 %v18949_v50, %s8544_s13  ;;  %5224 = vrot.lane.b32.xlu0 %v18949_v50, %s8539_s14  ;;  %v6561_v60 = vsel %vm6512_vm13, %v6496_v6, %v5607_v49  ;;  %v3960_v49 = vadd.f32 %v8470_v38, %v3959_v56  ;;  %v3965_v15 = vadd.f32 %v8470_v38, %v8129_v24  ;;  %v18957_v24 = vld [vmem:[#allocation232_spill] sm:$0xff] }
 0x8f3   : > { %v6626_v44 = vsel %vm6577_vm14, %v6561_v60, %v5799_v13 }
 0x8f4   : > { %v15980_v10 = vpop.permute.xlu1 %5206  ;;  %v15982_v23 = vpop.permute.xlu0 %5408  ;;  %v6691_v17 = vsel %vm6642_vm15, %v6626_v44, %v5985_v54  ;;  %v4030_v43 = vmax.f32 %v3960_v49, 0.0  ;;  %v6562_v54 = vsel %vm6512_vm13, %v6497_v35, %v5609_v2  ;;  %v4031_v0 = vmax.f32 %v3965_v15, 0.0  ;;  %v18958_v49 = vld [vmem:[#allocation409_spill] sm:$0xff] }
 0x8f5   : > { %v6627_v33 = vsel %vm6577_vm14, %v6562_v54, %v5801_v39  ;;  %v18960_v54 = vld [vmem:[#allocation52_spill] sm:$0xff] }
 0x8f6   : > { %5820 = vrot.lane.b32.xlu1 %v18952_v30, %s8544_s13  ;;  %6004 = vrot.lane.b32.xlu0 %v18953_v34, %s8545_s22  ;;  %v4193_v60 = vrot.slane %v4030_v43, 7  ;;  %v4194_v56 = vrot.slane %v4031_v0, 7 }
 0x8f8   : > { %v5987_v58 = vpop.permute.xlu1 %5986  ;;  %v6171_v40 = vpop.permute.xlu0 %6170  ;;  %v4195_v29 = vsel %vm4097_vm12, %v4193_v60, %v4194_v56 }
 0x8f9   : > { %v6756_v51 = vsel %vm6707_vm2, %v6691_v17, %v6171_v40  ;;  %v6692_v61 = vsel %vm6642_vm15, %v6627_v33, %v5987_v58  ;;  %v5304_v25 = vrot.slane %v4195_v29, 1 }
 0x8fa   : > { %5226 = vrot.lane.b32.xlu1 %v18952_v30, %s8539_s14  ;;  %5428 = vrot.lane.b32.xlu0 %v18953_v34, %s8541_s18 }
 0x8fb   : > { %v8192_v62 = vpop.f32.mrf.mxu1  ;;  %8220 = vmatprep.mubr.msk.f32.mxu1 %vm6788_vm3, %v6756_v51 }
 0x8fc   : > { %v7193_v13 = vadd.f32 %v15851_v36, %v8192_v62  ;;  %v16009_v1 = vpop.permute.xlu1 %5410  ;;  %v5611_v27 = vpop.permute.xlu0 %5610 }
 0x8fd   : > { %v7187_v52 = vpop.f32.mrf.mxu1 }
 0x8fe   : > { %v7188_v12 = vadd.f32 %v15851_v36, %v7187_v52  ;;  %6006 = vrot.lane.b32.xlu1 %v18956_v22, %s8545_s22  ;;  %6190 = vrot.lane.b32.xlu0 %v18957_v24, %s8546_s19  ;;  %v7395_v47 = vmax.f32 %v7193_v13, 0.0  ;;  %v18959_v13 = vld [vmem:[#allocation230_spill] sm:$0xff] }
 0x8ff   : > { %v6308_v35 = vsel %vm2919_vm4, %v18870_v20, %v18959_v13 }
 0x900   : > { %v7394_v21 = vmax.f32 %v7188_v12, 0.0  ;;  %v6173_v8 = vpop.permute.xlu1 %6172  ;;  %v16020_v6 = vpop.permute.xlu0 %5612  ;;  %v7487_v44 = vsel %vm3309_vm10, %v7395_v47, 0.0  ;;  %v6370_v12 = vsel %vm3049_vm6, %v6308_v35, %v18960_v54 }
 0x901   : > { %v6757_v2 = vsel %vm6707_vm2, %v6692_v61, %v6173_v8 }
 0x902   : > { %v7485_v34 = vsel %vm3309_vm10, %v7394_v21, 0.0  ;;  %5430 = vrot.lane.b32.xlu1 %v18956_v22, %s8541_s18  ;;  %5630 = vrot.lane.b32.xlu0 %v18957_v24, %s8543_s9  ;;  %v6434_v22 = vsel %vm3179_vm8, %v6370_v12, %v15961_v48 }
 0x903   : > { %v7486_v39 = vadd.f32 %v7485_v34, %v7484_v42  ;;  %8221 = vmatmul.mubr.msk.f32.gmra.mxu1 %vm6788_vm3, %v6757_v2  ;;  %v4324_v42 = vsel %vm4097_vm12, 0.0, %v4193_v60  ;;  %v6498_v20 = vsel %vm3309_vm10, %v6434_v22, %v15982_v23  ;;  %v4357_v60 = vsel %vm4097_vm12, %v4194_v56, 0.0  ;;  %v18963_v22 = vld [vmem:[#allocation273_spill] sm:$0xff] }
 0x904   : > { %v5803_v17 = vpop.permute.xlu1 %5802  ;;  %v16030_v58 = vpop.permute.xlu0 %5208  ;;  %v5303_v15 = vrot.slane %v4324_v42, 1  ;;  %v6563_v21 = vsel %vm6512_vm13, %v6498_v20, %v5611_v27  ;;  %v18964_v20 = vld [vmem:[#allocation375_spill] sm:$0xff] }
 0x905   : > { %v8195_v40 = vpop.f32.mrf.mxu1  ;;  %v7488_v51 = vadd.f32 %v7487_v44, %v7486_v39  ;;  %v6628_v48 = vsel %vm6577_vm14, %v6563_v21, %v5803_v17  ;;  %v5505_v44 = vrot.slane %v4324_v42, 2  ;;  %v5306_v17 = vrot.slane %v4357_v60, 1 }
 0x906   : > { %v7203_v38 = vadd.f32 %v15851_v36, %v8195_v40  ;;  %6192 = vrot.lane.b32.xlu1 %v18958_v49, %s8546_s19  ;;  %5632 = vrot.lane.b32.xlu0 %v18958_v49, %s8543_s9  ;;  %v5305_v47 = vsel %vm944_vm0, %v5303_v15, %v5304_v25  ;;  %v5506_v40 = vrot.slane %v4195_v29, 2  ;;  %v18962_v49 = vld [vmem:[#allocation343_spill] sm:$0xff] }
 0x907   : > { %v7197_v4 = vpop.f32.mrf.mxu1 }
 0x908   : > { %v7198_v41 = vadd.f32 %v15851_v36, %v7197_v4  ;;  %v5805_v53 = vpop.permute.xlu1 %5804  ;;  %v5989_v62 = vpop.permute.xlu0 %5988  ;;  %v7397_v52 = vmax.f32 %v7203_v38, 0.0 }
 0x909   : > { %v6693_v34 = vsel %vm6642_vm15, %v6628_v48, %v5989_v62 }
 0x90a   : > { %v7396_v43 = vmax.f32 %v7198_v41, 0.0  ;;  %5822 = vrot.lane.b32.xlu1 %v4324_v42, %s8544_s13  ;;  %5228 = vrot.lane.b32.xlu0 %v4324_v42, %s8539_s14  ;;  %v7491_v8 = vsel %vm3309_vm10, %v7397_v52, 0.0 }
 0x90c   : > { %v7489_v24 = vsel %vm3309_vm10, %v7396_v43, 0.0  ;;  %v16050_v33 = vpop.permute.xlu1 %5210  ;;  %v5413_v0 = vpop.permute.xlu0 %5412 }
 0x90d   : > { %v7490_v61 = vadd.f32 %v7489_v24, %v7488_v51  ;;  %v18961_v51 = vld [vmem:[#allocation224_spill] sm:$0xff]  ;;  %v6310_v24 = vsel %vm2919_vm4, %v18886_v26, %v18963_v22 }
 0x90e   : > { %5824 = vrot.lane.b32.xlu1 %v4195_v29, %s8544_s13  ;;  %6008 = vrot.lane.b32.xlu0 %v5305_v47, %s8545_s22  ;;  %v6309_v38 = vsel %vm2919_vm4, %v18875_v9, %v18961_v51  ;;  %v5307_v9 = vsel %vm944_vm0, %v5304_v25, %v5306_v17  ;;  %vm8547_vm0 = vmmov 0   ;;  %s8472_s13 = scalar_lea.vmem %s7673_s16, 16 }
 0x90f   : > { %v16060_v2 = vadd.f32 %v7491_v8, %v7490_v61  ;;  %v6371_v56 = vsel %vm3049_vm6, %v6309_v38, %v18962_v49  ;;  %v6372_v61 = vsel %vm3049_vm6, %v6310_v24, %v18964_v20  ;;  %p8473_p13 = scmp.ne.s32.totalorder %s7673_s16, %s8472_s13 }
 0x910   : > { %v5991_v23 = vpop.permute.xlu1 %5990  ;;  %v6175_v39 = vpop.permute.xlu0 %6174  ;;  %v6435_v42 = vsel %vm3179_vm8, %v6371_v56, %v15980_v10 }
 0x911   : > { %v6758_v27 = vsel %vm6707_vm2, %v6693_v34, %v6175_v39  ;;  %v6499_v62 = vsel %vm3309_vm10, %v6435_v42, %v16009_v1  ;;  %v5508_v1 = vrot.slane %v4357_v60, 2  ;;  %p8474_p0 = pnand %p8473_p13, %p8627_p6 }
 0x912   : > { %5230 = vrot.lane.b32.xlu1 %v4195_v29, %s8539_s14  ;;  %5432 = vrot.lane.b32.xlu0 %v5305_v47, %s8541_s18  ;;  %v5507_v29 = vsel %vm1297_vm1, %v5505_v44, %v5506_v40  ;;  %v6564_v15 = vsel %vm6512_vm13, %v6499_v62, %v16020_v6  ;;  %v6436_v47 = vsel %vm3179_vm8, %v6372_v61, %v16030_v58  ;;  %v18966_v58 = vld [vmem:[#allocation54_spill] sm:$0xff] }
 0x913   : > { %8223 = vmatprep.mubr.msk.f32.mxu1 %vm6788_vm3, %v6758_v27  ;;  %v6629_v13 = vsel %vm6577_vm14, %v6564_v15, %v5805_v53  ;;  %v5509_v54 = vsel %vm1297_vm1, %v5506_v40, %v5508_v1  ;;  %v6500_v48 = vsel %vm3309_vm10, %v6436_v47, %v5413_v0  ;;  %v18965_v40 = vld [vmem:[#allocation31_spill] sm:$0xff]  ;;  %p8475_p1 = pneg %p8474_p0 }
 0x914   : > { %v5415_v4 = vpop.permute.xlu1 %5414  ;;  %v5615_v41 = vpop.permute.xlu0 %5614  ;;  %v6694_v10 = vsel %vm6642_vm15, %v6629_v13, %v5991_v23  ;;  %v6311_v27 = vsel %vm2919_vm4, %v18889_v32, %v18965_v40 }
 0x915   : > { %v6565_v60 = vsel %vm6512_vm13, %v6500_v48, %v5615_v41  ;;  %v6373_v51 = vsel %vm3049_vm6, %v6311_v27, %v18966_v58 }
 0x916   : > { %6010 = vrot.lane.b32.xlu1 %v5307_v9, %s8545_s22  ;;  %6194 = vrot.lane.b32.xlu0 %v5507_v29, %s8546_s19  ;;  %v6437_v0 = vsel %vm3179_vm8, %v6373_v51, %v16050_v33  ;;  %s8548_s22 = smov [#allocation3]  }
 0x917   : > { %v6501_v49 = vsel %vm3309_vm10, %v6437_v0, %v5415_v4 }
 0x918   : > { %v6177_v35 = vpop.permute.xlu1 %6176  ;;  %v5617_v52 = vpop.permute.xlu0 %5616 }
 0x919   : > { %v6759_v43 = vsel %vm6707_vm2, %v6694_v10, %v6177_v35  ;;  %v6566_v56 = vsel %vm6512_vm13, %v6501_v49, %v5617_v52  ;;  %v18967_v10 = vld [vmem:[#allocation334_spill] sm:$0xff]  ;;  %v18968_v35 = vld [vmem:[#allocation241_spill] sm:$0xff]  ;;  %v18972_v49 = vld [vmem:[#allocation55_spill] sm:$0xff] }
 0x91a   : > { %5434 = vrot.lane.b32.xlu1 %v5307_v9, %s8541_s18  ;;  %5634 = vrot.lane.b32.xlu0 %v5507_v29, %s8543_s9  ;;  %v6312_v4 = vsel %vm2919_vm4, %v18900_v19, %v18967_v10  ;;  %v18969_v19 = vld [vmem:[#allocation147_spill] sm:$0xff] }
 0x91b   : > { %8224 = vmatmul.mubr.msk.f32.gmra.mxu1 %vm6788_vm3, %v6759_v43  ;;  %v6374_v52 = vsel %vm3049_vm6, %v6312_v4, %v18968_v35  ;;  %v6313_v47 = vsel %vm2919_vm4, %v18901_v14, %v18969_v19  ;;  %v8198_v3 = vpop.f32.mrf.mxu1 }
 0x91c   : > { %v5807_v6 = vpop.permute.xlu1 %5806  ;;  %v5213_v25 = vpop.permute.xlu0 %5212 }
 0x91d   : > { %v6630_v34 = vsel %vm6577_vm14, %v6565_v60, %v5807_v6  ;;  %v6438_v43 = vsel %vm3179_vm8, %v6374_v52, %v5213_v25  ;;  %v18970_v25 = vld [vmem:[#allocation376_spill] sm:$0xff] }
 0x91e   : > { %6196 = vrot.lane.b32.xlu1 %v5509_v54, %s8546_s19  ;;  %5636 = vrot.lane.b32.xlu0 %v5509_v54, %s8543_s9  ;;  %v6375_v48 = vsel %vm3049_vm6, %v6313_v47, %v18970_v25  ;;  %s7660_s9 = scalar_lea.sflag [#allocation4], %s8866_s20 }
 0x920   : > { %v5809_v53 = vpop.permute.xlu1 %5808  ;;  %v5993_v12 = vpop.permute.xlu0 %5992 }
 0x921   : > { %v6695_v23 = vsel %vm6642_vm15, %v6630_v34, %v5993_v12  ;;  %v6631_v42 = vsel %vm6577_vm14, %v6566_v56, %v5809_v53 }
 0x924   : > { %v5215_v21 = vpop.permute.xlu1 %5214  ;;  %v5417_v8 = vpop.permute.xlu0 %5416 }
 0x925   : > { %v6502_v54 = vsel %vm3309_vm10, %v6438_v43, %v5417_v8  ;;  %v6439_v8 = vsel %vm3179_vm8, %v6375_v48, %v5215_v21  ;;  %v18975_v48 = vld [vmem:[#allocation32_spill] sm:$0xff] }
 0x928   : > { %v5995_v39 = vpop.permute.xlu1 %5994  ;;  %v6179_v44 = vpop.permute.xlu0 %6178 }
 0x929   : > { %v6760_v26 = vsel %vm6707_vm2, %v6695_v23, %v6179_v44  ;;  %v6696_v41 = vsel %vm6642_vm15, %v6631_v42, %v5995_v39 }
 0x92a   : > { %8226 = vmatprep.mubr.msk.f32.mxu1 %vm6788_vm3, %v6760_v26 }
 0x92c   : > { %v5419_v38 = vpop.permute.xlu1 %5418  ;;  %v5619_v17 = vpop.permute.xlu0 %5618 }
 0x92d   : > { %v6567_v53 = vsel %vm6512_vm13, %v6502_v54, %v5619_v17  ;;  %v6503_v23 = vsel %vm3309_vm10, %v6439_v8, %v5419_v38  ;;  %v18971_v17 = vld [vmem:[#allocation227_spill] sm:$0xff]  ;;  %v6316_v8 = vsel %vm2919_vm4, %v18924_v45, %v18975_v48  ;;  %v18977_v45 = vld [vmem:[#allocation237_spill] sm:$0xff]  ;;  %v18983_v48 = vld [vmem:[#allocation344_spill] sm:$0xff] }
 0x92e   : > { %v6314_v38 = vsel %vm2919_vm4, %v18912_v55, %v18971_v17  ;;  %v18973_v55 = vld [vmem:[#allocation235_spill] sm:$0xff]  ;;  %v6317_v17 = vsel %vm2919_vm4, %v18926_v57, %v18977_v45 }
 0x92f   : > { %v6376_v56 = vsel %vm3049_vm6, %v6314_v38, %v18972_v49  ;;  %v6315_v35 = vsel %vm2919_vm4, %v18913_v37, %v18973_v55 }
 0x930   : > { %v6181_v62 = vpop.permute.xlu1 %6180  ;;  %v5621_v32 = vpop.permute.xlu0 %5620 }
 0x931   : > { %v6761_v9 = vsel %vm6707_vm2, %v6696_v41, %v6181_v62  ;;  %v6568_v39 = vsel %vm6512_vm13, %v6503_v23, %v5621_v32 }
 0x932   : > { %8227 = vmatmul.mubr.msk.f32.gmra.mxu1 %vm6788_vm3, %v6761_v9 }
 0x934   : > { %v5811_v29 = vpop.permute.xlu1 %5810  ;;  %v5217_v15 = vpop.permute.xlu0 %5216 }
 0x935   : > { %v6632_v12 = vsel %vm6577_vm14, %v6567_v53, %v5811_v29  ;;  %v6440_v42 = vsel %vm3179_vm8, %v6376_v56, %v5217_v15  ;;  %v18974_v15 = vld [vmem:[#allocation242_spill] sm:$0xff] }
 0x936   : > { %v6377_v52 = vsel %vm3049_vm6, %v6315_v35, %v18974_v15  ;;  %v18979_v35 = vld [vmem:[#allocation149_spill] sm:$0xff] }
 0x937   : > { %v6318_v15 = vsel %vm2919_vm4, %v18937_v11, %v18979_v35 }
 0x938   : > { %v5813_v13 = vpop.permute.xlu1 %5812  ;;  %v5997_v33 = vpop.permute.xlu0 %5996 }
 0x939   : > { %v6697_v22 = vsel %vm6642_vm15, %v6632_v12, %v5997_v33  ;;  %v6633_v44 = vsel %vm6577_vm14, %v6568_v39, %v5813_v13 }
 0x93c   : > { %v5219_v1 = vpop.permute.xlu1 %5218  ;;  %v5421_v6 = vpop.permute.xlu0 %5420 }
 0x93d   : > { %v6504_v32 = vsel %vm3309_vm10, %v6440_v42, %v5421_v6  ;;  %v6441_v43 = vsel %vm3179_vm8, %v6377_v52, %v5219_v1  ;;  %v18980_v52 = vld [vmem:[#allocation155_spill] sm:$0xff] }
 0x940   : > { %v5999_v24 = vpop.permute.xlu1 %5998  ;;  %v6183_v20 = vpop.permute.xlu0 %6182 }
 0x941   : > { %v6762_v61 = vsel %vm6707_vm2, %v6697_v22, %v6183_v20  ;;  %v6698_v26 = vsel %vm6642_vm15, %v6633_v44, %v5999_v24 }
 0x942   : > { %8229 = vmatprep.mubr.msk.f32.mxu1 %vm6788_vm3, %v6762_v61 }
 0x944   : > { %v5423_v60 = vpop.permute.xlu1 %5422  ;;  %v5623_v34 = vpop.permute.xlu0 %5622 }
 0x945   : > { %v6569_v9 = vsel %vm6512_vm13, %v6504_v32, %v5623_v34  ;;  %v6505_v53 = vsel %vm3309_vm10, %v6441_v43, %v5423_v60  ;;  %v18976_v60 = vld [vmem:[#allocation283_spill] sm:$0xff]  ;;  %v6380_v43 = vsel %vm3049_vm6, %v6318_v15, %v18980_v52  ;;  %v7213_v15 = vadd.f32 %v15851_v36, %v8198_v3 }
 0x946   : > { %v6378_v34 = vsel %vm3049_vm6, %v6316_v8, %v18976_v60  ;;  %v18984_v60 = vld [vmem:[#allocation284_spill] sm:$0xff] }
 0x948   : > { %v6185_v40 = vpop.permute.xlu1 %6184  ;;  %v5625_v27 = vpop.permute.xlu0 %5624 }
 0x949   : > { %v6763_v14 = vsel %vm6707_vm2, %v6698_v26, %v6185_v40  ;;  %v6570_v12 = vsel %vm6512_vm13, %v6505_v53, %v5625_v27 }
 0x94a   : > { %8230 = vmatmul.mubr.msk.f32.gmra.mxu1 %vm6788_vm3, %v6763_v14 }
 0x94c   : > { %v5815_v58 = vpop.permute.xlu1 %5814  ;;  %v5221_v51 = vpop.permute.xlu0 %5220 }
 0x94d   : > { %v6634_v29 = vsel %vm6577_vm14, %v6569_v9, %v5815_v58  ;;  %v6442_v23 = vsel %vm3179_vm8, %v6378_v34, %v5221_v51  ;;  %v18978_v51 = vld [vmem:[#allocation56_spill] sm:$0xff] }
 0x94e   : > { %v6379_v38 = vsel %vm3049_vm6, %v6317_v17, %v18978_v51 }
 0x950   : > { %v5817_v0 = vpop.permute.xlu1 %5816  ;;  %v6001_v21 = vpop.permute.xlu0 %6000 }
 0x951   : > { %v6699_v13 = vsel %vm6642_vm15, %v6634_v29, %v6001_v21  ;;  %v6635_v22 = vsel %vm6577_vm14, %v6570_v12, %v5817_v0 }
 0x954   : > { %v5223_v41 = vpop.permute.xlu1 %5222  ;;  %v5425_v62 = vpop.permute.xlu0 %5424 }
 0x955   : > { %v6506_v26 = vsel %vm3309_vm10, %v6442_v23, %v5425_v62  ;;  %v6443_v49 = vsel %vm3179_vm8, %v6379_v38, %v5223_v41 }
 0x958   : > { %v6003_v33 = vpop.permute.xlu1 %6002  ;;  %v6187_v10 = vpop.permute.xlu0 %6186 }
 0x959   : > { %v6764_v4 = vsel %vm6707_vm2, %v6699_v13, %v6187_v10  ;;  %v6700_v24 = vsel %vm6642_vm15, %v6635_v22, %v6003_v33 }
 0x95a   : > { %8232 = vmatprep.mubr.msk.f32.mxu1 %vm6788_vm3, %v6764_v4 }
 0x95c   : > { %v5427_v6 = vpop.permute.xlu1 %5426  ;;  %v5627_v54 = vpop.permute.xlu0 %5626 }
 0x95d   : > { %v6571_v40 = vsel %vm6512_vm13, %v6506_v26, %v5627_v54  ;;  %v6507_v62 = vsel %vm3309_vm10, %v6443_v49, %v5427_v6 }
 0x960   : > { %v6189_v20 = vpop.permute.xlu1 %6188  ;;  %v5629_v61 = vpop.permute.xlu0 %5628 }
 0x961   : > { %v6765_v37 = vsel %vm6707_vm2, %v6700_v24, %v6189_v20  ;;  %v6572_v32 = vsel %vm6512_vm13, %v6507_v62, %v5629_v61 }
 0x962   : > { %8233 = vmatmul.mubr.msk.f32.gmra.mxu1 %vm6788_vm3, %v6765_v37 }
 0x964   : > { %v5819_v19 = vpop.permute.xlu1 %5818  ;;  %v5225_v47 = vpop.permute.xlu0 %5224 }
 0x965   : > { %v6636_v27 = vsel %vm6577_vm14, %v6571_v40, %v5819_v19  ;;  %v6444_v6 = vsel %vm3179_vm8, %v6380_v43, %v5225_v47  ;;  %v18981_v19 = vld [vmem:[#allocation38_spill] sm:$0xff] }
 0x966   : > { %v6320_v11 = vsel %vm2919_vm4, %v18949_v50, %v18981_v19 }
 0x967   : > { %v6382_v8 = vsel %vm3049_vm6, %v6320_v11, %v18983_v48 }
 0x968   : > { %v5821_v25 = vpop.permute.xlu1 %5820  ;;  %v6005_v1 = vpop.permute.xlu0 %6004 }
 0x969   : > { %v6701_v14 = vsel %vm6642_vm15, %v6636_v27, %v6005_v1  ;;  %v6637_v9 = vsel %vm6577_vm14, %v6572_v32, %v5821_v25  ;;  %v18982_v1 = vld [vmem:[#allocation276_spill] sm:$0xff]  ;;  %v18985_v27 = vld [vmem:[#allocation337_spill] sm:$0xff] }
 0x96a   : > { %v6319_v47 = vsel %vm2919_vm4, %v18940_v7, %v18982_v1  ;;  %v6321_v7 = vsel %vm2919_vm4, %v18952_v30, %v18985_v27 }
 0x96b   : > { %v6381_v34 = vsel %vm3049_vm6, %v6319_v47, %v18984_v60 }
 0x96c   : > { %v5227_v39 = vpop.permute.xlu1 %5226  ;;  %v5429_v44 = vpop.permute.xlu0 %5428 }
 0x96d   : > { %v6508_v12 = vsel %vm3309_vm10, %v6444_v6, %v5429_v44  ;;  %v6445_v44 = vsel %vm3179_vm8, %v6381_v34, %v5227_v39 }
 0x970   : > { %v6007_v58 = vpop.permute.xlu1 %6006  ;;  %v6191_v0 = vpop.permute.xlu0 %6190 }
 0x971   : > { %v6766_v21 = vsel %vm6707_vm2, %v6701_v14, %v6191_v0  ;;  %v6702_v29 = vsel %vm6642_vm15, %v6637_v9, %v6007_v58  ;;  %v18986_v0 = vld [vmem:[#allocation53_spill] sm:$0xff] }
 0x972   : > { %8235 = vmatprep.mubr.msk.f32.mxu1 %vm6788_vm3, %v6766_v21  ;;  %v6383_v21 = vsel %vm3049_vm6, %v6321_v7, %v18986_v0 }
 0x974   : > { %v5431_v56 = vpop.permute.xlu1 %5430  ;;  %v5631_v42 = vpop.permute.xlu0 %5630 }
 0x975   : > { %v6573_v22 = vsel %vm6512_vm13, %v6508_v12, %v5631_v42  ;;  %v6509_v14 = vsel %vm3309_vm10, %v6445_v44, %v5431_v56 }
 0x978   : > { %v6193_v13 = vpop.permute.xlu1 %6192  ;;  %v5633_v33 = vpop.permute.xlu0 %5632 }
 0x979   : > { %v6767_v57 = vsel %vm6707_vm2, %v6702_v29, %v6193_v13  ;;  %v6574_v45 = vsel %vm6512_vm13, %v6509_v14, %v5633_v33  ;;  %v7578_v13 = vld [vmem:[%s16407_s5 + $0x10] sm:$0xff]  ;;  %v7207_v33 = vpop.f32.mrf.mxu1 }
 0x97a   : > { %8236 = vmatmul.mubr.msk.f32.gmra.mxu1 %vm6788_vm3, %v6767_v57  ;;  %v7577_v57 = vld [vmem:[%s16407_s5 + $0x8] sm:$0xff] }
 0x97c   : > { %v5823_v10 = vpop.permute.xlu1 %5822  ;;  %v5229_v4 = vpop.permute.xlu0 %5228 }
 0x97d   : > { %v6638_v24 = vsel %vm6577_vm14, %v6573_v22, %v5823_v10  ;;  %v6446_v23 = vsel %vm3179_vm8, %v6382_v8, %v5229_v4  ;;  %v8201_v10 = vpop.f32.mrf.mxu1  ;;  %v7576_v4 = vld [vmem:[%s16407_s5] sm:$0xff] }
 0x980   : > { %v5825_v55 = vpop.permute.xlu1 %5824  ;;  %v6009_v41 = vpop.permute.xlu0 %6008 }
 0x981   : > { %v6703_v20 = vsel %vm6642_vm15, %v6638_v24, %v6009_v41  ;;  %v6639_v17 = vsel %vm6577_vm14, %v6574_v45, %v5825_v55  ;;  %v7217_v55 = vpop.f32.mrf.mxu1  ;;  %v7208_v41 = vadd.f32 %v15851_v36, %v7207_v33  ;;  %v7223_v24 = vadd.f32 %v15851_v36, %v8201_v10 }
 0x982   : > { %v7218_v52 = vadd.f32 %v15851_v36, %v7217_v55 }
 0x983   : > { %v8204_v35 = vpop.f32.mrf.mxu1  ;;  %v7398_v43 = vmax.f32 %v7208_v41, 0.0 }
 0x984   : > { %v5231_v54 = vpop.permute.xlu1 %5230  ;;  %v5433_v53 = vpop.permute.xlu0 %5432  ;;  %v7233_v8 = vadd.f32 %v15851_v36, %v8204_v35 }
 0x985   : > { %v6510_v50 = vsel %vm3309_vm10, %v6446_v23, %v5433_v53  ;;  %v6447_v51 = vsel %vm3179_vm8, %v6383_v21, %v5231_v54  ;;  %v7227_v6 = vpop.f32.mrf.mxu1  ;;  %v7399_v54 = vmax.f32 %v7213_v15, 0.0  ;;  %v7400_v53 = vmax.f32 %v7218_v52, 0.0 }
 0x986   : > { %v7499_v22 = vsel %vm3309_vm10, %v7398_v43, 0.0 }
 0x987   : > { %v8207_v12 = vpop.f32.mrf.mxu1 }
 0x988   : > { %v6011_v61 = vpop.permute.xlu1 %6010  ;;  %v6195_v37 = vpop.permute.xlu0 %6194  ;;  %v7243_v14 = vadd.f32 %v15851_v36, %v8207_v12 }
 0x989   : > { %v6768_v25 = vsel %vm6707_vm2, %v6703_v20, %v6195_v37  ;;  %v6704_v38 = vsel %vm6642_vm15, %v6639_v17, %v6011_v61  ;;  %v7228_v20 = vadd.f32 %v15851_v36, %v7227_v6  ;;  %v7500_v61 = vsel %vm3309_vm10, %v7399_v54, 0.0  ;;  %v7237_v11 = vpop.f32.mrf.mxu1 }
 0x98a   : > { %8238 = vmatprep.mubr.msk.f32.mxu1 %vm6788_vm3, %v6768_v25  ;;  %v7502_v37 = vsel %vm3309_vm10, %v7400_v53, 0.0  ;;  %v7501_v19 = vadd.f32 %v7500_v61, %v7499_v22  ;;  %v7401_v25 = vmax.f32 %v7223_v24, 0.0  ;;  %v7238_v60 = vadd.f32 %v15851_v36, %v7237_v11 }
 0x98b   : > { %v7402_v1 = vmax.f32 %v7228_v20, 0.0  ;;  %v8210_v48 = vpop.f32.mrf.mxu1  ;;  %v7405_v17 = vmax.f32 %v7243_v14, 0.0 }
 0x98c   : > { %v5435_v26 = vpop.permute.xlu1 %5434  ;;  %v5635_v40 = vpop.permute.xlu0 %5634  ;;  %v7503_v47 = vadd.f32 %v7502_v37, %v7501_v19  ;;  %v7504_v34 = vsel %vm3309_vm10, %v7401_v25, 0.0 }
 0x98d   : > { %v6575_v58 = vsel %vm6512_vm13, %v6510_v50, %v5635_v40  ;;  %v6511_v49 = vsel %vm3309_vm10, %v6447_v51, %v5435_v26  ;;  %v7506_v23 = vsel %vm3309_vm10, %v7402_v1, 0.0  ;;  %v7247_v50 = vpop.f32.mrf.mxu1  ;;  %v7403_v26 = vmax.f32 %v7233_v8, 0.0  ;;  %v16317_v8 = vld [vmem:[%s16406_s4] ss:$0 sm:$0xff] }
 0x98e   : > { %v6640_v39 = vsel %vm6577_vm14, %v6575_v58, %v8332_v63  ;;  %v7505_v44 = vadd.f32 %v7504_v34, %v7503_v47  ;;  %v7404_v40 = vmax.f32 %v7238_v60, 0.0  ;;  %v7248_v58 = vadd.f32 %v15851_v36, %v7247_v50 }
 0x98f   : > { %v6705_v30 = vsel %vm6642_vm15, %v6640_v39, %v8337_v46  ;;  %v8213_v7 = vpop.f32.mrf.mxu1  ;;  %v7508_v0 = vsel %vm3309_vm10, %v7403_v26, 0.0 }
 0x990   : > { %v6197_v56 = vpop.permute.xlu1 %6196  ;;  %v5637_v42 = vpop.permute.xlu0 %5636  ;;  %v6770_v46 = vsel %vm6707_vm2, %v6705_v30, %v8342_v31  ;;  %v7582_v31 = vld [vmem:[%s16407_s5 + $0x30] sm:$0xff]  ;;  %v7507_v27 = vadd.f32 %v7506_v23, %v7505_v44  ;;  %v7510_v21 = vsel %vm3309_vm10, %v7404_v40, 0.0  ;;  %v7406_v51 = vmax.f32 %v7248_v58, 0.0 }
 0x991   : > { %v6769_v62 = vsel %vm6707_vm2, %v6704_v38, %v6197_v56  ;;  %v6576_v32 = vsel %vm6512_vm13, %v6511_v49, %v5637_v42  ;;  %v7257_v39 = vpop.f32.mrf.mxu1  ;;  %v7253_v49 = vadd.f32 %v15851_v36, %v8210_v48  ;;  %v7512_v42 = vsel %vm3309_vm10, %v7405_v17, 0.0 }
 0x992   : > { %v6641_v63 = vsel %vm6577_vm14, %v6576_v32, %v8333_v59  ;;  %8239 = vmatmul.mubr.msk.f32.gmra.mxu1 %vm6788_vm3, %v6769_v62  ;;  %v18987_v59 = vmov 0.0   ;;  %v7509_v45 = vadd.f32 %v7508_v0, %v7507_v27  ;;  %v7258_v56 = vadd.f32 %v15851_v36, %v7257_v39 }
 0x993   : > { %8241 = vmatprep.mubr.msk.f32.mxu1 %vm6788_vm3, %v6770_v46  ;;  %v6706_v9 = vsel %vm6642_vm15, %v6641_v63, %v8338_v5  ;;  %8246 = vmatprep.subr.mxu0 %v18987_v59  ;;  %v7580_v5 = vld [vmem:[%s16407_s5 + $0x20] sm:$0xff]  ;;  %v8216_v38 = vpop.f32.mrf.mxu1  ;;  %v7514_v62 = vsel %vm3309_vm10, %v7406_v51, 0.0  ;;  %v7407_v46 = vmax.f32 %v7253_v49, 0.0 }
 0x994   : > { %v6771_v29 = vsel %vm6707_vm2, %v6706_v9, %v8343_v18  ;;  %8247 = vmatpush3.msra.mxu0 %v7582_v31  ;;  %v7579_v18 = vld [vmem:[%s16407_s5 + $0x18] sm:$0xff]  ;;  %v7511_v30 = vadd.f32 %v7510_v21, %v7509_v45  ;;  %v7408_v9 = vmax.f32 %v7258_v56, 0.0  ;;  %v7263_v31 = vadd.f32 %v15851_v36, %v8213_v7  ;;  %8260 = vmatprep.mubr.msk.f32.mxu0 %vm8547_vm0, %v18987_v59 }
 0x995   : > { %8248 = vmatprep.subr.mxu0 %v18987_v59  ;;  %v7267_v63 = vpop.f32.mrf.mxu1  ;;  %v7273_v55 = vadd.f32 %v15851_v36, %v8216_v38 }
 0x996   : > { %8242 = vmatmul.mubr.msk.f32.gmra.mxu1 %vm6788_vm3, %v6771_v29  ;;  %8249 = vmatpush3.msra.mxu0 %v7581_v28  ;;  %v7513_v32 = vadd.f32 %v7512_v42, %v7511_v30  ;;  %v7268_v28 = vadd.f32 %v15851_v36, %v7267_v63  ;;  %v7518_v3 = vsel %vm3309_vm10, %v7408_v9, 0.0  ;;  %v7409_v33 = vmax.f32 %v7263_v31, 0.0 }
 0x997   : > { %8250 = vmatprep.subr.mxu0 %v18987_v59  ;;  %v7411_v6 = vmax.f32 %v7273_v55, 0.0 }
 0x998   : > { %8251 = vmatpush3.msra.mxu0 %v7580_v5  ;;  %v7515_v29 = vadd.f32 %v7514_v62, %v7513_v32  ;;  %v7516_v5 = vsel %vm3309_vm10, %v7407_v46, 0.0  ;;  %v7520_v35 = vsel %vm3309_vm10, %v7409_v33, 0.0 }
 0x999   : > { %8252 = vmatprep.subr.mxu0 %v18987_v59  ;;  %v7524_v20 = vsel %vm3309_vm10, %v7411_v6, 0.0 }
 0x99a   : > { %8253 = vmatpush3.msra.mxu0 %v7579_v18  ;;  %v7517_v18 = vadd.f32 %v7516_v5, %v7515_v29 }
 0x99b   : > { %8254 = vmatprep.subr.mxu0 %v18987_v59 }
 0x99c   : > { %8255 = vmatpush3.msra.mxu0 %v7578_v13  ;;  %v7519_v10 = vadd.f32 %v7518_v3, %v7517_v18 }
 0x99d   : > { %8256 = vmatprep.subr.mxu0 %v18987_v59 }
 0x99e   : > { %8257 = vmatpush3.msra.mxu0 %v7577_v57  ;;  %v7410_v57 = vmax.f32 %v7268_v28, 0.0  ;;  %v7521_v52 = vadd.f32 %v7520_v35, %v7519_v10 }
 0x99f   : > { %8258 = vmatprep.subr.mxu0 %v18987_v59 }
 0x9a0   : > { %8259 = vmatpush3.msra.mxu0 %v7576_v4  ;;  %v7522_v15 = vsel %vm3309_vm10, %v7410_v57, 0.0 }
 0x9a1   : > { %v7523_v53 = vadd.f32 %v7522_v15, %v7521_v52 }
 0x9a3   : > { %v7525_v37 = vadd.f32 %v7524_v20, %v7523_v53 }
 0x9ab   : > { %v8219_v16 = vpop.f32.mrf.mxu1 }
 0x9ac   : > { %v7283_v22 = vadd.f32 %v15851_v36, %v8219_v16 }
 0x9ad   : > { %v7277_v13 = vpop.f32.mrf.mxu1 }
 0x9ae   : > { %v7278_v41 = vadd.f32 %v15851_v36, %v7277_v13  ;;  %v7413_v11 = vmax.f32 %v7283_v22, 0.0 }
 0x9b0   : > { %v7412_v54 = vmax.f32 %v7278_v41, 0.0  ;;  %v7528_v34 = vsel %vm3309_vm10, %v7413_v11, 0.0 }
 0x9b2   : > { %v7526_v61 = vsel %vm3309_vm10, %v7412_v54, 0.0 }
 0x9b3   : > { %v7527_v1 = vadd.f32 %v7526_v61, %v7525_v37 }
 0x9b5   : > { %v7529_v44 = vadd.f32 %v7528_v34, %v7527_v1 }
 0x9c3   : > { %v8222_v4 = vpop.f32.mrf.mxu1 }
 0x9c4   : > { %v7293_v48 = vadd.f32 %v15851_v36, %v8222_v4 }
 0x9c5   : > { %v7287_v43 = vpop.f32.mrf.mxu1 }
 0x9c6   : > { %v7288_v24 = vadd.f32 %v15851_v36, %v7287_v43  ;;  %v7415_v26 = vmax.f32 %v7293_v48, 0.0 }
 0x9c8   : > { %v7414_v25 = vmax.f32 %v7288_v24, 0.0  ;;  %v7532_v58 = vsel %vm3309_vm10, %v7415_v26, 0.0 }
 0x9ca   : > { %v7530_v23 = vsel %vm3309_vm10, %v7414_v25, 0.0 }
 0x9cb   : > { %v7531_v27 = vadd.f32 %v7530_v23, %v7529_v44 }
 0x9cd   : > { %v7533_v21 = vadd.f32 %v7532_v58, %v7531_v27 }
 0x9db   : > { %v8225_v12 = vpop.f32.mrf.mxu1 }
 0x9dc   : > { %v7303_v14 = vadd.f32 %v16317_v8, %v8225_v12 }
 0x9dd   : > { %v7297_v19 = vpop.f32.mrf.mxu1 }
 0x9de   : > { %v7298_v60 = vadd.f32 %v16317_v8, %v7297_v19  ;;  %v7417_v39 = vmax.f32 %v7303_v14, 0.0 }
 0x9e0   : > { %v7416_v40 = vmax.f32 %v7298_v60, 0.0  ;;  %v7536_v56 = vsel %vm3309_vm10, %v7417_v39, 0.0 }
 0x9e2   : > { %v7534_v0 = vsel %vm3309_vm10, %v7416_v40, 0.0 }
 0x9e3   : > { %v7535_v51 = vadd.f32 %v7534_v0, %v7533_v21 }
 0x9e5   : > { %v7537_v62 = vadd.f32 %v7536_v56, %v7535_v51 }
 0x9f2   : > { %v8228_v47 = vpop.f32.mrf.mxu1 }
 0x9f3   : > { %v7313_v38 = vadd.f32 %v16317_v8, %v8228_v47 }
 0x9f4   : > { %v7307_v50 = vpop.f32.mrf.mxu1 }
 0x9f5   : > { %v7308_v36 = vadd.f32 %v16317_v8, %v7307_v50  ;;  %v7419_v63 = vmax.f32 %v7313_v38, 0.0  ;;  %v7493_v38 = vrot.slane %v16060_v2, 4 }
 0x9f7   : > { %v7418_v17 = vmax.f32 %v7308_v36, 0.0  ;;  %v7540_v28 = vsel %vm3309_vm10, %v7419_v63, 0.0 }
 0x9f9   : > { %v7538_v42 = vsel %vm3309_vm10, %v7418_v17, 0.0 }
 0x9fa   : > { %v7539_v9 = vadd.f32 %v7538_v42, %v7537_v62 }
 0x9fc   : > { %v7541_v3 = vadd.f32 %v7540_v28, %v7539_v9  ;;  %v7584_v9 = vld [vmem:[%s16408_s6] sm:$0x1] }
 0xa0a   : > { %v8231_v7 = vpop.f32.mrf.mxu1 }
 0xa0b   : > { %v7323_v16 = vadd.f32 %v16317_v8, %v8231_v7 }
 0xa0c   : > { %v7317_v45 = vpop.f32.mrf.mxu1 }
 0xa0d   : > { %v7318_v49 = vadd.f32 %v16317_v8, %v7317_v45  ;;  %v7421_v13 = vmax.f32 %v7323_v16, 0.0 }
 0xa0f   : > { %v7420_v46 = vmax.f32 %v7318_v49, 0.0  ;;  %v7544_v55 = vsel %vm3309_vm10, %v7421_v13, 0.0  ;;  %v7494_v49 = vadd.f32 %v7493_v38, %v16060_v2 }
 0xa11   : > { %v7542_v5 = vsel %vm3309_vm10, %v7420_v46, 0.0  ;;  %v7495_v56 = vrot.slane %v7494_v49, 2 }
 0xa12   : > { %v7543_v57 = vadd.f32 %v7542_v5, %v7541_v3 }
 0xa13   : > { %v7496_v42 = vadd.f32 %v7495_v56, %v7494_v49 }
 0xa14   : > { %v7545_v35 = vadd.f32 %v7544_v55, %v7543_v57 }
 0xa15   : > { %v7497_v62 = vrot.slane %v7496_v42, 1 }
 0xa22   : > { %v8234_v30 = vpop.f32.mrf.mxu1 }
 0xa23   : > { %v7333_v10 = vadd.f32 %v16317_v8, %v8234_v30 }
 0xa24   : > { %v7327_v32 = vpop.f32.mrf.mxu1 }
 0xa25   : > { %v7328_v31 = vadd.f32 %v16317_v8, %v7327_v32  ;;  %v7423_v15 = vmax.f32 %v7333_v10, 0.0  ;;  %v7498_v32 = vadd.f32 %v7497_v62, %v7496_v42 }
 0xa27   : > { %v7422_v33 = vmax.f32 %v7328_v31, 0.0  ;;  %v7548_v54 = vsel %vm3309_vm10, %v7423_v15, 0.0  ;;  %v7569_v63 = vmul.f32 0.00390625, %v7498_v32 }
 0xa29   : > { %v7546_v41 = vsel %vm3309_vm10, %v7422_v33, 0.0 }
 0xa2a   : > { %v7547_v43 = vadd.f32 %v7546_v41, %v7545_v35 }
 0xa2c   : > { %v7549_v12 = vadd.f32 %v7548_v54, %v7547_v43 }
 0xa3a   : > { %v8237_v29 = vpop.f32.mrf.mxu1 }
 0xa3b   : > { %v7343_v6 = vadd.f32 %v16317_v8, %v8237_v29 }
 0xa3c   : > { %v7337_v18 = vpop.f32.mrf.mxu1 }
 0xa3d   : > { %v7338_v4 = vadd.f32 %v16317_v8, %v7337_v18  ;;  %v7425_v24 = vmax.f32 %v7343_v6, 0.0 }
 0xa3f   : > { %v7424_v52 = vmax.f32 %v7338_v4, 0.0  ;;  %v7552_v25 = vsel %vm3309_vm10, %v7425_v24, 0.0 }
 0xa41   : > { %v7550_v53 = vsel %vm3309_vm10, %v7424_v52, 0.0 }
 0xa42   : > { %v7551_v61 = vadd.f32 %v7550_v53, %v7549_v12 }
 0xa44   : > { %v7553_v60 = vadd.f32 %v7552_v25, %v7551_v61 }
 0xa52   : > { %v8240_v22 = vpop.f32.mrf.mxu1 }
 0xa53   : > { %v7353_v20 = vadd.f32 %v16317_v8, %v8240_v22 }
 0xa54   : > { %v7347_v37 = vpop.f32.mrf.mxu1 }
 0xa55   : > { %v7348_v19 = vadd.f32 %v16317_v8, %v7347_v37  ;;  %v7427_v1 = vmax.f32 %v7353_v20, 0.0 }
 0xa56   : > { %v8243_v11 = vpop.f32.mrf.mxu1 }
 0xa57   : > { %v7426_v47 = vmax.f32 %v7348_v19, 0.0  ;;  %v7363_v48 = vadd.f32 %v16317_v8, %v8243_v11  ;;  %v7556_v26 = vsel %vm3309_vm10, %v7427_v1, 0.0 }
 0xa58   : > { %v7357_v34 = vpop.f32.mrf.mxu1 }
 0xa59   : > { %v7554_v23 = vsel %vm3309_vm10, %v7426_v47, 0.0  ;;  %v7358_v44 = vadd.f32 %v16317_v8, %v7357_v34  ;;  %v7429_v40 = vmax.f32 %v7363_v48, 0.0 }
 0xa5a   : > { %v7555_v50 = vadd.f32 %v7554_v23, %v7553_v60 }
 0xa5b   : > { %v7428_v27 = vmax.f32 %v7358_v44, 0.0  ;;  %v7560_v58 = vsel %vm3309_vm10, %v7429_v40, 0.0 }
 0xa5c   : > { %v7557_v7 = vadd.f32 %v7556_v26, %v7555_v50 }
 0xa5d   : > { %v7558_v14 = vsel %vm3309_vm10, %v7428_v27, 0.0 }
 0xa5e   : > { %v7559_v36 = vadd.f32 %v7558_v14, %v7557_v7 }
 0xa60   : > { %v7561_v0 = vadd.f32 %v7560_v58, %v7559_v36 }
 0xa62   : > { %v7562_v21 = vrot.slane %v7561_v0, 4 }
 0xa64   : > { %v7563_v45 = vadd.f32 %v7562_v21, %v7561_v0 }
 0xa66   : > { %v7564_v39 = vrot.slane %v7563_v45, 2 }
 0xa68   : > { %v7565_v17 = vadd.f32 %v7564_v39, %v7563_v45 }
 0xa6a   : > { %v7566_v8 = vrot.slane %v7565_v17, 1 }
 0xa6c   : > { %v7567_v51 = vadd.f32 %v7566_v8, %v7565_v17 }
 0xa6e   : > { %v7570_v30 = vmul.f32 0.00390625, %v7567_v51 }
 0xa70   : > { %7572 = vrot.lane.b32.xlu1 %v7570_v30, %s8541_s18  ;;  %s7870_s18 = sshll.u32 %s7732_s28, 4  ;;  %s8476_s28 = sshll.u32 %s8548_s22, 4  ;;  %s8477_s28 = int_to_ptr.vmem [resolvable:$false] %s8476_s28 }
 0xa71   : > { %s16365_s14 = scalar_lea.hbm %s16409_s7, %s7870_s18  ;;  %s8478_s29 = scalar_lea.vmem %s8477_s28, 32 }
 0xa72   : > { %p8479_p2 = scmp.lt.s32.totalorder %s7673_s16, %s8477_s28  ;;  %p8480_p3 = scmp.lt.s32.totalorder %s8478_s29, %s8472_s13 }
 0xa74   : > { %p8481_p4 = por %p8480_p3, %p8479_p2 }
 0xa76   : > { %p8482_p5 = pnand %p8481_p4, %p8475_p1 }
 0xae2   : > { %v7573_v59 = vpop.permute.xlu1 %7572 }
 0xae3   : > { %v7575_v46 = vsel %vm3309_vm10, %v7569_v63, %v7573_v59 }
 0xae4   : > { %8261 = vmatmul.mubr.msk.f32.vlgmr.msra.gmra.mxu0 %vm6707_vm2, %v7575_v46 }
 0xba4   : > { %v7654_v2 = vpop.f32.mrf.mxu0 }
 0xba5   : > { %v7655_v29 = vadd.f32 %v7654_v2, %v7584_v9 }
 0xba6   : > { %v8262_v16 = vpop.f32.mrf.mxu0 }
 0xba7   : > { %7658 = vst [vmem:[%s739_s8] sm:$0x1] %v7655_v29 }
 0xba8   : > { %8485 = shalt.err (!%p8482_p5)
}
 0xba9   : > { %s8486_s19 = scalar_lea.hbm %s16365_s14, 16  ;;  %s8490_s23 = scalar_lea.hbm %s16409_s7, 32 }
 0xbaa   : > { %p8487_p7 = scmp.ne.s32.totalorder %s16365_s14, %s8486_s19  ;;  %p8491_p12 = scmp.lt.s32.totalorder %s16365_s14, %s16409_s7 }
 0xbab   : > { %p8492_p13 = scmp.lt.s32.totalorder %s8490_s23, %s8486_s19 }
 0xbac   : > { %p8488_p10 = pnand %p8487_p7, %p8627_p6 }
 0xbad   : > { %p8493_p0 = por %p8492_p13, %p8491_p12 }
 0xbae   : > { %p8489_p11 = pneg %p8488_p10 }
 0xbb0   : > { %p8494_p1 = pnand %p8493_p0, %p8489_p11 }
 0xbb2   : > { %8497 = shalt.err (!%p8494_p1)
}
 0xbb3   : > { %8266 = dma.vmem_to_hbm [thread:$0]  (%p8627_p6), %s7673_s16, 16, %s16365_s14, %s7660_s9  }
 0xbb4 PF: > { %s7684_s17 = sand.u32 1, %s8520_s24   ;;  %p8269_p2 = pnand %p7735_p9, %p8631_p8 }
 0xbb5   : > { %s7685_s15 = scalar_lea.sflag [#allocation4], %s7684_s17 }
 0xbb6   : > { %p8270_p3 = pneg %p8269_p2 }
 0xbb8   : > { %8515 = dma.done.wait (%p8270_p3), %s7685_s15, 16  }
 0xbb9   : > { %8517 = vsyncadd (%p8270_p3), %s7685_s15, 4294967280  ;;  %p17_p4 = scmp.ge.s32.totalorder %s8612_s30, 4   ;;  %s18988_s24 = smov %s8524_s25 }
 0xbba   : > { %s18989_s25 = smov %s8528_s26  ;;  %s18990_s26 = smov %s8625_s10 }
 0xbbb   : > { %s18991_s27 = smov %s8612_s30  ;;  %19 = sbr.rel (!%p17_p4) target bundleno = 3 (0x3), region = 126 }
 0xbc0   :  { %7689 = vsyncpa [#allocation4], 1 }
 0xbc1   :  { %7691 = vsyncpa [#allocation4 + $0x1], 1 }

</bundles_post_ra>
